<compile_context>
chip_gen: v7x
topology: tpu7x:2x2x1
jax: 0.10.0
libtpu: 0.0.40
codegen_flags: <defaults>
</compile_context>

<pallas_src>
import functools

import jax
import jax.numpy as jnp
from jax import lax
from jax.experimental import pallas as pl
from jax.experimental.pallas import tpu as pltpu


def _round_up(x, m):
    return (x + m - 1) // m * m


# ------------------------------- kernels -------------------------------

def _upconv_kernel(x_ref, w_ref, b_ref, o_ref):
    """Per-image GEMM for ConvTranspose2d(k=2, s=2): (H*W, Cin) @ (Cin, 4*Coutp) + bias."""
    y = jnp.dot(x_ref[0], w_ref[...], preferred_element_type=jnp.float32)
    o_ref[0] = (y + b_ref[...]).astype(o_ref.dtype)


def _conv1_kernel(u_ref, s_ref, wu_ref, ws_ref, b_ref, o_ref, stats_ref, *, Ho, Wo):
    """3x3 conv with two concatenated sources (no materialized concat).

    u_ref / s_ref : (1, Ho+2, Wo+2, Cu/Cs) bf16, spatially zero-padded.
    wu_ref/ws_ref : (3, 3, Cu/Cs, Cp) bf16 (weight split along input channels).
    b_ref         : (1, Cp) f32 conv bias.
    o_ref         : (1, Ho+2, Wo+2, Cp) bf16 raw conv output with zero border
                    (already padded for the next conv).
    stats_ref     : (1, 8, Cp) f32; rows 0-3 = column sum, rows 4-7 = sum of squares.
    """
    xu = u_ref[0]                      # (Ho+2, Wo+2, Cu)
    xs = s_ref[0]                      # (Ho+2, Wo+2, Cs)
    cp = o_ref.shape[-1]
    cu = xu.shape[-1]
    cs = xs.shape[-1]

    acc = jnp.zeros((Ho * Wo, cp), jnp.float32)
    for dh in range(3):                # 9 taps built in VMEM -- no HBM im2col
        for dw in range(3):
            au = xu[dh:dh + Ho, dw:dw + Wo, :].reshape(Ho * Wo, cu)
            acc = acc + jnp.dot(au, wu_ref[dh, dw], preferred_element_type=jnp.float32)
            a_s = xs[dh:dh + Ho, dw:dw + Wo, :].reshape(Ho * Wo, cs)
            acc = acc + jnp.dot(a_s, ws_ref[dh, dw], preferred_element_type=jnp.float32)
    acc = acc + b_ref[...]             # conv bias (kept; BN uses batch stats)

    # Per-image BN statistics from the f32 accumulator.
    # TODO(synk): E[x^2]-E[x]^2 can lose precision for large-mean channels.
    col_sum = jnp.sum(acc, axis=0, keepdims=True)          # (1, Cp)
    col_sq = jnp.sum(acc * acc, axis=0, keepdims=True)     # (1, Cp)
    rid = lax.broadcasted_iota(jnp.int32, (8, cp), 0)
    stats_ref[0] = jnp.where(rid < 4, col_sum, col_sq)

    # Zero border + interior values -> padded raw conv1 output.
    o_ref[...] = jnp.zeros_like(o_ref)
    o_ref[0, 1:Ho + 1, 1:Wo + 1, :] = acc.reshape(Ho, Wo, cp).astype(o_ref.dtype)


def _conv2_kernel(x_ref, scale_ref, shift_ref, w_ref, b_ref, o_ref, stats_ref, *, Ho, Wo):
    """3x3 conv whose input load fuses BN1 affine + ReLU (scale*x + shift, relu).

    x_ref     : (1, Ho+2, Wo+2, Cp) bf16 raw conv1 output, zero spatial border.
    scale/shift: (1, Cp) f32 folded BN1 affine (zero on padded channels).
    w_ref     : (3, 3, Cp, Cp2) bf16,  b_ref: (1, Cp2) f32.
    o_ref     : (1, Ho*Wo, Cp2) bf16 raw conv2 output.
    stats_ref : (1, 8, Cp2) f32 (same layout as conv1 stats).
    """
    cp_in = x_ref.shape[-1]
    cp_out = o_ref.shape[-1]

    x = x_ref[0].astype(jnp.float32)                        # (Ho+2, Wo+2, Cp)
    a = jnp.maximum(x * scale_ref[...] + shift_ref[...], 0.0)
    # The zero-padding border must stay zero after BN (relu(shift) != 0 in general).
    row = lax.broadcasted_iota(jnp.int32, a.shape, 0)
    col = lax.broadcasted_iota(jnp.int32, a.shape, 1)
    interior = (row >= 1) & (row <= Ho) & (col >= 1) & (col <= Wo)
    a = jnp.where(interior, a, 0.0).astype(jnp.bfloat16)

    acc = jnp.zeros((Ho * Wo, cp_out), jnp.float32)
    for dh in range(3):
        for dw in range(3):
            blk = a[dh:dh + Ho, dw:dw + Wo, :].reshape(Ho * Wo, cp_in)
            acc = acc + jnp.dot(blk, w_ref[dh, dw], preferred_element_type=jnp.float32)
    acc = acc + b_ref[...]

    col_sum = jnp.sum(acc, axis=0, keepdims=True)
    col_sq = jnp.sum(acc * acc, axis=0, keepdims=True)
    rid = lax.broadcasted_iota(jnp.int32, (8, cp_out), 0)
    stats_ref[0] = jnp.where(rid < 4, col_sum, col_sq)

    o_ref[0] = acc.astype(o_ref.dtype)


# ---------------------------- pallas wrappers ----------------------------

def _upconv2x2(x_nhwc, w_iohw, bias, cout):
    """ConvTranspose2d(k=2,s=2) as a per-image GEMM; (2,2) pixel unpack stays in XLA."""
    N, H, W, Cin = x_nhwc.shape
    C4 = 4 * cout
    C4p = _round_up(C4, 128)
    x_flat = x_nhwc.reshape(N, H * W, Cin).astype(jnp.bfloat16)
    # column order (di, dj, co) so the output reshapes straight to (H, W, 2, 2, cout)
    wmat = jnp.transpose(w_iohw, (0, 2, 3, 1)).reshape(Cin, C4)
    wmat = jnp.pad(wmat, ((0, 0), (0, C4p - C4))).astype(jnp.bfloat16)
    bvec = jnp.pad(jnp.tile(bias, 4), (0, C4p - C4)).reshape(1, C4p).astype(jnp.float32)

    y = pl.pallas_call(
        _upconv_kernel,
        out_shape=jax.ShapeDtypeStruct((N, H * W, C4p), jnp.bfloat16),
        grid=(N,),
        in_specs=[pl.BlockSpec((1, H * W, Cin), lambda n: (n, 0, 0)),
                  pl.BlockSpec((Cin, C4p), lambda n: (0, 0)),
                  pl.BlockSpec((1, C4p), lambda n: (0, 0))],
        out_specs=pl.BlockSpec((1, H * W, C4p), lambda n: (n, 0, 0)),
        compiler_params=pltpu.CompilerParams(dimension_semantics=("parallel",)),
    )(x_flat, wmat, bvec)

    u = y[:, :, :C4].reshape(N, H, W, 2, 2, cout)
    u = jnp.transpose(u, (0, 1, 3, 2, 4, 5)).reshape(N, 2 * H, 2 * W, cout)
    return u                                                 # (N, 2H, 2W, cout) bf16


def _conv1_split(u_pad, skip_pad, w1, b1, cp, Ho, Wo):
    """Conv2d(3x3, pad=1) over the *virtual* concat [u, skip] (no concat materialized)."""
    N = u_pad.shape[0]
    Cu = u_pad.shape[-1]
    Cs = skip_pad.shape[-1]
    cout = w1.shape[0]
    wk = jnp.transpose(w1, (2, 3, 1, 0))                     # (3, 3, Cu+Cs, cout)
    wu = jnp.pad(wk[:, :, :Cu, :], ((0, 0), (0, 0), (0, 0), (0, cp - cout))).astype(jnp.bfloat16)
    ws = jnp.pad(wk[:, :, Cu:, :], ((0, 0), (0, 0), (0, 0), (0, cp - cout))).astype(jnp.bfloat16)
    bb = jnp.pad(b1, (0, cp - cout)).reshape(1, cp).astype(jnp.float32)

    kern = functools.partial(_conv1_kernel, Ho=Ho, Wo=Wo)
    h1pad, stats = pl.pallas_call(
        kern,
        out_shape=(jax.ShapeDtypeStruct((N, Ho + 2, Wo + 2, cp), jnp.bfloat16),
                   jax.ShapeDtypeStruct((N, 8, cp), jnp.float32)),
        grid=(N,),
        in_specs=[pl.BlockSpec((1, Ho + 2, Wo + 2, Cu), lambda n: (n, 0, 0, 0)),
                  pl.BlockSpec((1, Ho + 2, Wo + 2, Cs), lambda n: (n, 0, 0, 0)),
                  pl.BlockSpec((3, 3, Cu, cp), lambda n: (0, 0, 0, 0)),
                  pl.BlockSpec((3, 3, Cs, cp), lambda n: (0, 0, 0, 0)),
                  pl.BlockSpec((1, cp), lambda n: (0, 0))],
        out_specs=(pl.BlockSpec((1, Ho + 2, Wo + 2, cp), lambda n: (n, 0, 0, 0)),
                   pl.BlockSpec((1, 8, cp), lambda n: (n, 0, 0))),
        compiler_params=pltpu.CompilerParams(dimension_semantics=("parallel",)),
    )(u_pad, skip_pad, wu, ws, bb)
    return h1pad, stats


def _conv2_fused_bn(h1pad, scale1, shift1, w2, b2, cp2, Ho, Wo):
    """Conv2d(3x3, pad=1) whose input load fuses BN1 affine + ReLU."""
    N = h1pad.shape[0]
    cp_in = h1pad.shape[-1]
    cout = w2.shape[0]
    cin = w2.shape[1]
    wk = jnp.transpose(w2, (2, 3, 1, 0))                     # (3, 3, cin, cout)
    wk = jnp.pad(wk, ((0, 0), (0, 0), (0, cp_in - cin), (0, cp2 - cout))).astype(jnp.bfloat16)
    bb = jnp.pad(b2, (0, cp2 - cout)).reshape(1, cp2).astype(jnp.float32)

    kern = functools.partial(_conv2_kernel, Ho=Ho, Wo=Wo)
    h2, stats = pl.pallas_call(
        kern,
        out_shape=(jax.ShapeDtypeStruct((N, Ho * Wo, cp2), jnp.bfloat16),
                   jax.ShapeDtypeStruct((N, 8, cp2), jnp.float32)),
        grid=(N,),
        in_specs=[pl.BlockSpec((1, Ho + 2, Wo + 2, cp_in), lambda n: (n, 0, 0, 0)),
                  pl.BlockSpec((1, cp_in), lambda n: (0, 0)),
                  pl.BlockSpec((1, cp_in), lambda n: (0, 0)),
                  pl.BlockSpec((3, 3, cp_in, cp2), lambda n: (0, 0, 0, 0)),
                  pl.BlockSpec((1, cp2), lambda n: (0, 0))],
        out_specs=(pl.BlockSpec((1, Ho * Wo, cp2), lambda n: (n, 0, 0)),
                   pl.BlockSpec((1, 8, cp2), lambda n: (n, 0, 0))),
        compiler_params=pltpu.CompilerParams(dimension_semantics=("parallel",)),
    )(h1pad, scale1, shift1, wk, bb)
    return h2, stats


def _bn_affine(stats, gamma, beta, m_count, cout, cp, eps=1e-5):
    """Fold per-image sums into the per-channel BN affine (scale, shift)."""
    col_sum = jnp.sum(stats[:, 0, :], axis=0)                # (cp,)
    col_sq = jnp.sum(stats[:, 4, :], axis=0)
    mean = col_sum / m_count
    var = jnp.maximum(col_sq / m_count - mean * mean, 0.0)   # biased var (PyTorch training BN)
    inv = lax.rsqrt(var + eps)
    g = jnp.pad(gamma, (0, cp - cout))
    b = jnp.pad(beta, (0, cp - cout))
    scale = (g * inv).reshape(1, cp).astype(jnp.float32)
    shift = (b - mean * g * inv).reshape(1, cp).astype(jnp.float32)
    return scale, shift


# -------------------------- params + forward --------------------------

def init_params(key, in_channels, out_channels):
    ks = jax.random.split(key, 6)
    p = {}
    # nn.ConvTranspose2d weight layout: (Cin, Cout, 2, 2)
    p["up_w"] = 0.1 * jax.random.normal(ks[0], (in_channels, out_channels, 2, 2), jnp.float32)
    p["up_b"] = 0.1 * jax.random.normal(ks[1], (out_channels,), jnp.float32)
    # nn.Conv2d weight layout: (Cout, Cin, 3, 3)
    p["c1_w"] = 0.1 * jax.random.normal(ks[2], (out_channels, in_channels, 3, 3), jnp.float32)
    p["c1_b"] = 0.1 * jax.random.normal(ks[3], (out_channels,), jnp.float32)
    p["c2_w"] = 0.1 * jax.random.normal(ks[4], (out_channels, out_channels, 3, 3), jnp.float32)
    p["c2_b"] = 0.1 * jax.random.normal(ks[5], (out_channels,), jnp.float32)
    # BatchNorm default init: weight=1, bias=0
    p["bn1_g"] = jnp.ones((out_channels,), jnp.float32)
    p["bn1_b"] = jnp.zeros((out_channels,), jnp.float32)
    p["bn2_g"] = jnp.ones((out_channels,), jnp.float32)
    p["bn2_b"] = jnp.zeros((out_channels,), jnp.float32)
    return p


def unet_decoder_forward(params, x_nchw, skip_nchw, eps=1e-5):
    N, Cin, H, W = x_nchw.shape
    cout = params["up_w"].shape[1]
    Ho, Wo = 2 * H, 2 * W
    cp = _round_up(cout, 128)                                # lane-dense GEMM outputs

    # Single NCHW -> NHWC conversion per boundary tensor.
    x = jnp.transpose(x_nchw, (0, 2, 3, 1))
    skip = jnp.transpose(skip_nchw, (0, 2, 3, 1))

    # 1) upconv (Pallas GEMM); pixel unpack + spatial zero pad fuse into one small XLA pass.
    u = _upconv2x2(x, params["up_w"], params["up_b"], cout)          # (N, Ho, Wo, cout)
    u_pad = jnp.pad(u, ((0, 0), (1, 1), (1, 1), (0, 0)))
    skip_pad = jnp.pad(skip.astype(jnp.bfloat16), ((0, 0), (1, 1), (1, 1), (0, 0)))

    # 2) conv1: split-source 9-tap GEMM (no concat, no im2col); padded raw output + BN stats.
    h1pad, stats1 = _conv1_split(u_pad, skip_pad, params["c1_w"], params["c1_b"], cp, Ho, Wo)
    scale1, shift1 = _bn_affine(stats1, params["bn1_g"], params["bn1_b"],
                                N * Ho * Wo, cout, cp, eps)

    # 3) conv2 with BN1 + ReLU fused into its input load; raw output + BN stats.
    h2, stats2 = _conv2_fused_bn(h1pad, scale1, shift1, params["c2_w"], params["c2_b"],
                                 cp, Ho, Wo)
    scale2, shift2 = _bn_affine(stats2, params["bn2_g"], params["bn2_b"],
                                N * Ho * Wo, cout, cp, eps)

    # 4) BN2 + ReLU fused with the f32 cast / channel slice / NCHW transpose (one XLA pass).
    h2 = h2.astype(jnp.float32).reshape(N, Ho, Wo, cp)
    y = jnp.maximum(h2 * scale2.reshape(1, 1, 1, cp) + shift2.reshape(1, 1, 1, cp), 0.0)
    return jnp.transpose(y[:, :, :, :cout], (0, 3, 1, 2))            # (N, cout, Ho, Wo) f32


if __name__ == "__main__":
    in_channels, out_channels = 8, 4        # skip has in_channels - out_channels channels
    N, H, W = 2, 8, 8                       # output spatial 16x16 (multiple of 8 -> cheap reshapes)
    key = jax.random.PRNGKey(0)
    kx, ks, kp = jax.random.split(key, 3)
    x = jax.random.normal(kx, (N, in_channels, H, W), jnp.float32)
    skip = jax.random.normal(ks, (N, in_channels - out_channels, 2 * H, 2 * W), jnp.float32)
    params = init_params(kp, in_channels, out_channels)

    out = jax.jit(unet_decoder_forward)(params, x, skip)
    out = jax.block_until_ready(out)

    assert out.shape == (N, out_channels, 2 * H, 2 * W), out.shape
    assert bool(jnp.all(jnp.isfinite(out)))
    print("KERNEL_OK")
</pallas_src>

<mosaic_0001>
module attributes {stable_mosaic.version = 11 : i64} {
  func.func @_upconv_kernel(%arg0: i32, %arg1: memref<1x64x8xbf16, #tpu.memory_space<vmem>>, %arg2: memref<8x128xbf16, #tpu.memory_space<vmem>>, %arg3: memref<1x128xf32, #tpu.memory_space<vmem>>, %arg4: memref<1x64x128xbf16, #tpu.memory_space<vmem>>) attributes {dimension_semantics = [#tpu.dimension_semantics<parallel>], iteration_bounds = array<i64: 2>, scalar_prefetch = 0 : i64, scratch_operands = 0 : i64, tpu.core_type = #tpu.core_type<tc>, window_params = [{transform_indices = @transform_0, window_bounds = array<i64: 1, 64, 8>}, {pipeline_mode = #tpu.pipeline_mode<synchronous>, transform_indices = @transform_1, window_bounds = array<i64: 8, 128>}, {pipeline_mode = #tpu.pipeline_mode<synchronous>, transform_indices = @transform_2, window_bounds = array<i64: 1, 128>}, {transform_indices = @transform_3, window_bounds = array<i64: 1, 64, 128>}]} {
    %c0 = arith.constant 0 : index
    %c0_0 = arith.constant 0 : index
    %c0_1 = arith.constant 0 : index
    %0 = vector.load %arg1[%c0, %c0_0, %c0_1] : memref<1x64x8xbf16, #tpu.memory_space<vmem>>, vector<1x64x8xbf16>
    %1 = vector.shape_cast %0 : vector<1x64x8xbf16> to vector<64x8xbf16>
    %c0_2 = arith.constant 0 : index
    %c0_3 = arith.constant 0 : index
    %2 = vector.load %arg2[%c0_2, %c0_3] : memref<8x128xbf16, #tpu.memory_space<vmem>>, vector<8x128xbf16>
    %cst = arith.constant dense<0.000000e+00> : vector<64x128xf32>
    %3 = tpu.matmul %1, %2, %cst {dimension_numbers = #tpu.dot_dimension_numbers<[1], [0], [0], [1], [0, 0, 1, 1], [], []>} : vector<64x8xbf16>, vector<8x128xbf16>, vector<64x128xf32> -> vector<64x128xf32>
    %c0_4 = arith.constant 0 : index
    %c0_5 = arith.constant 0 : index
    %4 = vector.load %arg3[%c0_4, %c0_5] : memref<1x128xf32, #tpu.memory_space<vmem>>, vector<1x128xf32>
    %5 = vector.broadcast %4 : vector<1x128xf32> to vector<64x128xf32>
    %6 = arith.addf %3, %5 : vector<64x128xf32>
    %7 = arith.truncf %6 : vector<64x128xf32> to vector<64x128xbf16>
    %c0_6 = arith.constant 0 : index
    %c0_7 = arith.constant 0 : index
    %c0_8 = arith.constant 0 : index
    %8 = vector.load %arg4[%c0_6, %c0_7, %c0_8] : memref<1x64x128xbf16, #tpu.memory_space<vmem>>, vector<1x64x128xbf16>
    %9 = vector.shape_cast %8 : vector<1x64x128xbf16> to vector<64x128xbf16>
    %10 = vector.shape_cast %7 : vector<64x128xbf16> to vector<1x64x128xbf16>
    tpu.vector_store %arg4[%c0_6, %c0_7, %c0_8], %10 {strides = array<i32>} : memref<1x64x128xbf16, #tpu.memory_space<vmem>>, vector<1x64x128xbf16>,
    return
  }
  func.func @transform_0(%arg0: i32) -> (i32, i32, i32) {
    %c0_i32 = arith.constant 0 : i32
    %c0_i32_0 = arith.constant 0 : i32
    %c0_i32_1 = arith.constant 0 : i32
    return %arg0, %c0_i32, %c0_i32_0 : i32, i32, i32
  }
  func.func @transform_1(%arg0: i32) -> (i32, i32) {
    %c0_i32 = arith.constant 0 : i32
    %c0_i32_0 = arith.constant 0 : i32
    %c0_i32_1 = arith.constant 0 : i32
    return %c0_i32, %c0_i32_0 : i32, i32
  }
  func.func @transform_2(%arg0: i32) -> (i32, i32) {
    %c0_i32 = arith.constant 0 : i32
    %c0_i32_0 = arith.constant 0 : i32
    %c0_i32_1 = arith.constant 0 : i32
    return %c0_i32, %c0_i32_0 : i32, i32
  }
  func.func @transform_3(%arg0: i32) -> (i32, i32, i32) {
    %c0_i32 = arith.constant 0 : i32
    %c0_i32_0 = arith.constant 0 : i32
    %c0_i32_1 = arith.constant 0 : i32
    return %arg0, %c0_i32, %c0_i32_0 : i32, i32, i32
  }
}

module attributes {stable_mosaic.version = 11 : i64} {
  func.func @_conv1_kernel(%arg0: i32, %arg1: memref<1x18x18x4xbf16, #tpu.memory_space<vmem>>, %arg2: memref<1x18x18x4xbf16, #tpu.memory_space<vmem>>, %arg3: memref<3x3x4x128xbf16, #tpu.memory_space<vmem>>, %arg4: memref<3x3x4x128xbf16, #tpu.memory_space<vmem>>, %arg5: memref<1x128xf32, #tpu.memory_space<vmem>>, %arg6: memref<1x18x18x128xbf16, #tpu.memory_space<vmem>>, %arg7: memref<1x8x128xf32, #tpu.memory_space<vmem>>) attributes {dimension_semantics = [#tpu.dimension_semantics<parallel>], iteration_bounds = array<i64: 2>, scalar_prefetch = 0 : i64, scratch_operands = 0 : i64, tpu.core_type = #tpu.core_type<tc>, window_params = [{transform_indices = @transform_0, window_bounds = array<i64: 1, 18, 18, 4>}, {transform_indices = @transform_1, window_bounds = array<i64: 1, 18, 18, 4>}, {pipeline_mode = #tpu.pipeline_mode<synchronous>, transform_indices = @transform_2, window_bounds = array<i64: 3, 3, 4, 128>}, {pipeline_mode = #tpu.pipeline_mode<synchronous>, transform_indices = @transform_3, window_bounds = array<i64: 3, 3, 4, 128>}, {pipeline_mode = #tpu.pipeline_mode<synchronous>, transform_indices = @transform_4, window_bounds = array<i64: 1, 128>}, {transform_indices = @transform_5, window_bounds = array<i64: 1, 18, 18, 128>}, {transform_indices = @transform_6, window_bounds = array<i64: 1, 8, 128>}]} {
    %c0 = arith.constant 0 : index
    %c0_0 = arith.constant 0 : index
    %c0_1 = arith.constant 0 : index
    %c0_2 = arith.constant 0 : index
    %0 = vector.load %arg1[%c0, %c0_0, %c0_1, %c0_2] : memref<1x18x18x4xbf16, #tpu.memory_space<vmem>>, vector<1x18x18x4xbf16>
    %1 = vector.shape_cast %0 : vector<1x18x18x4xbf16> to vector<18x18x4xbf16>
    %c0_3 = arith.constant 0 : index
    %c0_4 = arith.constant 0 : index
    %c0_5 = arith.constant 0 : index
    %c0_6 = arith.constant 0 : index
    %2 = vector.load %arg2[%c0_3, %c0_4, %c0_5, %c0_6] : memref<1x18x18x4xbf16, #tpu.memory_space<vmem>>, vector<1x18x18x4xbf16>
    %3 = vector.shape_cast %2 : vector<1x18x18x4xbf16> to vector<18x18x4xbf16>
    %cst = arith.constant 0.000000e+00 : f32
    %4 = vector.broadcast %cst : f32 to vector<256x128xf32>
    %5 = vector.extract_strided_slice %1 {offsets = [0, 0, 0], sizes = [16, 16, 4], strides = [1, 1, 1]} : vector<18x18x4xbf16> to vector<16x16x4xbf16>
    %6 = vector.shape_cast %5 : vector<16x16x4xbf16> to vector<256x4xbf16>
    %c0_7 = arith.constant 0 : index
    %c0_8 = arith.constant 0 : index
    %c0_9 = arith.constant 0 : index
    %c0_10 = arith.constant 0 : index
    %7 = vector.load %arg3[%c0_7, %c0_8, %c0_9, %c0_10] : memref<3x3x4x128xbf16, #tpu.memory_space<vmem>>, vector<1x1x4x128xbf16>
    %8 = vector.shape_cast %7 : vector<1x1x4x128xbf16> to vector<4x128xbf16>
    %cst_11 = arith.constant dense<0.000000e+00> : vector<256x128xf32>
    %9 = tpu.matmul %6, %8, %cst_11 {dimension_numbers = #tpu.dot_dimension_numbers<[1], [0], [0], [1], [0, 0, 1, 1], [], []>} : vector<256x4xbf16>, vector<4x128xbf16>, vector<256x128xf32> -> vector<256x128xf32>
    %10 = arith.addf %4, %9 : vector<256x128xf32>
    %11 = vector.extract_strided_slice %3 {offsets = [0, 0, 0], sizes = [16, 16, 4], strides = [1, 1, 1]} : vector<18x18x4xbf16> to vector<16x16x4xbf16>
    %12 = vector.shape_cast %11 : vector<16x16x4xbf16> to vector<256x4xbf16>
    %c0_12 = arith.constant 0 : index
    %c0_13 = arith.constant 0 : index
    %c0_14 = arith.constant 0 : index
    %c0_15 = arith.constant 0 : index
    %13 = vector.load %arg4[%c0_12, %c0_13, %c0_14, %c0_15] : memref<3x3x4x128xbf16, #tpu.memory_space<vmem>>, vector<1x1x4x128xbf16>
    %14 = vector.shape_cast %13 : vector<1x1x4x128xbf16> to vector<4x128xbf16>
    %cst_16 = arith.constant dense<0.000000e+00> : vector<256x128xf32>
    %15 = tpu.matmul %12, %14, %cst_16 {dimension_numbers = #tpu.dot_dimension_numbers<[1], [0], [0], [1], [0, 0, 1, 1], [], []>} : vector<256x4xbf16>, vector<4x128xbf16>, vector<256x128xf32> -> vector<256x128xf32>
    %16 = arith.addf %10, %15 : vector<256x128xf32>
    %17 = vector.extract_strided_slice %1 {offsets = [0, 1, 0], sizes = [16, 16, 4], strides = [1, 1, 1]} : vector<18x18x4xbf16> to vector<16x16x4xbf16>
    %18 = vector.shape_cast %17 : vector<16x16x4xbf16> to vector<256x4xbf16>
    %c0_17 = arith.constant 0 : index
    %c1 = arith.constant 1 : index
    %c0_18 = arith.constant 0 : index
    %c0_19 = arith.constant 0 : index
    %19 = vector.load %arg3[%c0_17, %c1, %c0_18, %c0_19] : memref<3x3x4x128xbf16, #tpu.memory_space<vmem>>, vector<1x1x4x128xbf16>
    %20 = vector.shape_cast %19 : vector<1x1x4x128xbf16> to vector<4x128xbf16>
    %cst_20 = arith.constant dense<0.000000e+00> : vector<256x128xf32>
    %21 = tpu.matmul %18, %20, %cst_20 {dimension_numbers = #tpu.dot_dimension_numbers<[1], [0], [0], [1], [0, 0, 1, 1], [], []>} : vector<256x4xbf16>, vector<4x128xbf16>, vector<256x128xf32> -> vector<256x128xf32>
    %22 = arith.addf %16, %21 : vector<256x128xf32>
    %23 = vector.extract_strided_slice %3 {offsets = [0, 1, 0], sizes = [16, 16, 4], strides = [1, 1, 1]} : vector<18x18x4xbf16> to vector<16x16x4xbf16>
    %24 = vector.shape_cast %23 : vector<16x16x4xbf16> to vector<256x4xbf16>
    %c0_21 = arith.constant 0 : index
    %c1_22 = arith.constant 1 : index
    %c0_23 = arith.constant 0 : index
    %c0_24 = arith.constant 0 : index
    %25 = vector.load %arg4[%c0_21, %c1_22, %c0_23, %c0_24] : memref<3x3x4x128xbf16, #tpu.memory_space<vmem>>, vector<1x1x4x128xbf16>
    %26 = vector.shape_cast %25 : vector<1x1x4x128xbf16> to vector<4x128xbf16>
    %cst_25 = arith.constant dense<0.000000e+00> : vector<256x128xf32>
    %27 = tpu.matmul %24, %26, %cst_25 {dimension_numbers = #tpu.dot_dimension_numbers<[1], [0], [0], [1], [0, 0, 1, 1], [], []>} : vector<256x4xbf16>, vector<4x128xbf16>, vector<256x128xf32> -> vector<256x128xf32>
    %28 = arith.addf %22, %27 : vector<256x128xf32>
    %29 = vector.extract_strided_slice %1 {offsets = [0, 2, 0], sizes = [16, 16, 4], strides = [1, 1, 1]} : vector<18x18x4xbf16> to vector<16x16x4xbf16>
    %30 = vector.shape_cast %29 : vector<16x16x4xbf16> to vector<256x4xbf16>
    %c0_26 = arith.constant 0 : index
    %c2 = arith.constant 2 : index
    %c0_27 = arith.constant 0 : index
    %c0_28 = arith.constant 0 : index
    %31 = vector.load %arg3[%c0_26, %c2, %c0_27, %c0_28] : memref<3x3x4x128xbf16, #tpu.memory_space<vmem>>, vector<1x1x4x128xbf16>
    %32 = vector.shape_cast %31 : vector<1x1x4x128xbf16> to vector<4x128xbf16>
    %cst_29 = arith.constant dense<0.000000e+00> : vector<256x128xf32>
    %33 = tpu.matmul %30, %32, %cst_29 {dimension_numbers = #tpu.dot_dimension_numbers<[1], [0], [0], [1], [0, 0, 1, 1], [], []>} : vector<256x4xbf16>, vector<4x128xbf16>, vector<256x128xf32> -> vector<256x128xf32>
    %34 = arith.addf %28, %33 : vector<256x128xf32>
    %35 = vector.extract_strided_slice %3 {offsets = [0, 2, 0], sizes = [16, 16, 4], strides = [1, 1, 1]} : vector<18x18x4xbf16> to vector<16x16x4xbf16>
    %36 = vector.shape_cast %35 : vector<16x16x4xbf16> to vector<256x4xbf16>
    %c0_30 = arith.constant 0 : index
    %c2_31 = arith.constant 2 : index
    %c0_32 = arith.constant 0 : index
    %c0_33 = arith.constant 0 : index
    %37 = vector.load %arg4[%c0_30, %c2_31, %c0_32, %c0_33] : memref<3x3x4x128xbf16, #tpu.memory_space<vmem>>, vector<1x1x4x128xbf16>
    %38 = vector.shape_cast %37 : vector<1x1x4x128xbf16> to vector<4x128xbf16>
    %cst_34 = arith.constant dense<0.000000e+00> : vector<256x128xf32>
    %39 = tpu.matmul %36, %38, %cst_34 {dimension_numbers = #tpu.dot_dimension_numbers<[1], [0], [0], [1], [0, 0, 1, 1], [], []>} : vector<256x4xbf16>, vector<4x128xbf16>, vector<256x128xf32> -> vector<256x128xf32>
    %40 = arith.addf %34, %39 : vector<256x128xf32>
    %41 = vector.extract_strided_slice %1 {offsets = [1, 0, 0], sizes = [16, 16, 4], strides = [1, 1, 1]} : vector<18x18x4xbf16> to vector<16x16x4xbf16>
    %42 = vector.shape_cast %41 : vector<16x16x4xbf16> to vector<256x4xbf16>
    %c1_35 = arith.constant 1 : index
    %c0_36 = arith.constant 0 : index
    %c0_37 = arith.constant 0 : index
    %c0_38 = arith.constant 0 : index
    %43 = vector.load %arg3[%c1_35, %c0_36, %c0_37, %c0_38] : memref<3x3x4x128xbf16, #tpu.memory_space<vmem>>, vector<1x1x4x128xbf16>
    %44 = vector.shape_cast %43 : vector<1x1x4x128xbf16> to vector<4x128xbf16>
    %cst_39 = arith.constant dense<0.000000e+00> : vector<256x128xf32>
    %45 = tpu.matmul %42, %44, %cst_39 {dimension_numbers = #tpu.dot_dimension_numbers<[1], [0], [0], [1], [0, 0, 1, 1], [], []>} : vector<256x4xbf16>, vector<4x128xbf16>, vector<256x128xf32> -> vector<256x128xf32>
    %46 = arith.addf %40, %45 : vector<256x128xf32>
    %47 = vector.extract_strided_slice %3 {offsets = [1, 0, 0], sizes = [16, 16, 4], strides = [1, 1, 1]} : vector<18x18x4xbf16> to vector<16x16x4xbf16>
    %48 = vector.shape_cast %47 : vector<16x16x4xbf16> to vector<256x4xbf16>
    %c1_40 = arith.constant 1 : index
    %c0_41 = arith.constant 0 : index
    %c0_42 = arith.constant 0 : index
    %c0_43 = arith.constant 0 : index
    %49 = vector.load %arg4[%c1_40, %c0_41, %c0_42, %c0_43] : memref<3x3x4x128xbf16, #tpu.memory_space<vmem>>, vector<1x1x4x128xbf16>
    %50 = vector.shape_cast %49 : vector<1x1x4x128xbf16> to vector<4x128xbf16>
    %cst_44 = arith.constant dense<0.000000e+00> : vector<256x128xf32>
    %51 = tpu.matmul %48, %50, %cst_44 {dimension_numbers = #tpu.dot_dimension_numbers<[1], [0], [0], [1], [0, 0, 1, 1], [], []>} : vector<256x4xbf16>, vector<4x128xbf16>, vector<256x128xf32> -> vector<256x128xf32>
    %52 = arith.addf %46, %51 : vector<256x128xf32>
    %53 = vector.extract_strided_slice %1 {offsets = [1, 1, 0], sizes = [16, 16, 4], strides = [1, 1, 1]} : vector<18x18x4xbf16> to vector<16x16x4xbf16>
    %54 = vector.shape_cast %53 : vector<16x16x4xbf16> to vector<256x4xbf16>
    %c1_45 = arith.constant 1 : index
    %c1_46 = arith.constant 1 : index
    %c0_47 = arith.constant 0 : index
    %c0_48 = arith.constant 0 : index
    %55 = vector.load %arg3[%c1_45, %c1_46, %c0_47, %c0_48] : memref<3x3x4x128xbf16, #tpu.memory_space<vmem>>, vector<1x1x4x128xbf16>
    %56 = vector.shape_cast %55 : vector<1x1x4x128xbf16> to vector<4x128xbf16>
    %cst_49 = arith.constant dense<0.000000e+00> : vector<256x128xf32>
    %57 = tpu.matmul %54, %56, %cst_49 {dimension_numbers = #tpu.dot_dimension_numbers<[1], [0], [0], [1], [0, 0, 1, 1], [], []>} : vector<256x4xbf16>, vector<4x128xbf16>, vector<256x128xf32> -> vector<256x128xf32>
    %58 = arith.addf %52, %57 : vector<256x128xf32>
    %59 = vector.extract_strided_slice %3 {offsets = [1, 1, 0], sizes = [16, 16, 4], strides = [1, 1, 1]} : vector<18x18x4xbf16> to vector<16x16x4xbf16>
    %60 = vector.shape_cast %59 : vector<16x16x4xbf16> to vector<256x4xbf16>
    %c1_50 = arith.constant 1 : index
    %c1_51 = arith.constant 1 : index
    %c0_52 = arith.constant 0 : index
    %c0_53 = arith.constant 0 : index
    %61 = vector.load %arg4[%c1_50, %c1_51, %c0_52, %c0_53] : memref<3x3x4x128xbf16, #tpu.memory_space<vmem>>, vector<1x1x4x128xbf16>
    %62 = vector.shape_cast %61 : vector<1x1x4x128xbf16> to vector<4x128xbf16>
    %cst_54 = arith.constant dense<0.000000e+00> : vector<256x128xf32>
    %63 = tpu.matmul %60, %62, %cst_54 {dimension_numbers = #tpu.dot_dimension_numbers<[1], [0], [0], [1], [0, 0, 1, 1], [], []>} : vector<256x4xbf16>, vector<4x128xbf16>, vector<256x128xf32> -> vector<256x128xf32>
    %64 = arith.addf %58, %63 : vector<256x128xf32>
    %65 = vector.extract_strided_slice %1 {offsets = [1, 2, 0], sizes = [16, 16, 4], strides = [1, 1, 1]} : vector<18x18x4xbf16> to vector<16x16x4xbf16>
    %66 = vector.shape_cast %65 : vector<16x16x4xbf16> to vector<256x4xbf16>
    %c1_55 = arith.constant 1 : index
    %c2_56 = arith.constant 2 : index
    %c0_57 = arith.constant 0 : index
    %c0_58 = arith.constant 0 : index
    %67 = vector.load %arg3[%c1_55, %c2_56, %c0_57, %c0_58] : memref<3x3x4x128xbf16, #tpu.memory_space<vmem>>, vector<1x1x4x128xbf16>
    %68 = vector.shape_cast %67 : vector<1x1x4x128xbf16> to vector<4x128xbf16>
    %cst_59 = arith.constant dense<0.000000e+00> : vector<256x128xf32>
    %69 = tpu.matmul %66, %68, %cst_59 {dimension_numbers = #tpu.dot_dimension_numbers<[1], [0], [0], [1], [0, 0, 1, 1], [], []>} : vector<256x4xbf16>, vector<4x128xbf16>, vector<256x128xf32> -> vector<256x128xf32>
    %70 = arith.addf %64, %69 : vector<256x128xf32>
    %71 = vector.extract_strided_slice %3 {offsets = [1, 2, 0], sizes = [16, 16, 4], strides = [1, 1, 1]} : vector<18x18x4xbf16> to vector<16x16x4xbf16>
    %72 = vector.shape_cast %71 : vector<16x16x4xbf16> to vector<256x4xbf16>
    %c1_60 = arith.constant 1 : index
    %c2_61 = arith.constant 2 : index
    %c0_62 = arith.constant 0 : index
    %c0_63 = arith.constant 0 : index
    %73 = vector.load %arg4[%c1_60, %c2_61, %c0_62, %c0_63] : memref<3x3x4x128xbf16, #tpu.memory_space<vmem>>, vector<1x1x4x128xbf16>
    %74 = vector.shape_cast %73 : vector<1x1x4x128xbf16> to vector<4x128xbf16>
    %cst_64 = arith.constant dense<0.000000e+00> : vector<256x128xf32>
    %75 = tpu.matmul %72, %74, %cst_64 {dimension_numbers = #tpu.dot_dimension_numbers<[1], [0], [0], [1], [0, 0, 1, 1], [], []>} : vector<256x4xbf16>, vector<4x128xbf16>, vector<256x128xf32> -> vector<256x128xf32>
    %76 = arith.addf %70, %75 : vector<256x128xf32>
    %77 = vector.extract_strided_slice %1 {offsets = [2, 0, 0], sizes = [16, 16, 4], strides = [1, 1, 1]} : vector<18x18x4xbf16> to vector<16x16x4xbf16>
    %78 = vector.shape_cast %77 : vector<16x16x4xbf16> to vector<256x4xbf16>
    %c2_65 = arith.constant 2 : index
    %c0_66 = arith.constant 0 : index
    %c0_67 = arith.constant 0 : index
    %c0_68 = arith.constant 0 : index
    %79 = vector.load %arg3[%c2_65, %c0_66, %c0_67, %c0_68] : memref<3x3x4x128xbf16, #tpu.memory_space<vmem>>, vector<1x1x4x128xbf16>
    %80 = vector.shape_cast %79 : vector<1x1x4x128xbf16> to vector<4x128xbf16>
    %cst_69 = arith.constant dense<0.000000e+00> : vector<256x128xf32>
    %81 = tpu.matmul %78, %80, %cst_69 {dimension_numbers = #tpu.dot_dimension_numbers<[1], [0], [0], [1], [0, 0, 1, 1], [], []>} : vector<256x4xbf16>, vector<4x128xbf16>, vector<256x128xf32> -> vector<256x128xf32>
    %82 = arith.addf %76, %81 : vector<256x128xf32>
    %83 = vector.extract_strided_slice %3 {offsets = [2, 0, 0], sizes = [16, 16, 4], strides = [1, 1, 1]} : vector<18x18x4xbf16> to vector<16x16x4xbf16>
    %84 = vector.shape_cast %83 : vector<16x16x4xbf16> to vector<256x4xbf16>
    %c2_70 = arith.constant 2 : index
    %c0_71 = arith.constant 0 : index
    %c0_72 = arith.constant 0 : index
    %c0_73 = arith.constant 0 : index
    %85 = vector.load %arg4[%c2_70, %c0_71, %c0_72, %c0_73] : memref<3x3x4x128xbf16, #tpu.memory_space<vmem>>, vector<1x1x4x128xbf16>
    %86 = vector.shape_cast %85 : vector<1x1x4x128xbf16> to vector<4x128xbf16>
    %cst_74 = arith.constant dense<0.000000e+00> : vector<256x128xf32>
    %87 = tpu.matmul %84, %86, %cst_74 {dimension_numbers = #tpu.dot_dimension_numbers<[1], [0], [0], [1], [0, 0, 1, 1], [], []>} : vector<256x4xbf16>, vector<4x128xbf16>, vector<256x128xf32> -> vector<256x128xf32>
    %88 = arith.addf %82, %87 : vector<256x128xf32>
    %89 = vector.extract_strided_slice %1 {offsets = [2, 1, 0], sizes = [16, 16, 4], strides = [1, 1, 1]} : vector<18x18x4xbf16> to vector<16x16x4xbf16>
    %90 = vector.shape_cast %89 : vector<16x16x4xbf16> to vector<256x4xbf16>
    %c2_75 = arith.constant 2 : index
    %c1_76 = arith.constant 1 : index
    %c0_77 = arith.constant 0 : index
    %c0_78 = arith.constant 0 : index
    %91 = vector.load %arg3[%c2_75, %c1_76, %c0_77, %c0_78] : memref<3x3x4x128xbf16, #tpu.memory_space<vmem>>, vector<1x1x4x128xbf16>
    %92 = vector.shape_cast %91 : vector<1x1x4x128xbf16> to vector<4x128xbf16>
    %cst_79 = arith.constant dense<0.000000e+00> : vector<256x128xf32>
    %93 = tpu.matmul %90, %92, %cst_79 {dimension_numbers = #tpu.dot_dimension_numbers<[1], [0], [0], [1], [0, 0, 1, 1], [], []>} : vector<256x4xbf16>, vector<4x128xbf16>, vector<256x128xf32> -> vector<256x128xf32>
    %94 = arith.addf %88, %93 : vector<256x128xf32>
    %95 = vector.extract_strided_slice %3 {offsets = [2, 1, 0], sizes = [16, 16, 4], strides = [1, 1, 1]} : vector<18x18x4xbf16> to vector<16x16x4xbf16>
    %96 = vector.shape_cast %95 : vector<16x16x4xbf16> to vector<256x4xbf16>
    %c2_80 = arith.constant 2 : index
    %c1_81 = arith.constant 1 : index
    %c0_82 = arith.constant 0 : index
    %c0_83 = arith.constant 0 : index
    %97 = vector.load %arg4[%c2_80, %c1_81, %c0_82, %c0_83] : memref<3x3x4x128xbf16, #tpu.memory_space<vmem>>, vector<1x1x4x128xbf16>
    %98 = vector.shape_cast %97 : vector<1x1x4x128xbf16> to vector<4x128xbf16>
    %cst_84 = arith.constant dense<0.000000e+00> : vector<256x128xf32>
    %99 = tpu.matmul %96, %98, %cst_84 {dimension_numbers = #tpu.dot_dimension_numbers<[1], [0], [0], [1], [0, 0, 1, 1], [], []>} : vector<256x4xbf16>, vector<4x128xbf16>, vector<256x128xf32> -> vector<256x128xf32>
    %100 = arith.addf %94, %99 : vector<256x128xf32>
    %101 = vector.extract_strided_slice %1 {offsets = [2, 2, 0], sizes = [16, 16, 4], strides = [1, 1, 1]} : vector<18x18x4xbf16> to vector<16x16x4xbf16>
    %102 = vector.shape_cast %101 : vector<16x16x4xbf16> to vector<256x4xbf16>
    %c2_85 = arith.constant 2 : index
    %c2_86 = arith.constant 2 : index
    %c0_87 = arith.constant 0 : index
    %c0_88 = arith.constant 0 : index
    %103 = vector.load %arg3[%c2_85, %c2_86, %c0_87, %c0_88] : memref<3x3x4x128xbf16, #tpu.memory_space<vmem>>, vector<1x1x4x128xbf16>
    %104 = vector.shape_cast %103 : vector<1x1x4x128xbf16> to vector<4x128xbf16>
    %cst_89 = arith.constant dense<0.000000e+00> : vector<256x128xf32>
    %105 = tpu.matmul %102, %104, %cst_89 {dimension_numbers = #tpu.dot_dimension_numbers<[1], [0], [0], [1], [0, 0, 1, 1], [], []>} : vector<256x4xbf16>, vector<4x128xbf16>, vector<256x128xf32> -> vector<256x128xf32>
    %106 = arith.addf %100, %105 : vector<256x128xf32>
    %107 = vector.extract_strided_slice %3 {offsets = [2, 2, 0], sizes = [16, 16, 4], strides = [1, 1, 1]} : vector<18x18x4xbf16> to vector<16x16x4xbf16>
    %108 = vector.shape_cast %107 : vector<16x16x4xbf16> to vector<256x4xbf16>
    %c2_90 = arith.constant 2 : index
    %c2_91 = arith.constant 2 : index
    %c0_92 = arith.constant 0 : index
    %c0_93 = arith.constant 0 : index
    %109 = vector.load %arg4[%c2_90, %c2_91, %c0_92, %c0_93] : memref<3x3x4x128xbf16, #tpu.memory_space<vmem>>, vector<1x1x4x128xbf16>
    %110 = vector.shape_cast %109 : vector<1x1x4x128xbf16> to vector<4x128xbf16>
    %cst_94 = arith.constant dense<0.000000e+00> : vector<256x128xf32>
    %111 = tpu.matmul %108, %110, %cst_94 {dimension_numbers = #tpu.dot_dimension_numbers<[1], [0], [0], [1], [0, 0, 1, 1], [], []>} : vector<256x4xbf16>, vector<4x128xbf16>, vector<256x128xf32> -> vector<256x128xf32>
    %112 = arith.addf %106, %111 : vector<256x128xf32>
    %c0_95 = arith.constant 0 : index
    %c0_96 = arith.constant 0 : index
    %113 = vector.load %arg5[%c0_95, %c0_96] : memref<1x128xf32, #tpu.memory_space<vmem>>, vector<1x128xf32>
    %114 = vector.broadcast %113 : vector<1x128xf32> to vector<256x128xf32>
    %115 = arith.addf %112, %114 : vector<256x128xf32>
    %cst_97 = arith.constant dense<0.000000e+00> : vector<128xf32>
    %116 = vector.multi_reduction <add>, %115, %cst_97 [0] : vector<256x128xf32> to vector<128xf32>
    %117 = vector.shape_cast %116 : vector<128xf32> to vector<1x128xf32>
    %118 = arith.mulf %115, %115 : vector<256x128xf32>
    %cst_98 = arith.constant dense<0.000000e+00> : vector<128xf32>
    %119 = vector.multi_reduction <add>, %118, %cst_98 [0] : vector<256x128xf32> to vector<128xf32>
    %120 = vector.shape_cast %119 : vector<128xf32> to vector<1x128xf32>
    %121 = tpu.iota {dimensions = array<i32: 0>} : vector<8x128xi32>
    %c4_i32 = arith.constant 4 : i32
    %122 = vector.broadcast %c4_i32 : i32 to vector<8x128xi32>
    %123 = arith.cmpi slt, %121, %122 : vector<8x128xi32>
    %124 = vector.shape_cast %117 : vector<1x128xf32> to vector<1x128xf32>
    %125 = vector.broadcast %124 : vector<1x128xf32> to vector<8x128xf32>
    %126 = vector.shape_cast %120 : vector<1x128xf32> to vector<1x128xf32>
    %127 = vector.broadcast %126 : vector<1x128xf32> to vector<8x128xf32>
    %128 = arith.select %123, %125, %127 : vector<8x128xi1>, vector<8x128xf32>
    %c0_99 = arith.constant 0 : index
    %c0_100 = arith.constant 0 : index
    %c0_101 = arith.constant 0 : index
    %129 = vector.load %arg7[%c0_99, %c0_100, %c0_101] : memref<1x8x128xf32, #tpu.memory_space<vmem>>, vector<1x8x128xf32>
    %130 = vector.shape_cast %129 : vector<1x8x128xf32> to vector<8x128xf32>
    %131 = vector.shape_cast %128 : vector<8x128xf32> to vector<1x8x128xf32>
    tpu.vector_store %arg7[%c0_99, %c0_100, %c0_101], %131 {strides = array<i32>} : memref<1x8x128xf32, #tpu.memory_space<vmem>>, vector<1x8x128xf32>,
    %cst_102 = arith.constant 0.000000e+00 : bf16
    %132 = vector.broadcast %cst_102 : bf16 to vector<1x18x18x128xbf16>
    %c0_103 = arith.constant 0 : index
    %c0_104 = arith.constant 0 : index
    %c0_105 = arith.constant 0 : index
    %c0_106 = arith.constant 0 : index
    %133 = vector.load %arg6[%c0_103, %c0_104, %c0_105, %c0_106] : memref<1x18x18x128xbf16, #tpu.memory_space<vmem>>, vector<1x18x18x128xbf16>
    tpu.vector_store %arg6[%c0_103, %c0_104, %c0_105, %c0_106], %132 {strides = array<i32>} : memref<1x18x18x128xbf16, #tpu.memory_space<vmem>>, vector<1x18x18x128xbf16>,
    %134 = vector.shape_cast %115 : vector<256x128xf32> to vector<16x16x128xf32>
    %135 = arith.truncf %134 : vector<16x16x128xf32> to vector<16x16x128xbf16>
    %c0_107 = arith.constant 0 : index
    %c1_108 = arith.constant 1 : index
    %c1_109 = arith.constant 1 : index
    %c0_110 = arith.constant 0 : index
    %136 = vector.load %arg6[%c0_107, %c1_108, %c1_109, %c0_110] : memref<1x18x18x128xbf16, #tpu.memory_space<vmem>>, vector<1x16x16x128xbf16>
    %137 = vector.shape_cast %136 : vector<1x16x16x128xbf16> to vector<16x16x128xbf16>
    %138 = vector.shape_cast %135 : vector<16x16x128xbf16> to vector<1x16x16x128xbf16>
    tpu.vector_store %arg6[%c0_107, %c1_108, %c1_109, %c0_110], %138 {strides = array<i32>} : memref<1x18x18x128xbf16, #tpu.memory_space<vmem>>, vector<1x16x16x128xbf16>,
    return
  }
  func.func @transform_0(%arg0: i32) -> (i32, i32, i32, i32) {
    %c0_i32 = arith.constant 0 : i32
    %c0_i32_0 = arith.constant 0 : i32
    %c0_i32_1 = arith.constant 0 : i32
    %c0_i32_2 = arith.constant 0 : i32
    return %arg0, %c0_i32, %c0_i32_0, %c0_i32_1 : i32, i32, i32, i32
  }
  func.func @transform_1(%arg0: i32) -> (i32, i32, i32, i32) {
    %c0_i32 = arith.constant 0 : i32
    %c0_i32_0 = arith.constant 0 : i32
    %c0_i32_1 = arith.constant 0 : i32
    %c0_i32_2 = arith.constant 0 : i32
    return %arg0, %c0_i32, %c0_i32_0, %c0_i32_1 : i32, i32, i32, i32
  }
  func.func @transform_2(%arg0: i32) -> (i32, i32, i32, i32) {
    %c0_i32 = arith.constant 0 : i32
    %c0_i32_0 = arith.constant 0 : i32
    %c0_i32_1 = arith.constant 0 : i32
    %c0_i32_2 = arith.constant 0 : i32
    %c0_i32_3 = arith.constant 0 : i32
    return %c0_i32, %c0_i32_0, %c0_i32_1, %c0_i32_2 : i32, i32, i32, i32
  }
  func.func @transform_3(%arg0: i32) -> (i32, i32, i32, i32) {
    %c0_i32 = arith.constant 0 : i32
    %c0_i32_0 = arith.constant 0 : i32
    %c0_i32_1 = arith.constant 0 : i32
    %c0_i32_2 = arith.constant 0 : i32
    %c0_i32_3 = arith.constant 0 : i32
    return %c0_i32, %c0_i32_0, %c0_i32_1, %c0_i32_2 : i32, i32, i32, i32
  }
  func.func @transform_4(%arg0: i32) -> (i32, i32) {
    %c0_i32 = arith.constant 0 : i32
    %c0_i32_0 = arith.constant 0 : i32
    %c0_i32_1 = arith.constant 0 : i32
    return %c0_i32, %c0_i32_0 : i32, i32
  }
  func.func @transform_5(%arg0: i32) -> (i32, i32, i32, i32) {
    %c0_i32 = arith.constant 0 : i32
    %c0_i32_0 = arith.constant 0 : i32
    %c0_i32_1 = arith.constant 0 : i32
    %c0_i32_2 = arith.constant 0 : i32
    return %arg0, %c0_i32, %c0_i32_0, %c0_i32_1 : i32, i32, i32, i32
  }
  func.func @transform_6(%arg0: i32) -> (i32, i32, i32) {
    %c0_i32 = arith.constant 0 : i32
    %c0_i32_0 = arith.constant 0 : i32
    %c0_i32_1 = arith.constant 0 : i32
    return %arg0, %c0_i32, %c0_i32_0 : i32, i32, i32
  }
}

module attributes {stable_mosaic.version = 11 : i64} {
  func.func @_conv2_kernel(%arg0: i32, %arg1: memref<1x18x18x128xbf16, #tpu.memory_space<vmem>>, %arg2: memref<1x128xf32, #tpu.memory_space<vmem>>, %arg3: memref<1x128xf32, #tpu.memory_space<vmem>>, %arg4: memref<3x3x128x128xbf16, #tpu.memory_space<vmem>>, %arg5: memref<1x128xf32, #tpu.memory_space<vmem>>, %arg6: memref<1x256x128xbf16, #tpu.memory_space<vmem>>, %arg7: memref<1x8x128xf32, #tpu.memory_space<vmem>>) attributes {dimension_semantics = [#tpu.dimension_semantics<parallel>], iteration_bounds = array<i64: 2>, scalar_prefetch = 0 : i64, scratch_operands = 0 : i64, tpu.core_type = #tpu.core_type<tc>, window_params = [{transform_indices = @transform_0, window_bounds = array<i64: 1, 18, 18, 128>}, {pipeline_mode = #tpu.pipeline_mode<synchronous>, transform_indices = @transform_1, window_bounds = array<i64: 1, 128>}, {pipeline_mode = #tpu.pipeline_mode<synchronous>, transform_indices = @transform_2, window_bounds = array<i64: 1, 128>}, {pipeline_mode = #tpu.pipeline_mode<synchronous>, transform_indices = @transform_3, window_bounds = array<i64: 3, 3, 128, 128>}, {pipeline_mode = #tpu.pipeline_mode<synchronous>, transform_indices = @transform_4, window_bounds = array<i64: 1, 128>}, {transform_indices = @transform_5, window_bounds = array<i64: 1, 256, 128>}, {transform_indices = @transform_6, window_bounds = array<i64: 1, 8, 128>}]} {
    %c0 = arith.constant 0 : index
    %c0_0 = arith.constant 0 : index
    %c0_1 = arith.constant 0 : index
    %c0_2 = arith.constant 0 : index
    %0 = vector.load %arg1[%c0, %c0_0, %c0_1, %c0_2] : memref<1x18x18x128xbf16, #tpu.memory_space<vmem>>, vector<1x18x18x128xbf16>
    %1 = vector.shape_cast %0 : vector<1x18x18x128xbf16> to vector<18x18x128xbf16>
    %2 = arith.extf %1 : vector<18x18x128xbf16> to vector<18x18x128xf32>
    %c0_3 = arith.constant 0 : index
    %c0_4 = arith.constant 0 : index
    %3 = vector.load %arg2[%c0_3, %c0_4] : memref<1x128xf32, #tpu.memory_space<vmem>>, vector<1x128xf32>
    %4 = vector.shape_cast %3 : vector<1x128xf32> to vector<1x1x128xf32>
    %5 = vector.broadcast %4 : vector<1x1x128xf32> to vector<18x18x128xf32>
    %6 = arith.mulf %2, %5 : vector<18x18x128xf32>
    %c0_5 = arith.constant 0 : index
    %c0_6 = arith.constant 0 : index
    %7 = vector.load %arg3[%c0_5, %c0_6] : memref<1x128xf32, #tpu.memory_space<vmem>>, vector<1x128xf32>
    %8 = vector.shape_cast %7 : vector<1x128xf32> to vector<1x1x128xf32>
    %9 = vector.broadcast %8 : vector<1x1x128xf32> to vector<18x18x128xf32>
    %10 = arith.addf %6, %9 : vector<18x18x128xf32>
    %cst = arith.constant 0.000000e+00 : f32
    %11 = vector.broadcast %cst : f32 to vector<18x18x128xf32>
    %12 = arith.maximumf %10, %11 : vector<18x18x128xf32>
    %13 = tpu.iota {dimensions = array<i32: 0>} : vector<18x18x128xi32>
    %14 = tpu.iota {dimensions = array<i32: 1>} : vector<18x18x128xi32>
    %c1_i32 = arith.constant 1 : i32
    %15 = vector.broadcast %c1_i32 : i32 to vector<18x18x128xi32>
    %16 = arith.cmpi sge, %13, %15 : vector<18x18x128xi32>
    %c16_i32 = arith.constant 16 : i32
    %17 = vector.broadcast %c16_i32 : i32 to vector<18x18x128xi32>
    %18 = arith.cmpi sle, %13, %17 : vector<18x18x128xi32>
    %19 = arith.andi %16, %18 : vector<18x18x128xi1>
    %c1_i32_7 = arith.constant 1 : i32
    %20 = vector.broadcast %c1_i32_7 : i32 to vector<18x18x128xi32>
    %21 = arith.cmpi sge, %14, %20 : vector<18x18x128xi32>
    %22 = arith.andi %19, %21 : vector<18x18x128xi1>
    %c16_i32_8 = arith.constant 16 : i32
    %23 = vector.broadcast %c16_i32_8 : i32 to vector<18x18x128xi32>
    %24 = arith.cmpi sle, %14, %23 : vector<18x18x128xi32>
    %25 = arith.andi %22, %24 : vector<18x18x128xi1>
    %cst_9 = arith.constant 0.000000e+00 : f32
    %26 = vector.broadcast %cst_9 : f32 to vector<18x18x128xf32>
    %27 = arith.select %25, %12, %26 : vector<18x18x128xi1>, vector<18x18x128xf32>
    %28 = arith.truncf %27 : vector<18x18x128xf32> to vector<18x18x128xbf16>
    %cst_10 = arith.constant 0.000000e+00 : f32
    %29 = vector.broadcast %cst_10 : f32 to vector<256x128xf32>
    %30 = vector.extract_strided_slice %28 {offsets = [0, 0, 0], sizes = [16, 16, 128], strides = [1, 1, 1]} : vector<18x18x128xbf16> to vector<16x16x128xbf16>
    %31 = vector.shape_cast %30 : vector<16x16x128xbf16> to vector<256x128xbf16>
    %c0_11 = arith.constant 0 : index
    %c0_12 = arith.constant 0 : index
    %c0_13 = arith.constant 0 : index
    %c0_14 = arith.constant 0 : index
    %32 = vector.load %arg4[%c0_11, %c0_12, %c0_13, %c0_14] : memref<3x3x128x128xbf16, #tpu.memory_space<vmem>>, vector<1x1x128x128xbf16>
    %33 = vector.shape_cast %32 : vector<1x1x128x128xbf16> to vector<128x128xbf16>
    %cst_15 = arith.constant dense<0.000000e+00> : vector<256x128xf32>
    %34 = tpu.matmul %31, %33, %cst_15 {dimension_numbers = #tpu.dot_dimension_numbers<[1], [0], [0], [1], [0, 0, 1, 1], [], []>} : vector<256x128xbf16>, vector<128x128xbf16>, vector<256x128xf32> -> vector<256x128xf32>
    %35 = arith.addf %29, %34 : vector<256x128xf32>
    %36 = vector.extract_strided_slice %28 {offsets = [0, 1, 0], sizes = [16, 16, 128], strides = [1, 1, 1]} : vector<18x18x128xbf16> to vector<16x16x128xbf16>
    %37 = vector.shape_cast %36 : vector<16x16x128xbf16> to vector<256x128xbf16>
    %c0_16 = arith.constant 0 : index
    %c1 = arith.constant 1 : index
    %c0_17 = arith.constant 0 : index
    %c0_18 = arith.constant 0 : index
    %38 = vector.load %arg4[%c0_16, %c1, %c0_17, %c0_18] : memref<3x3x128x128xbf16, #tpu.memory_space<vmem>>, vector<1x1x128x128xbf16>
    %39 = vector.shape_cast %38 : vector<1x1x128x128xbf16> to vector<128x128xbf16>
    %cst_19 = arith.constant dense<0.000000e+00> : vector<256x128xf32>
    %40 = tpu.matmul %37, %39, %cst_19 {dimension_numbers = #tpu.dot_dimension_numbers<[1], [0], [0], [1], [0, 0, 1, 1], [], []>} : vector<256x128xbf16>, vector<128x128xbf16>, vector<256x128xf32> -> vector<256x128xf32>
    %41 = arith.addf %35, %40 : vector<256x128xf32>
    %42 = vector.extract_strided_slice %28 {offsets = [0, 2, 0], sizes = [16, 16, 128], strides = [1, 1, 1]} : vector<18x18x128xbf16> to vector<16x16x128xbf16>
    %43 = vector.shape_cast %42 : vector<16x16x128xbf16> to vector<256x128xbf16>
    %c0_20 = arith.constant 0 : index
    %c2 = arith.constant 2 : index
    %c0_21 = arith.constant 0 : index
    %c0_22 = arith.constant 0 : index
    %44 = vector.load %arg4[%c0_20, %c2, %c0_21, %c0_22] : memref<3x3x128x128xbf16, #tpu.memory_space<vmem>>, vector<1x1x128x128xbf16>
    %45 = vector.shape_cast %44 : vector<1x1x128x128xbf16> to vector<128x128xbf16>
    %cst_23 = arith.constant dense<0.000000e+00> : vector<256x128xf32>
    %46 = tpu.matmul %43, %45, %cst_23 {dimension_numbers = #tpu.dot_dimension_numbers<[1], [0], [0], [1], [0, 0, 1, 1], [], []>} : vector<256x128xbf16>, vector<128x128xbf16>, vector<256x128xf32> -> vector<256x128xf32>
    %47 = arith.addf %41, %46 : vector<256x128xf32>
    %48 = vector.extract_strided_slice %28 {offsets = [1, 0, 0], sizes = [16, 16, 128], strides = [1, 1, 1]} : vector<18x18x128xbf16> to vector<16x16x128xbf16>
    %49 = vector.shape_cast %48 : vector<16x16x128xbf16> to vector<256x128xbf16>
    %c1_24 = arith.constant 1 : index
    %c0_25 = arith.constant 0 : index
    %c0_26 = arith.constant 0 : index
    %c0_27 = arith.constant 0 : index
    %50 = vector.load %arg4[%c1_24, %c0_25, %c0_26, %c0_27] : memref<3x3x128x128xbf16, #tpu.memory_space<vmem>>, vector<1x1x128x128xbf16>
    %51 = vector.shape_cast %50 : vector<1x1x128x128xbf16> to vector<128x128xbf16>
    %cst_28 = arith.constant dense<0.000000e+00> : vector<256x128xf32>
    %52 = tpu.matmul %49, %51, %cst_28 {dimension_numbers = #tpu.dot_dimension_numbers<[1], [0], [0], [1], [0, 0, 1, 1], [], []>} : vector<256x128xbf16>, vector<128x128xbf16>, vector<256x128xf32> -> vector<256x128xf32>
    %53 = arith.addf %47, %52 : vector<256x128xf32>
    %54 = vector.extract_strided_slice %28 {offsets = [1, 1, 0], sizes = [16, 16, 128], strides = [1, 1, 1]} : vector<18x18x128xbf16> to vector<16x16x128xbf16>
    %55 = vector.shape_cast %54 : vector<16x16x128xbf16> to vector<256x128xbf16>
    %c1_29 = arith.constant 1 : index
    %c1_30 = arith.constant 1 : index
    %c0_31 = arith.constant 0 : index
    %c0_32 = arith.constant 0 : index
    %56 = vector.load %arg4[%c1_29, %c1_30, %c0_31, %c0_32] : memref<3x3x128x128xbf16, #tpu.memory_space<vmem>>, vector<1x1x128x128xbf16>
    %57 = vector.shape_cast %56 : vector<1x1x128x128xbf16> to vector<128x128xbf16>
    %cst_33 = arith.constant dense<0.000000e+00> : vector<256x128xf32>
    %58 = tpu.matmul %55, %57, %cst_33 {dimension_numbers = #tpu.dot_dimension_numbers<[1], [0], [0], [1], [0, 0, 1, 1], [], []>} : vector<256x128xbf16>, vector<128x128xbf16>, vector<256x128xf32> -> vector<256x128xf32>
    %59 = arith.addf %53, %58 : vector<256x128xf32>
    %60 = vector.extract_strided_slice %28 {offsets = [1, 2, 0], sizes = [16, 16, 128], strides = [1, 1, 1]} : vector<18x18x128xbf16> to vector<16x16x128xbf16>
    %61 = vector.shape_cast %60 : vector<16x16x128xbf16> to vector<256x128xbf16>
    %c1_34 = arith.constant 1 : index
    %c2_35 = arith.constant 2 : index
    %c0_36 = arith.constant 0 : index
    %c0_37 = arith.constant 0 : index
    %62 = vector.load %arg4[%c1_34, %c2_35, %c0_36, %c0_37] : memref<3x3x128x128xbf16, #tpu.memory_space<vmem>>, vector<1x1x128x128xbf16>
    %63 = vector.shape_cast %62 : vector<1x1x128x128xbf16> to vector<128x128xbf16>
    %cst_38 = arith.constant dense<0.000000e+00> : vector<256x128xf32>
    %64 = tpu.matmul %61, %63, %cst_38 {dimension_numbers = #tpu.dot_dimension_numbers<[1], [0], [0], [1], [0, 0, 1, 1], [], []>} : vector<256x128xbf16>, vector<128x128xbf16>, vector<256x128xf32> -> vector<256x128xf32>
    %65 = arith.addf %59, %64 : vector<256x128xf32>
    %66 = vector.extract_strided_slice %28 {offsets = [2, 0, 0], sizes = [16, 16, 128], strides = [1, 1, 1]} : vector<18x18x128xbf16> to vector<16x16x128xbf16>
    %67 = vector.shape_cast %66 : vector<16x16x128xbf16> to vector<256x128xbf16>
    %c2_39 = arith.constant 2 : index
    %c0_40 = arith.constant 0 : index
    %c0_41 = arith.constant 0 : index
    %c0_42 = arith.constant 0 : index
    %68 = vector.load %arg4[%c2_39, %c0_40, %c0_41, %c0_42] : memref<3x3x128x128xbf16, #tpu.memory_space<vmem>>, vector<1x1x128x128xbf16>
    %69 = vector.shape_cast %68 : vector<1x1x128x128xbf16> to vector<128x128xbf16>
    %cst_43 = arith.constant dense<0.000000e+00> : vector<256x128xf32>
    %70 = tpu.matmul %67, %69, %cst_43 {dimension_numbers = #tpu.dot_dimension_numbers<[1], [0], [0], [1], [0, 0, 1, 1], [], []>} : vector<256x128xbf16>, vector<128x128xbf16>, vector<256x128xf32> -> vector<256x128xf32>
    %71 = arith.addf %65, %70 : vector<256x128xf32>
    %72 = vector.extract_strided_slice %28 {offsets = [2, 1, 0], sizes = [16, 16, 128], strides = [1, 1, 1]} : vector<18x18x128xbf16> to vector<16x16x128xbf16>
    %73 = vector.shape_cast %72 : vector<16x16x128xbf16> to vector<256x128xbf16>
    %c2_44 = arith.constant 2 : index
    %c1_45 = arith.constant 1 : index
    %c0_46 = arith.constant 0 : index
    %c0_47 = arith.constant 0 : index
    %74 = vector.load %arg4[%c2_44, %c1_45, %c0_46, %c0_47] : memref<3x3x128x128xbf16, #tpu.memory_space<vmem>>, vector<1x1x128x128xbf16>
    %75 = vector.shape_cast %74 : vector<1x1x128x128xbf16> to vector<128x128xbf16>
    %cst_48 = arith.constant dense<0.000000e+00> : vector<256x128xf32>
    %76 = tpu.matmul %73, %75, %cst_48 {dimension_numbers = #tpu.dot_dimension_numbers<[1], [0], [0], [1], [0, 0, 1, 1], [], []>} : vector<256x128xbf16>, vector<128x128xbf16>, vector<256x128xf32> -> vector<256x128xf32>
    %77 = arith.addf %71, %76 : vector<256x128xf32>
    %78 = vector.extract_strided_slice %28 {offsets = [2, 2, 0], sizes = [16, 16, 128], strides = [1, 1, 1]} : vector<18x18x128xbf16> to vector<16x16x128xbf16>
    %79 = vector.shape_cast %78 : vector<16x16x128xbf16> to vector<256x128xbf16>
    %c2_49 = arith.constant 2 : index
    %c2_50 = arith.constant 2 : index
    %c0_51 = arith.constant 0 : index
    %c0_52 = arith.constant 0 : index
    %80 = vector.load %arg4[%c2_49, %c2_50, %c0_51, %c0_52] : memref<3x3x128x128xbf16, #tpu.memory_space<vmem>>, vector<1x1x128x128xbf16>
    %81 = vector.shape_cast %80 : vector<1x1x128x128xbf16> to vector<128x128xbf16>
    %cst_53 = arith.constant dense<0.000000e+00> : vector<256x128xf32>
    %82 = tpu.matmul %79, %81, %cst_53 {dimension_numbers = #tpu.dot_dimension_numbers<[1], [0], [0], [1], [0, 0, 1, 1], [], []>} : vector<256x128xbf16>, vector<128x128xbf16>, vector<256x128xf32> -> vector<256x128xf32>
    %83 = arith.addf %77, %82 : vector<256x128xf32>
    %c0_54 = arith.constant 0 : index
    %c0_55 = arith.constant 0 : index
    %84 = vector.load %arg5[%c0_54, %c0_55] : memref<1x128xf32, #tpu.memory_space<vmem>>, vector<1x128xf32>
    %85 = vector.broadcast %84 : vector<1x128xf32> to vector<256x128xf32>
    %86 = arith.addf %83, %85 : vector<256x128xf32>
    %cst_56 = arith.constant dense<0.000000e+00> : vector<128xf32>
    %87 = vector.multi_reduction <add>, %86, %cst_56 [0] : vector<256x128xf32> to vector<128xf32>
    %88 = vector.shape_cast %87 : vector<128xf32> to vector<1x128xf32>
    %89 = arith.mulf %86, %86 : vector<256x128xf32>
    %cst_57 = arith.constant dense<0.000000e+00> : vector<128xf32>
    %90 = vector.multi_reduction <add>, %89, %cst_57 [0] : vector<256x128xf32> to vector<128xf32>
    %91 = vector.shape_cast %90 : vector<128xf32> to vector<1x128xf32>
    %92 = tpu.iota {dimensions = array<i32: 0>} : vector<8x128xi32>
    %c4_i32 = arith.constant 4 : i32
    %93 = vector.broadcast %c4_i32 : i32 to vector<8x128xi32>
    %94 = arith.cmpi slt, %92, %93 : vector<8x128xi32>
    %95 = vector.shape_cast %88 : vector<1x128xf32> to vector<1x128xf32>
    %96 = vector.broadcast %95 : vector<1x128xf32> to vector<8x128xf32>
    %97 = vector.shape_cast %91 : vector<1x128xf32> to vector<1x128xf32>
    %98 = vector.broadcast %97 : vector<1x128xf32> to vector<8x128xf32>
    %99 = arith.select %94, %96, %98 : vector<8x128xi1>, vector<8x128xf32>
    %c0_58 = arith.constant 0 : index
    %c0_59 = arith.constant 0 : index
    %c0_60 = arith.constant 0 : index
    %100 = vector.load %arg7[%c0_58, %c0_59, %c0_60] : memref<1x8x128xf32, #tpu.memory_space<vmem>>, vector<1x8x128xf32>
    %101 = vector.shape_cast %100 : vector<1x8x128xf32> to vector<8x128xf32>
    %102 = vector.shape_cast %99 : vector<8x128xf32> to vector<1x8x128xf32>
    tpu.vector_store %arg7[%c0_58, %c0_59, %c0_60], %102 {strides = array<i32>} : memref<1x8x128xf32, #tpu.memory_space<vmem>>, vector<1x8x128xf32>,
    %103 = arith.truncf %86 : vector<256x128xf32> to vector<256x128xbf16>
    %c0_61 = arith.constant 0 : index
    %c0_62 = arith.constant 0 : index
    %c0_63 = arith.constant 0 : index
    %104 = vector.load %arg6[%c0_61, %c0_62, %c0_63] : memref<1x256x128xbf16, #tpu.memory_space<vmem>>, vector<1x256x128xbf16>
    %105 = vector.shape_cast %104 : vector<1x256x128xbf16> to vector<256x128xbf16>
    %106 = vector.shape_cast %103 : vector<256x128xbf16> to vector<1x256x128xbf16>
    tpu.vector_store %arg6[%c0_61, %c0_62, %c0_63], %106 {strides = array<i32>} : memref<1x256x128xbf16, #tpu.memory_space<vmem>>, vector<1x256x128xbf16>,
    return
  }
  func.func @transform_0(%arg0: i32) -> (i32, i32, i32, i32) {
    %c0_i32 = arith.constant 0 : i32
    %c0_i32_0 = arith.constant 0 : i32
    %c0_i32_1 = arith.constant 0 : i32
    %c0_i32_2 = arith.constant 0 : i32
    return %arg0, %c0_i32, %c0_i32_0, %c0_i32_1 : i32, i32, i32, i32
  }
  func.func @transform_1(%arg0: i32) -> (i32, i32) {
    %c0_i32 = arith.constant 0 : i32
    %c0_i32_0 = arith.constant 0 : i32
    %c0_i32_1 = arith.constant 0 : i32
    return %c0_i32, %c0_i32_0 : i32, i32
  }
  func.func @transform_2(%arg0: i32) -> (i32, i32) {
    %c0_i32 = arith.constant 0 : i32
    %c0_i32_0 = arith.constant 0 : i32
    %c0_i32_1 = arith.constant 0 : i32
    return %c0_i32, %c0_i32_0 : i32, i32
  }
  func.func @transform_3(%arg0: i32) -> (i32, i32, i32, i32) {
    %c0_i32 = arith.constant 0 : i32
    %c0_i32_0 = arith.constant 0 : i32
    %c0_i32_1 = arith.constant 0 : i32
    %c0_i32_2 = arith.constant 0 : i32
    %c0_i32_3 = arith.constant 0 : i32
    return %c0_i32, %c0_i32_0, %c0_i32_1, %c0_i32_2 : i32, i32, i32, i32
  }
  func.func @transform_4(%arg0: i32) -> (i32, i32) {
    %c0_i32 = arith.constant 0 : i32
    %c0_i32_0 = arith.constant 0 : i32
    %c0_i32_1 = arith.constant 0 : i32
    return %c0_i32, %c0_i32_0 : i32, i32
  }
  func.func @transform_5(%arg0: i32) -> (i32, i32, i32) {
    %c0_i32 = arith.constant 0 : i32
    %c0_i32_0 = arith.constant 0 : i32
    %c0_i32_1 = arith.constant 0 : i32
    return %arg0, %c0_i32, %c0_i32_0 : i32, i32, i32
  }
  func.func @transform_6(%arg0: i32) -> (i32, i32, i32) {
    %c0_i32 = arith.constant 0 : i32
    %c0_i32_0 = arith.constant 0 : i32
    %c0_i32_1 = arith.constant 0 : i32
    return %arg0, %c0_i32, %c0_i32_0 : i32, i32, i32
  }
}

</mosaic_0001>

<bundles_post_ra>
// kernel: tile.8
= control target key start
LH: loop header
LB: loop body
LE: loop exit
PB: predicated region body
PF: predicated region fallthrough
CT: control target
= control target key end

     0   :  { %s22_s0 = inlined_call_operand.vmem [shape: f32[4], index: 0, kind: input, shape index: {}]   ;;  %s23_s1 = inlined_call_operand.vmem [shape: f32[4,4], index: 1, kind: output, shape index: {}]  }
   0x1   :  { %v4_v0 = vld [vmem:[%s22_s0] ss:$0 sm:$0xff] }
   0x2   :  { %5 = vst [vmem:[%s23_s1] sm:$0xf] %v4_v0 }

// kernel: tile.9
= control target key start
LH: loop header
LB: loop body
LE: loop exit
PB: predicated region body
PF: predicated region fallthrough
CT: control target
= control target key end

     0   :  { %vm7_vm0 = vcmask 31744   ;;  %s37_s8 = smov 4   ;;  %s38_s9 = smov 8   ;;  %vm13_vm1 = vcmask 130144   ;;  %vm19_vm2 = vcmask 97344   ;;  %vm25_vm3 = vcmask 64544   ;;  %s55_s0 = inlined_call_operand.vmem [shape: f32[4,4], index: 0, kind: input, shape index: {}]   ;;  %s56_s1 = inlined_call_operand.vmem [shape: f32[16], index: 1, kind: output, shape index: {}]  }
   0x1   :  { %v4_v0 = vld [vmem:[%s55_s0] sm:$0xf]  ;;  %s36_s0 = smov 12  }
   0x2   :  { %5 = vst [vmem:[#allocation1] sm:$0xf] %v4_v0 }
   0x9   :  { %v10_v1 = vld [vmem:[#allocation1 + $0x3] sm:$0x1]   ;;  %v22_v2 = vld [vmem:[#allocation1 + $0x1] sm:$0x1]   ;;  %v6_v3 = vld [vmem:[#allocation1] sm:$0x1]  }
   0xa   :  { %11 = vrot.lane.b32.xlu0 %v10_v1, %s36_s0  ;;  %23 = vrot.lane.b32.xlu1 %v22_v2, %s37_s8  ;;  %v16_v4 = vld [vmem:[#allocation1 + $0x2] sm:$0x1]   ;;  %8 = vst.msk [vmem:[#allocation0] sm:$0x1] %vm7_vm0, %v6_v3  }
   0xe   :  { %17 = vrot.lane.b32.xlu0 %v16_v4, %s38_s9 }
  0x7c   :  { %v12_v5 = vpop.permute.xlu0 %11   ;;  %v24_v6 = vpop.permute.xlu1 %23  }
  0x7d   :  { %14 = vst.msk [vmem:[#allocation0] sm:$0x1] %vm13_vm1, %v12_v5  }
  0x80   :  { %v18_v7 = vpop.permute.xlu0 %17  }
  0x81   :  { %20 = vst.msk [vmem:[#allocation0] sm:$0x1] %vm19_vm2, %v18_v7  }
  0x82   :  { %26 = vst.msk [vmem:[#allocation0] sm:$0x1] %vm25_vm3, %v24_v6  }
  0x89   :  { %v30_v8 = vld [vmem:[#allocation0] sm:$0x1] }
  0x8a   :  { %32 = vst [vmem:[%s56_s1] sm:$0x1] %v30_v8 }

// kernel: unet_decoder_forward.3
= control target key start
LH: loop header
LB: loop body
LE: loop exit
PB: predicated region body
PF: predicated region fallthrough
CT: control target
= control target key end

     0   :  { %s505_s12 = smov 0   ;;  %s528_s0 = inlined_call_operand.vmem [shape: bf16[2,64,8], index: 0, kind: input, shape index: {}]   ;;  %s529_s1 = inlined_call_operand.vmem [shape: bf16[8,128], index: 1, kind: input, shape index: {}]   ;;  %s530_s2 = inlined_call_operand.vmem [shape: f32[1,128], index: 2, kind: input, shape index: {}]   ;;  %s531_s3 = inlined_call_operand.vmem [shape: bf16[2,64,128], index: 3, kind: output, shape index: {}]  }
   0x1 LB: > { %s385_s13 = sadd.s32 4294967295, %s483_s12   ;;  %p389_p0 = scmp.ge.s32.totalorder %s483_s12, 1  ;;  %s483_s12 = sphi %s505_s12, %s13_s12  }
   0x2   : > { %p137_p1 = scmp.lt.s32.totalorder %s483_s12, 3 }
   0x4   : > { %p138_p2 = pnand %p389_p0, %p137_p1 }
   0x5   : > { %v180_v0 = vld [vmem:[%s529_s1] sm:$0xf] (!%p138_p2)  ;;  %vm221_vm0 = vcmask (!%p138_p2), 1043456   ;;  %p161_p3 = scmp.lt.s32.totalorder (!%p138_p2), %s385_s13, 1  ;;  %vm208_vm1 = vcmask (!%p138_p2), 64512  }
   0x6   : > { %141 = sbr.rel (%p138_p2) target bundleno = 238 (0xee), region = 32  ;;  %463 = vmatprep.subr.msk.bf16.mxu0 (!%p138_p2), %vm221_vm0, %v180_v0  ;;  %464 = vmatprep.subr.msk.bf16.mxu1 (!%p138_p2), %vm221_vm0, %v180_v0  ;;  %v223_v1 = vsel (!%p138_p2), %vm221_vm0, %v180_v0, 0  ;;  %v394_v7 = vld [vmem:[%s530_s2] ss:$0 sm:$0xff] (!%p138_p2) }
   0x7   : > { %452 = vmatpush3.bf16.msra.mxu0 (!%p138_p2), %v223_v1  ;;  %462 = vmatpush3.bf16.msra.mxu1 (!%p138_p2), %v223_v1 }
   0xd   : > { %s533_s13 = smov (!%p161_p3, %s385_s13), 1 }
   0xe   : > { %s413_s16 = sshll.u32 %s533_s13, 5 }
   0xf   : > { %s165_s19 = scalar_lea.vmem %s528_s0, %s413_s16  ;;  %s170_s24 = scalar_lea.vmem %s531_s3, %s413_s16 }
  0x10   : > { %v473_v2 = vld [vmem:[%s165_s19] sm:$0xff]   ;;  %v474_v3 = vld [vmem:[%s165_s19 + $0x10] sm:$0xff]   ;;  %v475_v4 = vld [vmem:[%s165_s19 + $0x8] sm:$0xff]  }
  0x11   : > { %453 = vmatprep.mubr.msk.bf16.mxu0 %vm208_vm1, %v473_v2  ;;  %457 = vmatprep.mubr.msk.bf16.mxu1 %vm208_vm1, %v474_v3  ;;  %v476_v5 = vld [vmem:[%s165_s19 + $0x18] sm:$0xff]  }
  0x12   : > { %454 = vmatmul.mubr.msk.bf16.vlgmr.msra.gmra.mrb[0].mxu0 %vm208_vm1, %v475_v4  ;;  %458 = vmatmul.mubr.msk.bf16.vlgmr.msra.gmra.mrb[0].mxu1 %vm208_vm1, %v476_v5 }
  0xe5   : > { %v455_v6 = vpop.f32.mrb[0].mxu0  ;;  %v459_v8 = vpop.f32.mrb[0].mxu1 }
  0xe6   : > { %v259_v9 = vpop.f32.mrb[1].mxu0  ;;  %v275_v10 = vpop.f32.mrb[1].mxu1  ;;  %v268_v12 = vadd.f32 %v455_v6, %v394_v7  ;;  %v284_v16 = vadd.f32 %v459_v8, %v394_v7 }
  0xe7   : > { %v456_v11 = vpop.f32.mrb[2].mxu0  ;;  %v460_v14 = vpop.f32.mrb[2].mxu1  ;;  %v260_v17 = vadd.f32 %v394_v7, %v259_v9  ;;  %v276_v21 = vadd.f32 %v394_v7, %v275_v10 }
  0xe8   : > { %v271_v13 = vadd.f32 %v456_v11, %v394_v7  ;;  %v262_v15 = vpop.f32.mrb[3].mxu0  ;;  %v287_v18 = vadd.f32 %v460_v14, %v394_v7  ;;  %v278_v20 = vpop.f32.mrb[3].mxu1 }
  0xe9   : > { %v263_v19 = vadd.f32 %v394_v7, %v262_v15  ;;  %v279_v23 = vadd.f32 %v394_v7, %v278_v20 }
  0xea   : > { %v431_v22 = vpack.c.bf16 %v271_v13, %v268_v12  ;;  %v441_v24 = vpack.c.bf16 %v287_v18, %v284_v16 }
  0xeb   : > { %v426_v25 = vpack.c.bf16 %v263_v19, %v260_v17  ;;  %v436_v26 = vpack.c.bf16 %v279_v23, %v276_v21 }
  0xec   : > { %443 = vst [vmem:[%s170_s24 + $0x8] sm:$0xff] %v431_v22   ;;  %445 = vst [vmem:[%s170_s24 + $0x18] sm:$0xff] %v441_v24  }
  0xed   : > { %427 = vst [vmem:[%s170_s24] sm:$0xff] %v426_v25   ;;  %444 = vst [vmem:[%s170_s24 + $0x10] sm:$0xff] %v436_v26  }
  0xee PF: > { %s13_s12 = sadd.s32 1, %s483_s12  }
  0xef   : > { %p10_p4 = scmp.ge.s32.totalorder %s13_s12, 4  }
  0xf1   :  { %12 = sbr.rel (!%p10_p4) target bundleno = 1 (0x1), region = 62 }

// kernel: unet_decoder_forward.5
= control target key start
LH: loop header
LB: loop body
LE: loop exit
PB: predicated region body
PF: predicated region fallthrough
CT: control target
= control target key end

     0   :  { %s5267_s21 = smov 0   ;;  %s6554_s0 = inlined_call_operand.vmem [shape: bf16[2,18,18,128], index: 0, kind: input, shape index: {}]   ;;  %s6555_s1 = inlined_call_operand.vmem [shape: f32[1,128], index: 1, kind: input, shape index: {}]   ;;  %s6556_s2 = inlined_call_operand.vmem [shape: f32[1,128], index: 2, kind: input, shape index: {}]   ;;  %s6557_s3 = inlined_call_operand.vmem [shape: bf16[3,3,128,128], index: 3, kind: input, shape index: {}]   ;;  %s6558_s4 = inlined_call_operand.vmem [shape: f32[1,128], index: 4, kind: input, shape index: {}]   ;;  %s6559_s5 = inlined_call_operand.vmem [shape: bf16[2,256,128], index: 5, kind: output, shape index: {0}]   ;;  %s6560_s6 = inlined_call_operand.vmem [shape: f32[2,8,128], index: 6, kind: output, shape index: {1}]  }
   0x1 LB: > { %s3655_s22 = sadd.s32 4294967295, %s5227_s21   ;;  %p3659_p0 = scmp.ge.s32.totalorder %s5227_s21, 1  ;;  %s5227_s21 = sphi %s5267_s21, %s17_s21  }
   0x2   : > { %p215_p1 = scmp.lt.s32.totalorder %s5227_s21, 3 }
   0x4   : > { %p216_p2 = pnand %p3659_p0, %p215_p1 }
   0x6   : > { %219 = sbr.rel (%p216_p2) target bundleno = 591 (0x24f), region = 40 }
   0xd   : > { %v5139_v0 = vld [vmem:[%s6557_s3 + $0x40] sm:$0xff]   ;;  %v5229_v2 = vmov 0   ;;  %v5141_v4 = vld [vmem:[%s6557_s3 + $0x48] sm:$0xff]   ;;  %p249_p3 = scmp.lt.s32.totalorder %s3655_s22, 1  ;;  %v5143_v6 = vld [vmem:[%s6557_s3 + $0x50] sm:$0xff]   ;;  %v548_v9 = vlaneseq  ;;  %vm1352_vm3 = vcmask 1046528  }
   0xe   : > { %v5140_v1 = vld [vmem:[%s6557_s3 + $0x100] sm:$0xff]   ;;  %v5281_v3 = vrot.slane %v5229_v2, 1  ;;  %4423 = vmatprep.subr.bf16.mxu1 %v5139_v0  ;;  %v5142_v5 = vld [vmem:[%s6557_s3 + $0x108] sm:$0xff]   ;;  %v5144_v7 = vld [vmem:[%s6557_s3 + $0x110] sm:$0xff]   ;;  %vm676_vm2 = vsmask.f32 7424 }
   0xf   : > { %4615 = vmatprep.subr.bf16.mxu0 %v5140_v1  ;;  %4424 = vmatpush3.bf16.msra.mxu1 %v5139_v0  ;;  %s6685_s22 = smov (!%p249_p3, %s3655_s22), 1  ;;  %v5145_v8 = vld [vmem:[%s6557_s3 + $0x58] sm:$0xff]   ;;  %v5147_v11 = vld [vmem:[%s6557_s3 + $0x60] sm:$0xff]   ;;  %v5308_v12 = vshrl.u32 %v548_v9, 7  ;;  %v5149_v14 = vld [vmem:[%s6557_s3 + $0x68] sm:$0xff]   ;;  %vm5231_vm4 = vmmov 1  }
  0x10   : > { %6615 = vst [vmem:[#allocation2_spill] sm:$0xff] %v5281_v3  ;;  %4616 = vmatpush3.bf16.msra.mxu0 %v5140_v1  ;;  %4425 = vmatprep.subr.bf16.mxu1 %v5141_v4  ;;  %v5146_v10 = vld [vmem:[%s6557_s3 + $0x118] sm:$0xff]   ;;  %s5127_s15 = smul.u32 216, %s6685_s22  ;;  %v5148_v13 = vld [vmem:[%s6557_s3 + $0x120] sm:$0xff]   ;;  %v5150_v19 = vld [vmem:[%s6557_s3 + $0x128] sm:$0xff]   ;;  %s4039_s23 = sshll.u32 %s6685_s22, 7 }
  0x11   : > { %4617 = vmatprep.subr.bf16.mxu0 %v5142_v5  ;;  %4439 = vmatprep.mubr.bf16.mxu1 %v5281_v3  ;;  %v5326_v17 = vld [vmem:[%s6555_s1] ss:$0 sm:$0xff]  ;;  %v5329_v18 = vadd.s32 16, %v5308_v12  ;;  %vm552_vm0 = vcmp.ge.s32.totalorder %v5308_v12, 1  ;;  %v5151_v30 = vld [vmem:[%s6557_s3 + $0x70] sm:$0xff]   ;;  %v5153_v48 = vld [vmem:[%s6557_s3 + $0x78] sm:$0xff]   ;;  %s6492_s27 = scalar_lea.vmem %s6559_s5, %s4039_s23 }
  0x12   : > { %s5316_s24 = scalar_lea.vmem %s6554_s0, %s5127_s15  ;;  %v5337_v23 = vld [vmem:[%s6556_s2] ss:$0 sm:$0xff]  ;;  %v5152_v33 = vld [vmem:[%s6557_s3 + $0x130] sm:$0xff]   ;;  %v5154_v53 = vld [vmem:[%s6557_s3 + $0x138] sm:$0xff]   ;;  %s3663_s28 = sshll.u32 %s6685_s22, 3  ;;  %vm3406_vm6 = vcmp.lt.s32.totalorder %v5308_v12, 4 }
  0x13   : > { %4426 = vmatpush3.bf16.msra.mxu1 %v5141_v4  ;;  %v267_v15 = vld [vmem:[%s5316_s24 + $0xc] sm:$0xff]   ;;  %v269_v16 = vld [vmem:[%s5316_s24 + $0x14] sm:$0x1]  ;;  %v4184_v24 = vld [vmem:[%s5316_s24 + $0x18] sm:$0xff]   ;;  %vm563_vm1 = vcmp.le.s32.totalorder %v5329_v18, 16  ;;  %s262_s7 = scalar_lea.vmem %s6560_s6, %s3663_s28 }
  0x14   : > { %4618 = vmatpush3.bf16.msra.mxu0 %v5142_v5  ;;  %4427 = vmatprep.subr.bf16.mxu1 %v5143_v6  ;;  %v321_v20 = vunpack.c.l.bf16 %v267_v15  ;;  %v322_v21 = vunpack.c.h.bf16 %v267_v15  ;;  %v323_v22 = vunpack.c.l.bf16 %v269_v16  ;;  %v4074_v28 = vunpack.c.l.bf16 %v4184_v24  ;;  %v272_v29 = vld [vmem:[%s5316_s24 + $0x20] sm:$0x1]  ;;  %v273_v38 = vld [vmem:[%s5316_s24 + $0x24] sm:$0xff]   ;;  %v275_v39 = vld [vmem:[%s5316_s24 + $0x2c] sm:$0x1] }
  0x15   : > { %4619 = vmatprep.subr.bf16.mxu0 %v5144_v7  ;;  %v4075_v31 = vunpack.c.h.bf16 %v4184_v24  ;;  %v326_v32 = vunpack.c.l.bf16 %v272_v29  ;;  %v327_v42 = vunpack.c.l.bf16 %v273_v38  ;;  %v328_v43 = vunpack.c.h.bf16 %v273_v38  ;;  %v5155_v60 = vld [vmem:[%s6557_s3] sm:$0xff]   ;;  %v4185_v5 = vld [vmem:[%s5316_s24 + $0x30] sm:$0xff]   ;;  %v278_v15 = vld [vmem:[%s5316_s24 + $0x38] sm:$0x1] }
  0x16   : > { %v382_v25 = vmul.f32 %v5326_v17, %v321_v20  ;;  %v383_v26 = vmul.f32 %v5326_v17, %v322_v21  ;;  %v384_v27 = vmul.f32 %v5326_v17, %v323_v22  ;;  %v385_v37 = vmul.f32 %v4074_v28, %v5326_v17  ;;  %v5396_v0 = vld [vmem:[%s6557_s3 + $0x140] sm:$0xff]   ;;  %vm6081_vm5 = vmpackc.low %vm5231_vm4, %vm552_vm0 }
  0x17   : > { %4428 = vmatpush3.bf16.msra.mxu1 %v5143_v6  ;;  %v386_v40 = vmul.f32 %v4075_v31, %v5326_v17  ;;  %v387_v41 = vmul.f32 %v5326_v17, %v326_v32  ;;  %v329_v51 = vunpack.c.l.bf16 %v275_v39  ;;  %v388_v52 = vmul.f32 %v5326_v17, %v327_v42  ;;  %v279_v32 = vld [vmem:[%s5316_s24 + $0x3c] sm:$0xff]  }
  0x18   : > { %4620 = vmatpush3.bf16.msra.mxu0 %v5144_v7  ;;  %4429 = vmatprep.subr.bf16.mxu1 %v5145_v8  ;;  %v443_v34 = vadd.f32 %v5337_v23, %v382_v25  ;;  %v444_v35 = vadd.f32 %v5337_v23, %v383_v26  ;;  %v445_v36 = vadd.f32 %v5337_v23, %v384_v27  ;;  %v4078_v21 = vunpack.c.l.bf16 %v4185_v5 }
  0x19   : > { %4621 = vmatprep.subr.bf16.mxu0 %v5146_v10  ;;  %v5361_v47 = vadd.f32 %v5337_v23, %v385_v37  ;;  %v5367_v49 = vadd.f32 %v5337_v23, %v386_v40  ;;  %v448_v50 = vadd.f32 %v5337_v23, %v387_v41  ;;  %v389_v1 = vmul.f32 %v5326_v17, %v328_v43  ;;  %v281_v41 = vld [vmem:[%s5316_s24 + $0x44] sm:$0x1] }
  0x1a   : > { %v497_v44 = vmax.f32 %v443_v34, 0.0  ;;  %v498_v45 = vmax.f32 %v444_v35, 0.0  ;;  %v499_v46 = vmax.f32 %v445_v36, 0.0  ;;  %v390_v2 = vmul.f32 %v5326_v17, %v329_v51 }
  0x1b   : > { %4430 = vmatpush3.bf16.msra.mxu1 %v5145_v8  ;;  %v6570_v57 = vmax.f32 %v5361_v47, 0.0  ;;  %v6569_v61 = vmax.f32 %v5367_v49, 0.0  ;;  %v502_v62 = vmax.f32 %v448_v50, 0.0  ;;  %v5401_v4 = vadd.f32 %v5337_v23, %v388_v52 }
  0x1c   : > { %4622 = vmatpush3.bf16.msra.mxu0 %v5146_v10  ;;  %4431 = vmatprep.subr.bf16.mxu1 %v5147_v11  ;;  %v573_v54 = vsel %vm552_vm0, %v497_v44, 0.0  ;;  %v575_v55 = vsel %vm563_vm1, %v499_v46, 0.0  ;;  %v5378_v56 = vpack.c.bf16 %v498_v45, %v497_v44  ;;  %v4079_v31 = vunpack.c.h.bf16 %v4185_v5  ;;  %v5157_v46 = vld [vmem:[%s6557_s3 + $0x148] sm:$0xff]  }
  0x1d   : > { %4623 = vmatprep.subr.bf16.mxu0 %v5148_v13  ;;  %v5381_v58 = vpack.c.bf16 %v498_v45, %v573_v54  ;;  %v5383_v59 = vpack.c.bf16 %v575_v55, %v575_v55  ;;  %v576_v63 = vsel %vm552_vm0, %v6570_v57, 0.0  ;;  %v578_v9 = vsel %vm563_vm1, %v502_v62, 0.0  ;;  %v5161_v62 = vld [vmem:[%s6557_s3 + $0x10] sm:$0xff]  }
  0x1e   : > { %v5411_v10 = vpack.c.bf16 %v6569_v61, %v576_v63  ;;  %v6568_v20 = vmax.f32 %v5401_v4, 0.0  ;;  %v332_v36 = vunpack.c.l.bf16 %v278_v15  ;;  %v391_v39 = vmul.f32 %v4078_v21, %v5326_v17  ;;  %v4186_v63 = vld [vmem:[%s5316_s24 + $0x48] sm:$0xff]   ;;  %v5159_v21 = vld [vmem:[%s6557_s3 + $0x150] sm:$0xff]  }
  0x1f   : > { %4432 = vmatpush3.bf16.msra.mxu1 %v5147_v11  ;;  %v690_v6 = vshrl.u32 %v5381_v58, 16  ;;  %v692_v7 = vshll.u32 %v5381_v58, 16  ;;  %v697_v8 = vshll.u32 %v5383_v59, 16  ;;  %v5413_v11 = vpack.c.bf16 %v578_v9, %v578_v9 }
  0x20   : > { %4624 = vmatpush3.bf16.msra.mxu0 %v5148_v13  ;;  %4433 = vmatprep.subr.bf16.mxu1 %v5149_v14  ;;  %v5416_v13 = vadd.f32 %v5337_v23, %v389_v1  ;;  %v702_v22 = vshrl.u32 %v5411_v10, 16  ;;  %v704_v24 = vshll.u32 %v5411_v10, 16  ;;  %v579_v29 = vsel %vm552_vm0, %v6568_v20, 0.0  ;;  %v284_v1 = vld [vmem:[%s5316_s24 + $0x50] sm:$0x1] }
  0x21   : > { %4625 = vmatprep.subr.bf16.mxu0 %v5150_v19  ;;  %v694_v16 = vrot.slane %v692_v7, 1  ;;  %v709_v25 = vshll.u32 %v5413_v11, 16  ;;  %v392_v40 = vmul.f32 %v4079_v31, %v5326_v17  ;;  %v5453_v50 = vadd.f32 %v5337_v23, %v391_v39  ;;  %v5160_v39 = vld [vmem:[%s6557_s3 + $0x158] sm:$0xff]  }
  0x22   : > { %v6567_v26 = vmax.f32 %v5416_v13, 0.0  ;;  %v333_v52 = vunpack.c.l.bf16 %v279_v32  ;;  %v335_v7 = vunpack.c.l.bf16 %v281_v41  ;;  %v6656_v18 = vmax.f32 %v5401_v4, 0.0  ;;  %v5181_v4 = vld [vmem:[%s6557_s3 + $0x98] sm:$0xff]  }
  0x23   : > { %4434 = vmatpush3.bf16.msra.mxu1 %v5149_v14  ;;  %v451_v14 = vadd.f32 %v5337_v23, %v390_v2  ;;  %v695_v27 = vor.u32 %v694_v16, %v690_v6  ;;  %v711_v34 = vrot.slane %v709_v25, 1  ;;  %v5456_v51 = vadd.f32 %v5337_v23, %v392_v40 }
  0x24   : > { %4626 = vmatpush3.bf16.msra.mxu0 %v5150_v19  ;;  %4435 = vmatprep.subr.bf16.mxu1 %v5151_v30  ;;  %v699_v19 = vrot.slane %v697_v8, 1  ;;  %v5436_v35 = vpack.c.bf16 %v6567_v26, %v579_v29  ;;  %v6566_v5 = vmax.f32 %v5453_v50, 0.0  ;;  %v5164_v29 = vld [vmem:[%s6557_s3 + $0x18] sm:$0xff]  }
  0x25   : > { %4627 = vmatprep.subr.bf16.mxu0 %v5152_v33  ;;  %v505_v28 = vmax.f32 %v451_v14, 0.0  ;;  %v6565_v6 = vmax.f32 %v5456_v51, 0.0  ;;  %v394_v14 = vmul.f32 %v5326_v17, %v333_v52 }
  0x26   : > { %v700_v37 = vsel %vm676_vm2, %v695_v27, %v699_v19  ;;  %v714_v44 = vshrl.u32 %v5436_v35, 16  ;;  %v716_v45 = vshll.u32 %v5436_v35, 16  ;;  %v582_v19 = vsel %vm552_vm0, %v6566_v5, 0.0  ;;  %v4188_v5 = vld [vmem:[%s5316_s24 + $0x78] sm:$0xff]  }
  0x27   : > { %4436 = vmatpush3.bf16.msra.mxu1 %v5151_v30  ;;  %v5158_v30 = vld [vmem:[%s6557_s3 + $0x8] sm:$0xff]   ;;  %v581_v38 = vsel %vm563_vm1, %v505_v28, 0.0  ;;  %4631 = vmatprep.mubr.bf16.mxu0 %v700_v37  ;;  %v5488_v25 = vpack.c.bf16 %v6565_v6, %v582_v19  ;;  %v5491_v27 = vadd.f32 %v5337_v23, %v394_v14 }
  0x28   : > { %4628 = vmatpush3.bf16.msra.mxu0 %v5152_v33  ;;  %4437 = vmatprep.subr.bf16.mxu1 %v5153_v48  ;;  %v706_v33 = vrot.slane %v704_v24, 1  ;;  %v5444_v43 = vpack.c.bf16 %v581_v38, %v581_v38  ;;  %v718_v54 = vrot.slane %v716_v45, 1 }
  0x29   : > { %4629 = vmatprep.subr.bf16.mxu0 %v5154_v53  ;;  %v6564_v38 = vmax.f32 %v5491_v27, 0.0 }
  0x2a   : > { %v707_v42 = vor.u32 %v706_v33, %v702_v22  ;;  %v721_v55 = vshll.u32 %v5444_v43, 16  ;;  %v719_v8 = vor.u32 %v718_v54, %v714_v44  ;;  %v4082_v22 = vunpack.c.l.bf16 %v4186_v63  ;;  %v287_v54 = vld [vmem:[%s5316_s24 + $0x5c] sm:$0x1] }
  0x2b   : > { %4438 = vmatpush3.bf16.msra.mxu1 %v5153_v48  ;;  %v393_v48 = vmul.f32 %v5326_v17, %v332_v36  ;;  %v338_v33 = vunpack.c.l.bf16 %v284_v1  ;;  %v726_v36 = vshrl.u32 %v5488_v25, 16 }
  0x2c   : > { %4630 = vmatpush3.bf16.msra.mxu0 %v5154_v53  ;;  %4471 = vmatprep.subr.bf16.mxu1 %v5155_v60  ;;  %v5459_v53 = vsel %vm676_vm2, %v707_v42, %v711_v34  ;;  %v723_v9 = vrot.slane %v721_v55, 1  ;;  %v397_v42 = vmul.f32 %v4082_v22, %v5326_v17  ;;  %v5167_v55 = vld [vmem:[%s6557_s3 + $0x20] sm:$0xff]  }
  0x2d   : > { %4663 = vmatprep.subr.bf16.mxu0 %v5396_v0  ;;  %6616 = vst [vmem:[#allocation3_spill] sm:$0xff] %v5459_v53  ;;  %v454_v2 = vadd.f32 %v5337_v23, %v393_v48  ;;  %v585_v48 = vsel %vm552_vm0, %v6564_v38, 0.0  ;;  %v399_v52 = vmul.f32 %v5326_v17, %v338_v33  ;;  %v5162_v22 = vld [vmem:[%s6557_s3 + $0x160] sm:$0xff]  }
  0x2e   : > { %4440 = vmatmul.mubr.bf16.vlgmr.msra.gmra.mrb[0].mxu1 %v700_v37  ;;  %v5484_v24 = vsel %vm676_vm2, %v719_v8, %v723_v9  ;;  %v728_v37 = vshll.u32 %v5488_v25, 16  ;;  %v4187_v33 = vld [vmem:[%s5316_s24 + $0x60] sm:$0xff]  }
  0x2f   : > { %4472 = vmatpush3.bf16.msra.mxu1 %v5155_v60  ;;  %v334_v60 = vunpack.c.h.bf16 %v279_v32  ;;  %4632 = vmatmul.mubr.bf16.vlgmr.msra.gmra.mrb[0].mxu0 %v5459_v53  ;;  %v508_v16 = vmax.f32 %v454_v2, 0.0  ;;  %6617 = vst [vmem:[#allocation4_spill] sm:$0xff] %v5484_v24  ;;  %v4083_v32 = vunpack.c.h.bf16 %v4186_v63  ;;  %v5532_v63 = vadd.f32 %v5337_v23, %v397_v42  ;;  %v285_v2 = vld [vmem:[%s5316_s24 + $0x54] sm:$0xff]   ;;  %v5645_v38 = vld [vmem:[%s6557_s3 + $0x80] sm:$0xff]  }
  0x30   : > { %4473 = vmatprep.subr.bf16.mxu1 %v5158_v30  ;;  %4443 = vmatprep.mubr.bf16.mxu1 %v5459_v53  ;;  %v730_v45 = vrot.slane %v728_v37, 1  ;;  %v460_v14 = vadd.f32 %v5337_v23, %v399_v52  ;;  %v341_v42 = vunpack.c.l.bf16 %v287_v54 }
  0x31   : > { %4664 = vmatpush3.bf16.msra.mxu0 %v5396_v0  ;;  %v395_v15 = vmul.f32 %v5326_v17, %v334_v60  ;;  %v396_v0 = vmul.f32 %v5326_v17, %v335_v7  ;;  %4635 = vmatprep.mubr.bf16.mxu0 %v5484_v24  ;;  %v398_v44 = vmul.f32 %v4083_v32, %v5326_v17  ;;  %v6562_v19 = vmax.f32 %v5532_v63, 0.0 }
  0x32   : > { %4665 = vmatprep.subr.bf16.mxu0 %v5157_v46  ;;  %6618 = vst [vmem:[#allocation5_spill] sm:$0xff] %v5532_v63  ;;  %v731_v7 = vor.u32 %v730_v45, %v726_v36  ;;  %v339_v32 = vunpack.c.l.bf16 %v285_v2  ;;  %v5169_v36 = vld [vmem:[%s6557_s3 + $0x28] sm:$0xff]   ;;  %v402_v54 = vmul.f32 %v5326_v17, %v341_v42  ;;  %v4087_v42 = vunpack.c.h.bf16 %v4187_v33 }
  0x33   : > { %4474 = vmatpush3.bf16.msra.mxu1 %v5158_v30  ;;  %v5494_v28 = vadd.f32 %v5337_v23, %v395_v15  ;;  %v584_v30 = vsel %vm563_vm1, %v508_v16, 0.0  ;;  %v457_v31 = vadd.f32 %v5337_v23, %v396_v0  ;;  %v5535_v1 = vadd.f32 %v5337_v23, %v398_v44 }
  0x34   : > { %4475 = vmatprep.subr.bf16.mxu1 %v5161_v62  ;;  %v5504_v34 = vpack.c.bf16 %v584_v30, %v584_v30 }
  0x35   : > { %4666 = vmatpush3.bf16.msra.mxu0 %v5157_v46  ;;  %v6563_v40 = vmax.f32 %v5494_v28, 0.0  ;;  %v511_v41 = vmax.f32 %v457_v31, 0.0  ;;  %6619 = vst [vmem:[#allocation6_spill] sm:$0xff] %v5535_v1  ;;  %v6561_v0 = vmax.f32 %v5535_v1, 0.0  ;;  %v514_v31 = vmax.f32 %v460_v14, 0.0  ;;  %v5163_v14 = vld [vmem:[%s6557_s3 + $0x168] sm:$0xff]  }
  0x36   : > { %4444 = vmatmul.mubr.bf16.gmra.mrb[4].mxu1 %v5484_v24  ;;  %4667 = vmatprep.subr.bf16.mxu0 %v5159_v21  ;;  %v733_v46 = vshll.u32 %v5504_v34, 16  ;;  %v303_v24 = vld [vmem:[%s5316_s24 + $0x9c] sm:$0xff]  }
  0x37   : > { %4476 = vmatpush3.bf16.msra.mxu1 %v5161_v62  ;;  %v587_v60 = vsel %vm563_vm1, %v511_v41, 0.0  ;;  %v5529_v62 = vpack.c.bf16 %v6563_v40, %v585_v48  ;;  %v340_v41 = vunpack.c.h.bf16 %v285_v2  ;;  %v590_v45 = vsel %vm563_vm1, %v514_v31, 0.0 }
  0x38   : > { %4477 = vmatprep.subr.bf16.mxu1 %v5164_v29  ;;  %v735_v8 = vrot.slane %v733_v46, 1  ;;  %v5538_v9 = vpack.c.bf16 %v587_v60, %v587_v60  ;;  %v400_v48 = vmul.f32 %v5326_v17, %v339_v32  ;;  %v5569_v60 = vpack.c.bf16 %v590_v45, %v590_v45 }
  0x39   : > { %4668 = vmatpush3.bf16.msra.mxu0 %v5159_v21  ;;  %v738_v15 = vshrl.u32 %v5529_v62, 16  ;;  %v740_v16 = vshll.u32 %v5529_v62, 16 }
  0x3a   : > { %4669 = vmatprep.subr.bf16.mxu0 %v5160_v39  ;;  %v5549_v21 = vsel %vm676_vm2, %v731_v7, %v735_v8  ;;  %v745_v30 = vshll.u32 %v5538_v9, 16  ;;  %v401_v7 = vmul.f32 %v5326_v17, %v340_v41  ;;  %v757_v31 = vshll.u32 %v5569_v60, 16 }
  0x3b   : > { %4478 = vmatpush3.bf16.msra.mxu1 %v5164_v29  ;;  %6620 = vst [vmem:[#allocation7_spill] sm:$0xff] %v5549_v21  ;;  %4636 = vmatmul.mubr.bf16.gmra.mrb[4].mxu0 %v5549_v21  ;;  %v742_v37 = vrot.slane %v740_v16, 1  ;;  %v588_v29 = vsel %vm552_vm0, %v6562_v19, 0.0  ;;  %v5580_v16 = vadd.f32 %v5337_v23, %v400_v48 }
  0x3c   : > { %4479 = vmatprep.subr.bf16.mxu1 %v5167_v55  ;;  %4447 = vmatprep.mubr.bf16.mxu1 %v5549_v21  ;;  %v747_v44 = vrot.slane %v745_v30, 1  ;;  %v5566_v46 = vpack.c.bf16 %v6561_v0, %v588_v29  ;;  %v5587_v32 = vadd.f32 %v5337_v23, %v401_v7  ;;  %v5171_v29 = vld [vmem:[%s6557_s3 + $0x30] sm:$0xff]   ;;  %v759_v45 = vrot.slane %v757_v31, 1 }
  0x3d   : > { %4670 = vmatpush3.bf16.msra.mxu0 %v5160_v39  ;;  %v743_v52 = vor.u32 %v742_v37, %v738_v15  ;;  %v290_v39 = vld [vmem:[%s5316_s24 + $0x68] sm:$0x1]  ;;  %v4086_v15 = vunpack.c.l.bf16 %v4187_v33  ;;  %v463_v37 = vadd.f32 %v5337_v23, %v402_v54  ;;  %v6574_v41 = vmax.f32 %v5580_v16, 0.0  ;;  %v5165_v54 = vld [vmem:[%s6557_s3 + $0x170] sm:$0xff]  }
  0x3e   : > { %4671 = vmatprep.subr.bf16.mxu0 %v5162_v22  ;;  %v750_v2 = vshrl.u32 %v5566_v46, 16  ;;  %v752_v8 = vshll.u32 %v5566_v46, 16  ;;  %v6572_v48 = vmax.f32 %v5587_v32, 0.0  ;;  %v291_v0 = vld [vmem:[%s5316_s24 + $0x6c] sm:$0xff]   ;;  %v1369_v21 = vrot.slane %v5538_v9, 1 }
  0x3f   : > { %4480 = vmatpush3.bf16.msra.mxu1 %v5167_v55  ;;  %v5583_v30 = vsel %vm676_vm2, %v743_v52, %v747_v44  ;;  %v344_v44 = vunpack.c.l.bf16 %v290_v39  ;;  %v517_v52 = vmax.f32 %v463_v37, 0.0  ;;  %v403_v7 = vmul.f32 %v4086_v15, %v5326_v17 }
  0x40   : > { %6621 = vst [vmem:[#allocation8_spill] sm:$0xff] %v5583_v30  ;;  %4481 = vmatprep.subr.bf16.mxu1 %v5169_v36  ;;  %4639 = vmatprep.mubr.bf16.mxu0 %v5583_v30  ;;  %v754_v55 = vrot.slane %v752_v8, 1  ;;  %v591_v33 = vsel %vm552_vm0, %v6574_v41, 0.0  ;;  %v404_v39 = vmul.f32 %v4087_v42, %v5326_v17  ;;  %v5173_v8 = vld [vmem:[%s6557_s3 + $0x38] sm:$0xff]   ;;  %v1356_v37 = vrot.slane %v5381_v58, 1 }
  0x41   : > { %4448 = vmatmul.mubr.bf16.gmra.mrb[8].mxu1 %v5583_v30  ;;  %4672 = vmatpush3.bf16.msra.mxu0 %v5162_v22  ;;  %v405_v22 = vmul.f32 %v5326_v17, %v344_v44  ;;  %v593_v15 = vsel %vm563_vm1, %v517_v52, 0.0  ;;  %v5618_v31 = vadd.f32 %v5337_v23, %v403_v7  ;;  %v345_v40 = vunpack.c.l.bf16 %v291_v0 }
  0x42   : > { %v755_v19 = vor.u32 %v754_v55, %v750_v2  ;;  %4673 = vmatprep.subr.bf16.mxu0 %v5163_v14  ;;  %v5615_v2 = vpack.c.bf16 %v6572_v48, %v591_v33  ;;  %v5624_v55 = vpack.c.bf16 %v593_v15, %v593_v15  ;;  %v5627_v42 = vadd.f32 %v5337_v23, %v404_v39  ;;  %v5166_v15 = vld [vmem:[%s6557_s3 + $0x178] sm:$0xff]  }
  0x43   : > { %4482 = vmatpush3.bf16.msra.mxu1 %v5169_v36  ;;  %v466_v44 = vadd.f32 %v5337_v23, %v405_v22  ;;  %v6571_v58 = vmax.f32 %v5618_v31, 0.0  ;;  %v346_v6 = vunpack.c.h.bf16 %v291_v0  ;;  %v1359_v48 = vrot.slane %v5411_v10, 1 }
  0x44   : > { %4483 = vmatprep.subr.bf16.mxu1 %v5171_v29  ;;  %v5622_v36 = vsel %vm676_vm2, %v755_v19, %v759_v45  ;;  %v762_v52 = vshrl.u32 %v5615_v2, 16  ;;  %v764_v7 = vshll.u32 %v5615_v2, 16  ;;  %v1357_v19 = vrot.slane %v5383_v59, 1  ;;  %v293_v45 = vld [vmem:[%s5316_s24 + $0x74] sm:$0x1] }
  0x45   : > { %6622 = vst [vmem:[#allocation9_spill] sm:$0xff] %v5622_v36  ;;  %4640 = vmatmul.mubr.bf16.gmra.mrb[8].mxu0 %v5622_v36  ;;  %4451 = vmatprep.mubr.bf16.mxu1 %v5622_v36  ;;  %v769_v33 = vshll.u32 %v5624_v55, 16  ;;  %v6573_v39 = vmax.f32 %v5627_v42, 0.0  ;;  %v520_v22 = vmax.f32 %v466_v44, 0.0 }
  0x46   : > { %4674 = vmatpush3.bf16.msra.mxu0 %v5163_v14  ;;  %v766_v59 = vrot.slane %v764_v7, 1  ;;  %v594_v14 = vsel %vm552_vm0, %v6571_v58, 0.0  ;;  %v5652_v44 = vsel %vm1352_vm3, %v1356_v37, %v1357_v19  ;;  %v347_v7 = vunpack.c.l.bf16 %v293_v45  ;;  %v296_v19 = vld [vmem:[%s5316_s24 + $0x80] sm:$0x1] }
  0x47   : > { %4484 = vmatpush3.bf16.msra.mxu1 %v5171_v29  ;;  %4675 = vmatprep.subr.bf16.mxu0 %v5165_v54  ;;  %6623 = vst [vmem:[#allocation10_spill] sm:$0xff] %v5652_v44  ;;  %v771_v29 = vrot.slane %v769_v33, 1  ;;  %v596_v26 = vsel %vm563_vm1, %v520_v22, 0.0  ;;  %v5659_v20 = vpack.c.bf16 %v6573_v39, %v594_v14  ;;  %v406_v58 = vmul.f32 %v5326_v17, %v345_v40 }
  0x48   : > { %4485 = vmatprep.subr.bf16.mxu1 %v5173_v8  ;;  %v767_v61 = vor.u32 %v766_v59, %v762_v52  ;;  %v5661_v57 = vpack.c.bf16 %v596_v26, %v596_v26  ;;  %v407_v37 = vmul.f32 %v5326_v17, %v346_v6  ;;  %v408_v22 = vmul.f32 %v5326_v17, %v347_v7 }
  0x49   : > { %v774_v0 = vshrl.u32 %v5659_v20, 16  ;;  %v776_v33 = vshll.u32 %v5659_v20, 16  ;;  %v5675_v40 = vadd.f32 %v5337_v23, %v406_v58  ;;  %v4090_v52 = vunpack.c.l.bf16 %v4188_v5 }
  0x4a   : > { %4676 = vmatpush3.bf16.msra.mxu0 %v5165_v54  ;;  %v5671_v45 = vsel %vm676_vm2, %v767_v61, %v771_v29  ;;  %v781_v26 = vshll.u32 %v5661_v57, 16  ;;  %v5678_v6 = vadd.f32 %v5337_v23, %v407_v37  ;;  %v5683_v54 = vld [vmem:[%s6557_s3 + $0x180] sm:$0xff]   ;;  %v469_v10 = vadd.f32 %v5337_v23, %v408_v22 }
  0x4b   : > { %4486 = vmatpush3.bf16.msra.mxu1 %v5173_v8  ;;  %6624 = vst [vmem:[#allocation11_spill] sm:$0xff] %v5671_v45  ;;  %4677 = vmatprep.subr.bf16.mxu0 %v5166_v15  ;;  %v778_v61 = vrot.slane %v776_v33, 1  ;;  %v1360_v8 = vrot.slane %v5413_v11, 1  ;;  %v6576_v59 = vmax.f32 %v5675_v40, 0.0  ;;  %v4091_v29 = vunpack.c.h.bf16 %v4188_v5  ;;  %v297_v33 = vld [vmem:[%s5316_s24 + $0x84] sm:$0xff]  }
  0x4c   : > { %4519 = vmatprep.subr.bf16.mxu1 %v5645_v38  ;;  %4643 = vmatprep.mubr.bf16.mxu0 %v5671_v45  ;;  %v783_v58 = vrot.slane %v781_v26, 1  ;;  %v6575_v14 = vmax.f32 %v5678_v6, 0.0  ;;  %v523_v37 = vmax.f32 %v469_v10, 0.0  ;;  %v350_v41 = vunpack.c.l.bf16 %v296_v19 }
  0x4d   : > { %4452 = vmatmul.mubr.bf16.gmra.mrb[12].mxu1 %v5671_v45  ;;  %v779_v7 = vor.u32 %v778_v61, %v774_v0  ;;  %v5693_v39 = vsel %vm1352_vm3, %v1359_v48, %v1360_v8  ;;  %v597_v11 = vsel %vm552_vm0, %v6576_v59, 0.0  ;;  %v409_v22 = vmul.f32 %v4090_v52, %v5326_v17 }
  0x4e   : > { %4678 = vmatpush3.bf16.msra.mxu0 %v5166_v15  ;;  %6625 = vst [vmem:[#allocation12_spill] sm:$0xff] %v5693_v39  ;;  %v410_v26 = vmul.f32 %v4091_v29, %v5326_v17  ;;  %v1362_v5 = vrot.slane %v5436_v35, 1  ;;  %v299_v15 = vld [vmem:[%s5316_s24 + $0x8c] sm:$0x1]  ;;  %v599_v48 = vsel %vm563_vm1, %v523_v37, 0.0  ;;  %v5712_v19 = vpack.c.bf16 %v6575_v14, %v597_v11 }
  0x4f   : > { %4711 = vmatprep.subr.bf16.mxu0 %v5683_v54  ;;  %v5706_v0 = vsel %vm676_vm2, %v779_v7, %v783_v58  ;;  %v411_v61 = vmul.f32 %v5326_v17, %v350_v41  ;;  %v5717_v10 = vpack.c.bf16 %v599_v48, %v599_v48  ;;  %v5720_v35 = vadd.f32 %v5337_v23, %v409_v22 }
  0x50   : > { %6626 = vst [vmem:[#allocation13_spill] sm:$0xff] %v5706_v0  ;;  %4644 = vmatmul.mubr.bf16.gmra.mrb[12].mxu0 %v5706_v0  ;;  %4455 = vmatprep.mubr.bf16.mxu1 %v5706_v0  ;;  %v5723_v8 = vadd.f32 %v5337_v23, %v410_v26  ;;  %v1363_v52 = vrot.slane %v5444_v43, 1  ;;  %v786_v58 = vshrl.u32 %v5712_v19, 16  ;;  %v788_v41 = vshll.u32 %v5712_v19, 16 }
  0x51   : > { %4679 = vmatprep.mubr.bf16.mxu0 %v5652_v44  ;;  %v472_v29 = vadd.f32 %v5337_v23, %v411_v61  ;;  %v351_v7 = vunpack.c.l.bf16 %v297_v33  ;;  %v793_v37 = vshll.u32 %v5717_v10, 16  ;;  %v6580_v11 = vmax.f32 %v5720_v35, 0.0 }
  0x52   : > { %v5734_v26 = vsel %vm1352_vm3, %v1362_v5, %v1363_v52  ;;  %v790_v48 = vrot.slane %v788_v41, 1  ;;  %v352_v14 = vunpack.c.h.bf16 %v297_v33  ;;  %v353_v59 = vunpack.c.l.bf16 %v299_v15  ;;  %v5170_v15 = vld [vmem:[%s6557_s3 + $0x188] sm:$0xff]  }
  0x53   : > { %6627 = vst [vmem:[#allocation14_spill] sm:$0xff] %v5734_v26  ;;  %v526_v43 = vmax.f32 %v472_v29, 0.0  ;;  %v795_v3 = vrot.slane %v793_v37, 1  ;;  %v600_v61 = vsel %vm552_vm0, %v6580_v11, 0.0  ;;  %v412_v0 = vmul.f32 %v5326_v17, %v351_v7  ;;  %v4189_v37 = vld [vmem:[%s5316_s24 + $0x90] sm:$0xff]  }
  0x54   : > { %v1365_v45 = vrot.slane %v5488_v25, 1  ;;  %v791_v22 = vor.u32 %v790_v48, %v786_v58  ;;  %v6628_v52 = vmax.f32 %v5723_v8, 0.0  ;;  %v413_v33 = vmul.f32 %v5326_v17, %v352_v14 }
  0x55   : > { %v602_v5 = vsel %vm563_vm1, %v526_v43, 0.0  ;;  %v414_v7 = vmul.f32 %v5326_v17, %v353_v59  ;;  %v5756_v25 = vadd.f32 %v5337_v23, %v412_v0  ;;  %v1366_v58 = vrot.slane %v5504_v34, 1 }
  0x56   : > { %v5746_v41 = vpack.c.bf16 %v6628_v52, %v600_v61  ;;  %v5752_v29 = vpack.c.bf16 %v602_v5, %v602_v5  ;;  %v5761_v48 = vsel %vm676_vm2, %v791_v22, %v795_v3  ;;  %v5766_v61 = vadd.f32 %v5337_v23, %v413_v33  ;;  %v302_v5 = vld [vmem:[%s5316_s24 + $0x98] sm:$0x1] }
  0x57   : > { %6629 = vst [vmem:[#allocation15_spill] sm:$0xff] %v5761_v48  ;;  %4456 = vmatmul.mubr.bf16.gmra.mrb[16].mxu1 %v5761_v48  ;;  %v475_v34 = vadd.f32 %v5337_v23, %v414_v7  ;;  %v6585_v0 = vmax.f32 %v5756_v25, 0.0  ;;  %v5775_v3 = vsel %vm1352_vm3, %v1365_v45, %v1366_v58  ;;  %v4094_v33 = vunpack.c.l.bf16 %v4189_v37 }
  0x58   : > { %v798_v43 = vshrl.u32 %v5746_v41, 16  ;;  %v800_v14 = vshll.u32 %v5746_v41, 16  ;;  %4680 = vmatmul.mubr.bf16.vlgmr.msra.gmra.mrb[0].mxu0 %v5693_v39  ;;  %v805_v59 = vshll.u32 %v5752_v29, 16  ;;  %6630 = vst [vmem:[#allocation16_spill] sm:$0xff] %v5775_v3  ;;  %v6588_v52 = vmax.f32 %v5766_v61, 0.0  ;;  %v309_v39 = vld [vmem:[%s5316_s24 + $0xb4] sm:$0xff]  }
  0x59   : > { %4712 = vmatpush3.bf16.msra.mxu0 %v5683_v54  ;;  %4683 = vmatprep.mubr.bf16.mxu0 %v5734_v26  ;;  %v4095_v11 = vunpack.c.h.bf16 %v4189_v37  ;;  %v529_v36 = vmax.f32 %v475_v34, 0.0  ;;  %v603_v7 = vsel %vm552_vm0, %v6585_v0, 0.0  ;;  %v356_v45 = vunpack.c.l.bf16 %v302_v5  ;;  %v5172_v54 = vld [vmem:[%s6557_s3 + $0x190] sm:$0xff]   ;;  %v305_v34 = vld [vmem:[%s5316_s24 + $0xa4] sm:$0x1] }
  0x5a   : > { %v802_v22 = vrot.slane %v800_v14, 1  ;;  %v807_v48 = vrot.slane %v805_v59, 1  ;;  %4713 = vmatprep.subr.bf16.mxu0 %v5170_v15  ;;  %v5789_v14 = vpack.c.bf16 %v6588_v52, %v603_v7  ;;  %v415_v37 = vmul.f32 %v4094_v33, %v5326_v17  ;;  %v4190_v52 = vld [vmem:[%s5316_s24 + $0xa8] sm:$0xff]  }
  0x5b   : > { %v416_v59 = vmul.f32 %v4095_v11, %v5326_v17  ;;  %v605_v30 = vsel %vm563_vm1, %v529_v36, 0.0  ;;  %v417_v0 = vmul.f32 %v5326_v17, %v356_v45  ;;  %v1368_v5 = vrot.slane %v5529_v62, 1 }
  0x5c   : > { %v803_v58 = vor.u32 %v802_v22, %v798_v43  ;;  %v5803_v22 = vpack.c.bf16 %v605_v30, %v605_v30  ;;  %v810_v33 = vshrl.u32 %v5789_v14, 16  ;;  %v812_v11 = vshll.u32 %v5789_v14, 16  ;;  %v5174_v30 = vld [vmem:[%s6557_s3 + $0x198] sm:$0xff]  }
  0x5d   : > { %4714 = vmatpush3.bf16.msra.mxu0 %v5170_v15  ;;  %v5809_v36 = vadd.f32 %v5337_v23, %v415_v37  ;;  %v5812_v17 = vadd.f32 %v5337_v23, %v416_v59  ;;  %v478_v62 = vadd.f32 %v5337_v23, %v417_v0  ;;  %v5816_v9 = vsel %vm1352_vm3, %v1368_v5, %v1369_v21  ;;  %v5829_v5 = vld [vmem:[%s6555_s1] ss:$0 sm:$0xff] }
  0x5e   : > { %v5801_v43 = vsel %vm676_vm2, %v803_v58, %v807_v48  ;;  %6632 = vst [vmem:[#allocation18_spill] sm:$0xff] %v5816_v9  ;;  %v814_v48 = vrot.slane %v812_v11, 1  ;;  %v817_v15 = vshll.u32 %v5803_v22, 16  ;;  %v357_v7 = vunpack.c.l.bf16 %v303_v24  ;;  %4715 = vmatprep.subr.bf16.mxu0 %v5172_v54 }
  0x5f   : > { %6631 = vst [vmem:[#allocation17_spill] sm:$0xff] %v5801_v43  ;;  %4459 = vmatprep.mubr.bf16.mxu1 %v5801_v43  ;;  %v358_v45 = vunpack.c.h.bf16 %v303_v24  ;;  %v6589_v58 = vmax.f32 %v5809_v36, 0.0  ;;  %v6590_v23 = vmax.f32 %v5812_v17, 0.0  ;;  %v532_v21 = vmax.f32 %v478_v62, 0.0 }
  0x60   : > { %4684 = vmatmul.mubr.bf16.gmra.mrb[4].mxu0 %v5775_v3  ;;  %v359_v0 = vunpack.c.l.bf16 %v305_v34  ;;  %v815_v37 = vor.u32 %v814_v48, %v810_v33  ;;  %v819_v59 = vrot.slane %v817_v15, 1  ;;  %v418_v24 = vmul.f32 %v5829_v5, %v357_v7  ;;  %v308_v15 = vld [vmem:[%s5316_s24 + $0xb0] sm:$0x1]  ;;  %v5176_v7 = vld [vmem:[%s6557_s3 + $0x1a0] sm:$0xff]  }
  0x61   : > { %4687 = vmatprep.mubr.bf16.mxu0 %v5816_v9  ;;  %v419_v11 = vmul.f32 %v5829_v5, %v358_v45  ;;  %4716 = vmatpush3.bf16.msra.mxu0 %v5172_v54  ;;  %v606_v34 = vsel %vm552_vm0, %v6589_v58, 0.0  ;;  %v608_v33 = vsel %vm563_vm1, %v532_v21, 0.0  ;;  %v1371_v48 = vrot.slane %v5566_v46, 1  ;;  %v5858_v21 = vld [vmem:[%s6556_s2] ss:$0 sm:$0xff] }
  0x62   : > { %v420_v62 = vmul.f32 %v5829_v5, %v359_v0  ;;  %4717 = vmatprep.subr.bf16.mxu0 %v5174_v30  ;;  %v5847_v54 = vsel %vm676_vm2, %v815_v37, %v819_v59  ;;  %v5851_v45 = vpack.c.bf16 %v6590_v23, %v606_v34  ;;  %v5853_v58 = vpack.c.bf16 %v608_v33, %v608_v33 }
  0x63   : > { %6633 = vst [vmem:[#allocation19_spill] sm:$0xff] %v5847_v54  ;;  %v5861_v46 = vadd.f32 %v5858_v21, %v418_v24  ;;  %4460 = vmatmul.mubr.bf16.gmra.mrb[20].mxu1 %v5847_v54  ;;  %v5865_v0 = vadd.f32 %v5858_v21, %v419_v11  ;;  %v1372_v59 = vrot.slane %v5569_v60, 1  ;;  %v4098_v34 = vunpack.c.l.bf16 %v4190_v52  ;;  %v5178_v60 = vld [vmem:[%s6557_s3 + $0x1a8] sm:$0xff]  }
  0x64   : > { %v481_v37 = vadd.f32 %v5858_v21, %v420_v62  ;;  %v822_v33 = vshrl.u32 %v5851_v45, 16  ;;  %v824_v23 = vshll.u32 %v5851_v45, 16  ;;  %v829_v43 = vshll.u32 %v5853_v58, 16 }
  0x65   : > { %v6602_v9 = vmax.f32 %v5861_v46, 0.0  ;;  %4718 = vmatpush3.bf16.msra.mxu0 %v5174_v30  ;;  %v6605_v24 = vmax.f32 %v5865_v0, 0.0  ;;  %v5875_v11 = vsel %vm1352_vm3, %v1371_v48, %v1372_v59  ;;  %v4099_v53 = vunpack.c.h.bf16 %v4190_v52 }
  0x66   : > { %v535_v54 = vmax.f32 %v481_v37, 0.0  ;;  %6634 = vst [vmem:[#allocation20_spill] sm:$0xff] %v5875_v11  ;;  %4719 = vmatprep.subr.bf16.mxu0 %v5176_v7  ;;  %v826_v62 = vrot.slane %v824_v23, 1  ;;  %v831_v3 = vrot.slane %v829_v43, 1  ;;  %v362_v26 = vunpack.c.l.bf16 %v308_v15 }
  0x67   : > { %v609_v30 = vsel %vm552_vm0, %v6602_v9, 0.0  ;;  %v421_v48 = vmul.f32 %v5829_v5, %v4098_v34  ;;  %v422_v23 = vmul.f32 %v5829_v5, %v4099_v53  ;;  %v1374_v15 = vrot.slane %v5615_v2, 1  ;;  %v5180_v53 = vld [vmem:[%s6557_s3 + $0x1b0] sm:$0xff]  }
  0x68   : > { %v611_v37 = vsel %vm563_vm1, %v535_v54, 0.0  ;;  %v5888_v52 = vpack.c.bf16 %v6605_v24, %v609_v30  ;;  %4688 = vmatmul.mubr.bf16.gmra.mrb[8].mxu0 %v5875_v11  ;;  %v827_v43 = vor.u32 %v826_v62, %v822_v33  ;;  %v423_v9 = vmul.f32 %v5829_v5, %v362_v26  ;;  %v311_v62 = vld [vmem:[%s5316_s24 + $0xbc] sm:$0x1] }
  0x69   : > { %v5893_v59 = vpack.c.bf16 %v611_v37, %v611_v37  ;;  %4720 = vmatpush3.bf16.msra.mxu0 %v5176_v7  ;;  %v5901_v24 = vadd.f32 %v5858_v21, %v421_v48  ;;  %v5904_v34 = vadd.f32 %v5858_v21, %v422_v23  ;;  %v1375_v33 = vrot.slane %v5624_v55, 1 }
  0x6a   : > { %v834_v54 = vshrl.u32 %v5888_v52, 16  ;;  %v836_v30 = vshll.u32 %v5888_v52, 16  ;;  %4721 = vmatprep.subr.bf16.mxu0 %v5178_v60  ;;  %v5910_v26 = vsel %vm676_vm2, %v827_v43, %v831_v3  ;;  %v484_v7 = vadd.f32 %v5858_v21, %v423_v9 }
  0x6b   : > { %v841_v2 = vshll.u32 %v5893_v59, 16  ;;  %4463 = vmatprep.mubr.bf16.mxu1 %v5910_v26  ;;  %v6612_v48 = vmax.f32 %v5901_v24, 0.0  ;;  %v6611_v23 = vmax.f32 %v5904_v34, 0.0  ;;  %v363_v11 = vunpack.c.l.bf16 %v309_v39 }
  0x6c   : > { %v838_v37 = vrot.slane %v836_v30, 1  ;;  %v538_v1 = vmax.f32 %v484_v7, 0.0  ;;  %v5920_v3 = vsel %vm1352_vm3, %v1374_v15, %v1375_v33  ;;  %v364_v43 = vunpack.c.h.bf16 %v309_v39 }
  0x6d   : > { %v843_v44 = vrot.slane %v841_v2, 1  ;;  %4722 = vmatpush3.bf16.msra.mxu0 %v5178_v60  ;;  %v612_v55 = vsel %vm552_vm0, %v6612_v48, 0.0  ;;  %4691 = vmatprep.mubr.bf16.mxu0 %v5920_v3  ;;  %v365_v9 = vunpack.c.l.bf16 %v311_v62  ;;  %v424_v30 = vmul.f32 %v5829_v5, %v363_v11  ;;  %v5182_v2 = vld [vmem:[%s6557_s3 + $0x1b8] sm:$0xff]  }
  0x6e   : > { %v839_v63 = vor.u32 %v838_v37, %v834_v54  ;;  %4723 = vmatprep.subr.bf16.mxu0 %v5180_v53  ;;  %v614_v39 = vsel %vm563_vm1, %v538_v1, 0.0  ;;  %v5935_v60 = vpack.c.bf16 %v6611_v23, %v612_v55  ;;  %v425_v15 = vmul.f32 %v5829_v5, %v364_v43 }
  0x6f   : > { %v1377_v54 = vrot.slane %v5659_v20, 1  ;;  %v5942_v11 = vpack.c.bf16 %v614_v39, %v614_v39  ;;  %v426_v33 = vmul.f32 %v5829_v5, %v365_v9  ;;  %v5946_v62 = vadd.f32 %v5858_v21, %v424_v30  ;;  %v5962_v30 = vld [vmem:[%s6557_s3 + $0x1c0] sm:$0xff]  }
  0x70   : > { %v5940_v7 = vsel %vm676_vm2, %v839_v63, %v843_v44  ;;  %v846_v1 = vshrl.u32 %v5935_v60, 16  ;;  %v848_v37 = vshll.u32 %v5935_v60, 16  ;;  %v5952_v43 = vadd.f32 %v5858_v21, %v425_v15 }
  0x71   : > { %6635 = vst [vmem:[#allocation21_spill] sm:$0xff] %v5940_v7  ;;  %4464 = vmatmul.mubr.bf16.gmra.mrb[24].mxu1 %v5940_v7  ;;  %v1378_v20 = vrot.slane %v5661_v57, 1  ;;  %4724 = vmatpush3.bf16.msra.mxu0 %v5180_v53  ;;  %v853_v63 = vshll.u32 %v5942_v11, 16  ;;  %v487_v44 = vadd.f32 %v5858_v21, %v426_v33  ;;  %v539_v55 = vmax.f32 %v5946_v62, 0.0 }
  0x72   : > { %v1380_v9 = vrot.slane %v5712_v19, 1  ;;  %4725 = vmatprep.subr.bf16.mxu0 %v5182_v2  ;;  %v850_v39 = vrot.slane %v848_v37, 1  ;;  %v540_v15 = vmax.f32 %v5952_v43, 0.0  ;;  %v1381_v53 = vrot.slane %v5717_v10, 1 }
  0x73   : > { %v5966_v57 = vsel %vm1352_vm3, %v1377_v54, %v1378_v20  ;;  %v855_v23 = vrot.slane %v853_v63, 1  ;;  %v541_v33 = vmax.f32 %v487_v44, 0.0  ;;  %v615_v62 = vsel %vm552_vm0, %v539_v55, 0.0 }
  0x74   : > { %4692 = vmatmul.mubr.bf16.gmra.mrb[12].mxu0 %v5966_v57  ;;  %v1383_v19 = vrot.slane %v5746_v41, 1  ;;  %v851_v48 = vor.u32 %v850_v39, %v846_v1  ;;  %v5973_v7 = vpack.c.bf16 %v540_v15, %v615_v62  ;;  %v5976_v37 = vsel %vm1352_vm3, %v1380_v9, %v1381_v53  ;;  %v4191_v9 = vld [vmem:[%s5316_s24 + $0xc0] sm:$0xff]   ;;  %v314_v39 = vld [vmem:[%s5316_s24 + $0xc8] sm:$0x1] }
  0x75   : > { %v1384_v54 = vrot.slane %v5752_v29, 1  ;;  %4726 = vmatpush3.bf16.msra.mxu0 %v5182_v2  ;;  %v617_v10 = vsel %vm563_vm1, %v541_v33, 0.0  ;;  %4695 = vmatprep.mubr.bf16.mxu0 %v5976_v37  ;;  %v1386_v43 = vrot.slane %v5789_v14, 1  ;;  %v1387_v41 = vrot.slane %v5803_v22, 1 }
  0x76   : > { %4759 = vmatprep.subr.bf16.mxu0 %v5962_v30  ;;  %v5986_v1 = vsel %vm676_vm2, %v851_v48, %v855_v23  ;;  %v5988_v20 = vpack.c.bf16 %v617_v10, %v617_v10  ;;  %v858_v29 = vshrl.u32 %v5973_v7, 16  ;;  %v860_v2 = vshll.u32 %v5973_v7, 16 }
  0x77   : > { %4467 = vmatprep.mubr.bf16.mxu1 %v5986_v1  ;;  %v5995_v14 = vsel %vm1352_vm3, %v1383_v19, %v1384_v54  ;;  %v5998_v22 = vsel %vm1352_vm3, %v1386_v43, %v1387_v41  ;;  %v1389_v53 = vrot.slane %v5851_v45, 1  ;;  %v1390_v33 = vrot.slane %v5853_v58, 1 }
  0x78   : > { %v862_v63 = vrot.slane %v860_v2, 1  ;;  %v865_v44 = vshll.u32 %v5988_v20, 16  ;;  %v1392_v19 = vrot.slane %v5888_v52, 1  ;;  %v6636_v54 = vmax.f32 %v5580_v16, 0.0 }
  0x79   : > { %v6637_v10 = vmax.f32 %v5587_v32, 0.0  ;;  %v4102_v41 = vunpack.c.l.bf16 %v4191_v9  ;;  %v1393_v45 = vrot.slane %v5893_v59, 1  ;;  %v368_v58 = vunpack.c.l.bf16 %v314_v39 }
  0x7a   : > { %v863_v48 = vor.u32 %v862_v63, %v858_v29  ;;  %v867_v23 = vrot.slane %v865_v44, 1  ;;  %v4103_v29 = vunpack.c.h.bf16 %v4191_v9  ;;  %v6638_v2 = vmax.f32 %v5618_v31, 0.0 }
  0x7b   : > { %v6014_v43 = vpack.c.bf16 %v6637_v10, %v6636_v54  ;;  %v6639_v63 = vmax.f32 %v5627_v42, 0.0  ;;  %v5230_v52 = vmov 0.0|0.0   ;;  %v427_v16 = vmul.f32 %v5829_v5, %v4102_v41 }
  0x7c   : > { %4696 = vmatmul.mubr.bf16.gmra.mrb[16].mxu0 %v5995_v14  ;;  %v6006_v62 = vsel %vm676_vm2, %v863_v48, %v867_v23  ;;  %v6640_v32 = vmax.f32 %v5675_v40, 0.0  ;;  %v6641_v48 = vmax.f32 %v5678_v6, 0.0  ;;  %v6642_v59 = vmax.f32 %v5720_v35, 0.0 }
  0x7d   : > { %4699 = vmatprep.mubr.bf16.mxu0 %v5998_v22  ;;  %4468 = vmatmul.mubr.bf16.gmra.mrb[28].mxu1 %v6006_v62  ;;  %v6022_v44 = vpack.c.bf16 %v6639_v63, %v6638_v2  ;;  %v6643_v9 = vmax.f32 %v5723_v8, 0.0  ;;  %v6644_v42 = vmax.f32 %v5756_v25, 0.0  ;;  %v6645_v39 = vmax.f32 %v5766_v61, 0.0 }
  0x7e   : > { %4487 = vmatprep.mubr.bf16.mxu1 %v5230_v52  ;;  %v6030_v23 = vpack.c.bf16 %v6641_v48, %v6640_v32  ;;  %v428_v10 = vmul.f32 %v5829_v5, %v4103_v29  ;;  %v429_v40 = vmul.f32 %v5829_v5, %v368_v58  ;;  %v6646_v6 = vmax.f32 %v5809_v36, 0.0 }
  0x7f   : > { %v6036_v31 = vpack.c.bf16 %v6643_v9, %v6642_v59  ;;  %v6042_v54 = vpack.c.bf16 %v6645_v39, %v6644_v42  ;;  %v6647_v41 = vmax.f32 %v5812_v17, 0.0  ;;  %v6648_v35 = vmax.f32 %v5861_v46, 0.0 }
  0x80   : > { %v6649_v8 = vmax.f32 %v5865_v0, 0.0  ;;  %v6059_v25 = vsel %vm1352_vm3, %v1389_v53, %v1390_v33  ;;  %v6062_v61 = vadd.f32 %v5858_v21, %v427_v16  ;;  %v6650_v5 = vmax.f32 %v5901_v24, 0.0 }
  0x81   : > { %v6050_v2 = vpack.c.bf16 %v6647_v41, %v6646_v6  ;;  %v6651_v36 = vmax.f32 %v5904_v34, 0.0  ;;  %v6070_v17 = vpack.c.bf16 %v540_v15, %v539_v55  ;;  %v6073_v46 = vsel %vm1352_vm3, %v1392_v19, %v1393_v45  ;;  %v5177_v19 = vld [vmem:[%s6557_s3 + $0x88] sm:$0xff]  }
  0x82   : > { %v6056_v63 = vpack.c.bf16 %v6649_v8, %v6648_v35  ;;  %v6076_v0 = vadd.f32 %v5858_v21, %v428_v10  ;;  %v490_v53 = vadd.f32 %v5858_v21, %v429_v40  ;;  %v6654_v24 = vmax.f32 %v5361_v47, 0.0  ;;  %v6662_v8 = vld [vmem:[#allocation5_spill] sm:$0xff] }
  0x83   : > { %v6068_v29 = vpack.c.bf16 %v6651_v36, %v6650_v5  ;;  %v6655_v34 = vmax.f32 %v5367_v49, 0.0  ;;  %v542_v15 = vmax.f32 %v6062_v61, 0.0  ;;  %v1395_v45 = vrot.slane %v5935_v60, 1  ;;  %v6664_v36 = vld [vmem:[#allocation6_spill] sm:$0xff]  ;;  %v6669_v61 = vld [vmem:[#allocation16_spill] sm:$0xff] }
  0x84   : > { %4700 = vmatmul.mubr.bf16.gmra.mrb[20].mxu0 %v6059_v25  ;;  %v544_v21 = vmax.f32 %v490_v53, 0.0  ;;  %v1396_v58 = vrot.slane %v5942_v11, 1  ;;  %v543_v47 = vmax.f32 %v6076_v0, 0.0  ;;  %v1398_v49 = vrot.slane %v5973_v7, 1  ;;  %v5179_v7 = vld [vmem:[%s6557_s3 + $0x90] sm:$0xff]   ;;  %v5199_v0 = vld [vmem:[%s6557_s3 + $0xe0] sm:$0xff]  }
  0x85   : > { %v6089_v55 = vpack.c.bf16 %v6655_v34, %v6654_v24  ;;  %4703 = vmatprep.mubr.bf16.mxu0 %v6073_v46  ;;  %4488 = vmatmul.mubr.msk.bf16.vlgmr.msra.gmra.mrb[0].mxu1 %vm6081_vm5, %v5378_v56  ;;  %v1399_v16 = vrot.slane %v5988_v20, 1  ;;  %v618_v32 = vsel %vm552_vm0, %v542_v15, 0.0  ;;  %v6658_v42 = vmax.f32 %v5453_v50, 0.0  ;;  %v5183_v50 = vld [vmem:[%s6557_s3 + $0xa0] sm:$0xff]   ;;  %v5185_v34 = vld [vmem:[%s6557_s3 + $0xa8] sm:$0xff]  }
  0x86   : > { %v620_v60 = vsel %vm563_vm1, %v544_v21, 0.0  ;;  %4520 = vmatpush3.bf16.msra.mxu1 %v5645_v38  ;;  %v6119_v11 = vsel %vm1352_vm3, %v1395_v45, %v1396_v58  ;;  %v656_v20 = vpack.c.bf16 %v543_v47, %v618_v32  ;;  %v6657_v38 = vmax.f32 %v5416_v13, 0.0  ;;  %v5187_v21 = vld [vmem:[%s6557_s3 + $0xb0] sm:$0xff]   ;;  %v5189_v32 = vld [vmem:[%s6557_s3 + $0xb8] sm:$0xff]  }
  0x87   : > { %4491 = vmatprep.mubr.msk.bf16.mxu1 %vm6081_vm5, %v6089_v55  ;;  %4521 = vmatprep.subr.bf16.mxu1 %v5177_v19  ;;  %v657_v48 = vpack.c.bf16 %v620_v60, %v620_v60  ;;  %v6130_v9 = vsel %vm1352_vm3, %v1398_v49, %v1399_v16  ;;  %v6659_v39 = vmax.f32 %v5456_v51, 0.0  ;;  %v6660_v6 = vmax.f32 %v5491_v27, 0.0  ;;  %v5186_v49 = vld [vmem:[%s6557_s3 + $0x1c8] sm:$0xff]  }
  0x88   : > { %v6127_v59 = vpack.c.bf16 %v6657_v38, %v6656_v18  ;;  %v2206_v13 = vrot.slane %v656_v20, 1  ;;  %v6661_v41 = vmax.f32 %v5494_v28, 0.0  ;;  %v6663_v5 = vmax.f32 %v6662_v8, 0.0  ;;  %v5194_v18 = vld [vmem:[%s6557_s3 + $0x1e8] sm:$0xff]   ;;  %v5196_v38 = vld [vmem:[%s6557_s3 + $0x1f0] sm:$0xff]   ;;  %v5197_v8 = vld [vmem:[%s6557_s3 + $0xd8] sm:$0xff]  }
  0x89   : > { %v6136_v10 = vpack.c.bf16 %v6659_v39, %v6658_v42  ;;  %v2207_v40 = vrot.slane %v657_v48, 1  ;;  %v6665_v53 = vmax.f32 %v6664_v36, 0.0  ;;  %v1936_v27 = vshll.u32 %v656_v20, 16  ;;  %v5198_v42 = vld [vmem:[%s6557_s3 + $0x1f8] sm:$0xff]   ;;  %v5200_v39 = vld [vmem:[%s6557_s3 + $0x200] sm:$0xff]  }
  0x8a   : > { %4522 = vmatpush3.bf16.msra.mxu1 %v5177_v19  ;;  %v6159_v35 = vpack.c.bf16 %v6661_v41, %v6660_v6  ;;  %v1934_v28 = vshrl.u32 %v656_v20, 16  ;;  %v1941_v19 = vshll.u32 %v657_v48, 16  ;;  %v5190_v20 = vld [vmem:[%s6557_s3 + $0x1d8] sm:$0xff]   ;;  %v5192_v48 = vld [vmem:[%s6557_s3 + $0x1e0] sm:$0xff]   ;;  %v5195_v6 = vld [vmem:[%s6557_s3 + $0xd0] sm:$0xff]   ;;  %v6296_v41 = vpack.c.bf16 %v543_v47, %v542_v15 }
  0x8b   : > { %4523 = vmatprep.subr.bf16.mxu1 %v5179_v7  ;;  %v6153_v51 = vsel %vm1352_vm3, %v2206_v13, %v2207_v40  ;;  %v6165_v24 = vpack.c.bf16 %v6665_v53, %v6663_v5  ;;  %v1938_v45 = vrot.slane %v1936_v27, 1  ;;  %v5193_v13 = vld [vmem:[%s6557_s3 + $0xc8] sm:$0xff]   ;;  %v6666_v40 = vld [vmem:[#allocation10_spill] sm:$0xff]  ;;  %v6672_v53 = vld [vmem:[#allocation20_spill] sm:$0xff] }
  0x8c   : > { %4704 = vmatmul.mubr.bf16.gmra.mrb[24].mxu0 %v6119_v11  ;;  %v1943_v58 = vrot.slane %v1941_v19, 1  ;;  %v6668_v5 = vld [vmem:[#allocation14_spill] sm:$0xff]  ;;  %v5201_v15 = vld [vmem:[%s6557_s3 + $0xe8] sm:$0xff]   ;;  %v6673_v27 = vld [vmem:[#allocation4_spill] sm:$0xff] }
  0x8d   : > { %4707 = vmatprep.mubr.bf16.mxu0 %v6130_v9  ;;  %4492 = vmatmul.mubr.msk.bf16.gmra.mrb[4].mxu1 %vm6081_vm5, %v6127_v59  ;;  %v1939_v16 = vor.u32 %v1938_v45, %v1934_v28  ;;  %v6670_v47 = vld [vmem:[#allocation3_spill] sm:$0xff]  ;;  %v6671_v36 = vld [vmem:[#allocation18_spill] sm:$0xff]  ;;  %v5205_v28 = vld [vmem:[%s6557_s3 + $0xf8] sm:$0xff]  }
  0x8e   : > { %4495 = vmatprep.mubr.msk.bf16.mxu1 %vm6081_vm5, %v6136_v10  ;;  %4524 = vmatpush3.bf16.msra.mxu1 %v5179_v7  ;;  %v5188_v7 = vld [vmem:[%s6557_s3 + $0x1d0] sm:$0xff]   ;;  %v6674_v19 = vld [vmem:[#allocation7_spill] sm:$0xff]  ;;  %v5206_v45 = vld [vmem:[%s6557_s3 + $0x218] sm:$0xff]  }
  0x8f   : > { %4525 = vmatprep.subr.bf16.mxu1 %v5181_v4  ;;  %v6193_v60 = vsel %vm676_vm2, %v1939_v16, %v1943_v58  ;;  %v6675_v58 = vld [vmem:[#allocation8_spill] sm:$0xff]  ;;  %v6676_v16 = vld [vmem:[#allocation9_spill] sm:$0xff] }
  0x92   : > { %4526 = vmatpush3.bf16.msra.mxu1 %v5181_v4  ;;  %v6266_v4 = vrot.slane %v5230_v52, 1 }
  0x93   : > { %4527 = vmatprep.subr.bf16.mxu1 %v5183_v50 }
  0x94   : > { %4708 = vmatmul.mubr.bf16.gmra.mrb[28].mxu0 %v6153_v51 }
  0x95   : > { %4727 = vmatprep.mubr.msk.bf16.mxu0 %vm6081_vm5, %v6089_v55  ;;  %4496 = vmatmul.mubr.msk.bf16.gmra.mrb[8].mxu1 %vm6081_vm5, %v6159_v35 }
  0x96   : > { %4499 = vmatprep.mubr.msk.bf16.mxu1 %vm6081_vm5, %v6165_v24  ;;  %4528 = vmatpush3.bf16.msra.mxu1 %v5183_v50  ;;  %v6667_v50 = vld [vmem:[#allocation12_spill] sm:$0xff] }
  0x97   : > { %4529 = vmatprep.subr.bf16.mxu1 %v5185_v34 }
  0x9a   : > { %4530 = vmatpush3.bf16.msra.mxu1 %v5185_v34  ;;  %v5203_v34 = vld [vmem:[%s6557_s3 + $0xf0] sm:$0xff]  }
  0x9b   : > { %4531 = vmatprep.subr.bf16.mxu1 %v5187_v21 }
  0x9c   : > { %4728 = vmatmul.mubr.msk.bf16.vlgmr.msra.gmra.mrb[0].mxu0 %vm6081_vm5, %v6127_v59 }
  0x9d   : > { %4760 = vmatpush3.bf16.msra.mxu0 %v5962_v30  ;;  %4731 = vmatprep.mubr.msk.bf16.mxu0 %vm6081_vm5, %v6136_v10  ;;  %v5191_v30 = vld [vmem:[%s6557_s3 + $0xc0] sm:$0xff]  }
  0x9e   : > { %4500 = vmatmul.mubr.msk.bf16.gmra.mrb[12].mxu1 %vm6081_vm5, %v6014_v43  ;;  %4761 = vmatprep.subr.bf16.mxu0 %v5186_v49 }
  0x9f   : > { %4503 = vmatprep.mubr.msk.bf16.mxu1 %vm6081_vm5, %v6022_v44  ;;  %4532 = vmatpush3.bf16.msra.mxu1 %v5187_v21  ;;  %v5204_v21 = vld [vmem:[%s6557_s3 + $0x210] sm:$0xff]  }
  0xa0   : > { %4533 = vmatprep.subr.bf16.mxu1 %v5189_v32 }
  0xa1   : > { %4762 = vmatpush3.bf16.msra.mxu0 %v5186_v49  ;;  %v5213_v49 = vld [vmem:[%s6557_s3 + $0x100] sm:$0xff]  }
  0xa2   : > { %4763 = vmatprep.subr.bf16.mxu0 %v5188_v7 }
  0xa3   : > { %4534 = vmatpush3.bf16.msra.mxu1 %v5189_v32  ;;  %v5207_v32 = vld [vmem:[%s6557_s3 + $0x220] sm:$0xff]  }
  0xa4   : > { %4732 = vmatmul.mubr.msk.bf16.gmra.mrb[4].mxu0 %vm6081_vm5, %v6159_v35  ;;  %4567 = vmatprep.subr.bf16.mxu1 %v5191_v30 }
  0xa5   : > { %4735 = vmatprep.mubr.msk.bf16.mxu0 %vm6081_vm5, %v6165_v24  ;;  %4764 = vmatpush3.bf16.msra.mxu0 %v5188_v7  ;;  %v5208_v7 = vld [vmem:[%s6557_s3 + $0x228] sm:$0xff]  }
  0xa6   : > { %4504 = vmatmul.mubr.msk.bf16.gmra.mrb[16].mxu1 %vm6081_vm5, %v6030_v23  ;;  %4765 = vmatprep.subr.bf16.mxu0 %v5190_v20 }
  0xa7   : > { %4507 = vmatprep.mubr.msk.bf16.mxu1 %vm6081_vm5, %v6036_v31 }
  0xa9   : > { %4766 = vmatpush3.bf16.msra.mxu0 %v5190_v20  ;;  %v6678_v20 = vld [vmem:[#allocation13_spill] sm:$0xff] }
  0xaa   : > { %4767 = vmatprep.subr.bf16.mxu0 %v5192_v48 }
  0xac   : > { %4736 = vmatmul.mubr.msk.bf16.gmra.mrb[8].mxu0 %vm6081_vm5, %v6014_v43 }
  0xad   : > { %4739 = vmatprep.mubr.msk.bf16.mxu0 %vm6081_vm5, %v6022_v44  ;;  %4768 = vmatpush3.bf16.msra.mxu0 %v5192_v48  ;;  %v5209_v48 = vld [vmem:[%s6557_s3 + $0x230] sm:$0xff]  }
  0xae   : > { %4508 = vmatmul.mubr.msk.bf16.gmra.mrb[20].mxu1 %vm6081_vm5, %v6042_v54  ;;  %4769 = vmatprep.subr.bf16.mxu0 %v5194_v18 }
  0xaf   : > { %4511 = vmatprep.mubr.msk.bf16.mxu1 %vm6081_vm5, %v6050_v2 }
  0xb1   : > { %4770 = vmatpush3.bf16.msra.mxu0 %v5194_v18  ;;  %v5210_v18 = vld [vmem:[%s6557_s3 + $0x238] sm:$0xff]  }
  0xb2   : > { %4771 = vmatprep.subr.bf16.mxu0 %v5196_v38 }
  0xb4   : > { %4740 = vmatmul.mubr.msk.bf16.gmra.mrb[12].mxu0 %vm6081_vm5, %v6030_v23 }
  0xb5   : > { %4743 = vmatprep.mubr.msk.bf16.mxu0 %vm6081_vm5, %v6036_v31  ;;  %4772 = vmatpush3.bf16.msra.mxu0 %v5196_v38  ;;  %v6679_v38 = vld [vmem:[#allocation15_spill] sm:$0xff] }
  0xb6   : > { %4512 = vmatmul.mubr.msk.bf16.gmra.mrb[24].mxu1 %vm6081_vm5, %v6056_v63  ;;  %4773 = vmatprep.subr.bf16.mxu0 %v5198_v42 }
  0xb7   : > { %4515 = vmatprep.mubr.msk.bf16.mxu1 %vm6081_vm5, %v6068_v29 }
  0xb9   : > { %4774 = vmatpush3.bf16.msra.mxu0 %v5198_v42  ;;  %v6680_v42 = vld [vmem:[#allocation17_spill] sm:$0xff] }
  0xba   : > { %4807 = vmatprep.subr.bf16.mxu0 %v5200_v39 }
  0xbc   : > { %4744 = vmatmul.mubr.msk.bf16.gmra.mrb[16].mxu0 %vm6081_vm5, %v6042_v54 }
  0xbd   : > { %4747 = vmatprep.mubr.msk.bf16.mxu0 %vm6081_vm5, %v6050_v2 }
  0xbe   : > { %4516 = vmatmul.mubr.msk.bf16.gmra.mrb[28].mxu1 %vm6081_vm5, %v6070_v17 }
  0xbf   : > { %4535 = vmatprep.mubr.bf16.mxu1 %v6266_v4 }
  0xc4   : > { %4748 = vmatmul.mubr.msk.bf16.gmra.mrb[20].mxu0 %vm6081_vm5, %v6056_v63 }
  0xc5   : > { %4751 = vmatprep.mubr.msk.bf16.mxu0 %vm6081_vm5, %v6068_v29 }
  0xc6   : > { %4536 = vmatmul.mubr.bf16.vlgmr.msra.gmra.mrb[0].mxu1 %v6666_v40  ;;  %v5214_v40 = vld [vmem:[%s6557_s3 + $0x108] sm:$0xff]  }
  0xc7   : > { %4568 = vmatpush3.bf16.msra.mxu1 %v5191_v30  ;;  %4539 = vmatprep.mubr.bf16.mxu1 %v6667_v50  ;;  %v6677_v30 = vld [vmem:[#allocation11_spill] sm:$0xff] }
  0xc8   : > { %4569 = vmatprep.subr.bf16.mxu1 %v5193_v13 }
  0xcb   : > { %4570 = vmatpush3.bf16.msra.mxu1 %v5193_v13  ;;  %v6682_v13 = vld [vmem:[#allocation21_spill] sm:$0xff] }
  0xcc   : > { %4571 = vmatprep.subr.bf16.mxu1 %v5195_v6  ;;  %4752 = vmatmul.mubr.msk.bf16.gmra.mrb[24].mxu0 %vm6081_vm5, %v6070_v17 }
  0xcd   : > { %4755 = vmatprep.mubr.msk.bf16.mxu0 %vm6081_vm5, %v6296_v41 }
  0xce   : > { %4540 = vmatmul.mubr.bf16.gmra.mrb[4].mxu1 %v6668_v5 }
  0xcf   : > { %4543 = vmatprep.mubr.bf16.mxu1 %v6669_v61  ;;  %4572 = vmatpush3.bf16.msra.mxu1 %v5195_v6  ;;  %v5217_v6 = vld [vmem:[%s6557_s3 + $0x120] sm:$0xff]  }
  0xd0   : > { %4573 = vmatprep.subr.bf16.mxu1 %v5197_v8 }
  0xd3   : > { %4574 = vmatpush3.bf16.msra.mxu1 %v5197_v8 }
  0xd4   : > { %4756 = vmatmul.mubr.bf16.gmra.mrb[28].mxu0 %v5230_v52  ;;  %4575 = vmatprep.subr.bf16.mxu1 %v5199_v0  ;;  %v5202_v52 = vld [vmem:[%s6557_s3 + $0x208] sm:$0xff]  }
  0xd5   : > { %4775 = vmatprep.mubr.bf16.mxu0 %v6670_v47 }
  0xd6   : > { %4544 = vmatmul.mubr.bf16.gmra.mrb[8].mxu1 %v6671_v36 }
  0xd7   : > { %4547 = vmatprep.mubr.bf16.mxu1 %v6672_v53  ;;  %4576 = vmatpush3.bf16.msra.mxu1 %v5199_v0 }
  0xd8   : > { %4577 = vmatprep.subr.bf16.mxu1 %v5201_v15 }
  0xdb   : > { %4578 = vmatpush3.bf16.msra.mxu1 %v5201_v15 }
  0xdc   : > { %4776 = vmatmul.mubr.bf16.vlgmr.msra.gmra.mrb[0].mxu0 %v6673_v27  ;;  %4579 = vmatprep.subr.bf16.mxu1 %v5203_v34 }
  0xdd   : > { %4808 = vmatpush3.bf16.msra.mxu0 %v5200_v39  ;;  %4779 = vmatprep.mubr.bf16.mxu0 %v6674_v19  ;;  %v6681_v39 = vld [vmem:[#allocation19_spill] sm:$0xff] }
  0xde   : > { %4548 = vmatmul.mubr.bf16.gmra.mrb[12].mxu1 %v5920_v3  ;;  %4809 = vmatprep.subr.bf16.mxu0 %v5202_v52 }
  0xdf   : > { %4551 = vmatprep.mubr.bf16.mxu1 %v5966_v57  ;;  %4580 = vmatpush3.bf16.msra.mxu1 %v5203_v34 }
  0xe0   : > { %4581 = vmatprep.subr.bf16.mxu1 %v5205_v28 }
  0xe1   : > { %4810 = vmatpush3.bf16.msra.mxu0 %v5202_v52 }
  0xe2   : > { %4811 = vmatprep.subr.bf16.mxu0 %v5204_v21 }
  0xe3   : > { %4582 = vmatpush3.bf16.msra.mxu1 %v5205_v28 }
  0xe4   : > { %4780 = vmatmul.mubr.bf16.gmra.mrb[4].mxu0 %v6675_v58  ;;  %4855 = vmatprep.subr.bf16.mxu1 %v5213_v49 }
  0xe5   : > { %4783 = vmatprep.mubr.bf16.mxu0 %v6676_v16  ;;  %4812 = vmatpush3.bf16.msra.mxu0 %v5204_v21 }
  0xe6   : > { %4552 = vmatmul.mubr.bf16.gmra.mrb[16].mxu1 %v5976_v37  ;;  %4813 = vmatprep.subr.bf16.mxu0 %v5206_v45 }
  0xe7   : > { %4555 = vmatprep.mubr.bf16.mxu1 %v5995_v14 }
  0xe9   : > { %4814 = vmatpush3.bf16.msra.mxu0 %v5206_v45 }
  0xea   : > { %4815 = vmatprep.subr.bf16.mxu0 %v5207_v32 }
  0xec   : > { %4784 = vmatmul.mubr.bf16.gmra.mrb[8].mxu0 %v6677_v30 }
  0xed   : > { %4787 = vmatprep.mubr.bf16.mxu0 %v6678_v20  ;;  %4816 = vmatpush3.bf16.msra.mxu0 %v5207_v32 }
  0xee   : > { %4556 = vmatmul.mubr.bf16.gmra.mrb[20].mxu1 %v5998_v22  ;;  %4817 = vmatprep.subr.bf16.mxu0 %v5208_v7 }
  0xef   : > { %4559 = vmatprep.mubr.bf16.mxu1 %v6059_v25 }
  0xf1   : > { %4818 = vmatpush3.bf16.msra.mxu0 %v5208_v7 }
  0xf2   : > { %4819 = vmatprep.subr.bf16.mxu0 %v5209_v48 }
  0xf4   : > { %4788 = vmatmul.mubr.bf16.gmra.mrb[12].mxu0 %v6679_v38 }
  0xf5   : > { %4791 = vmatprep.mubr.bf16.mxu0 %v6680_v42  ;;  %4820 = vmatpush3.bf16.msra.mxu0 %v5209_v48 }
  0xf6   : > { %4560 = vmatmul.mubr.bf16.gmra.mrb[24].mxu1 %v6073_v46  ;;  %4821 = vmatprep.subr.bf16.mxu0 %v5210_v18 }
  0xf7   : > { %4563 = vmatprep.mubr.bf16.mxu1 %v6119_v11 }
  0xf9   : > { %4822 = vmatpush3.bf16.msra.mxu0 %v5210_v18 }
  0xfc   : > { %4792 = vmatmul.mubr.bf16.gmra.mrb[16].mxu0 %v6681_v39 }
  0xfd   : > { %4795 = vmatprep.mubr.bf16.mxu0 %v5910_v26 }
  0xfe   : > { %4564 = vmatmul.mubr.bf16.gmra.mrb[28].mxu1 %v6130_v9 }
  0xff   : > { %4583 = vmatprep.mubr.msk.bf16.mxu1 %vm6081_vm5, %v5378_v56  ;;  %v5215_v56 = vld [vmem:[%s6557_s3 + $0x110] sm:$0xff]  }
 0x104   : > { %4796 = vmatmul.mubr.bf16.gmra.mrb[20].mxu0 %v6682_v13 }
 0x105   : > { %4799 = vmatprep.mubr.bf16.mxu0 %v5986_v1 }
 0x106   : > { %4584 = vmatmul.mubr.msk.bf16.vlgmr.msra.gmra.mrb[0].mxu1 %vm6081_vm5, %v6089_v55  ;;  %v5216_v55 = vld [vmem:[%s6557_s3 + $0x118] sm:$0xff]  }
 0x107   : > { %4863 = vmatpush3.bf16.msra.mxu1 %v5213_v49  ;;  %4587 = vmatprep.mubr.msk.bf16.mxu1 %vm6081_vm5, %v6127_v59  ;;  %v6683_v59 = vld [vmem:[#allocation2_spill] sm:$0xff] }
 0x108   : > { %4856 = vmatprep.subr.bf16.mxu1 %v5214_v40 }
 0x10b   : > { %4864 = vmatpush3.bf16.msra.mxu1 %v5214_v40 }
 0x10c   : > { %4857 = vmatprep.subr.bf16.mxu1 %v5215_v56  ;;  %4800 = vmatmul.mubr.bf16.gmra.mrb[24].mxu0 %v6006_v62 }
 0x10d   : > { %4803 = vmatprep.mubr.bf16.mxu0 %v6193_v60 }
 0x10e   : > { %4588 = vmatmul.mubr.msk.bf16.gmra.mrb[4].mxu1 %vm6081_vm5, %v6136_v10  ;;  %v5218_v10 = vld [vmem:[%s6557_s3 + $0x128] sm:$0xff]  }
 0x10f   : > { %4591 = vmatprep.mubr.msk.bf16.mxu1 %vm6081_vm5, %v6159_v35  ;;  %4865 = vmatpush3.bf16.msra.mxu1 %v5215_v56  ;;  %v5219_v35 = vld [vmem:[%s6557_s3 + $0x130] sm:$0xff]  }
 0x110   : > { %4858 = vmatprep.subr.bf16.mxu1 %v5216_v55 }
 0x113   : > { %4866 = vmatpush3.bf16.msra.mxu1 %v5216_v55 }
 0x114   : > { %4804 = vmatmul.mubr.bf16.gmra.mrb[28].mxu0 %v6683_v59  ;;  %4859 = vmatprep.subr.bf16.mxu1 %v5217_v6 }
 0x115   : > { %4823 = vmatprep.mubr.bf16.mxu0 %v6667_v50 }
 0x116   : > { %4592 = vmatmul.mubr.msk.bf16.gmra.mrb[8].mxu1 %vm6081_vm5, %v6165_v24 }
 0x117   : > { %4595 = vmatprep.mubr.msk.bf16.mxu1 %vm6081_vm5, %v6014_v43  ;;  %4867 = vmatpush3.bf16.msra.mxu1 %v5217_v6  ;;  %v5220_v43 = vld [vmem:[%s6557_s3 + $0x138] sm:$0xff]  }
 0x118   : > { %4860 = vmatprep.subr.bf16.mxu1 %v5218_v10 }
 0x11b   : > { %4868 = vmatpush3.bf16.msra.mxu1 %v5218_v10 }
 0x11c   : > { %4824 = vmatmul.mubr.bf16.vlgmr.msra.gmra.mrb[0].mxu0 %v6668_v5  ;;  %4861 = vmatprep.subr.bf16.mxu1 %v5219_v35 }
 0x11d   : > { %4827 = vmatprep.mubr.bf16.mxu0 %v6669_v61 }
 0x11e   : > { %4596 = vmatmul.mubr.msk.bf16.gmra.mrb[12].mxu1 %vm6081_vm5, %v6022_v44 }
 0x11f   : > { %4599 = vmatprep.mubr.msk.bf16.mxu1 %vm6081_vm5, %v6030_v23  ;;  %4869 = vmatpush3.bf16.msra.mxu1 %v5219_v35 }
 0x120   : > { %4862 = vmatprep.subr.bf16.mxu1 %v5220_v43 }
 0x123   : > { %4870 = vmatpush3.bf16.msra.mxu1 %v5220_v43 }
 0x124   : > { %4828 = vmatmul.mubr.bf16.gmra.mrb[4].mxu0 %v6671_v36 }
 0x125   : > { %4831 = vmatprep.mubr.bf16.mxu0 %v6672_v53 }
 0x126   : > { %4600 = vmatmul.mubr.msk.bf16.gmra.mrb[16].mxu1 %vm6081_vm5, %v6036_v31 }
 0x127   : > { %4603 = vmatprep.mubr.msk.bf16.mxu1 %vm6081_vm5, %v6042_v54 }
 0x12c   : > { %4832 = vmatmul.mubr.bf16.gmra.mrb[8].mxu0 %v5920_v3 }
 0x12d   : > { %4835 = vmatprep.mubr.bf16.mxu0 %v5966_v57 }
 0x12e   : > { %4604 = vmatmul.mubr.msk.bf16.gmra.mrb[20].mxu1 %vm6081_vm5, %v6050_v2 }
 0x12f   : > { %4607 = vmatprep.mubr.msk.bf16.mxu1 %vm6081_vm5, %v6056_v63 }
 0x134   : > { %4836 = vmatmul.mubr.bf16.gmra.mrb[12].mxu0 %v5976_v37 }
 0x135   : > { %4839 = vmatprep.mubr.bf16.mxu0 %v5995_v14 }
 0x136   : > { %4608 = vmatmul.mubr.msk.bf16.gmra.mrb[24].mxu1 %vm6081_vm5, %v6068_v29 }
 0x137   : > { %4611 = vmatprep.mubr.msk.bf16.mxu1 %vm6081_vm5, %v6070_v17 }
 0x13c   : > { %4840 = vmatmul.mubr.bf16.gmra.mrb[16].mxu0 %v5998_v22 }
 0x13d   : > { %4843 = vmatprep.mubr.bf16.mxu0 %v6059_v25  ;;  %v6475_v25 = vld [vmem:[%s6558_s4] ss:$0 sm:$0xff] }
 0x13e   : > { %4612 = vmatmul.mubr.msk.bf16.gmra.mrb[28].mxu1 %vm6081_vm5, %v6296_v41 }
 0x13f   : > { %4647 = vmatprep.mubr.bf16.mxu1 %v6679_v38 }
 0x144   : > { %4844 = vmatmul.mubr.bf16.gmra.mrb[20].mxu0 %v6073_v46 }
 0x145   : > { %4847 = vmatprep.mubr.bf16.mxu0 %v6119_v11 }
 0x146   : > { %4648 = vmatmul.mubr.bf16.vlgmr.msra.gmra.mrb[16].mxu1 %v6680_v42 }
 0x147   : > { %4651 = vmatprep.mubr.bf16.mxu1 %v6681_v39 }
 0x14c   : > { %4848 = vmatmul.mubr.bf16.gmra.mrb[24].mxu0 %v6130_v9 }
 0x14d   : > { %4851 = vmatprep.mubr.bf16.mxu0 %v6153_v51 }
 0x14e   : > { %4652 = vmatmul.mubr.bf16.gmra.mrb[20].mxu1 %v5910_v26 }
 0x14f   : > { %4655 = vmatprep.mubr.bf16.mxu1 %v6682_v13 }
 0x154   : > { %4852 = vmatmul.mubr.bf16.gmra.mrb[28].mxu0 %v6266_v4 }
 0x156   : > { %4656 = vmatmul.mubr.bf16.gmra.mrb[24].mxu1 %v5986_v1 }
 0x157   : > { %4659 = vmatprep.mubr.bf16.mxu1 %v6006_v62 }
 0x15e   : > { %4660 = vmatmul.mubr.bf16.gmra.mrb[28].mxu1 %v6193_v60 }
 0x1d9   : > { %v4585_v3 = vpop.f32.mrb[0].mxu1 }
 0x1da   : > { %v1774_v57 = vpop.f32.mrb[1].mxu1 }
 0x1db   : > { %v4586_v37 = vpop.f32.mrb[2].mxu1 }
 0x1dc   : > { %v1777_v14 = vpop.f32.mrb[3].mxu1 }
 0x1e1   : > { %v4589_v22 = vpop.f32.mrb[4].mxu1 }
 0x1e2   : > { %v1790_v44 = vpop.f32.mrb[5].mxu1 }
 0x1e3   : > { %v4590_v23 = vpop.f32.mrb[6].mxu1 }
 0x1e4   : > { %v1793_v31 = vpop.f32.mrb[7].mxu1 }
 0x1e9   : > { %v4593_v26 = vpop.f32.mrb[8].mxu1 }
 0x1ea   : > { %v6466_v54 = vpop.f32.mrb[9].mxu1 }
 0x1eb   : > { %v6468_v2 = vpop.f32.mrb[10].mxu1 }
 0x1ec   : > { %v6470_v63 = vpop.f32.mrb[11].mxu1 }
 0x1ef   : > { %v4825_v1 = vpop.f32.mrb[0].mxu0 }
 0x1f0   : > { %v4871_v62 = vadd.f32 %v4825_v1, %v4585_v3  ;;  %v3102_v29 = vpop.f32.mrb[1].mxu0 }
 0x1f1   : > { %v6477_v17 = vpop.f32.mrb[12].mxu1  ;;  %v4872_v46 = vadd.f32 %v3102_v29, %v1774_v57  ;;  %v4826_v33 = vpop.f32.mrb[2].mxu0 }
 0x1f2   : > { %v6479_v11 = vpop.f32.mrb[13].mxu1  ;;  %v4873_v9 = vadd.f32 %v4826_v33, %v4586_v37  ;;  %v3105_v51 = vpop.f32.mrb[3].mxu0  ;;  %v3270_v41 = vadd.f32 %v4871_v62, %v6475_v25 }
 0x1f3   : > { %v6482_v24 = vpop.f32.mrb[14].mxu1  ;;  %v3268_v60 = vadd.f32 %v4872_v46, %v6475_v25  ;;  %v4874_v4 = vadd.f32 %v3105_v51, %v1777_v14 }
 0x1f4   : > { %v6485_v50 = vpop.f32.mrb[15].mxu1  ;;  %v3271_v8 = vadd.f32 %v4873_v9, %v6475_v25  ;;  %v3339_v27 = vmul.f32 %v3270_v41, %v3270_v41 }
 0x1f5   : > { %v3269_v5 = vadd.f32 %v4874_v4, %v6475_v25  ;;  %v3337_v0 = vmul.f32 %v3268_v60, %v3268_v60 }
 0x1f6   : > { %v4112_v61 = vpack.c.bf16 %v3271_v8, %v3270_v41  ;;  %v3340_v58 = vmul.f32 %v3271_v8, %v3271_v8 }
 0x1f7   : > { %v3300_v15 = vadd.f32 %v3269_v5, %v3268_v60  ;;  %v3338_v47 = vmul.f32 %v3269_v5, %v3269_v5  ;;  %v4107_v36 = vpack.c.bf16 %v3269_v5, %v3268_v60  ;;  %v4829_v53 = vpop.f32.mrb[4].mxu0 }
 0x1f8   : > { %4192 = vst [vmem:[%s6492_s27 + $0x8] sm:$0xff] %v4112_v61   ;;  %v4875_v34 = vadd.f32 %v4829_v53, %v4589_v22  ;;  %v3118_v52 = vpop.f32.mrb[5].mxu0 }
 0x1f9   : > { %v3301_v28 = vadd.f32 %v3300_v15, %v3270_v41  ;;  %v3369_v19 = vadd.f32 %v3338_v47, %v3337_v0  ;;  %4108 = vst [vmem:[%s6492_s27] sm:$0xff] %v4107_v36   ;;  %v4876_v21 = vadd.f32 %v3118_v52, %v1790_v44  ;;  %v4830_v45 = vpop.f32.mrb[6].mxu0 }
 0x1fa   : > { %v4877_v49 = vadd.f32 %v4830_v45, %v4590_v23  ;;  %v3121_v16 = vpop.f32.mrb[7].mxu0  ;;  %v3274_v48 = vadd.f32 %v4875_v34, %v6475_v25 }
 0x1fb   : > { %v3370_v32 = vadd.f32 %v3369_v19, %v3339_v27  ;;  %v3272_v7 = vadd.f32 %v4876_v21, %v6475_v25  ;;  %v3302_v30 = vadd.f32 %v3301_v28, %v3271_v8  ;;  %v4878_v20 = vadd.f32 %v3121_v16, %v1793_v31 }
 0x1fc   : > { %v3275_v18 = vadd.f32 %v4877_v49, %v6475_v25  ;;  %v3343_v3 = vmul.f32 %v3274_v48, %v3274_v48 }
 0x1fd   : > { %v3303_v38 = vadd.f32 %v3302_v30, %v3272_v7  ;;  %v3341_v42 = vmul.f32 %v3272_v7, %v3272_v7  ;;  %v3371_v39 = vadd.f32 %v3370_v32, %v3340_v58  ;;  %v3273_v13 = vadd.f32 %v4878_v20, %v6475_v25 }
 0x1fe   : > { %v4122_v40 = vpack.c.bf16 %v3275_v18, %v3274_v48  ;;  %v3344_v44 = vmul.f32 %v3275_v18, %v3275_v18 }
 0x1ff   : > { %v3372_v56 = vadd.f32 %v3371_v39, %v3341_v42  ;;  %v3304_v55 = vadd.f32 %v3303_v38, %v3273_v13  ;;  %v3342_v59 = vmul.f32 %v3273_v13, %v3273_v13  ;;  %v4117_v6 = vpack.c.bf16 %v3273_v13, %v3272_v7  ;;  %v4833_v10 = vpop.f32.mrb[8].mxu0 }
 0x200   : > { %4194 = vst [vmem:[%s6492_s27 + $0x18] sm:$0xff] %v4122_v40   ;;  %v4879_v35 = vadd.f32 %v4833_v10, %v4593_v26  ;;  %v3134_v43 = vpop.f32.mrb[9].mxu0 }
 0x201   : > { %v3305_v57 = vadd.f32 %v3304_v55, %v3274_v48  ;;  %v3373_v37 = vadd.f32 %v3372_v56, %v3342_v59  ;;  %4193 = vst [vmem:[%s6492_s27 + $0x10] sm:$0xff] %v4117_v6   ;;  %v4880_v14 = vadd.f32 %v3134_v43, %v6466_v54  ;;  %v4834_v22 = vpop.f32.mrb[10].mxu0 }
 0x202   : > { %v4881_v23 = vadd.f32 %v4834_v22, %v6468_v2  ;;  %v3137_v31 = vpop.f32.mrb[11].mxu0  ;;  %v3278_v26 = vadd.f32 %v4879_v35, %v6475_v25 }
 0x203   : > { %v3374_v1 = vadd.f32 %v3373_v37, %v3343_v3  ;;  %v3276_v62 = vadd.f32 %v4880_v14, %v6475_v25  ;;  %v3306_v29 = vadd.f32 %v3305_v57, %v3275_v18  ;;  %v4882_v46 = vadd.f32 %v3137_v31, %v6470_v63 }
 0x204   : > { %v3279_v33 = vadd.f32 %v4881_v23, %v6475_v25  ;;  %v3347_v15 = vmul.f32 %v3278_v26, %v3278_v26 }
 0x205   : > { %v3307_v9 = vadd.f32 %v3306_v29, %v3276_v62  ;;  %v3345_v51 = vmul.f32 %v3276_v62, %v3276_v62  ;;  %v3375_v54 = vadd.f32 %v3374_v1, %v3344_v44  ;;  %v3277_v60 = vadd.f32 %v4882_v46, %v6475_v25 }
 0x206   : > { %v4132_v4 = vpack.c.bf16 %v3279_v33, %v3278_v26  ;;  %v3348_v52 = vmul.f32 %v3279_v33, %v3279_v33 }
 0x207   : > { %v3376_v2 = vadd.f32 %v3375_v54, %v3345_v51  ;;  %v3308_v41 = vadd.f32 %v3307_v9, %v3277_v60  ;;  %v3346_v8 = vmul.f32 %v3277_v60, %v3277_v60  ;;  %v4127_v5 = vpack.c.bf16 %v3277_v60, %v3276_v62  ;;  %v4837_v61 = vpop.f32.mrb[12].mxu0 }
 0x208   : > { %4196 = vst [vmem:[%s6492_s27 + $0x28] sm:$0xff] %v4132_v4   ;;  %v4883_v0 = vadd.f32 %v4837_v61, %v6477_v17  ;;  %v3150_v63 = vpop.f32.mrb[13].mxu0 }
 0x209   : > { %v3309_v47 = vadd.f32 %v3308_v41, %v3278_v26  ;;  %v3377_v36 = vadd.f32 %v3376_v2, %v3346_v8  ;;  %4195 = vst [vmem:[%s6492_s27 + $0x20] sm:$0xff] %v4127_v5   ;;  %v4884_v53 = vadd.f32 %v3150_v63, %v6479_v11  ;;  %v4838_v34 = vpop.f32.mrb[14].mxu0 }
 0x20a   : > { %v4885_v27 = vadd.f32 %v4838_v34, %v6482_v24  ;;  %v3153_v28 = vpop.f32.mrb[15].mxu0  ;;  %v3282_v17 = vadd.f32 %v4883_v0, %v6475_v25 }
 0x20b   : > { %v3378_v19 = vadd.f32 %v3377_v36, %v3347_v15  ;;  %v3280_v21 = vadd.f32 %v4884_v53, %v6475_v25  ;;  %v3310_v45 = vadd.f32 %v3309_v47, %v3279_v33  ;;  %v4886_v58 = vadd.f32 %v3153_v28, %v6485_v50 }
 0x20c   : > { %v3283_v49 = vadd.f32 %v4885_v27, %v6475_v25  ;;  %v3351_v39 = vmul.f32 %v3282_v17, %v3282_v17 }
 0x20d   : > { %v3311_v16 = vadd.f32 %v3310_v45, %v3280_v21  ;;  %v3349_v32 = vmul.f32 %v3280_v21, %v3280_v21  ;;  %v3379_v11 = vadd.f32 %v3378_v19, %v3348_v52  ;;  %v3281_v7 = vadd.f32 %v4886_v58, %v6475_v25 }
 0x20e   : > { %v4142_v30 = vpack.c.bf16 %v3283_v49, %v3282_v17  ;;  %v3352_v55 = vmul.f32 %v3283_v49, %v3283_v49 }
 0x20f   : > { %v3380_v24 = vadd.f32 %v3379_v11, %v3349_v32  ;;  %v3312_v20 = vadd.f32 %v3311_v16, %v3281_v7  ;;  %v3350_v48 = vmul.f32 %v3281_v7, %v3281_v7  ;;  %v4137_v18 = vpack.c.bf16 %v3281_v7, %v3280_v21  ;;  %v4841_v38 = vpop.f32.mrb[16].mxu0 }
 0x210   : > { %4198 = vst [vmem:[%s6492_s27 + $0x38] sm:$0xff] %v4142_v30   ;;  %v3166_v42 = vpop.f32.mrb[17].mxu0 }
 0x211   : > { %v3313_v50 = vadd.f32 %v3312_v20, %v3282_v17  ;;  %v3381_v13 = vadd.f32 %v3380_v24, %v3350_v48  ;;  %4197 = vst [vmem:[%s6492_s27 + $0x30] sm:$0xff] %v4137_v18   ;;  %v4842_v40 = vpop.f32.mrb[18].mxu0 }
 0x212   : > { %v3169_v56 = vpop.f32.mrb[19].mxu0 }
 0x213   : > { %v3382_v59 = vadd.f32 %v3381_v13, %v3351_v39  ;;  %v3314_v6 = vadd.f32 %v3313_v50, %v3283_v49 }
 0x215   : > { %v3383_v10 = vadd.f32 %v3382_v59, %v3352_v55 }
 0x217   : > { %v4845_v35 = vpop.f32.mrb[20].mxu0 }
 0x218   : > { %v3182_v43 = vpop.f32.mrb[21].mxu0 }
 0x219   : > { %v4649_v3 = vpop.f32.mrb[16].mxu1  ;;  %v4846_v57 = vpop.f32.mrb[22].mxu0 }
 0x21a   : > { %v4887_v37 = vadd.f32 %v4841_v38, %v4649_v3  ;;  %v2109_v14 = vpop.f32.mrb[17].mxu1  ;;  %v3185_v22 = vpop.f32.mrb[23].mxu0 }
 0x21b   : > { %v4888_v44 = vadd.f32 %v3166_v42, %v2109_v14  ;;  %v4650_v23 = vpop.f32.mrb[18].mxu1 }
 0x21c   : > { %v4889_v31 = vadd.f32 %v4842_v40, %v4650_v23  ;;  %v2112_v1 = vpop.f32.mrb[19].mxu1  ;;  %v3286_v46 = vadd.f32 %v4887_v37, %v6475_v25 }
 0x21d   : > { %v3284_v62 = vadd.f32 %v4888_v44, %v6475_v25  ;;  %v4890_v29 = vadd.f32 %v3169_v56, %v2112_v1 }
 0x21e   : > { %v3287_v26 = vadd.f32 %v4889_v31, %v6475_v25  ;;  %v3355_v36 = vmul.f32 %v3286_v46, %v3286_v46 }
 0x21f   : > { %v3315_v33 = vadd.f32 %v3314_v6, %v3284_v62  ;;  %v3353_v9 = vmul.f32 %v3284_v62, %v3284_v62  ;;  %v3285_v51 = vadd.f32 %v4890_v29, %v6475_v25  ;;  %v4849_v54 = vpop.f32.mrb[24].mxu0 }
 0x220   : > { %v4152_v60 = vpack.c.bf16 %v3287_v26, %v3286_v46  ;;  %v3198_v4 = vpop.f32.mrb[25].mxu0  ;;  %v3356_v28 = vmul.f32 %v3287_v26, %v3287_v26 }
 0x221   : > { %v3384_v2 = vadd.f32 %v3383_v10, %v3353_v9  ;;  %v3316_v41 = vadd.f32 %v3315_v33, %v3285_v51  ;;  %v3354_v8 = vmul.f32 %v3285_v51, %v3285_v51  ;;  %v4147_v5 = vpack.c.bf16 %v3285_v51, %v3284_v62  ;;  %v4653_v61 = vpop.f32.mrb[20].mxu1  ;;  %v4850_v0 = vpop.f32.mrb[26].mxu0 }
 0x222   : > { %4200 = vst [vmem:[%s6492_s27 + $0x48] sm:$0xff] %v4152_v60   ;;  %v4891_v63 = vadd.f32 %v4845_v35, %v4653_v61  ;;  %v2125_v15 = vpop.f32.mrb[21].mxu1  ;;  %v3201_v47 = vpop.f32.mrb[27].mxu0 }
 0x223   : > { %v3317_v53 = vadd.f32 %v3316_v41, %v3286_v46  ;;  %v3385_v34 = vadd.f32 %v3384_v2, %v3354_v8  ;;  %4199 = vst [vmem:[%s6492_s27 + $0x40] sm:$0xff] %v4147_v5   ;;  %v4892_v52 = vadd.f32 %v3182_v43, %v2125_v15  ;;  %v4654_v27 = vpop.f32.mrb[22].mxu1 }
 0x224   : > { %v4893_v19 = vadd.f32 %v4846_v57, %v4654_v27  ;;  %v2128_v21 = vpop.f32.mrb[23].mxu1  ;;  %v3290_v16 = vadd.f32 %v4891_v63, %v6475_v25 }
 0x225   : > { %v3386_v45 = vadd.f32 %v3385_v34, %v3355_v36  ;;  %v3288_v58 = vadd.f32 %v4892_v52, %v6475_v25  ;;  %v3318_v17 = vadd.f32 %v3317_v53, %v3287_v26  ;;  %v4894_v49 = vadd.f32 %v3185_v22, %v2128_v21 }
 0x226   : > { %v3291_v32 = vadd.f32 %v4893_v19, %v6475_v25  ;;  %v3359_v6 = vmul.f32 %v3290_v16, %v3290_v16 }
 0x227   : > { %v3319_v11 = vadd.f32 %v3318_v17, %v3288_v58  ;;  %v3357_v7 = vmul.f32 %v3288_v58, %v3288_v58  ;;  %v3387_v30 = vadd.f32 %v3386_v45, %v3356_v28  ;;  %v3289_v24 = vadd.f32 %v4894_v49, %v6475_v25  ;;  %v4853_v20 = vpop.f32.mrb[28].mxu0 }
 0x228   : > { %v4162_v48 = vpack.c.bf16 %v3291_v32, %v3290_v16  ;;  %v3214_v18 = vpop.f32.mrb[29].mxu0  ;;  %v3360_v57 = vmul.f32 %v3291_v32, %v3291_v32 }
 0x229   : > { %v3388_v38 = vadd.f32 %v3387_v30, %v3357_v7  ;;  %v3320_v42 = vadd.f32 %v3319_v11, %v3289_v24  ;;  %v3358_v39 = vmul.f32 %v3289_v24, %v3289_v24  ;;  %v4157_v50 = vpack.c.bf16 %v3289_v24, %v3288_v58  ;;  %v4657_v13 = vpop.f32.mrb[24].mxu1  ;;  %v4854_v40 = vpop.f32.mrb[30].mxu0 }
 0x22a   : > { %4202 = vst [vmem:[%s6492_s27 + $0x58] sm:$0xff] %v4162_v48   ;;  %v4895_v56 = vadd.f32 %v4849_v54, %v4657_v13  ;;  %v2141_v55 = vpop.f32.mrb[25].mxu1  ;;  %v3217_v59 = vpop.f32.mrb[31].mxu0 }
 0x22b   : > { %v3321_v10 = vadd.f32 %v3320_v42, %v3290_v16  ;;  %v3389_v35 = vadd.f32 %v3388_v38, %v3358_v39  ;;  %4201 = vst [vmem:[%s6492_s27 + $0x50] sm:$0xff] %v4157_v50   ;;  %v4896_v43 = vadd.f32 %v3198_v4, %v2141_v55  ;;  %v4658_v3 = vpop.f32.mrb[26].mxu1 }
 0x22c   : > { %v4897_v37 = vadd.f32 %v4850_v0, %v4658_v3  ;;  %v2144_v14 = vpop.f32.mrb[27].mxu1  ;;  %v3294_v1 = vadd.f32 %v4895_v56, %v6475_v25 }
 0x22d   : > { %v3390_v22 = vadd.f32 %v3389_v35, %v3359_v6  ;;  %v3292_v44 = vadd.f32 %v4896_v43, %v6475_v25  ;;  %v3322_v23 = vadd.f32 %v3321_v10, %v3291_v32  ;;  %v4898_v31 = vadd.f32 %v3201_v47, %v2144_v14 }
 0x22e   : > { %v3295_v62 = vadd.f32 %v4897_v37, %v6475_v25  ;;  %v3363_v5 = vmul.f32 %v3294_v1, %v3294_v1 }
 0x22f   : > { %v3323_v29 = vadd.f32 %v3322_v23, %v3292_v44  ;;  %v3361_v46 = vmul.f32 %v3292_v44, %v3292_v44  ;;  %v3391_v26 = vadd.f32 %v3390_v22, %v3360_v57  ;;  %v3293_v33 = vadd.f32 %v4898_v31, %v6475_v25 }
 0x230   : > { %v4172_v9 = vpack.c.bf16 %v3295_v62, %v3294_v1  ;;  %v3364_v47 = vmul.f32 %v3295_v62, %v3295_v62 }
 0x231   : > { %v3392_v51 = vadd.f32 %v3391_v26, %v3361_v46  ;;  %v3324_v54 = vadd.f32 %v3323_v29, %v3293_v33  ;;  %v3362_v60 = vmul.f32 %v3293_v33, %v3293_v33  ;;  %v4167_v4 = vpack.c.bf16 %v3293_v33, %v3292_v44  ;;  %v4661_v2 = vpop.f32.mrb[28].mxu1 }
 0x232   : > { %4204 = vst [vmem:[%s6492_s27 + $0x68] sm:$0xff] %v4172_v9   ;;  %v4899_v41 = vadd.f32 %v4853_v20, %v4661_v2  ;;  %v2157_v8 = vpop.f32.mrb[29].mxu1 }
 0x233   : > { %v3325_v61 = vadd.f32 %v3324_v54, %v3294_v1  ;;  %v3393_v0 = vadd.f32 %v3392_v51, %v3362_v60  ;;  %4203 = vst [vmem:[%s6492_s27 + $0x60] sm:$0xff] %v4167_v4   ;;  %v4900_v63 = vadd.f32 %v3214_v18, %v2157_v8  ;;  %v4662_v15 = vpop.f32.mrb[30].mxu1 }
 0x234   : > { %v4901_v36 = vadd.f32 %v4854_v40, %v4662_v15  ;;  %v2160_v53 = vpop.f32.mrb[31].mxu1  ;;  %v3298_v19 = vadd.f32 %v4899_v41, %v6475_v25 }
 0x235   : > { %v3394_v34 = vadd.f32 %v3393_v0, %v3363_v5  ;;  %v3296_v52 = vadd.f32 %v4900_v63, %v6475_v25  ;;  %v3326_v27 = vadd.f32 %v3325_v61, %v3295_v62  ;;  %v4902_v28 = vadd.f32 %v3217_v59, %v2160_v53 }
 0x236   : > { %v3299_v21 = vadd.f32 %v4901_v36, %v6475_v25  ;;  %v3367_v24 = vmul.f32 %v3298_v19, %v3298_v19 }
 0x237   : > { %v3327_v45 = vadd.f32 %v3326_v27, %v3296_v52  ;;  %v3365_v58 = vmul.f32 %v3296_v52, %v3296_v52  ;;  %v3395_v17 = vadd.f32 %v3394_v34, %v3364_v47  ;;  %v3297_v49 = vadd.f32 %v4902_v28, %v6475_v25 }
 0x238   : > { %v4182_v16 = vpack.c.bf16 %v3299_v21, %v3298_v19  ;;  %v3368_v18 = vmul.f32 %v3299_v21, %v3299_v21 }
 0x239   : > { %v3396_v32 = vadd.f32 %v3395_v17, %v3365_v58  ;;  %v3328_v11 = vadd.f32 %v3327_v45, %v3297_v49  ;;  %v3366_v7 = vmul.f32 %v3297_v49, %v3297_v49  ;;  %v4177_v30 = vpack.c.bf16 %v3297_v49, %v3296_v52 }
 0x23a   : > { %4206 = vst [vmem:[%s6492_s27 + $0x78] sm:$0xff] %v4182_v16  }
 0x23b   : > { %v3329_v20 = vadd.f32 %v3328_v11, %v3298_v19  ;;  %v3397_v48 = vadd.f32 %v3396_v32, %v3366_v7  ;;  %4205 = vst [vmem:[%s6492_s27 + $0x70] sm:$0xff] %v4177_v30  }
 0x23d   : > { %v3330_v38 = vadd.f32 %v3329_v20, %v3299_v21  ;;  %v3398_v42 = vadd.f32 %v3397_v48, %v3367_v24 }
 0x23f   : > { %v3331_v39 = vrot.slane %v3330_v38, 4  ;;  %v3399_v50 = vadd.f32 %v3398_v42, %v3368_v18 }
 0x241   : > { %v3332_v13 = vadd.f32 %v3331_v39, %v3330_v38  ;;  %v3400_v40 = vrot.slane %v3399_v50, 4 }
 0x243   : > { %v3333_v56 = vrot.slane %v3332_v13, 2  ;;  %v3401_v25 = vadd.f32 %v3400_v40, %v3399_v50 }
 0x245   : > { %v3334_v55 = vadd.f32 %v3333_v56, %v3332_v13  ;;  %v3402_v59 = vrot.slane %v3401_v25, 2 }
 0x247   : > { %v3335_v6 = vrot.slane %v3334_v55, 1  ;;  %v3403_v10 = vadd.f32 %v3402_v59, %v3401_v25 }
 0x249   : > { %v3404_v35 = vrot.slane %v3403_v10, 1  ;;  %v3336_v43 = vadd.f32 %v3335_v6, %v3334_v55 }
 0x24b   : > { %v3405_v3 = vadd.f32 %v3404_v35, %v3403_v10 }
 0x24d   : > { %v3407_v57 = vsel %vm3406_vm6, %v3336_v43, %v3405_v3 }
 0x24e   : > { %3408 = vst [vmem:[%s262_s7] sm:$0xff] %v3407_v57 }
 0x24f PF: > { %s17_s21 = sadd.s32 1, %s5227_s21  }
 0x250   : > { %p14_p4 = scmp.ge.s32.totalorder %s17_s21, 4  }
 0x252   :  { %16 = sbr.rel (!%p14_p4) target bundleno = 1 (0x1), region = 90 }

// kernel: unet_decoder_forward.4
= control target key start
LH: loop header
LB: loop body
LE: loop exit
PB: predicated region body
PF: predicated region fallthrough
CT: control target
= control target key end

     0   :  { %s8834_s21 = smov 0   ;;  %s11210_s0 = inlined_call_operand.vmem [shape: bf16[2,18,18,4], index: 0, kind: input, shape index: {}]   ;;  %s11211_s1 = inlined_call_operand.vmem [shape: bf16[2,18,18,4], index: 1, kind: input, shape index: {}]   ;;  %s11212_s2 = inlined_call_operand.vmem [shape: bf16[3,3,4,128], index: 2, kind: input, shape index: {}]   ;;  %s11213_s3 = inlined_call_operand.vmem [shape: bf16[3,3,4,128], index: 3, kind: input, shape index: {}]   ;;  %s11214_s4 = inlined_call_operand.vmem [shape: f32[1,128], index: 4, kind: input, shape index: {}]   ;;  %s11215_s5 = inlined_call_operand.vmem [shape: bf16[2,18,18,128], index: 5, kind: output, shape index: {0}]   ;;  %s11216_s6 = inlined_call_operand.vmem [shape: f32[2,8,128], index: 6, kind: output, shape index: {1}]  }
   0x1 LB: > { %s6609_s22 = sadd.s32 4294967295, %s8796_s21   ;;  %p6613_p0 = scmp.ge.s32.totalorder %s8796_s21, 1  ;;  %s8796_s21 = sphi %s8834_s21, %s17_s21  }
   0x2   : > { %p225_p1 = scmp.lt.s32.totalorder %s8796_s21, 3 }
   0x4   : > { %p226_p2 = pnand %p6613_p0, %p225_p1 }
   0x6   : > { %229 = sbr.rel (%p226_p2) target bundleno = 899 (0x383), region = 40 }
   0xd   : > { %v393_v0 = vld [vmem:[%s11213_s3] sm:$0x3]  ;;  %vm523_vm0 = vcmask 1041408   ;;  %p264_p3 = scmp.lt.s32.totalorder %s6609_s22, 1  ;;  %v6900_v2 = vld [vmem:[%s11213_s3 + $0x8] sm:$0x3] }
   0xe   : > { %8675 = vmatprep.subr.msk.bf16.mxu1 %vm523_vm0, %v393_v0  ;;  %v525_v1 = vsel %vm523_vm0, %v393_v0, 0  ;;  %v392_v3 = vld [vmem:[%s11212_s2] sm:$0x3]  ;;  %8684 = vmatprep.subr.msk.bf16.mxu0 %vm523_vm0, %v6900_v2  ;;  %v3859_v4 = vsel %vm523_vm0, %v6900_v2, 0  ;;  %v6919_v5 = vld [vmem:[%s11212_s2 + $0xa] sm:$0x3] }
   0xf   : > { %7520 = vmatpush3.bf16.msra.mxu1 %v525_v1  ;;  %s11667_s22 = smov (!%p264_p3, %s6609_s22), 1  ;;  %7826 = vmatpush3.bf16.msra.mxu0 %v3859_v4  ;;  %vm474_vm1 = vcmask 31744   ;;  %v817_v6 = vsel %vm523_vm0, %v392_v3, 0  ;;  %v6682_v7 = vld [vmem:[%s11212_s2 + $0x2] sm:$0x3]  ;;  %v8890_v20 = vsel %vm523_vm0, %v6919_v5, 0 }
  0x10   : > { %8676 = vmatprep.subr.msk.bf16.mxu1 %vm523_vm0, %v392_v3  ;;  %s8862_s7 = smul.u32 216, %s11667_s22  ;;  %8685 = vmatprep.subr.msk.bf16.mxu0 %vm523_vm0, %v6919_v5  ;;  %v8878_v8 = vld [vmem:[%s11213_s3 + $0xa] sm:$0x3]  ;;  %vm980_vm2 = vsmask.f32 3328  ;;  %v8893_v21 = vsel %vm523_vm0, %v6682_v7, 0 }
  0x11   : > { %vm981_vm3 = vsmask.f32 7440  ;;  %v8903_v26 = vsel %vm523_vm0, %v8878_v8, 0  ;;  %vm2355_vm5 = vcmask 1042432   ;;  %vm2356_vm6 = vcmask 1046532   ;;  %s6617_s27 = sshll.u32 %s11667_s22, 3 }
  0x12   : > { %s8869_s10 = scalar_lea.vmem %s11211_s1, %s8862_s7  ;;  %vm8964_vm4 = vmor %vm980_vm2, %vm981_vm3  ;;  %s9191_s17 = scalar_lea.vmem %s11210_s0, %s8862_s7  ;;  %vm6394_vm8 = vcmask 1043456   ;;  %vm6395_vm9 = vsmask.f32 7938  ;;  %vm6070_vm10 = vsmask.f32 256  ;;  %vm6401_vm12 = vcmask 1040384  }
  0x13   : > { %v338_v9 = vld [vmem:[%s8869_s10] sm:$0xf]  ;;  %v339_v10 = vld [vmem:[%s8869_s10 + $0x4] sm:$0xf]  ;;  %v341_v11 = vld [vmem:[%s8869_s10 + $0xc] sm:$0xf]  ;;  %s10727_s25 = scalar_lea.vmem %s11215_s5, %s8862_s7  ;;  %s282_s30 = scalar_lea.vmem %s11216_s6, %s6617_s27 }
  0x14   : > { %v6618_v12 = vcombine.low %v338_v9, %v339_v10  ;;  %v1662_v13 = vshrl.u32 %v338_v9, 16  ;;  %v1665_v14 = vshll.u32 %v338_v9, 16  ;;  %v1671_v15 = vshll.u32 %v339_v10, 16  ;;  %v342_v16 = vld [vmem:[%s8869_s10 + $0x10] sm:$0xf]  ;;  %vm9301_vm7 = vmor %vm2355_vm5, %vm2356_vm6 }
  0x15   : > { %v1675_v17 = vshrl.u32 %v339_v10, 16  ;;  %v8884_v18 = vcombine.low %v341_v11, %v342_v16  ;;  %v8887_v19 = vld [vmem:[%s8869_s10 + $0x18] sm:$0xf]  ;;  %v8899_v25 = vld [vmem:[%s8869_s10 + $0x1c] sm:$0xf]  ;;  %v1686_v45 = vshrl.u32 %v341_v11, 16  ;;  %vm10808_vm13 = vmand %vm6394_vm8, %vm6395_vm9 }
  0x16   : > { %7521 = vmatprep.mubr.msk.bf16.mxu1 %vm474_vm1, %v6618_v12  ;;  %v1664_v22 = vrot.slane %v1662_v13, 4  ;;  %v1667_v23 = vrot.slane %v1665_v14, 5  ;;  %v8896_v24 = vrot.slane %v1671_v15, 5  ;;  %v8909_v28 = vcombine.low %v8887_v19, %v8899_v25  ;;  %v8914_v31 = vld [vmem:[%s8869_s10 + $0x24] sm:$0xf]  ;;  %vm10822_vm15 = vmand %vm6401_vm12, %vm6070_vm10 }
  0x17   : > { %11376 = vst [vmem:[#allocation2_spill] sm:$0xff] %v8884_v18  ;;  %v1677_v27 = vrot.slane %v1675_v17, 4  ;;  %7522 = vmatmul.mubr.msk.bf16.vlgmr.msra.gmra.mrb[0].mxu1 %vm474_vm1, %v8884_v18  ;;  %v1710_v29 = vshrl.u32 %v8887_v19, 16  ;;  %v1713_v30 = vshll.u32 %v8887_v19, 16  ;;  %v1723_v33 = vshrl.u32 %v8899_v25, 16 }
  0x18   : > { %11377 = vst [vmem:[#allocation3_spill] sm:$0xff] %v8896_v24  ;;  %11378 = vst [vmem:[#allocation4_spill] sm:$0xff] %v8909_v28  ;;  %v1668_v32 = vor.u32 %v1667_v23, %v1664_v22  ;;  %v11217_v35 = vrot.slane %v8899_v25, 5  ;;  %v8920_v36 = vld [vmem:[%s8869_s10 + $0x28] sm:$0xf]  ;;  %7554 = vmatpush3.bf16.msra.mxu1 %v817_v6  ;;  %7525 = vmatprep.mubr.msk.bf16.mxu1 %vm474_vm1, %v8909_v28  ;;  %v1734_v39 = vshrl.u32 %v8914_v31, 16 }
  0x19   : > { %v1678_v37 = vor.u32 %v1677_v27, %v8896_v24  ;;  %v8927_v38 = vcombine.low %v8914_v31, %v8920_v36  ;;  %v1737_v40 = vshll.u32 %v8914_v31, 16  ;;  %v8932_v41 = vld [vmem:[%s8869_s10 + $0x14] sm:$0x1]  ;;  %8677 = vmatprep.subr.msk.bf16.mxu1 %vm523_vm0, %v6682_v7  ;;  %v1747_v44 = vshrl.u32 %v8920_v36, 16  ;;  %v8945_v50 = vld [vmem:[%s8869_s10 + $0x20] sm:$0x1] }
  0x1a   : > { %v8935_v42 = vrot.slane %v1668_v32, 4  ;;  %v8939_v43 = vrot.slane %v11217_v35, 4  ;;  %v1689_v47 = vshll.u32 %v341_v11, 16  ;;  %v1695_v48 = vshll.u32 %v342_v16, 16  ;;  %v350_v59 = vld [vmem:[%s8869_s10 + $0x30] sm:$0xf] }
  0x1b   : > { %11379 = vst [vmem:[#allocation5_spill] sm:$0xff] %v8927_v38  ;;  %v8942_v46 = vrot.slane %v1678_v37, 4  ;;  %v1699_v49 = vshrl.u32 %v342_v16, 16  ;;  %v1688_v51 = vrot.slane %v1686_v45, 4  ;;  %v1705_v52 = vshll.u32 %v8932_v41, 16 }
  0x1c   : > { %11380 = vst [vmem:[#allocation6_spill] sm:$0xff] %v8935_v42  ;;  %v1712_v54 = vrot.slane %v1710_v29, 4  ;;  %v1691_v55 = vrot.slane %v1689_v47, 5  ;;  %v1697_v56 = vrot.slane %v1695_v48, 5  ;;  %v1715_v58 = vrot.slane %v1713_v30, 5 }
  0x1d   : > { %11381 = vst [vmem:[#allocation7_spill] sm:$0xff] %v8942_v46  ;;  %v1701_v57 = vrot.slane %v1699_v49, 4  ;;  %v1707_v60 = vrot.slane %v1705_v52, 5  ;;  %v1719_v61 = vshll.u32 %v8899_v25, 16  ;;  %v1725_v62 = vrot.slane %v1723_v33, 4 }
  0x1e   : > { %v1729_v63 = vshll.u32 %v8945_v50, 16  ;;  %v351_v0 = vld [vmem:[%s8869_s10 + $0x34] sm:$0xf]  ;;  %v1692_v1 = vor.u32 %v1691_v55, %v1688_v51  ;;  %v1716_v3 = vor.u32 %v1715_v58, %v1712_v54  ;;  %v8957_v5 = vld [vmem:[%s8869_s10 + $0x3c] sm:$0xf]  ;;  %v1758_v12 = vshrl.u32 %v350_v59, 16 }
  0x1f   : > { %7526 = vmatmul.mubr.msk.bf16.gmra.mrb[4].mxu1 %vm474_vm1, %v8927_v38  ;;  %v1702_v2 = vor.u32 %v1701_v57, %v1697_v56  ;;  %v8960_v6 = vld [vmem:[%s8869_s10 + $0x40] sm:$0xf]  ;;  %v1721_v9 = vrot.slane %v1719_v61, 5  ;;  %v8968_v11 = vcombine.low %v350_v59, %v351_v0  ;;  %v1761_v16 = vshll.u32 %v350_v59, 16  ;;  %v349_v29 = vld [vmem:[%s8869_s10 + $0x2c] sm:$0x1] }
  0x20   : > { %v1731_v10 = vrot.slane %v1729_v63, 5  ;;  %v1693_v13 = vrot.slane %v1692_v1, 4  ;;  %v1717_v15 = vrot.slane %v1716_v3, 4  ;;  %v1771_v22 = vshrl.u32 %v351_v0, 16  ;;  %v352_v55 = vld [vmem:[%s8869_s10 + $0x38] sm:$0x1] }
  0x21   : > { %11384 = vst [vmem:[#allocation8_spill] sm:$0xff] %v8968_v11  ;;  %v1703_v14 = vrot.slane %v1702_v2, 4  ;;  %v1726_v17 = vor.u32 %v1725_v62, %v1721_v9  ;;  %7529 = vmatprep.mubr.msk.bf16.mxu1 %vm474_vm1, %v8968_v11  ;;  %v8974_v23 = vcombine.low %v8957_v5, %v8960_v6  ;;  %v1782_v27 = vshrl.u32 %v8957_v5, 16  ;;  %v357_v61 = vld [vmem:[%s8869_s10 + $0x4c] sm:$0xf] }
  0x22   : > { %v1698_v30 = vsel %vm8964_vm4, %v1693_v13, %v1697_v56  ;;  %v1722_v32 = vsel %vm8964_vm4, %v1717_v15, %v1721_v9  ;;  %v1785_v33 = vshll.u32 %v8957_v5, 16  ;;  %v1795_v47 = vshrl.u32 %v8960_v6, 16  ;;  %v9001_v62 = vld [vmem:[%s8869_s10 + $0x54] sm:$0xf]  ;;  %v9004_v5 = vld [vmem:[%s8869_s10 + $0x58] sm:$0xf] }
  0x23   : > { %11385 = vst [vmem:[#allocation9_spill] sm:$0xff] %v8974_v23  ;;  %v1708_v31 = vsel %vm8964_vm4, %v1703_v14, %v1707_v60  ;;  %v1727_v45 = vrot.slane %v1726_v17, 4  ;;  %v1736_v48 = vrot.slane %v1734_v39, 4  ;;  %v1739_v49 = vrot.slane %v1737_v40, 5  ;;  %v356_v60 = vld [vmem:[%s8869_s10 + $0x48] sm:$0xf] }
  0x24   : > { %v8985_v37 = vcombine.low %v1698_v30, %v1708_v31  ;;  %v1743_v51 = vshll.u32 %v8920_v36, 16  ;;  %v1749_v52 = vrot.slane %v1747_v44, 4  ;;  %v1753_v54 = vshll.u32 %v349_v29, 16  ;;  %v381_v34 = vld [vmem:[%s8869_s10 + $0xac] sm:$0xf] }
  0x25   : > { %v1732_v56 = vsel %vm8964_vm4, %v1727_v45, %v1731_v10  ;;  %v1760_v57 = vrot.slane %v1758_v12, 4  ;;  %v1763_v58 = vrot.slane %v1761_v16, 5  ;;  %v1767_v59 = vshll.u32 %v351_v0, 16  ;;  %v9421_v28 = vld [vmem:[%s9191_s17 + $0x60] sm:$0xf] }
  0x26   : > { %11386 = vst [vmem:[#allocation10_spill] sm:$0xff] %v8985_v37  ;;  %7827 = vmatprep.mubr.msk.bf16.mxu0 %vm474_vm1, %v8985_v37  ;;  %v8995_v39 = vcombine.low %v1722_v32, %v1732_v56  ;;  %v1740_v36 = vor.u32 %v1739_v49, %v1736_v48  ;;  %v1745_v40 = vrot.slane %v1743_v51, 5  ;;  %v1755_v44 = vrot.slane %v1753_v54, 5  ;;  %v355_v48 = vld [vmem:[%s8869_s10 + $0x44] sm:$0x1] }
  0x27   : > { %7530 = vmatmul.mubr.msk.bf16.gmra.mrb[8].mxu1 %vm474_vm1, %v8974_v23  ;;  %v1764_v63 = vor.u32 %v1763_v58, %v1760_v57  ;;  %v1769_v1 = vrot.slane %v1767_v59, 5  ;;  %v1773_v2 = vrot.slane %v1771_v22, 4  ;;  %v1777_v3 = vshll.u32 %v352_v55, 16  ;;  %v358_v58 = vld [vmem:[%s8869_s10 + $0x50] sm:$0x1] }
  0x28   : > { %11387 = vst [vmem:[#allocation11_spill] sm:$0xff] %v8995_v39  ;;  %7828 = vmatmul.mubr.msk.bf16.vlgmr.msra.gmra.mrb[0].mxu0 %vm474_vm1, %v8995_v39  ;;  %v1741_v0 = vrot.slane %v1740_v36, 4  ;;  %v1750_v9 = vor.u32 %v1749_v52, %v1745_v40  ;;  %v9008_v10 = vcombine.low %v356_v60, %v357_v61  ;;  %v1806_v12 = vshrl.u32 %v356_v60, 16  ;;  %v9546_v39 = vld [vmem:[%s9191_s17 + $0x90] sm:$0xf] }
  0x29   : > { %7860 = vmatpush3.bf16.msra.mxu0 %v8890_v20  ;;  %v1765_v13 = vrot.slane %v1764_v63, 4  ;;  %v1774_v14 = vor.u32 %v1773_v2, %v1769_v1  ;;  %v1779_v15 = vrot.slane %v1777_v3, 5  ;;  %v1809_v16 = vshll.u32 %v356_v60, 16  ;;  %11441 = vst [vmem:[#allocation63_spill] sm:$0xff] %v9546_v39  ;;  %v9555_v42 = vld [vmem:[%s9191_s17 + $0x94] sm:$0xf] }
  0x2a   : > { %11388 = vst [vmem:[#allocation12_spill] sm:$0xff] %v9008_v10  ;;  %v1746_v17 = vsel %vm8964_vm4, %v1741_v0, %v1745_v40  ;;  %v1751_v22 = vrot.slane %v1750_v9, 4  ;;  %7533 = vmatprep.mubr.msk.bf16.mxu1 %vm474_vm1, %v9008_v10  ;;  %v1819_v29 = vshrl.u32 %v357_v61, 16  ;;  %v9017_v30 = vcombine.low %v9001_v62, %v9004_v5  ;;  %8686 = vmatprep.subr.msk.bf16.mxu0 %vm523_vm0, %v8878_v8  ;;  %v363_v40 = vld [vmem:[%s8869_s10 + $0x64] sm:$0xf] }
  0x2b   : > { %v1770_v20 = vsel %vm8964_vm4, %v1765_v13, %v1769_v1  ;;  %v1775_v31 = vrot.slane %v1774_v14, 4  ;;  %v1830_v32 = vshrl.u32 %v9001_v62, 16  ;;  %v1833_v45 = vshll.u32 %v9001_v62, 16  ;;  %v9051_v9 = vld [vmem:[%s8869_s10 + $0x70] sm:$0xf]  ;;  %11443 = vst [vmem:[#allocation65_spill] sm:$0xff] %v9555_v42 }
  0x2c   : > { %11389 = vst [vmem:[#allocation13_spill] sm:$0xff] %v9017_v30  ;;  %v1756_v49 = vsel %vm8964_vm4, %v1751_v22, %v1755_v44  ;;  %v1843_v51 = vshrl.u32 %v9004_v5, 16  ;;  %v1784_v52 = vrot.slane %v1782_v27, 4  ;;  %v1787_v54 = vrot.slane %v1785_v33, 5  ;;  %v362_v33 = vld [vmem:[%s8869_s10 + $0x60] sm:$0xf] }
  0x2d   : > { %v9029_v55 = vcombine.low %v1746_v17, %v1756_v49  ;;  %v1780_v8 = vsel %vm8964_vm4, %v1775_v31, %v1779_v15  ;;  %v1791_v56 = vshll.u32 %v8960_v6, 16  ;;  %v1797_v57 = vrot.slane %v1795_v47, 4  ;;  %v9044_v47 = vld [vmem:[%s8869_s10 + $0x6c] sm:$0xf]  ;;  %v361_v49 = vld [vmem:[%s8869_s10 + $0x5c] sm:$0x1] }
  0x2e   : > { %v9035_v59 = vcombine.low %v1770_v20, %v1780_v8  ;;  %v1788_v60 = vor.u32 %v1787_v54, %v1784_v52  ;;  %v1801_v36 = vshll.u32 %v355_v48, 16  ;;  %v1808_v27 = vrot.slane %v1806_v12, 4 }
  0x2f   : > { %11390 = vst [vmem:[#allocation14_spill] sm:$0xff] %v9029_v55  ;;  %7534 = vmatmul.mubr.msk.bf16.gmra.mrb[12].mxu1 %vm474_vm1, %v9017_v30  ;;  %7831 = vmatprep.mubr.msk.bf16.mxu0 %vm474_vm1, %v9029_v55  ;;  %v1793_v44 = vrot.slane %v1791_v56, 5  ;;  %v1811_v62 = vrot.slane %v1809_v16, 5  ;;  %v1815_v63 = vshll.u32 %v357_v61, 16  ;;  %v1821_v6 = vrot.slane %v1819_v29, 4 }
  0x30   : > { %11391 = vst [vmem:[#allocation15_spill] sm:$0xff] %v9035_v59  ;;  %7832 = vmatmul.mubr.msk.bf16.gmra.mrb[4].mxu0 %vm474_vm1, %v9035_v59  ;;  %v1789_v1 = vrot.slane %v1788_v60, 4  ;;  %v1803_v2 = vrot.slane %v1801_v36, 5  ;;  %v1825_v3 = vshll.u32 %v358_v58, 16  ;;  %v9048_v0 = vcombine.low %v362_v33, %v363_v40  ;;  %v9524_v55 = vld [vmem:[%s9191_s17 + $0x74] sm:$0x1] }
  0x31   : > { %v1798_v12 = vor.u32 %v1797_v57, %v1793_v44  ;;  %v1812_v13 = vor.u32 %v1811_v62, %v1808_v27  ;;  %v1817_v14 = vrot.slane %v1815_v63, 5  ;;  %v1854_v15 = vshrl.u32 %v362_v33, 16  ;;  %11438 = vst [vmem:[#allocation60_spill] sm:$0xff] %v9524_v55 }
  0x32   : > { %11392 = vst [vmem:[#allocation16_spill] sm:$0xff] %v9048_v0  ;;  %v1794_v61 = vsel %vm8964_vm4, %v1789_v1, %v1793_v44  ;;  %v1827_v16 = vrot.slane %v1825_v3, 5  ;;  %7537 = vmatprep.mubr.msk.bf16.mxu1 %vm474_vm1, %v9048_v0  ;;  %v1857_v17 = vshll.u32 %v362_v33, 16  ;;  %v1867_v22 = vshrl.u32 %v363_v40, 16  ;;  %v9354_v0 = vld [vmem:[%s9191_s17 + $0x38] sm:$0x1] }
  0x33   : > { %v1799_v29 = vrot.slane %v1798_v12, 4  ;;  %v1813_v20 = vrot.slane %v1812_v13, 4  ;;  %v1822_v31 = vor.u32 %v1821_v6, %v1817_v14  ;;  %v9059_v48 = vcombine.low %v9044_v47, %v9051_v9 }
  0x34   : > { %v1878_v52 = vshrl.u32 %v9044_v47, 16  ;;  %v1881_v54 = vshll.u32 %v9044_v47, 16  ;;  %v1891_v8 = vshrl.u32 %v9051_v9, 16  ;;  %v1832_v56 = vrot.slane %v1830_v32, 4  ;;  %v364_v32 = vld [vmem:[%s8869_s10 + $0x68] sm:$0x1] }
  0x35   : > { %11393 = vst [vmem:[#allocation17_spill] sm:$0xff] %v9059_v48  ;;  %v1804_v57 = vsel %vm8964_vm4, %v1799_v29, %v1803_v2  ;;  %v1818_v58 = vsel %vm8964_vm4, %v1813_v20, %v1817_v14  ;;  %v1823_v60 = vrot.slane %v1822_v31, 4  ;;  %v1835_v36 = vrot.slane %v1833_v45, 5  ;;  %v368_v2 = vld [vmem:[%s8869_s10 + $0x78] sm:$0xf] }
  0x36   : > { %v9069_v27 = vcombine.low %v1794_v61, %v1804_v57  ;;  %v1839_v33 = vshll.u32 %v9004_v5, 16  ;;  %v1845_v44 = vrot.slane %v1843_v51, 4  ;;  %v1849_v62 = vshll.u32 %v361_v49, 16  ;;  %v369_v45 = vld [vmem:[%s8869_s10 + $0x7c] sm:$0xf] }
  0x37   : > { %7538 = vmatmul.mubr.msk.bf16.gmra.mrb[16].mxu1 %vm474_vm1, %v9059_v48  ;;  %v1828_v63 = vsel %vm8964_vm4, %v1823_v60, %v1827_v16  ;;  %v1836_v6 = vor.u32 %v1835_v36, %v1832_v56  ;;  %v1856_v47 = vrot.slane %v1854_v15, 4  ;;  %v1859_v1 = vrot.slane %v1857_v17, 5  ;;  %v9084_v51 = vld [vmem:[%s8869_s10 + $0x84] sm:$0xf]  ;;  %v9087_v20 = vld [vmem:[%s8869_s10 + $0x88] sm:$0xf] }
  0x38   : > { %11394 = vst [vmem:[#allocation18_spill] sm:$0xff] %v9069_v27  ;;  %7835 = vmatprep.mubr.msk.bf16.mxu0 %vm474_vm1, %v9069_v27  ;;  %v9081_v3 = vcombine.low %v1818_v58, %v1828_v63  ;;  %v1841_v12 = vrot.slane %v1839_v33, 5  ;;  %v1851_v13 = vrot.slane %v1849_v62, 5  ;;  %v1863_v5 = vshll.u32 %v363_v40, 16 }
  0x39   : > { %v1837_v14 = vrot.slane %v1836_v6, 4  ;;  %v1860_v61 = vor.u32 %v1859_v1, %v1856_v47  ;;  %v1869_v29 = vrot.slane %v1867_v22, 4  ;;  %v1873_v16 = vshll.u32 %v364_v32, 16 }
  0x3a   : > { %11395 = vst [vmem:[#allocation19_spill] sm:$0xff] %v9081_v3  ;;  %7836 = vmatmul.mubr.msk.bf16.gmra.mrb[8].mxu0 %vm474_vm1, %v9081_v3  ;;  %v1846_v15 = vor.u32 %v1845_v44, %v1841_v12  ;;  %v1865_v17 = vrot.slane %v1863_v5, 5  ;;  %v9091_v31 = vcombine.low %v368_v2, %v369_v45  ;;  %v1902_v49 = vshrl.u32 %v368_v2, 16  ;;  %v367_v44 = vld [vmem:[%s8869_s10 + $0x74] sm:$0x1] }
  0x3b   : > { %v1842_v40 = vsel %vm8964_vm4, %v1837_v14, %v1841_v12  ;;  %v1861_v56 = vrot.slane %v1860_v61, 4  ;;  %v1875_v57 = vrot.slane %v1873_v16, 5  ;;  %v1905_v58 = vshll.u32 %v368_v2, 16 }
  0x3c   : > { %11396 = vst [vmem:[#allocation20_spill] sm:$0xff] %v9091_v31  ;;  %v1847_v60 = vrot.slane %v1846_v15, 4  ;;  %v1870_v22 = vor.u32 %v1869_v29, %v1865_v17  ;;  %7541 = vmatprep.mubr.msk.bf16.mxu1 %vm474_vm1, %v9091_v31  ;;  %v1915_v36 = vshrl.u32 %v369_v45, 16  ;;  %v9099_v33 = vcombine.low %v9084_v51, %v9087_v20  ;;  %v370_v29 = vld [vmem:[%s8869_s10 + $0x80] sm:$0x1] }
  0x3d   : > { %v1866_v62 = vsel %vm8964_vm4, %v1861_v56, %v1865_v17  ;;  %v1926_v32 = vshrl.u32 %v9084_v51, 16  ;;  %v1929_v63 = vshll.u32 %v9084_v51, 16  ;;  %v1939_v6 = vshrl.u32 %v9087_v20, 16  ;;  %v374_v56 = vld [vmem:[%s8869_s10 + $0x90] sm:$0xf] }
  0x3e   : > { %11397 = vst [vmem:[#allocation21_spill] sm:$0xff] %v9099_v33  ;;  %v1852_v47 = vsel %vm8964_vm4, %v1847_v60, %v1851_v13  ;;  %v1871_v1 = vrot.slane %v1870_v22, 4  ;;  %v1880_v2 = vrot.slane %v1878_v52, 4  ;;  %v1883_v12 = vrot.slane %v1881_v54, 5  ;;  %v375_v60 = vld [vmem:[%s8869_s10 + $0x94] sm:$0xf] }
  0x3f   : > { %7542 = vmatmul.mubr.msk.bf16.gmra.mrb[20].mxu1 %vm474_vm1, %v9099_v33  ;;  %v9111_v5 = vcombine.low %v1842_v40, %v1852_v47  ;;  %v1887_v14 = vshll.u32 %v9051_v9, 16  ;;  %v1893_v61 = vrot.slane %v1891_v8, 4  ;;  %v1897_v51 = vshll.u32 %v367_v44, 16  ;;  %v9124_v8 = vld [vmem:[%s8869_s10 + $0x9c] sm:$0xf] }
  0x40   : > { %v1876_v16 = vsel %vm8964_vm4, %v1871_v1, %v1875_v57  ;;  %v1884_v15 = vor.u32 %v1883_v12, %v1880_v2  ;;  %v1904_v13 = vrot.slane %v1902_v49, 4  ;;  %v1907_v17 = vrot.slane %v1905_v58, 5  ;;  %v9127_v1 = vld [vmem:[%s8869_s10 + $0xa0] sm:$0xf]  ;;  %v9318_v33 = vld [vmem:[%s9191_s17 + $0x30] sm:$0xf] }
  0x41   : > { %11398 = vst [vmem:[#allocation22_spill] sm:$0xff] %v9111_v5  ;;  %7839 = vmatprep.mubr.msk.bf16.mxu0 %vm474_vm1, %v9111_v5  ;;  %v9121_v52 = vcombine.low %v1866_v62, %v1876_v16  ;;  %v1889_v54 = vrot.slane %v1887_v14, 5  ;;  %v1899_v40 = vrot.slane %v1897_v51, 5  ;;  %v1911_v9 = vshll.u32 %v369_v45, 16  ;;  %v9438_v5 = vld [vmem:[%s9191_s17 + $0x6c] sm:$0xf] }
  0x42   : > { %v1885_v22 = vrot.slane %v1884_v15, 4  ;;  %v1908_v44 = vor.u32 %v1907_v17, %v1904_v13  ;;  %v1917_v47 = vrot.slane %v1915_v36, 4  ;;  %v1921_v57 = vshll.u32 %v370_v29, 16  ;;  %v373_v15 = vld [vmem:[%s8869_s10 + $0x8c] sm:$0x1]  ;;  %11425 = vst [vmem:[#allocation47_spill] sm:$0xff] %v9438_v5 }
  0x43   : > { %11399 = vst [vmem:[#allocation23_spill] sm:$0xff] %v9121_v52  ;;  %7840 = vmatmul.mubr.msk.bf16.gmra.mrb[12].mxu0 %vm474_vm1, %v9121_v52  ;;  %v1894_v49 = vor.u32 %v1893_v61, %v1889_v54  ;;  %v1913_v58 = vrot.slane %v1911_v9, 5  ;;  %v9131_v2 = vcombine.low %v374_v56, %v375_v60  ;;  %v1950_v62 = vshrl.u32 %v374_v56, 16 }
  0x44   : > { %v1890_v45 = vsel %vm8964_vm4, %v1885_v22, %v1889_v54  ;;  %v1909_v12 = vrot.slane %v1908_v44, 4  ;;  %v1923_v14 = vrot.slane %v1921_v57, 5  ;;  %v1953_v51 = vshll.u32 %v374_v56, 16 }
  0x45   : > { %11400 = vst [vmem:[#allocation24_spill] sm:$0xff] %v9131_v2  ;;  %v1895_v16 = vrot.slane %v1894_v49, 4  ;;  %v1918_v36 = vor.u32 %v1917_v47, %v1913_v58  ;;  %7545 = vmatprep.mubr.msk.bf16.mxu1 %vm474_vm1, %v9131_v2  ;;  %v1963_v29 = vshrl.u32 %v375_v60, 16  ;;  %v9139_v61 = vcombine.low %v9124_v8, %v9127_v1 }
  0x46   : > { %v1914_v13 = vsel %vm8964_vm4, %v1909_v12, %v1913_v58  ;;  %v1974_v17 = vshrl.u32 %v9124_v8, 16  ;;  %v1977_v54 = vshll.u32 %v9124_v8, 16  ;;  %v1987_v56 = vshrl.u32 %v9127_v1, 16  ;;  %v376_v12 = vld [vmem:[%s8869_s10 + $0x98] sm:$0x1] }
  0x47   : > { %11401 = vst [vmem:[#allocation25_spill] sm:$0xff] %v9139_v61  ;;  %v1900_v9 = vsel %vm8964_vm4, %v1895_v16, %v1899_v40  ;;  %v1919_v22 = vrot.slane %v1918_v36, 4  ;;  %7546 = vmatmul.mubr.msk.bf16.gmra.mrb[24].mxu1 %vm474_vm1, %v9139_v61  ;;  %v1928_v44 = vrot.slane %v1926_v32, 4  ;;  %v1931_v47 = vrot.slane %v1929_v63, 5  ;;  %v380_v36 = vld [vmem:[%s8869_s10 + $0xa8] sm:$0xf] }
  0x48   : > { %v9151_v57 = vcombine.low %v1890_v45, %v1900_v9  ;;  %v1935_v49 = vshll.u32 %v9087_v20, 16  ;;  %v1941_v58 = vrot.slane %v1939_v6, 4  ;;  %v1945_v8 = vshll.u32 %v373_v15, 16  ;;  %v9164_v6 = vld [vmem:[%s8869_s10 + $0xb4] sm:$0xf] }
  0x49   : > { %v1924_v53 = vsel %vm8964_vm4, %v1919_v22, %v1923_v14  ;;  %v1932_v4 = vor.u32 %v1931_v47, %v1928_v44  ;;  %v1952_v40 = vrot.slane %v1950_v62, 4  ;;  %v1955_v16 = vrot.slane %v1953_v51, 5  ;;  %v9167_v22 = vld [vmem:[%s8869_s10 + $0xb8] sm:$0xf] }
  0x4a   : > { %11402 = vst [vmem:[#allocation26_spill] sm:$0xff] %v9151_v57  ;;  %7843 = vmatprep.mubr.msk.bf16.mxu0 %vm474_vm1, %v9151_v57  ;;  %v9161_v32 = vcombine.low %v1914_v13, %v1924_v53  ;;  %v1937_v63 = vrot.slane %v1935_v49, 5  ;;  %v1947_v45 = vrot.slane %v1945_v8, 5  ;;  %v1959_v20 = vshll.u32 %v375_v60, 16 }
  0x4b   : > { %v1933_v15 = vrot.slane %v1932_v4, 4  ;;  %v1956_v9 = vor.u32 %v1955_v16, %v1952_v40  ;;  %v1965_v35 = vrot.slane %v1963_v29, 4  ;;  %v1969_v14 = vshll.u32 %v376_v12, 16  ;;  %v379_v12 = vld [vmem:[%s8869_s10 + $0xa4] sm:$0x1] }
  0x4c   : > { %11403 = vst [vmem:[#allocation27_spill] sm:$0xff] %v9161_v32  ;;  %7844 = vmatmul.mubr.msk.bf16.gmra.mrb[16].mxu0 %vm474_vm1, %v9161_v32  ;;  %v1942_v62 = vor.u32 %v1941_v58, %v1937_v63  ;;  %v1961_v51 = vrot.slane %v1959_v20, 5  ;;  %v9171_v44 = vcombine.low %v380_v36, %v381_v34  ;;  %v1998_v53 = vshrl.u32 %v380_v36, 16 }
  0x4d   : > { %v1938_v60 = vsel %vm8964_vm4, %v1933_v15, %v1937_v63  ;;  %v1957_v13 = vrot.slane %v1956_v9, 4  ;;  %v1971_v4 = vrot.slane %v1969_v14, 5  ;;  %v2001_v47 = vshll.u32 %v380_v36, 16 }
  0x4e   : > { %11404 = vst [vmem:[#allocation28_spill] sm:$0xff] %v9171_v44  ;;  %v1943_v29 = vrot.slane %v1942_v62, 4  ;;  %v1966_v49 = vor.u32 %v1965_v35, %v1961_v51  ;;  %7549 = vmatprep.mubr.msk.bf16.mxu1 %vm474_vm1, %v9171_v44  ;;  %v2011_v8 = vshrl.u32 %v381_v34, 16  ;;  %v9179_v58 = vcombine.low %v9164_v6, %v9167_v22 }
  0x4f   : > { %v1962_v40 = vsel %vm8964_vm4, %v1957_v13, %v1961_v51  ;;  %v2022_v16 = vshrl.u32 %v9164_v6, 16  ;;  %v2025_v63 = vshll.u32 %v9164_v6, 16  ;;  %v2035_v36 = vshrl.u32 %v9167_v22, 16  ;;  %v382_v13 = vld [vmem:[%s8869_s10 + $0xb0] sm:$0x1] }
  0x50   : > { %11405 = vst [vmem:[#allocation29_spill] sm:$0xff] %v9179_v58  ;;  %v1948_v35 = vsel %vm8964_vm4, %v1943_v29, %v1947_v45  ;;  %v1967_v20 = vrot.slane %v1966_v49, 4  ;;  %7550 = vmatmul.mubr.msk.bf16.gmra.mrb[28].mxu1 %vm474_vm1, %v9179_v58  ;;  %v1976_v15 = vrot.slane %v1974_v17, 4  ;;  %v1979_v9 = vrot.slane %v1977_v54, 5  ;;  %v9204_v49 = vld [vmem:[%s9191_s17] sm:$0xf] }
  0x51   : > { %v9197_v14 = vcombine.low %v1938_v60, %v1948_v35  ;;  %v1983_v6 = vshll.u32 %v9127_v1, 16  ;;  %v1989_v62 = vrot.slane %v1987_v56, 4  ;;  %v1993_v51 = vshll.u32 %v379_v12, 16  ;;  %v9207_v58 = vld [vmem:[%s9191_s17 + $0x4] sm:$0xf] }
  0x52   : > { %v1972_v18 = vsel %vm8964_vm4, %v1967_v20, %v1971_v4  ;;  %v1980_v44 = vor.u32 %v1979_v9, %v1976_v15  ;;  %v2000_v45 = vrot.slane %v1998_v53, 4  ;;  %v2003_v29 = vrot.slane %v2001_v47, 5  ;;  %v9214_v60 = vld [vmem:[%s9191_s17 + $0xc] sm:$0xf]  ;;  %v9217_v53 = vld [vmem:[%s9191_s17 + $0x10] sm:$0xf] }
  0x53   : > { %11406 = vst [vmem:[#allocation30_spill] sm:$0xff] %v9197_v14  ;;  %7847 = vmatprep.mubr.msk.bf16.mxu0 %vm474_vm1, %v9197_v14  ;;  %v9211_v17 = vcombine.low %v1962_v40, %v1972_v18  ;;  %v1985_v1 = vrot.slane %v1983_v6, 5  ;;  %v1995_v54 = vrot.slane %v1993_v51, 5  ;;  %v2007_v56 = vshll.u32 %v381_v34, 16  ;;  %v9253_v40 = vld [vmem:[%s9191_s17 + $0x18] sm:$0xf] }
  0x54   : > { %v1981_v12 = vrot.slane %v1980_v44, 4  ;;  %v2004_v4 = vor.u32 %v2003_v29, %v2000_v45  ;;  %v2013_v35 = vrot.slane %v2011_v8, 4  ;;  %v2017_v20 = vshll.u32 %v382_v13, 16  ;;  %v385_v45 = vld [vmem:[%s8869_s10 + $0xbc] sm:$0x1] }
  0x55   : > { %11407 = vst [vmem:[#allocation31_spill] sm:$0xff] %v9211_v17  ;;  %7848 = vmatmul.mubr.msk.bf16.gmra.mrb[20].mxu0 %vm474_vm1, %v9211_v17  ;;  %v1990_v47 = vor.u32 %v1989_v62, %v1985_v1  ;;  %v2009_v15 = vrot.slane %v2007_v56, 5  ;;  %v6650_v18 = vcombine.low %v9204_v49, %v9207_v58  ;;  %v9231_v13 = vcombine.low %v9214_v60, %v9217_v53  ;;  %v387_v62 = vld [vmem:[%s8869_s10 + $0xc4] sm:$0xf] }
  0x56   : > { %v1986_v34 = vsel %vm8964_vm4, %v1981_v12, %v1985_v1  ;;  %v2005_v44 = vrot.slane %v2004_v4, 4  ;;  %v2019_v8 = vrot.slane %v2017_v20, 5  ;;  %v386_v4 = vld [vmem:[%s8869_s10 + $0xc0] sm:$0xf]  ;;  %v2037_v56 = vrot.slane %v2035_v36, 4 }
  0x57   : > { %v1991_v6 = vrot.slane %v1990_v47, 4  ;;  %v2014_v51 = vor.u32 %v2013_v35, %v2009_v15  ;;  %7555 = vmatprep.mubr.msk.bf16.mxu1 %vm474_vm1, %v6650_v18  ;;  %11408 = vst [vmem:[#allocation32_spill] sm:$0xff] %v9231_v13  ;;  %v2024_v47 = vrot.slane %v2022_v16, 4  ;;  %v2027_v18 = vrot.slane %v2025_v63, 5  ;;  %v9429_v14 = vld [vmem:[%s9191_s17 + $0x64] sm:$0xf] }
  0x58   : > { %v2010_v29 = vsel %vm8964_vm4, %v2005_v44, %v2009_v15  ;;  %7556 = vmatmul.mubr.msk.bf16.vlgmr.msra.gmra.mrb[0].mxu1 %vm474_vm1, %v9231_v13  ;;  %v2031_v44 = vshll.u32 %v9167_v22, 16  ;;  %v2041_v1 = vshll.u32 %v385_v45, 16  ;;  %v3830_v9 = vshll.u32 %v386_v4, 16 }
  0x59   : > { %v1996_v35 = vsel %vm8964_vm4, %v1991_v6, %v1995_v54  ;;  %v2015_v20 = vrot.slane %v2014_v51, 4  ;;  %7588 = vmatpush3.bf16.msra.mxu1 %v8893_v21  ;;  %v2028_v54 = vor.u32 %v2027_v18, %v2024_v47  ;;  %v388_v6 = vld [vmem:[%s8869_s10 + $0xc8] sm:$0x1]  ;;  %v3827_v51 = vshrl.u32 %v386_v4, 16  ;;  %v9262_v21 = vld [vmem:[%s11213_s3 + $0x2] sm:$0x3] }
  0x5a   : > { %v9245_v15 = vcombine.low %v1986_v34, %v1996_v35  ;;  %v2033_v22 = vrot.slane %v2031_v44, 5  ;;  %v2043_v63 = vrot.slane %v2041_v1, 5  ;;  %v3836_v36 = vshll.u32 %v387_v62, 16  ;;  %v9265_v35 = vld [vmem:[%s9191_s17 + $0x1c] sm:$0xf]  ;;  %8678 = vmatprep.subr.msk.bf16.mxu1 %vm523_vm0, %v9262_v21 }
  0x5b   : > { %v2020_v12 = vsel %vm8964_vm4, %v2015_v20, %v2019_v8  ;;  %v2029_v34 = vrot.slane %v2028_v54, 4  ;;  %v3829_v8 = vrot.slane %v3827_v51, 4  ;;  %v3832_v45 = vrot.slane %v3830_v9, 5  ;;  %v9279_v44 = vld [vmem:[%s9191_s17 + $0x24] sm:$0xf] }
  0x5c   : > { %11409 = vst [vmem:[#allocation33_spill] sm:$0xff] %v9245_v15  ;;  %7851 = vmatprep.mubr.msk.bf16.mxu0 %vm474_vm1, %v9245_v15  ;;  %v9257_v16 = vcombine.low %v2010_v29, %v2020_v12  ;;  %v3840_v4 = vshrl.u32 %v387_v62, 16  ;;  %v2038_v29 = vor.u32 %v2037_v56, %v2033_v22  ;;  %v3838_v1 = vrot.slane %v3836_v36, 5  ;;  %v9282_v54 = vld [vmem:[%s9191_s17 + $0x28] sm:$0xf] }
  0x5d   : > { %v3846_v12 = vshll.u32 %v388_v6, 16  ;;  %v9273_v20 = vcombine.low %v9253_v40, %v9265_v35  ;;  %v2034_v47 = vsel %vm8964_vm4, %v2029_v34, %v2033_v22  ;;  %v3833_v9 = vor.u32 %v3832_v45, %v3829_v8  ;;  %v289_v18 = vld [vmem:[%s9191_s17 + $0x14] sm:$0x1]  ;;  %v9331_v6 = vld [vmem:[%s9191_s17 + $0x40] sm:$0xf] }
  0x5e   : > { %11410 = vst [vmem:[#allocation34_spill] sm:$0xff] %v9257_v16  ;;  %7852 = vmatmul.mubr.msk.bf16.gmra.mrb[24].mxu0 %vm474_vm1, %v9257_v16  ;;  %v3842_v62 = vrot.slane %v3840_v4, 4  ;;  %v2039_v56 = vrot.slane %v2038_v29, 4  ;;  %v6750_v8 = vrot.slane %v9253_v40, 9  ;;  %v2374_v45 = vrot.slane %v9265_v35, 5 }
  0x5f   : > { %11411 = vst [vmem:[#allocation35_spill] sm:$0xff] %v9273_v20  ;;  %v3848_v51 = vrot.slane %v3846_v12, 5  ;;  %7559 = vmatprep.mubr.msk.bf16.mxu1 %vm474_vm1, %v9273_v20  ;;  %v3834_v22 = vrot.slane %v3833_v9, 4  ;;  %v9294_v29 = vcombine.low %v9279_v44, %v9282_v54  ;;  %v11413_v9 = vmov 0 }
  0x60   : > { %v3843_v34 = vor.u32 %v3842_v62, %v3838_v1  ;;  %v2044_v4 = vsel %vm8964_vm4, %v2039_v56, %v2043_v63  ;;  %v11414_v9 = vsel %vm9301_vm7, 4294967295, %v11413_v9  ;;  %v9306_v62 = vld [vmem:[%s9191_s17 + $0x20] sm:$0x1]  ;;  %v2376_v12 = vrot.slane %v2374_v45, 4 }
  0x61   : > { %11412 = vst [vmem:[#allocation36_spill] sm:$0xff] %v9294_v29  ;;  %11415 = vst [vmem:[#allocation37_spill] sm:$0xff] %v11414_v9  ;;  %v9308_v63 = vcombine.low %v2034_v47, %v2044_v4  ;;  %v3839_v56 = vsel %vm8964_vm4, %v3834_v22, %v3838_v1  ;;  %7560 = vmatmul.mubr.msk.bf16.gmra.mrb[4].mxu1 %vm474_vm1, %v9294_v29  ;;  %v1027_v13 = vshll.u32 %v289_v18, 16  ;;  %v6749_v61 = vrot.slane %v9214_v60, 9  ;;  %v9328_v4 = vld [vmem:[%s9191_s17 + $0x3c] sm:$0xf] }
  0x62   : > { %v3844_v36 = vrot.slane %v3843_v34, 4  ;;  %v2367_v2 = vrot.slane %v9217_v53, 5  ;;  %v2370_v47 = vrot.slane %v289_v18, 5  ;;  %v2375_v22 = vsel %vm9301_vm7, %v6750_v8, %v2374_v45  ;;  %v9340_v18 = vld [vmem:[%s9191_s17 + $0x34] sm:$0xf] }
  0x63   : > { %11416 = vst [vmem:[#allocation38_spill] sm:$0xff] %v9308_v63  ;;  %7855 = vmatprep.mubr.msk.bf16.mxu0 %vm474_vm1, %v9308_v63  ;;  %v2377_v34 = vrot.slane %v9306_v62, 5  ;;  %v9335_v48 = vrot.slane %v1027_v13, 5  ;;  %v9346_v45 = vcombine.low %v9318_v33, %v9340_v18  ;;  %v9368_v13 = vld [vmem:[%s9191_s17 + $0x48] sm:$0xf]  ;;  %v6753_v17 = vrot.slane %v9328_v4, 9 }
  0x64   : > { %v3849_v1 = vsel %vm8964_vm4, %v3844_v36, %v3848_v51  ;;  %v2368_v51 = vsel %vm9301_vm7, %v6749_v61, %v2367_v2  ;;  %v2369_v36 = vrot.slane %v2367_v2, 4  ;;  %v9406_v63 = vld [vmem:[%s9191_s17 + $0x44] sm:$0x1]  ;;  %v2395_v57 = vrot.slane %v9331_v6, 5  ;;  %v9536_v29 = vld [vmem:[%s9191_s17 + $0x80] sm:$0x1] }
  0x65   : > { %v9333_v31 = vcombine.low %v3839_v56, %v3849_v1  ;;  %v2378_v8 = vsel %vm9301_vm7, %v2376_v12, %v2377_v34  ;;  %11418 = vst [vmem:[#allocation40_spill] sm:$0xff] %v9346_v45  ;;  %v9351_v1 = vld [vmem:[%s9191_s17 + $0x2c] sm:$0x1]  ;;  %v9365_v34 = vcombine.low %v9328_v4, %v9331_v6  ;;  %7563 = vmatprep.mubr.msk.bf16.mxu1 %vm474_vm1, %v9346_v45  ;;  %v6751_v12 = vrot.slane %v9279_v44, 9 }
  0x66   : > { %v2371_v2 = vsel %vm9301_vm7, %v2369_v36, %v2370_v47  ;;  %v9360_v61 = vcombine.low %v2375_v22, %v2378_v8  ;;  %v9371_v56 = vld [vmem:[%s9191_s17 + $0x4c] sm:$0xf]  ;;  %v9381_v8 = vld [vmem:[%s9191_s17 + $0x54] sm:$0xf]  ;;  %v2384_v10 = vrot.slane %v9351_v1, 5  ;;  %v2388_v22 = vrot.slane %v9340_v18, 5 }
  0x67   : > { %11417 = vst [vmem:[#allocation39_spill] sm:$0xff] %v9333_v31  ;;  %7856 = vmatmul.mubr.msk.bf16.gmra.mrb[28].mxu0 %vm474_vm1, %v9333_v31  ;;  %11420 = vst [vmem:[#allocation42_spill] sm:$0xff] %v9365_v34  ;;  %v9373_v30 = vcombine.low %v2368_v51, %v2371_v2  ;;  %v2381_v31 = vrot.slane %v9282_v54, 5  ;;  %v6752_v51 = vrot.slane %v9318_v33, 9  ;;  %v9388_v2 = vld [vmem:[%s9191_s17 + $0x58] sm:$0xf]  ;;  %v9396_v47 = vcombine.low %v9368_v13, %v9371_v56 }
  0x68   : > { %11419 = vst [vmem:[#allocation41_spill] sm:$0xff] %v9360_v61  ;;  %v2391_v36 = vrot.slane %v9354_v0, 5  ;;  %v2390_v15 = vrot.slane %v2388_v22, 4  ;;  %v9414_v23 = vcombine.low %v9381_v8, %v9388_v2  ;;  %v2398_v52 = vrot.slane %v9406_v63, 5  ;;  %11440 = vst [vmem:[#allocation62_spill] sm:$0xff] %v9536_v29 }
  0x69   : > { %11421 = vst [vmem:[#allocation43_spill] sm:$0xff] %v9373_v30  ;;  %7861 = vmatprep.mubr.msk.bf16.mxu0 %vm474_vm1, %v9373_v30  ;;  %11422 = vst [vmem:[#allocation44_spill] sm:$0xff] %v9396_v47  ;;  %7564 = vmatmul.mubr.msk.bf16.gmra.mrb[8].mxu1 %vm474_vm1, %v9365_v34  ;;  %v2382_v11 = vsel %vm9301_vm7, %v6751_v12, %v2381_v31  ;;  %v2383_v38 = vrot.slane %v2381_v31, 4  ;;  %v2389_v16 = vsel %vm9301_vm7, %v6752_v51, %v2388_v22  ;;  %v9418_v12 = vld [vmem:[%s9191_s17 + $0x50] sm:$0x1] }
  0x6a   : > { %7567 = vmatprep.mubr.msk.bf16.mxu1 %vm474_vm1, %v9396_v47  ;;  %11423 = vst [vmem:[#allocation45_spill] sm:$0xff] %v9414_v23  ;;  %v2392_v31 = vsel %vm9301_vm7, %v2390_v15, %v2391_v36  ;;  %v2405_v15 = vrot.slane %v9418_v12, 5  ;;  %v9453_v36 = vld [vmem:[%s9191_s17 + $0x70] sm:$0xf]  ;;  %v2396_v22 = vsel %vm9301_vm7, %v6753_v17, %v2395_v57  ;;  %v9470_v34 = vld [vmem:[%s9191_s17 + $0x5c] sm:$0x1] }
  0x6b   : > { %v2385_v30 = vsel %vm9301_vm7, %v2383_v38, %v2384_v10  ;;  %v9443_v38 = vld [vmem:[%s11212_s2 + $0xc] sm:$0x3]  ;;  %v6754_v10 = vrot.slane %v9368_v13, 9  ;;  %11427 = vst [vmem:[#allocation49_spill] sm:$0xff] %v9453_v36  ;;  %v9478_v17 = vcombine.low %v9438_v5, %v9453_v36  ;;  %v6755_v3 = vrot.slane %v9381_v8, 9 }
  0x6c   : > { %v9431_v32 = vcombine.low %v2382_v11, %v2385_v30  ;;  %v9447_v11 = vcombine.low %v2389_v16, %v2392_v31  ;;  %v2402_v30 = vrot.slane %v9371_v56, 5  ;;  %v2397_v16 = vrot.slane %v2395_v57, 4 }
  0x6d   : > { %v9462_v31 = vcombine.low %v9421_v28, %v9429_v14  ;;  %11429 = vst [vmem:[#allocation51_spill] sm:$0xff] %v9478_v17  ;;  %v2423_v46 = vrot.slane %v9453_v36, 5  ;;  %v9610_v36 = vld [vmem:[%s9191_s17 + $0xb4] sm:$0xf]  ;;  %vm6071_vm11 = vsmask.f32 4368 }
  0x6e   : > { %11424 = vst [vmem:[#allocation46_spill] sm:$0xff] %v9431_v32  ;;  %11426 = vst [vmem:[#allocation48_spill] sm:$0xff] %v9447_v11  ;;  %v2404_v47 = vrot.slane %v2402_v30, 4  ;;  %v2399_v57 = vsel %vm9301_vm7, %v2397_v16, %v2398_v52  ;;  %v2416_v16 = vrot.slane %v9429_v14, 5 }
  0x6f   : > { %7862 = vmatmul.mubr.msk.bf16.vlgmr.msra.gmra.mrb[0].mxu0 %vm474_vm1, %v9360_v61  ;;  %11428 = vst [vmem:[#allocation50_spill] sm:$0xff] %v9462_v31  ;;  %v2403_v61 = vsel %vm9301_vm7, %v6754_v10, %v2402_v30  ;;  %v9490_v51 = vcombine.low %v2396_v22, %v2399_v57  ;;  %v9497_v10 = vld [vmem:[%s9191_s17 + $0x7c] sm:$0xf]  ;;  %v9500_v30 = vld [vmem:[%s9191_s17 + $0x84] sm:$0xf]  ;;  %v2409_v22 = vrot.slane %v9388_v2, 5  ;;  %vm10816_vm14 = vmor %vm6070_vm10, %vm6071_vm11 }
  0x70   : > { %7894 = vmatpush3.bf16.msra.mxu0 %v8903_v26  ;;  %7865 = vmatprep.mubr.msk.bf16.mxu0 %vm474_vm1, %v9431_v32  ;;  %v9483_v26 = vld [vmem:[%s9191_s17 + $0x68] sm:$0x1]  ;;  %v9486_v32 = vld [vmem:[%s9191_s17 + $0x78] sm:$0xf]  ;;  %v2406_v52 = vsel %vm9301_vm7, %v2404_v47, %v2405_v15  ;;  %11433 = vst [vmem:[#allocation55_spill] sm:$0xff] %v9497_v10  ;;  %11434 = vst [vmem:[#allocation56_spill] sm:$0xff] %v9500_v30 }
  0x71   : > { %8687 = vmatprep.subr.msk.bf16.mxu0 %vm523_vm0, %v9443_v38  ;;  %11430 = vst [vmem:[#allocation52_spill] sm:$0xff] %v9483_v26  ;;  %11431 = vst [vmem:[#allocation53_spill] sm:$0xff] %v9486_v32  ;;  %7568 = vmatmul.mubr.msk.bf16.gmra.mrb[12].mxu1 %vm474_vm1, %v9414_v23  ;;  %v9502_v27 = vcombine.low %v2403_v61, %v2406_v52  ;;  %v2412_v57 = vrot.slane %v9470_v34, 5  ;;  %v6756_v47 = vrot.slane %v9421_v28, 9  ;;  %v9510_v15 = vld [vmem:[%s9191_s17 + $0x88] sm:$0xf] }
  0x72   : > { %11432 = vst [vmem:[#allocation54_spill] sm:$0xff] %v9490_v51  ;;  %7571 = vmatprep.mubr.msk.bf16.mxu1 %vm474_vm1, %v9462_v31  ;;  %11436 = vst [vmem:[#allocation58_spill] sm:$0xff] %v9510_v15  ;;  %v2419_v23 = vrot.slane %v9483_v26, 5  ;;  %v9516_v61 = vcombine.low %v9486_v32, %v9497_v10  ;;  %v2410_v31 = vsel %vm9301_vm7, %v6755_v3, %v2409_v22  ;;  %v2411_v45 = vrot.slane %v2409_v22, 4 }
  0x73   : > { %11435 = vst [vmem:[#allocation57_spill] sm:$0xff] %v9502_v27  ;;  %v2417_v20 = vsel %vm9301_vm7, %v6756_v47, %v2416_v16  ;;  %v2418_v52 = vrot.slane %v2416_v16, 4  ;;  %v9532_v3 = vcombine.low %v9500_v30, %v9510_v15  ;;  %v6757_v16 = vrot.slane %v9438_v5, 9  ;;  %v9646_v5 = vld [vmem:[%s9191_s17 + $0xb0] sm:$0x1] }
  0x74   : > { %11437 = vst [vmem:[#allocation59_spill] sm:$0xff] %v9516_v61  ;;  %v2413_v59 = vsel %vm9301_vm7, %v2411_v45, %v2412_v57  ;;  %v9558_v45 = vld [vmem:[%s9191_s17 + $0x9c] sm:$0xf]  ;;  %v6758_v47 = vrot.slane %v9486_v32, 9  ;;  %v9595_v32 = vld [vmem:[%s9191_s17 + $0x98] sm:$0x1] }
  0x75   : > { %11439 = vst [vmem:[#allocation61_spill] sm:$0xff] %v9532_v3  ;;  %v9548_v37 = vcombine.low %v2410_v31, %v2413_v59  ;;  %v2420_v22 = vsel %vm9301_vm7, %v2418_v52, %v2419_v23  ;;  %v2433_v59 = vrot.slane %v9536_v29, 5  ;;  %v9566_v31 = vld [vmem:[%s9191_s17 + $0xa0] sm:$0xf]  ;;  %v2424_v23 = vsel %vm9301_vm7, %v6757_v16, %v2423_v46  ;;  %11449 = vst [vmem:[#allocation71_spill] sm:$0xff] %v9595_v32  ;;  %v11583_v9 = vld [vmem:[#allocation48_spill] sm:$0xff] }
  0x76   : > { %v9560_v57 = vcombine.low %v2417_v20, %v2420_v22  ;;  %11445 = vst [vmem:[#allocation67_spill] sm:$0xff] %v9566_v31  ;;  %v2425_v52 = vrot.slane %v2423_v46, 4  ;;  %v9574_v20 = vcombine.low %v9546_v39, %v9555_v42  ;;  %v9584_v46 = vld [vmem:[%s9191_s17 + $0x8c] sm:$0x1]  ;;  %v9590_v22 = vcombine.low %v9558_v45, %v9566_v31  ;;  %11456 = vst [vmem:[#allocation78_spill] sm:$0xff] %v9646_v5 }
  0x77   : > { %7866 = vmatmul.mubr.msk.bf16.gmra.mrb[4].mxu0 %vm474_vm1, %v9447_v11  ;;  %11442 = vst [vmem:[#allocation64_spill] sm:$0xff] %v9548_v37  ;;  %v2430_v11 = vrot.slane %v9497_v10, 5  ;;  %11447 = vst [vmem:[#allocation69_spill] sm:$0xff] %v9584_v46 }
  0x78   : > { %7869 = vmatprep.mubr.msk.bf16.mxu0 %vm474_vm1, %v9490_v51  ;;  %v2426_v51 = vrot.slane %v9524_v55, 5  ;;  %11444 = vst [vmem:[#allocation66_spill] sm:$0xff] %v9560_v57  ;;  %11446 = vst [vmem:[#allocation68_spill] sm:$0xff] %v9574_v20  ;;  %v9607_v55 = vld [vmem:[%s9191_s17 + $0xac] sm:$0xf] }
  0x79   : > { %7572 = vmatmul.mubr.msk.bf16.gmra.mrb[16].mxu1 %vm474_vm1, %v9478_v17  ;;  %v2431_v24 = vsel %vm9301_vm7, %v6758_v47, %v2430_v11  ;;  %v2432_v17 = vrot.slane %v2430_v11, 4  ;;  %11448 = vst [vmem:[#allocation70_spill] sm:$0xff] %v9590_v22  ;;  %v9598_v11 = vld [vmem:[%s9191_s17 + $0xa8] sm:$0xf]  ;;  %11452 = vst [vmem:[#allocation74_spill] sm:$0xff] %v9607_v55 }
  0x7a   : > { %7575 = vmatprep.mubr.msk.bf16.mxu1 %vm474_vm1, %v9516_v61  ;;  %v2427_v10 = vsel %vm9301_vm7, %v2425_v52, %v2426_v51  ;;  %11450 = vst [vmem:[#allocation72_spill] sm:$0xff] %v9598_v11  ;;  %v6759_v52 = vrot.slane %v9500_v30, 9  ;;  %v2444_v51 = vrot.slane %v9555_v42, 5  ;;  %v2447_v61 = vrot.slane %v9595_v32, 5  ;;  %v9636_v30 = vld [vmem:[%s9191_s17 + $0xa4] sm:$0x1] }
  0x7b   : > { %v9600_v29 = vcombine.low %v2424_v23, %v2427_v10  ;;  %v2434_v16 = vsel %vm9301_vm7, %v2432_v17, %v2433_v59  ;;  %v2437_v10 = vrot.slane %v9510_v15, 5  ;;  %v2440_v23 = vrot.slane %v9584_v46, 5  ;;  %v9620_v59 = vld [vmem:[%s9191_s17 + $0xb8] sm:$0xf]  ;;  %11455 = vst [vmem:[#allocation77_spill] sm:$0xff] %v9636_v30 }
  0x7c   : > { %v9614_v47 = vcombine.low %v2431_v24, %v2434_v16  ;;  %v6760_v17 = vrot.slane %v9546_v39, 9  ;;  %v9628_v24 = vcombine.low %v9598_v11, %v9607_v55  ;;  %v2446_v32 = vrot.slane %v2444_v51, 4 }
  0x7d   : > { %11451 = vst [vmem:[#allocation73_spill] sm:$0xff] %v9600_v29  ;;  %v2439_v39 = vrot.slane %v2437_v10, 4  ;;  %v9642_v42 = vcombine.low %v9610_v36, %v9620_v59  ;;  %v2451_v46 = vrot.slane %v9566_v31, 5  ;;  %v9701_v31 = vld [vmem:[%s9191_s17 + $0xc0] sm:$0xf] }
  0x7e   : > { %11453 = vst [vmem:[#allocation75_spill] sm:$0xff] %v9614_v47  ;;  %11454 = vst [vmem:[#allocation76_spill] sm:$0xff] %v9628_v24  ;;  %v2448_v16 = vsel %vm9301_vm7, %v2446_v32, %v2447_v61  ;;  %v11459_v32 = vshrl.u32 %v9204_v49, 16 }
  0x7f   : > { %7870 = vmatmul.mubr.msk.bf16.gmra.mrb[8].mxu0 %vm474_vm1, %v9502_v27  ;;  %v2438_v27 = vsel %vm9301_vm7, %v6759_v52, %v2437_v10  ;;  %v2441_v52 = vsel %vm9301_vm7, %v2439_v39, %v2440_v23  ;;  %v6762_v39 = vrot.slane %v9598_v11, 9  ;;  %v2458_v23 = vrot.slane %v9607_v55, 5  ;;  %v9669_v10 = vld [vmem:[%s9191_s17 + $0x8] sm:$0x1] }
  0x80   : > { %7873 = vmatprep.mubr.msk.bf16.mxu0 %vm474_vm1, %v9548_v37  ;;  %v2445_v37 = vsel %vm9301_vm7, %v6760_v17, %v2444_v51  ;;  %v6761_v51 = vrot.slane %v9558_v45, 9  ;;  %v9657_v15 = vcombine.low %v2438_v27, %v2441_v52  ;;  %v2461_v17 = vrot.slane %v9646_v5, 5 }
  0x81   : > { %7576 = vmatmul.mubr.msk.bf16.gmra.mrb[20].mxu1 %vm474_vm1, %v9532_v3  ;;  %v2454_v3 = vrot.slane %v9636_v30, 5  ;;  %v9663_v26 = vcombine.low %v2445_v37, %v2448_v16  ;;  %v2453_v52 = vrot.slane %v2451_v46, 4  ;;  %v986_v61 = vrot.slane %v11459_v32, 4 }
  0x82   : > { %7579 = vmatprep.mubr.msk.bf16.mxu1 %vm474_vm1, %v9574_v20  ;;  %11457 = vst [vmem:[#allocation79_spill] sm:$0xff] %v9657_v15  ;;  %v2452_v27 = vsel %vm9301_vm7, %v6761_v51, %v2451_v46  ;;  %v11460_v20 = vshll.u32 %v9204_v49, 16  ;;  %v2459_v16 = vsel %vm9301_vm7, %v6762_v39, %v2458_v23  ;;  %v2460_v5 = vrot.slane %v2458_v23, 4 }
  0x83   : > { %11458 = vst [vmem:[#allocation80_spill] sm:$0xff] %v9663_v26  ;;  %v993_v55 = vshll.u32 %v9207_v58, 16  ;;  %v11461_v51 = vshrl.u32 %v9207_v58, 16  ;;  %v2455_v49 = vsel %vm9301_vm7, %v2453_v52, %v2454_v3  ;;  %v1003_v32 = vshll.u32 %v9669_v10, 16 }
  0x84   : > { %v989_v37 = vrot.slane %v11460_v20, 5  ;;  %v9691_v39 = vcombine.low %v2452_v27, %v2455_v49  ;;  %v2462_v58 = vsel %vm9301_vm7, %v2460_v5, %v2461_v17  ;;  %v9707_v27 = vld [vmem:[%s9191_s17 + $0xc4] sm:$0xf]  ;;  %v334_v49 = vld [vmem:[%s9191_s17 + $0xc8] sm:$0x1] }
  0x85   : > { %v999_v46 = vrot.slane %v11461_v51, 4  ;;  %v995_v23 = vrot.slane %v993_v55, 5  ;;  %v11464_v51 = vshll.u32 %v9214_v60, 16  ;;  %v9703_v3 = vcombine.low %v2459_v16, %v2462_v58 }
  0x86   : > { %v990_v20 = vor.u32 %v989_v37, %v986_v61  ;;  %11463 = vst [vmem:[#allocation81_spill] sm:$0xff] %v9691_v39  ;;  %v1005_v61 = vrot.slane %v1003_v32, 5  ;;  %v6763_v37 = vrot.slane %v9610_v36, 9  ;;  %v2465_v32 = vrot.slane %v9620_v59, 5 }
  0x87   : > { %7874 = vmatmul.mubr.msk.bf16.gmra.mrb[12].mxu0 %vm474_vm1, %v9560_v57  ;;  %v11462_v57 = vshrl.u32 %v9214_v60, 16  ;;  %v1013_v30 = vrot.slane %v11464_v51, 5  ;;  %11465 = vst [vmem:[#allocation82_spill] sm:$0xff] %v9703_v3  ;;  %v1000_v5 = vor.u32 %v999_v46, %v995_v23  ;;  %v11466_v60 = vshrl.u32 %v9217_v53, 16 }
  0x88   : > { %7877 = vmatprep.mubr.msk.bf16.mxu0 %vm474_vm1, %v9600_v29  ;;  %v9698_v29 = vld [vmem:[%s9191_s17 + $0xbc] sm:$0x1]  ;;  %v991_v52 = vrot.slane %v990_v20, 4 }
  0x89   : > { %v1010_v11 = vrot.slane %v11462_v57, 4  ;;  %v1017_v57 = vshll.u32 %v9217_v53, 16  ;;  %7580 = vmatmul.mubr.msk.bf16.gmra.mrb[24].mxu1 %vm474_vm1, %v9590_v22  ;;  %v1023_v17 = vrot.slane %v11466_v60, 4  ;;  %v2468_v58 = vrot.slane %v9698_v29, 5 }
  0x8a   : > { %7583 = vmatprep.mubr.msk.bf16.mxu1 %vm474_vm1, %v9628_v24  ;;  %v996_v16 = vsel %vm8964_vm4, %v991_v52, %v995_v23  ;;  %v1001_v51 = vrot.slane %v1000_v5, 4  ;;  %v4057_v53 = vrot.slane %v9707_v27, 5  ;;  %v2466_v60 = vsel %vm9301_vm7, %v6763_v37, %v2465_v32 }
  0x8b   : > { %v1014_v55 = vor.u32 %v1013_v30, %v1010_v11  ;;  %v1019_v20 = vrot.slane %v1017_v57, 5  ;;  %v6918_v30 = vrot.slane %v9701_v31, 9  ;;  %v2467_v22 = vrot.slane %v2465_v32, 4 }
  0x8c   : > { %v4060_v24 = vrot.slane %v334_v49, 5  ;;  %v1006_v23 = vsel %vm8964_vm4, %v1001_v51, %v1005_v61  ;;  %v4059_v5 = vrot.slane %v4057_v53, 4  ;;  %v11467_v49 = vshrl.u32 %v9253_v40, 16 }
  0x8d   : > { %v1015_v46 = vrot.slane %v1014_v55, 4  ;;  %v1024_v11 = vor.u32 %v1023_v17, %v1019_v20  ;;  %v4058_v57 = vsel %vm9301_vm7, %v6918_v30, %v4057_v53  ;;  %v6683_v55 = vcombine.low %v996_v16, %v1006_v23 }
  0x8e   : > { %v2469_v37 = vsel %vm9301_vm7, %v2467_v22, %v2468_v58  ;;  %v1034_v32 = vrot.slane %v11467_v49, 4  ;;  %v4061_v61 = vsel %vm9301_vm7, %v4059_v5, %v4060_v24  ;;  %v11470_v22 = vshrl.u32 %v9265_v35, 16 }
  0x8f   : > { %7878 = vmatmul.mubr.msk.bf16.gmra.mrb[16].mxu0 %vm474_vm1, %v9614_v47  ;;  %v1020_v52 = vsel %vm8964_vm4, %v1015_v46, %v1019_v20  ;;  %v1025_v17 = vrot.slane %v1024_v11, 4  ;;  %v9739_v47 = vcombine.low %v2466_v60, %v2469_v37  ;;  %v11468_v20 = vshll.u32 %v9253_v40, 16 }
  0x90   : > { %7881 = vmatprep.mubr.msk.bf16.mxu0 %vm474_vm1, %v9657_v15  ;;  %v1041_v46 = vshll.u32 %v9265_v35, 16  ;;  %v9749_v30 = vcombine.low %v4058_v57, %v4061_v61  ;;  %v1047_v58 = vrot.slane %v11470_v22, 4  ;;  %v1051_v53 = vshll.u32 %v9306_v62, 16 }
  0x91   : > { %v1037_v51 = vrot.slane %v11468_v20, 5  ;;  %v1030_v16 = vsel %vm8964_vm4, %v1025_v17, %v9335_v48  ;;  %7584 = vmatmul.mubr.msk.bf16.gmra.mrb[28].mxu1 %vm474_vm1, %v9642_v42  ;;  %v11472_v60 = vshrl.u32 %v9279_v44, 16  ;;  %v11473_v35 = vshll.u32 %v9279_v44, 16 }
  0x92   : > { %11469 = vst [vmem:[#allocation83_spill] sm:$0xff] %v9749_v30  ;;  %v9756_v24 = vcombine.low %v1020_v52, %v1030_v16  ;;  %v1043_v11 = vrot.slane %v1041_v46, 5  ;;  %7589 = vmatprep.mubr.msk.bf16.mxu1 %vm474_vm1, %v6683_v55  ;;  %v1053_v48 = vrot.slane %v1051_v53, 5  ;;  %v1065_v5 = vshll.u32 %v9282_v54, 16  ;;  %v8740_v46 = vld [vmem:[%s8869_s10 + $0x10] sm:$0xf] }
  0x93   : > { %v1038_v40 = vor.u32 %v1037_v51, %v1034_v32  ;;  %v1058_v23 = vrot.slane %v11472_v60, 4  ;;  %v1061_v57 = vrot.slane %v11473_v35, 5  ;;  %v11474_v62 = vshrl.u32 %v9282_v54, 16  ;;  %v8739_v32 = vld [vmem:[%s8869_s10 + $0xc] sm:$0xf] }
  0x94   : > { %11471 = vst [vmem:[#allocation84_spill] sm:$0xff] %v9756_v24  ;;  %v1048_v52 = vor.u32 %v1047_v58, %v1043_v11  ;;  %v1075_v49 = vshll.u32 %v9351_v1, 16  ;;  %v6798_v61 = vrot.slane %v8739_v32, 9  ;;  %v1067_v51 = vrot.slane %v1065_v5, 5 }
  0x95   : > { %v1071_v17 = vrot.slane %v11474_v62, 4  ;;  %v1039_v37 = vrot.slane %v1038_v40, 4  ;;  %v1062_v20 = vor.u32 %v1061_v57, %v1058_v23  ;;  %v2789_v16 = vrot.slane %v8740_v46, 5 }
  0x96   : > { %v2144_v55 = vsel %vm523_vm0, %v9262_v21, 0  ;;  %v1049_v54 = vrot.slane %v1048_v52, 4  ;;  %v1077_v22 = vrot.slane %v1075_v49, 5  ;;  %v11475_v58 = vrot.slane %v8899_v25, 5 }
  0x97   : > { %7882 = vmatmul.mubr.msk.bf16.gmra.mrb[20].mxu0 %vm474_vm1, %v9663_v26  ;;  %v1044_v44 = vsel %vm8964_vm4, %v1039_v37, %v1043_v11  ;;  %v11476_v1 = vrot.slane %v8887_v19, 9  ;;  %v1063_v40 = vrot.slane %v1062_v20, 4  ;;  %v1072_v21 = vor.u32 %v1071_v17, %v1067_v51 }
  0x98   : > { %7885 = vmatprep.mubr.msk.bf16.mxu0 %vm474_vm1, %v9691_v39  ;;  %v2790_v60 = vsel %vm9301_vm7, %v6798_v61, %v2789_v16  ;;  %v2791_v23 = vrot.slane %v2789_v16, 4  ;;  %v1054_v11 = vsel %vm8964_vm4, %v1049_v54, %v1053_v48  ;;  %v11477_v35 = vrot.slane %v8945_v50, 5 }
  0x99   : > { %v2797_v53 = vsel %vm9301_vm7, %v11476_v1, %v11475_v58  ;;  %v9794_v25 = vsel %vm523_vm0, %v9443_v38, 0  ;;  %v11478_v57 = vshrl.u32 %v9318_v33, 16  ;;  %v9798_v62 = vcombine.low %v1044_v44, %v1054_v11  ;;  %7590 = vmatmul.mubr.msk.bf16.vlgmr.msra.gmra.mrb[0].mxu1 %vm474_vm1, %v9756_v24  ;;  %v11569_v24 = vld [vmem:[#allocation59_spill] sm:$0xff] }
  0x9a   : > { %v2800_v19 = vsel %vm9301_vm7, %v8939_v43, %v11477_v35  ;;  %v1068_v17 = vsel %vm8964_vm4, %v1063_v40, %v1067_v51  ;;  %v1073_v37 = vrot.slane %v1072_v21, 4  ;;  %v11479_v48 = vrot.slane %v8932_v41, 5  ;;  %v9809_v43 = vld [vmem:[%s11212_s2 + $0x4] sm:$0x3]  ;;  %7622 = vmatpush3.bf16.msra.mxu1 %v2144_v55 }
  0x9b   : > { %v1082_v5 = vrot.slane %v11478_v57, 4  ;;  %v9815_v52 = vcombine.low %v2797_v53, %v2800_v19  ;;  %v11480_v49 = vshll.u32 %v9318_v33, 16  ;;  %v1089_v41 = vshll.u32 %v9340_v18, 16  ;;  %7593 = vmatprep.mubr.msk.bf16.mxu1 %vm474_vm1, %v9798_v62  ;;  %8679 = vmatprep.subr.msk.bf16.mxu1 %vm523_vm0, %v9809_v43  ;;  %v8742_v57 = vld [vmem:[%s8869_s10 + $0x28] sm:$0xf] }
  0x9c   : > { %v2793_v50 = vsel %vm9301_vm7, %v2791_v23, %v11479_v48  ;;  %v1078_v61 = vsel %vm8964_vm4, %v1073_v37, %v1077_v22  ;;  %v11481_v20 = vshrl.u32 %v9340_v18, 16  ;;  %v1099_v46 = vshll.u32 %v9354_v0, 16  ;;  %v8741_v23 = vld [vmem:[%s8869_s10 + $0x24] sm:$0xf] }
  0x9d   : > { %v9813_v38 = vcombine.low %v2790_v60, %v2793_v50  ;;  %v1085_v32 = vrot.slane %v11480_v49, 5  ;;  %v11482_v16 = vshrl.u32 %v9328_v4, 16  ;;  %v9829_v33 = vcombine.low %v1068_v17, %v1078_v61  ;;  %v8744_v50 = vld [vmem:[%s8869_s10 + $0x30] sm:$0xf] }
  0x9e   : > { %v1095_v51 = vrot.slane %v11481_v20, 4  ;;  %v1091_v58 = vrot.slane %v1089_v41, 5  ;;  %v11483_v1 = vshll.u32 %v9328_v4, 16  ;;  %v1101_v18 = vrot.slane %v1099_v46, 5  ;;  %v8745_v20 = vld [vmem:[%s8869_s10 + $0x34] sm:$0xf] }
  0x9f   : > { %v1106_v44 = vrot.slane %v11482_v16, 4  ;;  %v1086_v54 = vor.u32 %v1085_v32, %v1082_v5  ;;  %v1113_v55 = vshll.u32 %v9331_v6, 16  ;;  %v11484_v0 = vshrl.u32 %v9331_v6, 16  ;;  %7886 = vmatmul.mubr.msk.bf16.gmra.mrb[24].mxu0 %vm474_vm1, %v9703_v3  ;;  %v8743_v5 = vld [vmem:[%s8869_s10 + $0x2c] sm:$0x1] }
  0xa0   : > { %v1109_v53 = vrot.slane %v11483_v1, 5  ;;  %v1123_v40 = vshll.u32 %v9406_v63, 16  ;;  %v1096_v4 = vor.u32 %v1095_v51, %v1091_v58  ;;  %v6800_v11 = vrot.slane %v8741_v23, 9  ;;  %7889 = vmatprep.mubr.msk.bf16.mxu0 %vm474_vm1, %v9739_v47 }
  0xa1   : > { %v1119_v22 = vrot.slane %v11484_v0, 4  ;;  %v1087_v21 = vrot.slane %v1086_v54, 4  ;;  %v1115_v35 = vrot.slane %v1113_v55, 5  ;;  %v2803_v6 = vrot.slane %v8742_v57, 5  ;;  %7594 = vmatmul.mubr.msk.bf16.gmra.mrb[4].mxu1 %vm474_vm1, %v9829_v33 }
  0xa2   : > { %v1110_v60 = vor.u32 %v1109_v53, %v1106_v44  ;;  %v1125_v19 = vrot.slane %v1123_v40, 5  ;;  %v2806_v63 = vrot.slane %v8743_v5, 5  ;;  %v1097_v37 = vrot.slane %v1096_v4, 4  ;;  %v8746_v44 = vld [vmem:[%s8869_s10 + $0x38] sm:$0x1] }
  0xa3   : > { %v1092_v17 = vsel %vm8964_vm4, %v1087_v21, %v1091_v58  ;;  %v6801_v49 = vrot.slane %v8744_v50, 9  ;;  %v1120_v32 = vor.u32 %v1119_v22, %v1115_v35  ;;  %v2804_v41 = vsel %vm9301_vm7, %v6800_v11, %v2803_v6 }
  0xa4   : > { %v1111_v48 = vrot.slane %v1110_v60, 4  ;;  %v2805_v61 = vrot.slane %v2803_v6, 4  ;;  %v2810_v51 = vrot.slane %v8745_v20, 5  ;;  %v1102_v46 = vsel %vm8964_vm4, %v1097_v37, %v1101_v18 }
  0xa5   : > { %v2813_v54 = vrot.slane %v8746_v44, 5  ;;  %v11485_v58 = vshrl.u32 %v9368_v13, 16  ;;  %v9861_v53 = vcombine.low %v1092_v17, %v1102_v46  ;;  %v1121_v55 = vrot.slane %v1120_v32, 4 }
  0xa6   : > { %v1116_v16 = vsel %vm8964_vm4, %v1111_v48, %v1115_v35  ;;  %v2807_v0 = vsel %vm9301_vm7, %v2805_v61, %v2806_v63  ;;  %v2811_v22 = vsel %vm9301_vm7, %v6801_v49, %v2810_v51  ;;  %v2812_v18 = vrot.slane %v2810_v51, 4 }
  0xa7   : > { %v1130_v1 = vrot.slane %v11485_v58, 4  ;;  %v9867_v40 = vcombine.low %v2804_v41, %v2807_v0  ;;  %v11486_v21 = vshll.u32 %v9368_v13, 16  ;;  %v1137_v60 = vshll.u32 %v9371_v56, 16  ;;  %7597 = vmatprep.mubr.msk.bf16.mxu1 %vm474_vm1, %v9861_v53  ;;  %7890 = vmatmul.mubr.msk.bf16.gmra.mrb[28].mxu0 %vm474_vm1, %v9749_v30 }
  0xa8   : > { %v1126_v23 = vsel %vm8964_vm4, %v1121_v55, %v1125_v19  ;;  %v11487_v11 = vshrl.u32 %v9371_v56, 16  ;;  %v1147_v57 = vshll.u32 %v9418_v12, 16  ;;  %v11488_v6 = vshrl.u32 %v9381_v8, 16  ;;  %7895 = vmatprep.mubr.msk.bf16.mxu0 %vm474_vm1, %v9813_v38  ;;  %v8749_v55 = vld [vmem:[%s8869_s10 + $0x44] sm:$0x1] }
  0xa9   : > { %v1133_v4 = vrot.slane %v11486_v21, 5  ;;  %v9883_v13 = vcombine.low %v1116_v16, %v1126_v23  ;;  %v2814_v63 = vsel %vm9301_vm7, %v2812_v18, %v2813_v54  ;;  %v1139_v19 = vrot.slane %v1137_v60, 5  ;;  %v8747_v16 = vld [vmem:[%s8869_s10 + $0x3c] sm:$0xf]  ;;  %v8748_v54 = vld [vmem:[%s8869_s10 + $0x40] sm:$0xf] }
  0xaa   : > { %v1143_v35 = vrot.slane %v11487_v11, 4  ;;  %v1154_v5 = vrot.slane %v11488_v6, 4  ;;  %v9889_v56 = vcombine.low %v2811_v22, %v2814_v63  ;;  %v1149_v12 = vrot.slane %v1147_v57, 5  ;;  %v8750_v60 = vld [vmem:[%s8869_s10 + $0x48] sm:$0xf] }
  0xab   : > { %v1134_v17 = vor.u32 %v1133_v4, %v1130_v1  ;;  %v11489_v37 = vshll.u32 %v9381_v8, 16  ;;  %v1161_v50 = vshll.u32 %v9388_v2, 16  ;;  %v11490_v41 = vshrl.u32 %v9388_v2, 16  ;;  %7598 = vmatmul.mubr.msk.bf16.gmra.mrb[8].mxu1 %vm474_vm1, %v9883_v13  ;;  %v8751_v11 = vld [vmem:[%s8869_s10 + $0x4c] sm:$0xf] }
  0xac   : > { %v1144_v32 = vor.u32 %v1143_v35, %v1139_v19  ;;  %v1171_v20 = vshll.u32 %v9470_v34, 16  ;;  %v6802_v44 = vrot.slane %v8747_v16, 9  ;;  %v2817_v58 = vrot.slane %v8748_v54, 5  ;;  %v8752_v57 = vld [vmem:[%s8869_s10 + $0x50] sm:$0x1] }
  0xad   : > { %v1157_v48 = vrot.slane %v11489_v37, 5  ;;  %v1135_v49 = vrot.slane %v1134_v17, 4  ;;  %v1167_v61 = vrot.slane %v11490_v41, 4  ;;  %v1163_v46 = vrot.slane %v1161_v50, 5  ;;  %v9920_v37 = vld [vmem:[%s11213_s3 + $0xc] sm:$0x3] }
  0xae   : > { %v1145_v1 = vrot.slane %v1144_v32, 4  ;;  %v1173_v2 = vrot.slane %v1171_v20, 5  ;;  %v2820_v0 = vrot.slane %v8749_v55, 5  ;;  %v2818_v18 = vsel %vm9301_vm7, %v6802_v44, %v2817_v58  ;;  %v11497_v54 = vld [vmem:[#allocation52_spill] sm:$0xff] }
  0xaf   : > { %v1158_v51 = vor.u32 %v1157_v48, %v1154_v5  ;;  %v1140_v8 = vsel %vm8964_vm4, %v1135_v49, %v1139_v19  ;;  %v1168_v22 = vor.u32 %v1167_v61, %v1163_v46  ;;  %v2819_v21 = vrot.slane %v2817_v58, 4  ;;  %7896 = vmatmul.mubr.msk.bf16.vlgmr.msra.gmra.mrb[0].mxu0 %vm474_vm1, %v9815_v52 }
  0xb0   : > { %v1150_v4 = vsel %vm8964_vm4, %v1145_v1, %v1149_v12  ;;  %v6803_v23 = vrot.slane %v8750_v60, 9  ;;  %v2824_v35 = vrot.slane %v8751_v11, 5  ;;  %v2827_v6 = vrot.slane %v8752_v57, 5  ;;  %7928 = vmatpush3.bf16.msra.mxu0 %v9794_v25  ;;  %7899 = vmatprep.mubr.msk.bf16.mxu0 %vm474_vm1, %v9867_v40 }
  0xb1   : > { %v1159_v34 = vrot.slane %v1158_v51, 4  ;;  %v9911_v5 = vcombine.low %v1140_v8, %v1150_v4  ;;  %v1169_v17 = vrot.slane %v1168_v22, 4  ;;  %v2821_v19 = vsel %vm9301_vm7, %v2819_v21, %v2820_v0  ;;  %v11498_v8 = vld [vmem:[#allocation47_spill] sm:$0xff]  ;;  %8688 = vmatprep.subr.msk.bf16.mxu0 %vm523_vm0, %v9920_v37 }
  0xb2   : > { %v9924_v12 = vcombine.low %v2818_v18, %v2821_v19  ;;  %v2825_v48 = vsel %vm9301_vm7, %v6803_v23, %v2824_v35  ;;  %v2826_v50 = vrot.slane %v2824_v35, 4  ;;  %v11493_v49 = vshrl.u32 %v9421_v28, 16  ;;  %v11502_v18 = vld [vmem:[#allocation49_spill] sm:$0xff]  ;;  %v11504_v23 = vld [vmem:[#allocation60_spill] sm:$0xff] }
  0xb3   : > { %11491 = vst [vmem:[#allocation85_spill] sm:$0xff] %v9911_v5  ;;  %v1164_v63 = vsel %vm8964_vm4, %v1159_v34, %v1163_v46  ;;  %v1174_v41 = vsel %vm8964_vm4, %v1169_v17, %v1173_v2  ;;  %v11494_v61 = vshll.u32 %v9421_v28, 16  ;;  %v1185_v51 = vshll.u32 %v9429_v14, 16  ;;  %7601 = vmatprep.mubr.msk.bf16.mxu1 %vm474_vm1, %v9911_v5 }
  0xb4   : > { %11492 = vst [vmem:[#allocation86_spill] sm:$0xff] %v9924_v12  ;;  %v1178_v32 = vrot.slane %v11493_v49, 4  ;;  %v11495_v46 = vshrl.u32 %v9429_v14, 16  ;;  %v9942_v44 = vcombine.low %v1164_v63, %v1174_v41  ;;  %v2828_v25 = vsel %vm9301_vm7, %v2826_v50, %v2827_v6  ;;  %v8753_v63 = vld [vmem:[%s8869_s10 + $0x54] sm:$0xf] }
  0xb5   : > { %v1181_v20 = vrot.slane %v11494_v61, 5  ;;  %v1195_v58 = vshll.u32 %v11497_v54, 16  ;;  %v11499_v1 = vshrl.u32 %v11498_v8, 16  ;;  %v9951_v2 = vcombine.low %v2825_v48, %v2828_v25  ;;  %v8754_v50 = vld [vmem:[%s8869_s10 + $0x58] sm:$0xf] }
  0xb6   : > { %v1191_v16 = vrot.slane %v11495_v46, 4  ;;  %11496 = vst [vmem:[#allocation87_spill] sm:$0xff] %v9942_v44  ;;  %v1187_v55 = vrot.slane %v1185_v51, 5  ;;  %v11501_v0 = vshll.u32 %v11498_v8, 16  ;;  %7602 = vmatmul.mubr.msk.bf16.gmra.mrb[12].mxu1 %vm474_vm1, %v9942_v44  ;;  %v1209_v21 = vshll.u32 %v11502_v18, 16 }
  0xb7   : > { %v1202_v28 = vrot.slane %v11499_v1, 4  ;;  %11500 = vst [vmem:[#allocation52_spill] sm:$0xff] %v9951_v2  ;;  %v1182_v14 = vor.u32 %v1181_v20, %v1178_v32  ;;  %v1197_v22 = vrot.slane %v1195_v58, 5  ;;  %v11503_v4 = vshrl.u32 %v11502_v18, 16  ;;  %v8755_v32 = vld [vmem:[%s8869_s10 + $0x5c] sm:$0x1]  ;;  %7900 = vmatmul.mubr.msk.bf16.gmra.mrb[4].mxu0 %vm474_vm1, %v9889_v56 }
  0xb8   : > { %v1205_v34 = vrot.slane %v11501_v0, 5  ;;  %v1219_v11 = vshll.u32 %v11504_v23, 16  ;;  %v1192_v57 = vor.u32 %v1191_v16, %v1187_v55  ;;  %v6804_v17 = vrot.slane %v8753_v63, 9  ;;  %v8756_v46 = vld [vmem:[%s8869_s10 + $0x60] sm:$0xf]  ;;  %7903 = vmatprep.mubr.msk.bf16.mxu0 %vm474_vm1, %v9924_v12  ;;  %v11510_v63 = vld [vmem:[#allocation55_spill] sm:$0xff] }
  0xb9   : > { %v1215_v60 = vrot.slane %v11503_v4, 4  ;;  %v1183_v35 = vrot.slane %v1182_v14, 4  ;;  %v1211_v19 = vrot.slane %v1209_v21, 5  ;;  %v2831_v49 = vrot.slane %v8754_v50, 5  ;;  %v8757_v8 = vld [vmem:[%s8869_s10 + $0x64] sm:$0xf] }
  0xba   : > { %v1206_v6 = vor.u32 %v1205_v34, %v1202_v28  ;;  %v1221_v48 = vrot.slane %v1219_v11, 5  ;;  %v2834_v41 = vrot.slane %v8755_v32, 5  ;;  %v1193_v20 = vrot.slane %v1192_v57, 4  ;;  %v11505_v34 = vld [vmem:[#allocation53_spill] sm:$0xff]  ;;  %v11512_v32 = vld [vmem:[#allocation62_spill] sm:$0xff] }
  0xbb   : > { %v1188_v61 = vsel %vm8964_vm4, %v1183_v35, %v1187_v55  ;;  %v6805_v25 = vrot.slane %v8756_v46, 9  ;;  %v1216_v16 = vor.u32 %v1215_v60, %v1211_v19  ;;  %v2832_v54 = vsel %vm9301_vm7, %v6804_v17, %v2831_v49  ;;  %v8758_v55 = vld [vmem:[%s8869_s10 + $0x68] sm:$0x1] }
  0xbc   : > { %v1207_v51 = vrot.slane %v1206_v6, 4  ;;  %v2833_v58 = vrot.slane %v2831_v49, 4  ;;  %v2838_v1 = vrot.slane %v8757_v8, 5  ;;  %v1198_v28 = vsel %vm8964_vm4, %v1193_v20, %v1197_v22 }
  0xbd   : > { %v2841_v0 = vrot.slane %v8758_v55, 5  ;;  %v11506_v18 = vshrl.u32 %v11505_v34, 16  ;;  %v9981_v4 = vcombine.low %v1188_v61, %v1198_v28  ;;  %v1217_v60 = vrot.slane %v1216_v16, 4  ;;  %v11513_v61 = vld [vmem:[#allocation56_spill] sm:$0xff]  ;;  %v11518_v28 = vld [vmem:[#allocation58_spill] sm:$0xff] }
  0xbe   : > { %v1212_v14 = vsel %vm8964_vm4, %v1207_v51, %v1211_v19  ;;  %v2835_v23 = vsel %vm9301_vm7, %v2833_v58, %v2834_v41  ;;  %v2839_v11 = vsel %vm9301_vm7, %v6805_v25, %v2838_v1  ;;  %v2840_v22 = vrot.slane %v2838_v1, 4 }
  0xbf   : > { %v1226_v21 = vrot.slane %v11506_v18, 4  ;;  %11507 = vst [vmem:[#allocation47_spill] sm:$0xff] %v9981_v4  ;;  %v9987_v35 = vcombine.low %v2832_v54, %v2835_v23  ;;  %v11509_v57 = vshll.u32 %v11505_v34, 16  ;;  %v1233_v17 = vshll.u32 %v11510_v63, 16  ;;  %7605 = vmatprep.mubr.msk.bf16.mxu1 %vm474_vm1, %v9981_v4  ;;  %7904 = vmatmul.mubr.msk.bf16.gmra.mrb[8].mxu0 %vm474_vm1, %v9951_v2 }
  0xc0   : > { %v1222_v19 = vsel %vm8964_vm4, %v1217_v60, %v1221_v48  ;;  %v11511_v50 = vshrl.u32 %v11510_v63, 16  ;;  %v1243_v41 = vshll.u32 %v11512_v32, 16  ;;  %v11514_v20 = vshrl.u32 %v11513_v61, 16 }
  0xc1   : > { %11508 = vst [vmem:[#allocation49_spill] sm:$0xff] %v9987_v35  ;;  %v1229_v6 = vrot.slane %v11509_v57, 5  ;;  %v10001_v46 = vcombine.low %v1212_v14, %v1222_v19  ;;  %v2842_v25 = vsel %vm9301_vm7, %v2840_v22, %v2841_v0  ;;  %v1235_v54 = vrot.slane %v1233_v17, 5  ;;  %v8759_v22 = vld [vmem:[%s8869_s10 + $0x6c] sm:$0xf]  ;;  %7907 = vmatprep.mubr.msk.bf16.mxu0 %vm474_vm1, %v9987_v35 }
  0xc2   : > { %v1239_v49 = vrot.slane %v11511_v50, 4  ;;  %v1250_v51 = vrot.slane %v11514_v20, 4  ;;  %v10005_v58 = vcombine.low %v2839_v11, %v2842_v25  ;;  %v1245_v48 = vrot.slane %v1243_v41, 5 }
  0xc3   : > { %11515 = vst [vmem:[#allocation60_spill] sm:$0xff] %v10001_v46  ;;  %v1230_v16 = vor.u32 %v1229_v6, %v1226_v21  ;;  %v11517_v8 = vshll.u32 %v11513_v61, 16  ;;  %v1257_v55 = vshll.u32 %v11518_v28, 16  ;;  %7606 = vmatmul.mubr.msk.bf16.gmra.mrb[16].mxu1 %vm474_vm1, %v10001_v46  ;;  %v11519_v18 = vshrl.u32 %v11518_v28, 16  ;;  %v11520_v21 = vld [vmem:[#allocation69_spill] sm:$0xff] }
  0xc4   : > { %11516 = vst [vmem:[#allocation53_spill] sm:$0xff] %v10005_v58  ;;  %v1240_v34 = vor.u32 %v1239_v49, %v1235_v54  ;;  %v1267_v60 = vshll.u32 %v11520_v21, 16  ;;  %v6806_v57 = vrot.slane %v8759_v22, 9  ;;  %v8760_v6 = vld [vmem:[%s8869_s10 + $0x70] sm:$0xf] }
  0xc5   : > { %v1253_v1 = vrot.slane %v11517_v8, 5  ;;  %v1231_v14 = vrot.slane %v1230_v16, 4  ;;  %v1263_v0 = vrot.slane %v11519_v18, 4  ;;  %v1259_v11 = vrot.slane %v1257_v55, 5  ;;  %v8761_v49 = vld [vmem:[%s8869_s10 + $0x74] sm:$0x1] }
  0xc6   : > { %v2845_v63 = vrot.slane %v8760_v6, 5  ;;  %v1241_v19 = vrot.slane %v1240_v34, 4  ;;  %v1269_v50 = vrot.slane %v1267_v60, 5  ;;  %v2848_v32 = vrot.slane %v8761_v49, 5  ;;  %v8762_v16 = vld [vmem:[%s8869_s10 + $0x78] sm:$0xf] }
  0xc7   : > { %v1254_v23 = vor.u32 %v1253_v1, %v1250_v51  ;;  %v1236_v17 = vsel %vm8964_vm4, %v1231_v14, %v1235_v54  ;;  %v1264_v61 = vor.u32 %v1263_v0, %v1259_v11  ;;  %v6807_v8 = vrot.slane %v8762_v16, 9  ;;  %v8763_v1 = vld [vmem:[%s8869_s10 + $0x7c] sm:$0xf]  ;;  %v8764_v55 = vld [vmem:[%s8869_s10 + $0x80] sm:$0x1]  ;;  %7908 = vmatmul.mubr.msk.bf16.gmra.mrb[12].mxu0 %vm474_vm1, %v10005_v58 }
  0xc8   : > { %v2846_v20 = vsel %vm9301_vm7, %v6806_v57, %v2845_v63  ;;  %v2847_v51 = vrot.slane %v2845_v63, 4  ;;  %v1246_v25 = vsel %vm8964_vm4, %v1241_v19, %v1245_v48  ;;  %v2852_v28 = vrot.slane %v8763_v1, 5 }
  0xc9   : > { %v1255_v41 = vrot.slane %v1254_v23, 4  ;;  %v2855_v18 = vrot.slane %v8764_v55, 5  ;;  %v10031_v54 = vcombine.low %v1236_v17, %v1246_v25  ;;  %v1265_v34 = vrot.slane %v1264_v61, 4  ;;  %v11523_v23 = vld [vmem:[#allocation63_spill] sm:$0xff]  ;;  %v11526_v17 = vld [vmem:[#allocation65_spill] sm:$0xff] }
  0xca   : > { %v2849_v0 = vsel %vm9301_vm7, %v2847_v51, %v2848_v32  ;;  %v2853_v48 = vsel %vm9301_vm7, %v6807_v8, %v2852_v28  ;;  %v2854_v60 = vrot.slane %v2852_v28, 4  ;;  %v11524_v22 = vshrl.u32 %v11523_v23, 16 }
  0xcb   : > { %11521 = vst [vmem:[#allocation55_spill] sm:$0xff] %v10031_v54  ;;  %v1260_v14 = vsel %vm8964_vm4, %v1255_v41, %v1259_v11  ;;  %v10037_v21 = vcombine.low %v2846_v20, %v2849_v0  ;;  %7609 = vmatprep.mubr.msk.bf16.mxu1 %vm474_vm1, %v10031_v54  ;;  %v1270_v6 = vsel %vm8964_vm4, %v1265_v34, %v1269_v50  ;;  %v11525_v11 = vshll.u32 %v11523_v23, 16  ;;  %v11529_v20 = vld [vmem:[#allocation71_spill] sm:$0xff] }
  0xcc   : > { %v1274_v57 = vrot.slane %v11524_v22, 4  ;;  %v1281_v19 = vshll.u32 %v11526_v17, 16  ;;  %v11527_v49 = vshrl.u32 %v11526_v17, 16  ;;  %v10052_v41 = vcombine.low %v1260_v14, %v1270_v6  ;;  %v11533_v14 = vld [vmem:[#allocation67_spill] sm:$0xff]  ;;  %v8765_v6 = vld [vmem:[%s8869_s10 + $0x84] sm:$0xf] }
  0xcd   : > { %11522 = vst [vmem:[#allocation62_spill] sm:$0xff] %v10037_v21  ;;  %v1277_v63 = vrot.slane %v11525_v11, 5  ;;  %v2856_v61 = vsel %vm9301_vm7, %v2854_v60, %v2855_v18  ;;  %v1291_v51 = vshll.u32 %v11529_v20, 16  ;;  %v11530_v25 = vshrl.u32 %v9558_v45, 16  ;;  %7911 = vmatprep.mubr.msk.bf16.mxu0 %vm474_vm1, %v10037_v21  ;;  %v11535_v60 = vld [vmem:[#allocation77_spill] sm:$0xff] }
  0xce   : > { %v1287_v32 = vrot.slane %v11527_v49, 4  ;;  %11528 = vst [vmem:[#allocation56_spill] sm:$0xff] %v10052_v41  ;;  %v10061_v50 = vcombine.low %v2853_v48, %v2856_v61  ;;  %v1283_v1 = vrot.slane %v1281_v19, 5  ;;  %v11532_v28 = vshll.u32 %v9558_v45, 16  ;;  %7610 = vmatmul.mubr.msk.bf16.gmra.mrb[20].mxu1 %vm474_vm1, %v10052_v41  ;;  %v8766_v19 = vld [vmem:[%s8869_s10 + $0x88] sm:$0xf] }
  0xcf   : > { %v1298_v16 = vrot.slane %v11530_v25, 4  ;;  %v1278_v8 = vor.u32 %v1277_v63, %v1274_v57  ;;  %v1293_v18 = vrot.slane %v1291_v51, 5  ;;  %v1305_v34 = vshll.u32 %v11533_v14, 16  ;;  %v8767_v61 = vld [vmem:[%s8869_s10 + $0x8c] sm:$0x1] }
  0xd0   : > { %11531 = vst [vmem:[#allocation58_spill] sm:$0xff] %v10061_v50  ;;  %v1301_v55 = vrot.slane %v11532_v28, 5  ;;  %v11534_v0 = vshrl.u32 %v11533_v14, 16  ;;  %v1315_v23 = vshll.u32 %v11535_v60, 16  ;;  %v1288_v57 = vor.u32 %v1287_v32, %v1283_v1  ;;  %v8768_v14 = vld [vmem:[%s8869_s10 + $0x90] sm:$0xf]  ;;  %7912 = vmatmul.mubr.msk.bf16.gmra.mrb[16].mxu0 %vm474_vm1, %v10061_v50 }
  0xd1   : > { %v1279_v22 = vrot.slane %v1278_v8, 4  ;;  %v6808_v11 = vrot.slane %v8765_v6, 9  ;;  %v1307_v63 = vrot.slane %v1305_v34, 5  ;;  %v2859_v49 = vrot.slane %v8766_v19, 5  ;;  %v8770_v6 = vld [vmem:[%s8869_s10 + $0x98] sm:$0x1] }
  0xd2   : > { %v1311_v48 = vrot.slane %v11534_v0, 4  ;;  %v1302_v45 = vor.u32 %v1301_v55, %v1298_v16  ;;  %v1317_v17 = vrot.slane %v1315_v23, 5  ;;  %v2862_v20 = vrot.slane %v8767_v61, 5  ;;  %v8769_v55 = vld [vmem:[%s8869_s10 + $0x94] sm:$0xf] }
  0xd3   : > { %v1284_v51 = vsel %vm8964_vm4, %v1279_v22, %v1283_v1  ;;  %v1289_v25 = vrot.slane %v1288_v57, 4  ;;  %v6809_v0 = vrot.slane %v8768_v14, 9  ;;  %v2860_v32 = vsel %vm9301_vm7, %v6808_v11, %v2859_v49  ;;  %v11536_v1 = vld [vmem:[#allocation72_spill] sm:$0xff] }
  0xd4   : > { %v1303_v28 = vrot.slane %v1302_v45, 4  ;;  %v1312_v8 = vor.u32 %v1311_v48, %v1307_v63  ;;  %v2861_v16 = vrot.slane %v2859_v49, 4  ;;  %v2866_v34 = vrot.slane %v8769_v55, 5 }
  0xd5   : > { %v1294_v60 = vsel %vm8964_vm4, %v1289_v25, %v1293_v18  ;;  %v2869_v19 = vrot.slane %v8770_v6, 5  ;;  %v11537_v22 = vshrl.u32 %v11536_v1, 16  ;;  %v11539_v61 = vshll.u32 %v11536_v1, 16 }
  0xd6   : > { %v1308_v23 = vsel %vm8964_vm4, %v1303_v28, %v1307_v63  ;;  %v10089_v45 = vcombine.low %v1284_v51, %v1294_v60  ;;  %v1313_v48 = vrot.slane %v1312_v8, 4  ;;  %v2863_v11 = vsel %vm9301_vm7, %v2861_v16, %v2862_v20  ;;  %v11540_v28 = vld [vmem:[#allocation74_spill] sm:$0xff] }
  0xd7   : > { %v1322_v57 = vrot.slane %v11537_v22, 4  ;;  %v2867_v49 = vsel %vm9301_vm7, %v6809_v0, %v2866_v34  ;;  %v10097_v18 = vcombine.low %v2860_v32, %v2863_v11  ;;  %v2868_v63 = vrot.slane %v2866_v34, 4  ;;  %v11542_v8 = vld [vmem:[#allocation78_spill] sm:$0xff] }
  0xd8   : > { %v1325_v25 = vrot.slane %v11539_v61, 5  ;;  %v1329_v14 = vshll.u32 %v11540_v28, 16  ;;  %7613 = vmatprep.mubr.msk.bf16.mxu1 %vm474_vm1, %v10089_v45  ;;  %v1318_v20 = vsel %vm8964_vm4, %v1313_v48, %v1317_v17  ;;  %v11541_v51 = vshrl.u32 %v11540_v28, 16 }
  0xd9   : > { %11538 = vst [vmem:[#allocation69_spill] sm:$0xff] %v10097_v18  ;;  %v1339_v16 = vshll.u32 %v11542_v8, 16  ;;  %v11543_v32 = vshrl.u32 %v9610_v36, 16  ;;  %v10111_v34 = vcombine.low %v1308_v23, %v1318_v20  ;;  %7915 = vmatprep.mubr.msk.bf16.mxu0 %vm474_vm1, %v10097_v18  ;;  %v2870_v60 = vsel %vm9301_vm7, %v2868_v63, %v2869_v19 }
  0xda   : > { %v1335_v0 = vrot.slane %v11541_v51, 4  ;;  %v1326_v6 = vor.u32 %v1325_v25, %v1322_v57  ;;  %v1331_v17 = vrot.slane %v1329_v14, 5  ;;  %v10117_v1 = vcombine.low %v2867_v49, %v2870_v60  ;;  %v8771_v25 = vld [vmem:[%s8869_s10 + $0x9c] sm:$0xf] }
  0xdb   : > { %v1346_v55 = vrot.slane %v11543_v32, 4  ;;  %v1341_v22 = vrot.slane %v1339_v16, 5  ;;  %v11545_v48 = vshll.u32 %v9610_v36, 16  ;;  %v1353_v23 = vshll.u32 %v9620_v59, 16  ;;  %7614 = vmatmul.mubr.msk.bf16.gmra.mrb[24].mxu1 %vm474_vm1, %v10111_v34  ;;  %v8772_v36 = vld [vmem:[%s8869_s10 + $0xa0] sm:$0xf] }
  0xdc   : > { %11544 = vst [vmem:[#allocation63_spill] sm:$0xff] %v10117_v1  ;;  %v1327_v61 = vrot.slane %v1326_v6, 4  ;;  %v1336_v28 = vor.u32 %v1335_v0, %v1331_v17  ;;  %v11546_v20 = vshrl.u32 %v9620_v59, 16  ;;  %v1363_v57 = vshll.u32 %v9698_v29, 16  ;;  %v8773_v32 = vld [vmem:[%s8869_s10 + $0xa4] sm:$0x1]  ;;  %7916 = vmatmul.mubr.msk.bf16.gmra.mrb[20].mxu0 %vm474_vm1, %v10117_v1 }
  0xdd   : > { %v1349_v11 = vrot.slane %v11545_v48, 5  ;;  %v1355_v49 = vrot.slane %v1353_v23, 5  ;;  %v6810_v14 = vrot.slane %v8771_v25, 9  ;;  %v2873_v51 = vrot.slane %v8772_v36, 5 }
  0xde   : > { %v1359_v19 = vrot.slane %v11546_v20, 4  ;;  %v1332_v8 = vsel %vm8964_vm4, %v1327_v61, %v1331_v17  ;;  %v1337_v16 = vrot.slane %v1336_v28, 4  ;;  %v1365_v0 = vrot.slane %v1363_v57, 5  ;;  %v8775_v17 = vld [vmem:[%s8869_s10 + $0xac] sm:$0xf] }
  0xdf   : > { %v1350_v63 = vor.u32 %v1349_v11, %v1346_v55  ;;  %v2876_v59 = vrot.slane %v8773_v32, 5  ;;  %v2874_v29 = vsel %vm9301_vm7, %v6810_v14, %v2873_v51  ;;  %v2875_v55 = vrot.slane %v2873_v51, 4  ;;  %v8774_v11 = vld [vmem:[%s8869_s10 + $0xa8] sm:$0xf]  ;;  %v8776_v28 = vld [vmem:[%s8869_s10 + $0xb0] sm:$0x1] }
  0xe0   : > { %v1360_v6 = vor.u32 %v1359_v19, %v1355_v49  ;;  %v1342_v48 = vsel %vm8964_vm4, %v1337_v16, %v1341_v22  ;;  %v6811_v23 = vrot.slane %v8774_v11, 9  ;;  %v2880_v61 = vrot.slane %v8775_v17, 5  ;;  %v340_v57 = vld [vmem:[%s8869_s10 + $0x8] sm:$0x1]  ;;  %v11548_v32 = vld [vmem:[#allocation6_spill] sm:$0xff] }
  0xe1   : > { %v1351_v60 = vrot.slane %v1350_v63, 4  ;;  %v2883_v20 = vrot.slane %v8776_v28, 5  ;;  %v10142_v19 = vcombine.low %v1332_v8, %v1342_v48  ;;  %v2877_v14 = vsel %vm9301_vm7, %v2875_v55, %v2876_v59  ;;  %v11547_v16 = vld [vmem:[#allocation3_spill] sm:$0xff]  ;;  %v8777_v59 = vld [vmem:[%s8869_s10 + $0xb4] sm:$0xf] }
  0xe2   : > { %v1361_v25 = vrot.slane %v1360_v6, 4  ;;  %v10148_v22 = vcombine.low %v2874_v29, %v2877_v14  ;;  %v2881_v36 = vsel %vm9301_vm7, %v6811_v23, %v2880_v61  ;;  %v2882_v51 = vrot.slane %v2880_v61, 4  ;;  %v8778_v29 = vld [vmem:[%s8869_s10 + $0xb8] sm:$0xf]  ;;  %v8779_v23 = vld [vmem:[%s8869_s10 + $0xbc] sm:$0x1] }
  0xe3   : > { %v1356_v63 = vsel %vm8964_vm4, %v1351_v60, %v1355_v49  ;;  %v1674_v8 = vsel %vm8964_vm4, %v11548_v32, %v11547_v16  ;;  %7617 = vmatprep.mubr.msk.bf16.mxu1 %vm474_vm1, %v10142_v19  ;;  %v1681_v60 = vshll.u32 %v340_v57, 16  ;;  %v6812_v6 = vrot.slane %v8777_v59, 9  ;;  %v8781_v16 = vld [vmem:[%s8869_s10 + $0x4] sm:$0xf] }
  0xe4   : > { %v1366_v49 = vsel %vm8964_vm4, %v1361_v25, %v1365_v0  ;;  %v2887_v55 = vrot.slane %v8778_v29, 5  ;;  %7919 = vmatprep.mubr.msk.bf16.mxu0 %vm474_vm1, %v10148_v22  ;;  %v2884_v11 = vsel %vm9301_vm7, %v2882_v51, %v2883_v20  ;;  %v2890_v17 = vrot.slane %v8779_v23, 5  ;;  %v10170_v0 = vld [vmem:[%s8869_s10 + $0xc0] sm:$0xf]  ;;  %v10181_v20 = vld [vmem:[%s8869_s10 + $0xc4] sm:$0xf] }
  0xe5   : > { %v10162_v48 = vcombine.low %v1356_v63, %v1366_v49  ;;  %v6937_v61 = vrot.slane %v10170_v0, 9  ;;  %v10173_v28 = vcombine.low %v2881_v36, %v2884_v11  ;;  %v1683_v25 = vrot.slane %v1681_v60, 5  ;;  %v8783_v49 = vld [vmem:[%s8869_s10 + $0xc8] sm:$0x1] }
  0xe6   : > { %v2888_v63 = vsel %vm9301_vm7, %v6812_v6, %v2887_v55  ;;  %v2889_v14 = vrot.slane %v2887_v55, 4  ;;  %v2782_v32 = vrot.slane %v8781_v16, 5  ;;  %v4269_v51 = vrot.slane %v10181_v20, 5  ;;  %v11549_v29 = vld [vmem:[#allocation7_spill] sm:$0xff]  ;;  %v8784_v6 = vld [vmem:[%s8869_s10] sm:$0xf] }
  0xe7   : > { %7618 = vmatmul.mubr.msk.bf16.gmra.mrb[28].mxu1 %vm474_vm1, %v10162_v48  ;;  %v4272_v59 = vrot.slane %v8783_v49, 5  ;;  %v1684_v36 = vsel %vm8964_vm4, %v11549_v29, %v1683_v25  ;;  %v6797_v55 = vrot.slane %v8784_v6, 9  ;;  %7920 = vmatmul.mubr.msk.bf16.gmra.mrb[24].mxu0 %vm474_vm1, %v10173_v28  ;;  %v4695_v29 = vsel %vm523_vm0, %v9920_v37, 0  ;;  %v11556_v6 = vld [vmem:[#allocation36_spill] sm:$0xff]  ;;  %v11559_v37 = vld [vmem:[#allocation19_spill] sm:$0xff] }
  0xe8   : > { %v2891_v60 = vsel %vm9301_vm7, %v2889_v14, %v2890_v17  ;;  %v6716_v11 = vcombine.low %v1674_v8, %v1684_v36  ;;  %v4271_v16 = vrot.slane %v4269_v51, 4  ;;  %v4270_v30 = vsel %vm9301_vm7, %v6937_v61, %v4269_v51  ;;  %v6813_v61 = vld [vmem:[%s11213_s3 + $0x4] sm:$0x3]  ;;  %v11555_v36 = vld [vmem:[#allocation15_spill] sm:$0xff] }
  0xe9   : > { %v10193_v23 = vcombine.low %v2888_v63, %v2891_v60  ;;  %v2784_v49 = vrot.slane %v2782_v32, 4  ;;  %v2569_v8 = vsel %vm523_vm0, %v9809_v43, 0  ;;  %v10208_v63 = vsel %vm9301_vm7, %v6797_v55, %v2782_v32  ;;  %v11551_v51 = vld [vmem:[#allocation10_spill] sm:$0xff]  ;;  %v6992_v60 = vld [vmem:[%s11212_s2 + $0xe] sm:$0x3]  ;;  %v11557_v55 = vld [vmem:[#allocation40_spill] sm:$0xff] }
  0xea   : > { %7623 = vmatprep.mubr.msk.bf16.mxu1 %vm474_vm1, %v6716_v11  ;;  %v4273_v17 = vsel %vm9301_vm7, %v4271_v16, %v4272_v59  ;;  %v2785_v14 = vrot.slane %v340_v57, 5  ;;  %v11553_v57 = vld [vmem:[#allocation35_spill] sm:$0xff]  ;;  %v11554_v32 = vld [vmem:[#allocation14_spill] sm:$0xff] }
  0xeb   : > { %7923 = vmatprep.mubr.msk.bf16.mxu0 %vm474_vm1, %v10193_v23  ;;  %v10202_v25 = vcombine.low %v4270_v30, %v4273_v17  ;;  %v11552_v30 = vld [vmem:[#allocation11_spill] sm:$0xff]  ;;  %v11558_v11 = vld [vmem:[#allocation18_spill] sm:$0xff] }
  0xec   : > { %v10217_v59 = vsel %vm9301_vm7, %v2784_v49, %v2785_v14  ;;  %v11560_v16 = vld [vmem:[#allocation42_spill] sm:$0xff]  ;;  %v11561_v49 = vld [vmem:[#allocation44_spill] sm:$0xff]  ;;  %v11564_v14 = vld [vmem:[#allocation45_spill] sm:$0xff] }
  0xed   : > { %11550 = vst [vmem:[#allocation65_spill] sm:$0xff] %v10202_v25  ;;  %v11562_v17 = vld [vmem:[#allocation22_spill] sm:$0xff]  ;;  %v11567_v43 = vld [vmem:[#allocation27_spill] sm:$0xff] }
  0xef   : > { %7624 = vmatmul.mubr.msk.bf16.vlgmr.msra.gmra.mrb[0].mxu1 %vm474_vm1, %v11551_v51  ;;  %7924 = vmatmul.mubr.msk.bf16.gmra.mrb[28].mxu0 %vm474_vm1, %v10202_v25  ;;  %v11565_v51 = vld [vmem:[#allocation50_spill] sm:$0xff]  ;;  %v11568_v25 = vld [vmem:[#allocation51_spill] sm:$0xff] }
  0xf0   : > { %7627 = vmatprep.mubr.msk.bf16.mxu1 %vm474_vm1, %v11552_v30  ;;  %7656 = vmatpush3.bf16.msra.mxu1 %v2569_v8  ;;  %v11563_v8 = vld [vmem:[#allocation23_spill] sm:$0xff] }
  0xf1   : > { %8680 = vmatprep.subr.msk.bf16.mxu1 %vm523_vm0, %v6813_v61  ;;  %7929 = vmatprep.mubr.msk.bf16.mxu0 %vm474_vm1, %v11553_v57 }
  0xf7   : > { %7628 = vmatmul.mubr.msk.bf16.gmra.mrb[4].mxu1 %vm474_vm1, %v11554_v32  ;;  %7930 = vmatmul.mubr.msk.bf16.vlgmr.msra.gmra.mrb[0].mxu0 %vm474_vm1, %v11556_v6 }
  0xf8   : > { %7631 = vmatprep.mubr.msk.bf16.mxu1 %vm474_vm1, %v11555_v36  ;;  %7962 = vmatpush3.bf16.msra.mxu0 %v4695_v29  ;;  %v11566_v29 = vld [vmem:[#allocation26_spill] sm:$0xff] }
  0xf9   : > { %7933 = vmatprep.mubr.msk.bf16.mxu0 %vm474_vm1, %v11557_v55  ;;  %8689 = vmatprep.subr.msk.bf16.mxu0 %vm523_vm0, %v6992_v60 }
  0xff   : > { %7632 = vmatmul.mubr.msk.bf16.gmra.mrb[8].mxu1 %vm474_vm1, %v11558_v11  ;;  %7934 = vmatmul.mubr.msk.bf16.gmra.mrb[4].mxu0 %vm474_vm1, %v11560_v16  ;;  %v11573_v11 = vld [vmem:[#allocation68_spill] sm:$0xff] }
 0x100   : > { %7635 = vmatprep.mubr.msk.bf16.mxu1 %vm474_vm1, %v11559_v37  ;;  %7937 = vmatprep.mubr.msk.bf16.mxu0 %vm474_vm1, %v11561_v49  ;;  %v11572_v37 = vld [vmem:[#allocation61_spill] sm:$0xff] }
 0x101   : > { %v11574_v49 = vld [vmem:[#allocation33_spill] sm:$0xff] }
 0x107   : > { %7636 = vmatmul.mubr.msk.bf16.gmra.mrb[12].mxu1 %vm474_vm1, %v11562_v17  ;;  %7938 = vmatmul.mubr.msk.bf16.gmra.mrb[8].mxu0 %vm474_vm1, %v11564_v14  ;;  %v11570_v17 = vld [vmem:[#allocation30_spill] sm:$0xff] }
 0x108   : > { %7639 = vmatprep.mubr.msk.bf16.mxu1 %vm474_vm1, %v11563_v8  ;;  %7941 = vmatprep.mubr.msk.bf16.mxu0 %vm474_vm1, %v11565_v51  ;;  %v11571_v8 = vld [vmem:[#allocation31_spill] sm:$0xff]  ;;  %v8785_v51 = vld [vmem:[%s9191_s17 + $0x4] sm:$0xf] }
 0x10f   : > { %7640 = vmatmul.mubr.msk.bf16.gmra.mrb[16].mxu1 %vm474_vm1, %v11566_v29  ;;  %7942 = vmatmul.mubr.msk.bf16.gmra.mrb[12].mxu0 %vm474_vm1, %v11568_v25  ;;  %v2360_v29 = vrot.slane %v8785_v51, 5 }
 0x110   : > { %7643 = vmatprep.mubr.msk.bf16.mxu1 %vm474_vm1, %v11567_v43  ;;  %7945 = vmatprep.mubr.msk.bf16.mxu0 %vm474_vm1, %v11569_v24  ;;  %v8786_v43 = vld [vmem:[%s9191_s17] sm:$0xf]  ;;  %v2363_v24 = vrot.slane %v9669_v10, 5  ;;  %v10291_v10 = vcombine.low %v9701_v31, %v9707_v27  ;;  %v2991_v31 = vsel %vm523_vm0, %v6813_v61, 0  ;;  %v6846_v27 = vld [vmem:[%s11212_s2 + $0x6] sm:$0x3] }
 0x111   : > { %v6748_v25 = vrot.slane %v8786_v43, 9  ;;  %v2362_v14 = vrot.slane %v2360_v29, 4  ;;  %v11577_v43 = vld [vmem:[#allocation76_spill] sm:$0xff]  ;;  %v4923_v61 = vsel %vm523_vm0, %v6992_v60, 0  ;;  %v11587_v60 = vld [vmem:[#allocation57_spill] sm:$0xff] }
 0x113   : > { %v2361_v51 = vsel %vm9301_vm7, %v6748_v25, %v2360_v29  ;;  %v10304_v25 = vld [vmem:[%s9191_s17 + $0xd0] sm:$0xf] }
 0x114   : > { %v11581_v29 = vld [vmem:[#allocation4_spill] sm:$0xff] }
 0x117   : > { %7644 = vmatmul.mubr.msk.bf16.gmra.mrb[20].mxu1 %vm474_vm1, %v11570_v17  ;;  %7946 = vmatmul.mubr.msk.bf16.gmra.mrb[16].mxu0 %vm474_vm1, %v11572_v37  ;;  %v11575_v17 = vld [vmem:[#allocation34_spill] sm:$0xff] }
 0x118   : > { %7647 = vmatprep.mubr.msk.bf16.mxu1 %vm474_vm1, %v11571_v8  ;;  %7949 = vmatprep.mubr.msk.bf16.mxu0 %vm474_vm1, %v11573_v11  ;;  %v11576_v8 = vld [vmem:[#allocation70_spill] sm:$0xff]  ;;  %v2364_v11 = vsel %vm9301_vm7, %v2362_v14, %v2363_v24  ;;  %v10301_v24 = vld [vmem:[%s9191_s17 + $0xcc] sm:$0xf]  ;;  %v11580_v14 = vld [vmem:[#allocation41_spill] sm:$0xff] }
 0x119   : > { %v6765_v37 = vcombine.low %v2361_v51, %v2364_v11  ;;  %v6957_v11 = vcombine.low %v10301_v24, %v10304_v25  ;;  %v11582_v51 = vld [vmem:[#allocation46_spill] sm:$0xff] }
 0x11f   : > { %7648 = vmatmul.mubr.msk.bf16.gmra.mrb[24].mxu1 %vm474_vm1, %v11574_v49  ;;  %7950 = vmatmul.mubr.msk.bf16.gmra.mrb[20].mxu0 %vm474_vm1, %v11576_v8  ;;  %v11578_v49 = vld [vmem:[#allocation38_spill] sm:$0xff] }
 0x120   : > { %7651 = vmatprep.mubr.msk.bf16.mxu1 %vm474_vm1, %v11575_v17  ;;  %7953 = vmatprep.mubr.msk.bf16.mxu0 %vm474_vm1, %v11577_v43 }
 0x127   : > { %7652 = vmatmul.mubr.msk.bf16.gmra.mrb[28].mxu1 %vm474_vm1, %v11578_v49  ;;  %7954 = vmatmul.mubr.msk.bf16.gmra.mrb[24].mxu0 %vm474_vm1, %v9642_v42 }
 0x128   : > { %7657 = vmatprep.mubr.msk.bf16.mxu1 %vm474_vm1, %v6765_v37  ;;  %7957 = vmatprep.mubr.msk.bf16.mxu0 %vm474_vm1, %v10291_v10  ;;  %v11579_v37 = vld [vmem:[#allocation43_spill] sm:$0xff] }
 0x12f   : > { %7658 = vmatmul.mubr.msk.bf16.vlgmr.msra.gmra.mrb[0].mxu1 %vm474_vm1, %v11579_v37  ;;  %7958 = vmatmul.mubr.msk.bf16.gmra.mrb[28].mxu0 %vm474_vm1, %v6957_v11  ;;  %v7010_v37 = vld [vmem:[%s11213_s3 + $0xe] sm:$0x3]  ;;  %v11585_v11 = vld [vmem:[#allocation8_spill] sm:$0xff] }
 0x130   : > { %7661 = vmatprep.mubr.msk.bf16.mxu1 %vm474_vm1, %v11580_v14  ;;  %7690 = vmatpush3.bf16.msra.mxu1 %v2991_v31  ;;  %v11584_v31 = vld [vmem:[#allocation5_spill] sm:$0xff]  ;;  %v11586_v14 = vld [vmem:[#allocation54_spill] sm:$0xff] }
 0x131   : > { %8681 = vmatprep.subr.msk.bf16.mxu1 %vm523_vm0, %v6846_v27  ;;  %7963 = vmatprep.mubr.msk.bf16.mxu0 %vm474_vm1, %v11581_v29  ;;  %v11590_v29 = vld [vmem:[#allocation64_spill] sm:$0xff] }
 0x137   : > { %7662 = vmatmul.mubr.msk.bf16.gmra.mrb[4].mxu1 %vm474_vm1, %v11582_v51  ;;  %7964 = vmatmul.mubr.msk.bf16.vlgmr.msra.gmra.mrb[0].mxu0 %vm474_vm1, %v11584_v31  ;;  %v11589_v51 = vld [vmem:[#allocation12_spill] sm:$0xff] }
 0x138   : > { %7665 = vmatprep.mubr.msk.bf16.mxu1 %vm474_vm1, %v11583_v9  ;;  %7996 = vmatpush3.bf16.msra.mxu0 %v4923_v61  ;;  %v11588_v9 = vld [vmem:[#allocation9_spill] sm:$0xff]  ;;  %v11591_v61 = vld [vmem:[#allocation66_spill] sm:$0xff]  ;;  %v11593_v31 = vld [vmem:[#allocation16_spill] sm:$0xff] }
 0x139   : > { %7967 = vmatprep.mubr.msk.bf16.mxu0 %vm474_vm1, %v11585_v11  ;;  %8690 = vmatprep.subr.msk.bf16.mxu0 %vm523_vm0, %v7010_v37  ;;  %v11592_v11 = vld [vmem:[#allocation13_spill] sm:$0xff] }
 0x13f   : > { %7666 = vmatmul.mubr.msk.bf16.gmra.mrb[8].mxu1 %vm474_vm1, %v11586_v14  ;;  %7968 = vmatmul.mubr.msk.bf16.gmra.mrb[4].mxu0 %vm474_vm1, %v11588_v9  ;;  %v11594_v14 = vld [vmem:[#allocation73_spill] sm:$0xff] }
 0x140   : > { %7669 = vmatprep.mubr.msk.bf16.mxu1 %vm474_vm1, %v11587_v60  ;;  %7971 = vmatprep.mubr.msk.bf16.mxu0 %vm474_vm1, %v11589_v51  ;;  %v11595_v60 = vld [vmem:[#allocation75_spill] sm:$0xff]  ;;  %v11596_v9 = vld [vmem:[#allocation17_spill] sm:$0xff] }
 0x147   : > { %7670 = vmatmul.mubr.msk.bf16.gmra.mrb[12].mxu1 %vm474_vm1, %v11590_v29  ;;  %7972 = vmatmul.mubr.msk.bf16.gmra.mrb[8].mxu0 %vm474_vm1, %v11592_v11  ;;  %v11597_v29 = vld [vmem:[#allocation20_spill] sm:$0xff] }
 0x148   : > { %7673 = vmatprep.mubr.msk.bf16.mxu1 %vm474_vm1, %v11591_v61  ;;  %7975 = vmatprep.mubr.msk.bf16.mxu0 %vm474_vm1, %v11593_v31  ;;  %v11598_v61 = vld [vmem:[#allocation21_spill] sm:$0xff] }
 0x14f   : > { %7674 = vmatmul.mubr.msk.bf16.gmra.mrb[16].mxu1 %vm474_vm1, %v11594_v14  ;;  %7976 = vmatmul.mubr.msk.bf16.gmra.mrb[12].mxu0 %vm474_vm1, %v11596_v9  ;;  %v11599_v14 = vld [vmem:[#allocation24_spill] sm:$0xff] }
 0x150   : > { %7677 = vmatprep.mubr.msk.bf16.mxu1 %vm474_vm1, %v11595_v60  ;;  %7979 = vmatprep.mubr.msk.bf16.mxu0 %vm474_vm1, %v11597_v29  ;;  %v11600_v60 = vld [vmem:[#allocation25_spill] sm:$0xff]  ;;  %v11601_v29 = vld [vmem:[#allocation28_spill] sm:$0xff] }
 0x157   : > { %7678 = vmatmul.mubr.msk.bf16.gmra.mrb[20].mxu1 %vm474_vm1, %v9657_v15  ;;  %7980 = vmatmul.mubr.msk.bf16.gmra.mrb[16].mxu0 %vm474_vm1, %v11598_v61  ;;  %v11602_v15 = vcombine.low %v10208_v63, %v10217_v59  ;;  %v10399_v63 = vld [vmem:[%s11213_s3 + $0x6] sm:$0x3]  ;;  %v8787_v59 = vld [vmem:[%s9191_s17 + $0xc0] sm:$0xf] }
 0x158   : > { %7681 = vmatprep.mubr.msk.bf16.mxu1 %vm474_vm1, %v9663_v26  ;;  %7983 = vmatprep.mubr.msk.bf16.mxu0 %vm474_vm1, %v11599_v14  ;;  %v10375_v26 = vcombine.low %v10170_v0, %v10181_v20  ;;  %v3197_v20 = vsel %vm523_vm0, %v6846_v27, 0  ;;  %v3599_v27 = vshrl.u32 %v8787_v59, 16 }
 0x15f   : > { %7682 = vmatmul.mubr.msk.bf16.gmra.mrb[24].mxu1 %vm474_vm1, %v9691_v39  ;;  %7984 = vmatmul.mubr.msk.bf16.gmra.mrb[20].mxu0 %vm474_vm1, %v11600_v60  ;;  %v11603_v39 = vld [vmem:[#allocation29_spill] sm:$0xff] }
 0x160   : > { %7685 = vmatprep.mubr.msk.bf16.mxu1 %vm474_vm1, %v9703_v3  ;;  %7987 = vmatprep.mubr.msk.bf16.mxu0 %vm474_vm1, %v11601_v29  ;;  %v10388_v3 = vld [vmem:[%s8869_s10 + $0xcc] sm:$0xf]  ;;  %v10391_v29 = vld [vmem:[%s8869_s10 + $0xd0] sm:$0xf] }
 0x161   : > { %v6975_v0 = vcombine.low %v10388_v3, %v10391_v29 }
 0x167   : > { %7686 = vmatmul.mubr.msk.bf16.gmra.mrb[28].mxu1 %vm474_vm1, %v9739_v47  ;;  %7988 = vmatmul.mubr.msk.bf16.gmra.mrb[24].mxu0 %vm474_vm1, %v11603_v39 }
 0x168   : > { %7691 = vmatprep.mubr.msk.bf16.mxu1 %vm474_vm1, %v11602_v15  ;;  %7991 = vmatprep.mubr.msk.bf16.mxu0 %vm474_vm1, %v10375_v26  ;;  %v5151_v15 = vsel %vm523_vm0, %v7010_v37, 0  ;;  %v3602_v37 = vshll.u32 %v8787_v59, 16  ;;  %v4894_v59 = vshll.u32 %v10301_v24, 16 }
 0x16f   : > { %7692 = vmatmul.mubr.msk.bf16.vlgmr.msra.gmra.mrb[0].mxu1 %vm474_vm1, %v9813_v38  ;;  %7992 = vmatmul.mubr.msk.bf16.gmra.mrb[28].mxu0 %vm474_vm1, %v6975_v0  ;;  %v10418_v38 = vld [vmem:[%s11212_s2 + $0x10] sm:$0x3]  ;;  %v8788_v0 = vld [vmem:[%s9191_s17 + $0xc4] sm:$0xf] }
 0x170   : > { %7695 = vmatprep.mubr.msk.bf16.mxu1 %vm474_vm1, %v9815_v52  ;;  %7724 = vmatpush3.bf16.msra.mxu1 %v3197_v20  ;;  %v3608_v20 = vshll.u32 %v8788_v0, 16 }
 0x171   : > { %8682 = vmatprep.subr.msk.bf16.mxu1 %vm523_vm0, %v10399_v63  ;;  %7997 = vmatprep.mubr.msk.bf16.mxu0 %vm474_vm1, %v9798_v62 }
 0x177   : > { %7696 = vmatmul.mubr.msk.bf16.gmra.mrb[4].mxu1 %vm474_vm1, %v9867_v40  ;;  %7998 = vmatmul.mubr.msk.bf16.vlgmr.msra.gmra.mrb[0].mxu0 %vm474_vm1, %v9829_v33 }
 0x178   : > { %7699 = vmatprep.mubr.msk.bf16.mxu1 %vm474_vm1, %v9889_v56  ;;  %8030 = vmatpush3.bf16.msra.mxu0 %v5151_v15  ;;  %v3612_v15 = vshrl.u32 %v8788_v0, 16  ;;  %v4904_v0 = vshrl.u32 %v10304_v25, 16 }
 0x179   : > { %8001 = vmatprep.mubr.msk.bf16.mxu0 %vm474_vm1, %v9861_v53  ;;  %8691 = vmatprep.subr.msk.bf16.mxu0 %vm523_vm0, %v10418_v38 }
 0x17f   : > { %7700 = vmatmul.mubr.msk.bf16.gmra.mrb[8].mxu1 %vm474_vm1, %v9924_v12  ;;  %8002 = vmatmul.mubr.msk.bf16.gmra.mrb[4].mxu0 %vm474_vm1, %v9883_v13 }
 0x180   : > { %7703 = vmatprep.mubr.msk.bf16.mxu1 %vm474_vm1, %v9951_v2  ;;  %8005 = vmatprep.mubr.msk.bf16.mxu0 %vm474_vm1, %v9911_v5  ;;  %v10468_v5 = vld [vmem:[%s9191_s17 + $0xd4] sm:$0x1] }
 0x187   : > { %7704 = vmatmul.mubr.msk.bf16.gmra.mrb[12].mxu1 %vm474_vm1, %v9987_v35  ;;  %8006 = vmatmul.mubr.msk.bf16.gmra.mrb[8].mxu0 %vm474_vm1, %v9942_v44  ;;  %v3610_v35 = vrot.slane %v3608_v20, 5 }
 0x188   : > { %7707 = vmatprep.mubr.msk.bf16.mxu1 %vm474_vm1, %v10005_v58  ;;  %8009 = vmatprep.mubr.msk.bf16.mxu0 %vm474_vm1, %v9981_v4  ;;  %v3604_v58 = vrot.slane %v3602_v37, 5 }
 0x18f   : > { %7708 = vmatmul.mubr.msk.bf16.gmra.mrb[16].mxu1 %vm474_vm1, %v10037_v21  ;;  %8010 = vmatmul.mubr.msk.bf16.gmra.mrb[12].mxu0 %vm474_vm1, %v10001_v46  ;;  %v3601_v21 = vrot.slane %v3599_v27, 4  ;;  %v4900_v27 = vshll.u32 %v10304_v25, 16  ;;  %v4896_v46 = vrot.slane %v4894_v59, 5 }
 0x190   : > { %7711 = vmatprep.mubr.msk.bf16.mxu1 %vm474_vm1, %v10061_v50  ;;  %8013 = vmatprep.mubr.msk.bf16.mxu0 %vm474_vm1, %v10031_v54  ;;  %v3614_v50 = vrot.slane %v3612_v15, 4  ;;  %v4891_v54 = vshrl.u32 %v10301_v24, 16  ;;  %v8789_v15 = vld [vmem:[%s9191_s17 + $0xc8] sm:$0x1] }
 0x191   : > { %v3605_v37 = vor.u32 %v3604_v58, %v3601_v21  ;;  %v4902_v4 = vrot.slane %v4900_v27, 5  ;;  %v4910_v21 = vshll.u32 %v10468_v5, 16 }
 0x192   : > { %v3615_v20 = vor.u32 %v3614_v50, %v3610_v35 }
 0x193   : > { %v3606_v2 = vrot.slane %v3605_v37, 4  ;;  %v4912_v37 = vrot.slane %v4910_v21, 5  ;;  %v11618_v21 = vld [vmem:[#allocation30_spill] sm:$0xff] }
 0x194   : > { %v3616_v12 = vrot.slane %v3615_v20, 4  ;;  %v11604_v20 = vld [vmem:[#allocation32_spill] sm:$0xff] }
 0x195   : > { %v3611_v50 = vsel %vm8964_vm4, %v3606_v2, %v3610_v35  ;;  %v3403_v35 = vsel %vm523_vm0, %v10399_v63, 0  ;;  %v11613_v63 = vld [vmem:[#allocation59_spill] sm:$0xff] }
 0x197   : > { %7712 = vmatmul.mubr.msk.bf16.gmra.mrb[20].mxu1 %vm474_vm1, %v10097_v18  ;;  %8014 = vmatmul.mubr.msk.bf16.gmra.mrb[16].mxu0 %vm474_vm1, %v10052_v41  ;;  %v3618_v18 = vshll.u32 %v8789_v15, 16  ;;  %v4906_v41 = vrot.slane %v4904_v0, 4  ;;  %v11615_v15 = vld [vmem:[#allocation26_spill] sm:$0xff] }
 0x198   : > { %7715 = vmatprep.mubr.msk.bf16.mxu1 %vm474_vm1, %v10117_v1  ;;  %8017 = vmatprep.mubr.msk.bf16.mxu0 %vm474_vm1, %v10089_v45  ;;  %v4893_v1 = vrot.slane %v4891_v54, 4 }
 0x199   : > { %v3620_v44 = vrot.slane %v3618_v18, 5  ;;  %v4907_v54 = vor.u32 %v4906_v41, %v4902_v4  ;;  %v7048_v41 = vld [vmem:[%s11213_s3 + $0x10] sm:$0x3] }
 0x19a   : > { %v4897_v58 = vor.u32 %v4896_v46, %v4893_v1  ;;  %v6882_v46 = vld [vmem:[%s11212_s2 + $0x8] sm:$0x3]  ;;  %v11605_v1 = vld [vmem:[#allocation44_spill] sm:$0xff]  ;;  %v5575_v7 = vsel %vm523_vm0, %v7048_v41, 0 }
 0x19b   : > { %v3621_v18 = vsel %vm8964_vm4, %v3616_v12, %v3620_v44  ;;  %v4908_v27 = vrot.slane %v4907_v54, 4  ;;  %v11617_v54 = vld [vmem:[#allocation68_spill] sm:$0xff] }
 0x19c   : > { %v10481_v59 = vcombine.low %v3611_v50, %v3621_v18  ;;  %v4898_v0 = vrot.slane %v4897_v58, 4  ;;  %v11616_v58 = vld [vmem:[#allocation27_spill] sm:$0xff]  ;;  %v5119_v50 = vshrl.u32 %v10388_v3, 16  ;;  %v5122_v18 = vshll.u32 %v10388_v3, 16 }
 0x19d   : > { %v4913_v44 = vsel %vm8964_vm4, %v4908_v27, %v4912_v37  ;;  %v11619_v27 = vld [vmem:[#allocation31_spill] sm:$0xff]  ;;  %v5128_v37 = vshll.u32 %v10391_v29, 16 }
 0x19e   : > { %v4903_v12 = vsel %vm8964_vm4, %v4898_v0, %v4902_v4  ;;  %v5363_v4 = vsel %vm523_vm0, %v10418_v38, 0  ;;  %v11614_v38 = vld [vmem:[#allocation61_spill] sm:$0xff]  ;;  %v5132_v0 = vshrl.u32 %v10391_v29, 16 }
 0x19f   : > { %7716 = vmatmul.mubr.msk.bf16.gmra.mrb[24].mxu1 %vm474_vm1, %v10148_v22  ;;  %8018 = vmatmul.mubr.msk.bf16.gmra.mrb[20].mxu0 %vm474_vm1, %v10111_v34  ;;  %v6993_v2 = vcombine.low %v4903_v12, %v4913_v44  ;;  %v5124_v12 = vrot.slane %v5122_v18, 5  ;;  %v5130_v44 = vrot.slane %v5128_v37, 5  ;;  %v11636_v18 = vld [vmem:[#allocation75_spill] sm:$0xff] }
 0x1a0   : > { %7719 = vmatprep.mubr.msk.bf16.mxu1 %vm474_vm1, %v10173_v28  ;;  %8021 = vmatprep.mubr.msk.bf16.mxu0 %vm474_vm1, %v10142_v19 }
 0x1a7   : > { %7720 = vmatmul.mubr.msk.bf16.gmra.mrb[28].mxu1 %vm474_vm1, %v10193_v23  ;;  %8022 = vmatmul.mubr.msk.bf16.gmra.mrb[24].mxu0 %vm474_vm1, %v10162_v48 }
 0x1a8   : > { %7725 = vmatprep.mubr.msk.bf16.mxu1 %vm474_vm1, %v11604_v20  ;;  %8025 = vmatprep.mubr.msk.bf16.mxu0 %vm474_vm1, %v10481_v59  ;;  %v5121_v20 = vrot.slane %v5119_v50, 4  ;;  %v11633_v50 = vld [vmem:[#allocation66_spill] sm:$0xff] }
 0x1af   : > { %7726 = vmatmul.mubr.msk.bf16.vlgmr.msra.gmra.mrb[0].mxu1 %vm474_vm1, %v11553_v57  ;;  %8026 = vmatmul.mubr.msk.bf16.gmra.mrb[28].mxu0 %vm474_vm1, %v6993_v2  ;;  %v11607_v57 = vld [vmem:[#allocation18_spill] sm:$0xff]  ;;  %v5134_v2 = vrot.slane %v5132_v0, 4  ;;  %v11639_v0 = vld [vmem:[#allocation28_spill] sm:$0xff] }
 0x1b0   : > { %7729 = vmatprep.mubr.msk.bf16.mxu1 %vm474_vm1, %v11556_v6  ;;  %7758 = vmatpush3.bf16.msra.mxu1 %v3403_v35  ;;  %v11608_v6 = vld [vmem:[#allocation19_spill] sm:$0xff]  ;;  %v11620_v35 = vld [vmem:[#allocation33_spill] sm:$0xff] }
 0x1b1   : > { %8683 = vmatprep.subr.msk.bf16.mxu1 %vm523_vm0, %v6882_v46  ;;  %8031 = vmatprep.mubr.msk.bf16.mxu0 %vm474_vm1, %v11552_v30  ;;  %v11606_v30 = vld [vmem:[#allocation45_spill] sm:$0xff] }
 0x1b7   : > { %7730 = vmatmul.mubr.msk.bf16.gmra.mrb[4].mxu1 %vm474_vm1, %v11557_v55  ;;  %8032 = vmatmul.mubr.msk.bf16.vlgmr.msra.gmra.mrb[0].mxu0 %vm474_vm1, %v11554_v32  ;;  %v11609_v55 = vld [vmem:[#allocation50_spill] sm:$0xff]  ;;  %v11610_v32 = vld [vmem:[#allocation51_spill] sm:$0xff] }
 0x1b8   : > { %7733 = vmatprep.mubr.msk.bf16.mxu1 %vm474_vm1, %v11560_v16  ;;  %8064 = vmatpush3.bf16.msra.mxu0 %v5363_v4  ;;  %v11612_v16 = vld [vmem:[#allocation23_spill] sm:$0xff]  ;;  %v5125_v4 = vor.u32 %v5124_v12, %v5121_v20  ;;  %v5352_v20 = vrot.slane %v10468_v5, 5  ;;  %v11642_v12 = vld [vmem:[#allocation84_spill] sm:$0xff] }
 0x1b9   : > { %8035 = vmatprep.mubr.msk.bf16.mxu0 %vm474_vm1, %v11555_v36  ;;  %8692 = vmatprep.subr.msk.bf16.mxu0 %vm523_vm0, %v7048_v41  ;;  %v11611_v36 = vld [vmem:[#allocation22_spill] sm:$0xff]  ;;  %v11631_v41 = vld [vmem:[#allocation57_spill] sm:$0xff]  ;;  %v11654_v5 = vld [vmem:[#allocation56_spill] sm:$0xff] }
 0x1bf   : > { %7734 = vmatmul.mubr.msk.bf16.gmra.mrb[8].mxu1 %vm474_vm1, %v11605_v1  ;;  %8036 = vmatmul.mubr.msk.bf16.gmra.mrb[4].mxu0 %vm474_vm1, %v11607_v57  ;;  %v5135_v1 = vor.u32 %v5134_v2, %v5130_v44  ;;  %v5126_v57 = vrot.slane %v5125_v4, 4  ;;  %v11656_v4 = vld [vmem:[#allocation58_spill] sm:$0xff] }
 0x1c0   : > { %7737 = vmatprep.mubr.msk.bf16.mxu1 %vm474_vm1, %v11606_v30  ;;  %8039 = vmatprep.mubr.msk.bf16.mxu0 %vm474_vm1, %v11608_v6 }
 0x1c1   : > { %v5136_v6 = vrot.slane %v5135_v1, 4  ;;  %v11657_v1 = vld [vmem:[#allocation69_spill] sm:$0xff] }
 0x1c7   : > { %7738 = vmatmul.mubr.msk.bf16.gmra.mrb[12].mxu1 %vm474_vm1, %v11609_v55  ;;  %8040 = vmatmul.mubr.msk.bf16.gmra.mrb[8].mxu0 %vm474_vm1, %v11611_v36 }
 0x1c8   : > { %7741 = vmatprep.mubr.msk.bf16.mxu1 %vm474_vm1, %v11610_v32  ;;  %8043 = vmatprep.mubr.msk.bf16.mxu0 %vm474_vm1, %v11612_v16  ;;  %v3631_v16 = vsel %vm523_vm0, %v6882_v46, 0  ;;  %v11628_v46 = vld [vmem:[#allocation46_spill] sm:$0xff] }
 0x1cf   : > { %7742 = vmatmul.mubr.msk.bf16.gmra.mrb[16].mxu1 %vm474_vm1, %v11613_v63  ;;  %8044 = vmatmul.mubr.msk.bf16.gmra.mrb[12].mxu0 %vm474_vm1, %v11615_v15  ;;  %v11623_v63 = vld [vmem:[#allocation4_spill] sm:$0xff]  ;;  %v11627_v15 = vld [vmem:[#allocation9_spill] sm:$0xff] }
 0x1d0   : > { %7745 = vmatprep.mubr.msk.bf16.mxu1 %vm474_vm1, %v11614_v38  ;;  %8047 = vmatprep.mubr.msk.bf16.mxu0 %vm474_vm1, %v11616_v58  ;;  %v11626_v38 = vld [vmem:[#allocation8_spill] sm:$0xff] }
 0x1d1   : > { %v11629_v58 = vld [vmem:[#allocation48_spill] sm:$0xff] }
 0x1d7   : > { %7746 = vmatmul.mubr.msk.bf16.gmra.mrb[20].mxu1 %vm474_vm1, %v11617_v54  ;;  %8048 = vmatmul.mubr.msk.bf16.gmra.mrb[16].mxu0 %vm474_vm1, %v11618_v21  ;;  %v11630_v54 = vld [vmem:[#allocation54_spill] sm:$0xff]  ;;  %v11632_v21 = vld [vmem:[#allocation64_spill] sm:$0xff] }
 0x1d8   : > { %7749 = vmatprep.mubr.msk.bf16.mxu1 %vm474_vm1, %v11576_v8  ;;  %8051 = vmatprep.mubr.msk.bf16.mxu0 %vm474_vm1, %v11619_v27  ;;  %v10561_v8 = vld [vmem:[%s8869_s10 + $0xd4] sm:$0x1]  ;;  %v11641_v27 = vld [vmem:[#allocation82_spill] sm:$0xff] }
 0x1d9   : > { %v5138_v30 = vshll.u32 %v10561_v8, 16 }
 0x1db   : > { %v5140_v55 = vrot.slane %v5138_v30, 5  ;;  %v11658_v30 = vld [vmem:[#allocation63_spill] sm:$0xff] }
 0x1dd   : > { %v5141_v32 = vsel %vm8964_vm4, %v5136_v6, %v5140_v55  ;;  %v5564_v6 = vrot.slane %v10561_v8, 5 }
 0x1df   : > { %7750 = vmatmul.mubr.msk.bf16.gmra.mrb[24].mxu1 %vm474_vm1, %v11577_v43  ;;  %8052 = vmatmul.mubr.msk.bf16.gmra.mrb[20].mxu0 %vm474_vm1, %v11620_v35  ;;  %v11621_v43 = vld [vmem:[#allocation2_spill] sm:$0xff] }
 0x1e0   : > { %7753 = vmatprep.mubr.msk.bf16.mxu1 %vm474_vm1, %v9642_v42  ;;  %8055 = vmatprep.mubr.msk.bf16.mxu0 %vm474_vm1, %v11575_v17  ;;  %v11622_v42 = vld [vmem:[#allocation39_spill] sm:$0xff]  ;;  %v5131_v17 = vsel %vm8964_vm4, %v5126_v57, %v5130_v44  ;;  %v11655_v35 = vld [vmem:[#allocation62_spill] sm:$0xff] }
 0x1e1   : > { %v7011_v36 = vcombine.low %v5131_v17, %v5141_v32  ;;  %v10788_v17 = vld [vmem:[%s11214_s4] ss:$0 sm:$0xff] }
 0x1e7   : > { %7754 = vmatmul.mubr.msk.bf16.gmra.mrb[28].mxu1 %vm474_vm1, %v10291_v10  ;;  %8056 = vmatmul.mubr.msk.bf16.gmra.mrb[24].mxu0 %vm474_vm1, %v11578_v49  ;;  %v11624_v10 = vld [vmem:[#allocation5_spill] sm:$0xff] }
 0x1e8   : > { %7759 = vmatprep.mubr.msk.bf16.mxu1 %vm474_vm1, %v11621_v43  ;;  %8059 = vmatprep.mubr.msk.bf16.mxu0 %vm474_vm1, %v11622_v42  ;;  %v11625_v49 = vld [vmem:[#allocation41_spill] sm:$0xff] }
 0x1ef   : > { %7760 = vmatmul.mubr.msk.bf16.vlgmr.msra.gmra.mrb[0].mxu1 %vm474_vm1, %v11623_v63  ;;  %8060 = vmatmul.mubr.msk.bf16.gmra.mrb[28].mxu0 %vm474_vm1, %v7011_v36 }
 0x1f0   : > { %7763 = vmatprep.mubr.msk.bf16.mxu1 %vm474_vm1, %v11624_v10  ;;  %7792 = vmatpush3.bf16.msra.mxu1 %v3631_v16 }
 0x1f1   : > { %8065 = vmatprep.mubr.msk.bf16.mxu0 %vm474_vm1, %v11625_v49 }
 0x1f7   : > { %7764 = vmatmul.mubr.msk.bf16.gmra.mrb[4].mxu1 %vm474_vm1, %v11626_v38  ;;  %8066 = vmatmul.mubr.msk.bf16.vlgmr.msra.gmra.mrb[0].mxu0 %vm474_vm1, %v11628_v46 }
 0x1f8   : > { %7767 = vmatprep.mubr.msk.bf16.mxu1 %vm474_vm1, %v11627_v15  ;;  %8098 = vmatpush3.bf16.msra.mxu0 %v5575_v7 }
 0x1f9   : > { %8069 = vmatprep.mubr.msk.bf16.mxu0 %vm474_vm1, %v11629_v58 }
 0x1ff   : > { %7768 = vmatmul.mubr.msk.bf16.gmra.mrb[8].mxu1 %vm474_vm1, %v11589_v51  ;;  %8070 = vmatmul.mubr.msk.bf16.gmra.mrb[4].mxu0 %vm474_vm1, %v11630_v54  ;;  %v11634_v51 = vld [vmem:[#allocation20_spill] sm:$0xff] }
 0x200   : > { %7771 = vmatprep.mubr.msk.bf16.mxu1 %vm474_vm1, %v11592_v11  ;;  %8073 = vmatprep.mubr.msk.bf16.mxu0 %vm474_vm1, %v11631_v41  ;;  %v11635_v11 = vld [vmem:[#allocation73_spill] sm:$0xff] }
 0x207   : > { %7772 = vmatmul.mubr.msk.bf16.gmra.mrb[12].mxu1 %vm474_vm1, %v11593_v31  ;;  %8074 = vmatmul.mubr.msk.bf16.gmra.mrb[8].mxu0 %vm474_vm1, %v11632_v21  ;;  %v11638_v31 = vld [vmem:[#allocation80_spill] sm:$0xff] }
 0x208   : > { %7775 = vmatprep.mubr.msk.bf16.mxu1 %vm474_vm1, %v11596_v9  ;;  %8077 = vmatprep.mubr.msk.bf16.mxu0 %vm474_vm1, %v11633_v50  ;;  %v11637_v9 = vld [vmem:[#allocation79_spill] sm:$0xff] }
 0x20f   : > { %7776 = vmatmul.mubr.msk.bf16.gmra.mrb[16].mxu1 %vm474_vm1, %v11634_v51  ;;  %8078 = vmatmul.mubr.msk.bf16.gmra.mrb[12].mxu0 %vm474_vm1, %v11635_v11 }
 0x210   : > { %7779 = vmatprep.mubr.msk.bf16.mxu1 %vm474_vm1, %v11598_v61  ;;  %8081 = vmatprep.mubr.msk.bf16.mxu0 %vm474_vm1, %v11636_v18  ;;  %v11640_v61 = vld [vmem:[#allocation81_spill] sm:$0xff] }
 0x217   : > { %7780 = vmatmul.mubr.msk.bf16.gmra.mrb[20].mxu1 %vm474_vm1, %v11599_v14  ;;  %8082 = vmatmul.mubr.msk.bf16.gmra.mrb[16].mxu0 %vm474_vm1, %v11637_v9  ;;  %v5349_v14 = vrot.slane %v10304_v25, 5 }
 0x218   : > { %7783 = vmatprep.mubr.msk.bf16.mxu1 %vm474_vm1, %v11600_v60  ;;  %8085 = vmatprep.mubr.msk.bf16.mxu0 %vm474_vm1, %v11638_v31  ;;  %v7028_v60 = vrot.slane %v10301_v24, 9 }
 0x219   : > { %v5351_v37 = vrot.slane %v5349_v14, 4 }
 0x21a   : > { %v5350_v25 = vsel %vm9301_vm7, %v7028_v60, %v5349_v14 }
 0x21b   : > { %v5353_v24 = vsel %vm9301_vm7, %v5351_v37, %v5352_v20 }
 0x21c   : > { %v7030_v2 = vcombine.low %v5350_v25, %v5353_v24 }
 0x21f   : > { %7784 = vmatmul.mubr.msk.bf16.gmra.mrb[24].mxu1 %vm474_vm1, %v11639_v0  ;;  %8086 = vmatmul.mubr.msk.bf16.gmra.mrb[20].mxu0 %vm474_vm1, %v11640_v61 }
 0x220   : > { %7787 = vmatprep.mubr.msk.bf16.mxu1 %vm474_vm1, %v11603_v39  ;;  %8089 = vmatprep.mubr.msk.bf16.mxu0 %vm474_vm1, %v11641_v27  ;;  %v11643_v39 = vld [vmem:[#allocation83_spill] sm:$0xff] }
 0x227   : > { %7788 = vmatmul.mubr.msk.bf16.gmra.mrb[28].mxu1 %vm474_vm1, %v10375_v26  ;;  %8090 = vmatmul.mubr.msk.bf16.gmra.mrb[24].mxu0 %vm474_vm1, %v9739_v47  ;;  %v11645_v26 = vld [vmem:[#allocation85_spill] sm:$0xff]  ;;  %v11646_v47 = vld [vmem:[#allocation87_spill] sm:$0xff] }
 0x228   : > { %7793 = vmatprep.mubr.msk.bf16.mxu1 %vm474_vm1, %v11642_v12  ;;  %8093 = vmatprep.mubr.msk.bf16.mxu0 %vm474_vm1, %v11643_v39 }
 0x22f   : > { %7794 = vmatmul.mubr.msk.bf16.vlgmr.msra.gmra.mrb[0].mxu1 %vm474_vm1, %v9798_v62  ;;  %8094 = vmatmul.mubr.msk.bf16.gmra.mrb[28].mxu0 %vm474_vm1, %v7030_v2  ;;  %v11647_v62 = vld [vmem:[#allocation86_spill] sm:$0xff] }
 0x230   : > { %7797 = vmatprep.mubr.msk.bf16.mxu1 %vm474_vm1, %v9829_v33  ;;  %8099 = vmatprep.mubr.msk.bf16.mxu0 %vm474_vm1, %v9815_v52  ;;  %v11648_v52 = vld [vmem:[#allocation52_spill] sm:$0xff]  ;;  %v11649_v33 = vld [vmem:[#allocation47_spill] sm:$0xff] }
 0x237   : > { %7798 = vmatmul.mubr.msk.bf16.gmra.mrb[4].mxu1 %vm474_vm1, %v9861_v53  ;;  %8100 = vmatmul.mubr.msk.bf16.vlgmr.msra.gmra.mrb[0].mxu0 %vm474_vm1, %v9867_v40  ;;  %v11650_v53 = vld [vmem:[#allocation60_spill] sm:$0xff]  ;;  %v11651_v40 = vld [vmem:[#allocation49_spill] sm:$0xff] }
 0x238   : > { %7801 = vmatprep.mubr.msk.bf16.mxu1 %vm474_vm1, %v9883_v13  ;;  %8103 = vmatprep.mubr.msk.bf16.mxu0 %vm474_vm1, %v9889_v56  ;;  %v11652_v13 = vld [vmem:[#allocation53_spill] sm:$0xff]  ;;  %v11653_v56 = vld [vmem:[#allocation55_spill] sm:$0xff] }
 0x23f   : > { %7802 = vmatmul.mubr.msk.bf16.gmra.mrb[8].mxu1 %vm474_vm1, %v11645_v26  ;;  %8104 = vmatmul.mubr.msk.bf16.gmra.mrb[4].mxu0 %vm474_vm1, %v11647_v62 }
 0x240   : > { %7805 = vmatprep.mubr.msk.bf16.mxu1 %vm474_vm1, %v11646_v47  ;;  %8107 = vmatprep.mubr.msk.bf16.mxu0 %vm474_vm1, %v11648_v52 }
 0x247   : > { %7806 = vmatmul.mubr.msk.bf16.gmra.mrb[12].mxu1 %vm474_vm1, %v11649_v33  ;;  %8108 = vmatmul.mubr.msk.bf16.gmra.mrb[8].mxu0 %vm474_vm1, %v11651_v40 }
 0x248   : > { %7809 = vmatprep.mubr.msk.bf16.mxu1 %vm474_vm1, %v11650_v53  ;;  %8111 = vmatprep.mubr.msk.bf16.mxu0 %vm474_vm1, %v11652_v13 }
 0x24f   : > { %7810 = vmatmul.mubr.msk.bf16.gmra.mrb[16].mxu1 %vm474_vm1, %v11653_v56  ;;  %8112 = vmatmul.mubr.msk.bf16.gmra.mrb[12].mxu0 %vm474_vm1, %v11655_v35 }
 0x250   : > { %7813 = vmatprep.mubr.msk.bf16.mxu1 %vm474_vm1, %v11654_v5  ;;  %8115 = vmatprep.mubr.msk.bf16.mxu0 %vm474_vm1, %v11656_v4 }
 0x257   : > { %7814 = vmatmul.mubr.msk.bf16.gmra.mrb[20].mxu1 %vm474_vm1, %v10089_v45  ;;  %8116 = vmatmul.mubr.msk.bf16.gmra.mrb[16].mxu0 %vm474_vm1, %v11657_v1  ;;  %v5561_v45 = vrot.slane %v10391_v29, 5 }
 0x258   : > { %7817 = vmatprep.mubr.msk.bf16.mxu1 %vm474_vm1, %v10111_v34  ;;  %8119 = vmatprep.mubr.msk.bf16.mxu0 %vm474_vm1, %v11658_v30  ;;  %v7047_v34 = vrot.slane %v10388_v3, 9  ;;  %v8798_v3 = vmov 0  }
 0x259   : > { %v5563_v57 = vrot.slane %v5561_v45, 4  ;;  %5926 = vst [vmem:[%s10727_s25 + $0x18] sm:$0xf] %v8798_v3  ;;  %5920 = vst [vmem:[%s10727_s25] sm:$0xf] %v8798_v3 }
 0x25a   : > { %5921 = vst [vmem:[%s10727_s25 + $0x4] sm:$0xf] %v8798_v3  ;;  %5922 = vst [vmem:[%s10727_s25 + $0x8] sm:$0x1] %v8798_v3 }
 0x25b   : > { %5923 = vst [vmem:[%s10727_s25 + $0xc] sm:$0xf] %v8798_v3  ;;  %5924 = vst [vmem:[%s10727_s25 + $0x10] sm:$0xf] %v8798_v3 }
 0x25c   : > { %5925 = vst [vmem:[%s10727_s25 + $0x14] sm:$0x1] %v8798_v3  ;;  %5927 = vst [vmem:[%s10727_s25 + $0x1c] sm:$0xf] %v8798_v3 }
 0x25d   : > { %5928 = vst [vmem:[%s10727_s25 + $0x20] sm:$0x1] %v8798_v3  ;;  %5929 = vst [vmem:[%s10727_s25 + $0x24] sm:$0xf] %v8798_v3 }
 0x25e   : > { %5930 = vst [vmem:[%s10727_s25 + $0x28] sm:$0xf] %v8798_v3  ;;  %5931 = vst [vmem:[%s10727_s25 + $0x2c] sm:$0x1] %v8798_v3 }
 0x25f   : > { %7818 = vmatmul.mubr.msk.bf16.gmra.mrb[24].mxu1 %vm474_vm1, %v10142_v19  ;;  %8120 = vmatmul.mubr.msk.bf16.gmra.mrb[20].mxu0 %vm474_vm1, %v10148_v22  ;;  %v11659_v19 = vld [vmem:[#allocation65_spill] sm:$0xff]  ;;  %v5562_v22 = vsel %vm9301_vm7, %v7047_v34, %v5561_v45  ;;  %5932 = vst [vmem:[%s10727_s25 + $0x30] sm:$0xf] %v8798_v3  ;;  %5933 = vst [vmem:[%s10727_s25 + $0x34] sm:$0xf] %v8798_v3 }
 0x260   : > { %7821 = vmatprep.mubr.msk.bf16.mxu1 %vm474_vm1, %v10162_v48  ;;  %8123 = vmatprep.mubr.msk.bf16.mxu0 %vm474_vm1, %v10173_v28  ;;  %v5565_v48 = vsel %vm9301_vm7, %v5563_v57, %v5564_v6  ;;  %5934 = vst [vmem:[%s10727_s25 + $0x38] sm:$0x1] %v8798_v3  ;;  %5935 = vst [vmem:[%s10727_s25 + $0x3c] sm:$0xf] %v8798_v3  ;;  %v7104_v52 = vld [vmem:[%s10727_s25 + $0x18] sm:$0xf] }
 0x261   : > { %v7049_v28 = vcombine.low %v5562_v22, %v5565_v48  ;;  %5936 = vst [vmem:[%s10727_s25 + $0x40] sm:$0xf] %v8798_v3  ;;  %5937 = vst [vmem:[%s10727_s25 + $0x44] sm:$0x1] %v8798_v3 }
 0x262   : > { %5938 = vst [vmem:[%s10727_s25 + $0x48] sm:$0xf] %v8798_v3  ;;  %5939 = vst [vmem:[%s10727_s25 + $0x4c] sm:$0xf] %v8798_v3  ;;  %v7099_v4 = vld [vmem:[%s10727_s25 + $0xc] sm:$0xf] }
 0x263   : > { %5940 = vst [vmem:[%s10727_s25 + $0x50] sm:$0x1] %v8798_v3  ;;  %5941 = vst [vmem:[%s10727_s25 + $0x54] sm:$0xf] %v8798_v3 }
 0x264   : > { %5942 = vst [vmem:[%s10727_s25 + $0x58] sm:$0xf] %v8798_v3  ;;  %5943 = vst [vmem:[%s10727_s25 + $0x5c] sm:$0x1] %v8798_v3  ;;  %v7107_v22 = vld [vmem:[%s10727_s25 + $0x20] sm:$0x1] }
 0x265   : > { %5944 = vst [vmem:[%s10727_s25 + $0x60] sm:$0xf] %v8798_v3  ;;  %5945 = vst [vmem:[%s10727_s25 + $0x64] sm:$0xf] %v8798_v3 }
 0x266   : > { %5946 = vst [vmem:[%s10727_s25 + $0x68] sm:$0x1] %v8798_v3  ;;  %5947 = vst [vmem:[%s10727_s25 + $0x6c] sm:$0xf] %v8798_v3 }
 0x267   : > { %7822 = vmatmul.mubr.msk.bf16.gmra.mrb[28].mxu1 %vm474_vm1, %v10481_v59  ;;  %8124 = vmatmul.mubr.msk.bf16.gmra.mrb[24].mxu0 %vm474_vm1, %v10193_v23  ;;  %5948 = vst [vmem:[%s10727_s25 + $0x70] sm:$0xf] %v8798_v3  ;;  %5949 = vst [vmem:[%s10727_s25 + $0x74] sm:$0x1] %v8798_v3 }
 0x268   : > { %8127 = vmatprep.mubr.msk.bf16.mxu0 %vm474_vm1, %v11659_v19  ;;  %5950 = vst [vmem:[%s10727_s25 + $0x78] sm:$0xf] %v8798_v3  ;;  %5951 = vst [vmem:[%s10727_s25 + $0x7c] sm:$0xf] %v8798_v3 }
 0x269   : > { %5952 = vst [vmem:[%s10727_s25 + $0x80] sm:$0x1] %v8798_v3  ;;  %5953 = vst [vmem:[%s10727_s25 + $0x84] sm:$0xf] %v8798_v3 }
 0x26a   : > { %5954 = vst [vmem:[%s10727_s25 + $0x88] sm:$0xf] %v8798_v3  ;;  %5955 = vst [vmem:[%s10727_s25 + $0x8c] sm:$0x1] %v8798_v3 }
 0x26b   : > { %5956 = vst [vmem:[%s10727_s25 + $0x90] sm:$0xf] %v8798_v3  ;;  %5957 = vst [vmem:[%s10727_s25 + $0x94] sm:$0xf] %v8798_v3 }
 0x26c   : > { %5958 = vst [vmem:[%s10727_s25 + $0x98] sm:$0x1] %v8798_v3  ;;  %5959 = vst [vmem:[%s10727_s25 + $0x9c] sm:$0xf] %v8798_v3 }
 0x26d   : > { %5960 = vst [vmem:[%s10727_s25 + $0xa0] sm:$0xf] %v8798_v3  ;;  %5961 = vst [vmem:[%s10727_s25 + $0xa4] sm:$0x1] %v8798_v3 }
 0x26e   : > { %5962 = vst [vmem:[%s10727_s25 + $0xa8] sm:$0xf] %v8798_v3  ;;  %5963 = vst [vmem:[%s10727_s25 + $0xac] sm:$0xf] %v8798_v3 }
 0x26f   : > { %8128 = vmatmul.mubr.msk.bf16.gmra.mrb[28].mxu0 %vm474_vm1, %v7049_v28  ;;  %5964 = vst [vmem:[%s10727_s25 + $0xb0] sm:$0x1] %v8798_v3  ;;  %5965 = vst [vmem:[%s10727_s25 + $0xb4] sm:$0xf] %v8798_v3 }
 0x270   : > { %5966 = vst [vmem:[%s10727_s25 + $0xb8] sm:$0xf] %v8798_v3  ;;  %5967 = vst [vmem:[%s10727_s25 + $0xbc] sm:$0x1] %v8798_v3 }
 0x271   : > { %5968 = vst [vmem:[%s10727_s25 + $0xc0] sm:$0xf] %v8798_v3  ;;  %5969 = vst [vmem:[%s10727_s25 + $0xc4] sm:$0xf] %v8798_v3 }
 0x272   : > { %5970 = vst [vmem:[%s10727_s25 + $0xc8] sm:$0x1] %v8798_v3  ;;  %5971 = vst [vmem:[%s10727_s25 + $0xcc] sm:$0xf] %v8798_v3 }
 0x273   : > { %5972 = vst [vmem:[%s10727_s25 + $0xd0] sm:$0xf] %v8798_v3  ;;  %5973 = vst [vmem:[%s10727_s25 + $0xd4] sm:$0x1] %v8798_v3 }
 0x302   : > { %v7795_v23 = vpop.f32.mrb[0].mxu1 }
 0x303   : > { %v3667_v29 = vpop.f32.mrb[1].mxu1 }
 0x304   : > { %v7796_v59 = vpop.f32.mrb[2].mxu1 }
 0x305   : > { %v3670_v8 = vpop.f32.mrb[3].mxu1 }
 0x30a   : > { %v7799_v55 = vpop.f32.mrb[4].mxu1  ;;  %v8101_v42 = vpop.f32.mrb[0].mxu0 }
 0x30b   : > { %v10783_v43 = vpop.f32.mrb[5].mxu1  ;;  %v8131_v36 = vadd.f32 %v8101_v42, %v7795_v23  ;;  %v5611_v16 = vpop.f32.mrb[1].mxu0 }
 0x30c   : > { %v10790_v32 = vpop.f32.mrb[6].mxu1  ;;  %v8132_v10 = vadd.f32 %v5611_v16, %v3667_v29  ;;  %v8102_v49 = vpop.f32.mrb[2].mxu0 }
 0x30d   : > { %v10792_v63 = vpop.f32.mrb[7].mxu1  ;;  %v5779_v38 = vadd.f32 %v8131_v36, %v10788_v17  ;;  %v8133_v7 = vadd.f32 %v8102_v49, %v7796_v59  ;;  %v5614_v15 = vpop.f32.mrb[3].mxu0 }
 0x30e   : > { %v5777_v46 = vadd.f32 %v8132_v10, %v10788_v17  ;;  %v8134_v58 = vadd.f32 %v5614_v15, %v3670_v8 }
 0x30f   : > { %v7183_v54 = vpack.c.bf16 %v5779_v38, %v5779_v38  ;;  %v5780_v41 = vadd.f32 %v8133_v7, %v10788_v17  ;;  %v5848_v21 = vmul.f32 %v5779_v38, %v5779_v38 }
 0x310   : > { %v5846_v50 = vmul.f32 %v5777_v46, %v5777_v46  ;;  %v7181_v51 = vpack.c.bf16 %v5777_v46, %v5777_v46  ;;  %v5778_v11 = vadd.f32 %v8134_v58, %v10788_v17 }
 0x311   : > { %v6091_v9 = vshrl.u32 %v7183_v54, 16  ;;  %v6094_v31 = vshll.u32 %v7183_v54, 16  ;;  %v5849_v0 = vmul.f32 %v5780_v41, %v5780_v41  ;;  %v7184_v61 = vpack.c.bf16 %v5780_v41, %v5780_v41 }
 0x312   : > { %v10798_v18 = vpop.f32.mrb[8].mxu1  ;;  %v6074_v14 = vshrl.u32 %v7181_v51, 16  ;;  %v6077_v60 = vshll.u32 %v7181_v51, 16  ;;  %v5809_v37 = vadd.f32 %v5778_v11, %v5777_v46  ;;  %v5847_v20 = vmul.f32 %v5778_v11, %v5778_v11  ;;  %v8105_v12 = vpop.f32.mrb[4].mxu0 }
 0x313   : > { %v10800_v27 = vpop.f32.mrb[9].mxu1  ;;  %v6093_v44 = vrot.slane %v6091_v9, 7  ;;  %v6099_v25 = vshrl.u32 %v7184_v61, 16  ;;  %v6102_v24 = vshll.u32 %v7184_v61, 16  ;;  %v7182_v2 = vpack.c.bf16 %v5778_v11, %v5778_v11  ;;  %v5627_v26 = vpop.f32.mrb[5].mxu0 }
 0x314   : > { %v10802_v39 = vpop.f32.mrb[10].mxu1  ;;  %v6076_v33 = vrot.slane %v6074_v14, 7  ;;  %v5810_v53 = vadd.f32 %v5809_v37, %v5779_v38  ;;  %v5878_v40 = vadd.f32 %v5847_v20, %v5846_v50  ;;  %v8135_v13 = vadd.f32 %v8105_v12, %v7799_v55  ;;  %v8106_v56 = vpop.f32.mrb[6].mxu0  ;;  %v7102_v55 = vld [vmem:[%s10727_s25 + $0x14] sm:$0x1] }
 0x315   : > { %v10804_v47 = vpop.f32.mrb[11].mxu1  ;;  %v6096_v5 = vor.u32 %v6094_v31, %v6093_v44  ;;  %v6097_v35 = vrot.slane %v6093_v44, 4  ;;  %v6101_v30 = vrot.slane %v6099_v25, 7  ;;  %v6082_v45 = vshrl.u32 %v7182_v2, 16  ;;  %v5630_v34 = vpop.f32.mrb[7].mxu0 }
 0x316   : > { %v6079_v57 = vor.u32 %v6077_v60, %v6076_v33  ;;  %v6080_v6 = vrot.slane %v6076_v33, 4  ;;  %v5879_v48 = vadd.f32 %v5878_v40, %v5848_v21  ;;  %v6085_v28 = vshll.u32 %v7182_v2, 16 }
 0x317   : > { %v6407_v3 = vsel %vm10808_vm13, %v6096_v5, %v7104_v52  ;;  %v6104_v23 = vor.u32 %v6102_v24, %v6101_v30  ;;  %v6106_v29 = vrot.slane %v6101_v30, 4  ;;  %v6084_v59 = vrot.slane %v6082_v45, 7 }
 0x318   : > { %7105 = vst [vmem:[%s10727_s25 + $0x18] sm:$0xf] %v6407_v3  ;;  %v6398_v8 = vsel %vm10808_vm13, %v6079_v57, %v7099_v4  ;;  %v5783_v42 = vadd.f32 %v8135_v13, %v10788_v17  ;;  %v8136_v36 = vadd.f32 %v5627_v26, %v10783_v43  ;;  %v5811_v16 = vadd.f32 %v5810_v53, %v5780_v41  ;;  %v7114_v53 = vld [vmem:[%s10727_s25 + $0x30] sm:$0xf] }
 0x319   : > { %7100 = vst [vmem:[%s10727_s25 + $0xc] sm:$0xf] %v6398_v8  ;;  %v6105_v49 = vsel %vm10816_vm14, %v6097_v35, %v6104_v23  ;;  %v6411_v38 = vsel %vm10822_vm15, %v6106_v29, %v7107_v22  ;;  %v6087_v7 = vor.u32 %v6085_v28, %v6084_v59  ;;  %v6089_v15 = vrot.slane %v6084_v59, 4  ;;  %v7109_v22 = vld [vmem:[%s10727_s25 + $0x24] sm:$0xf] }
 0x31a   : > { %v10835_v10 = vpop.f32.mrb[12].mxu1  ;;  %7106 = vst [vmem:[%s10727_s25 + $0x1c] sm:$0xf] %v6105_v49  ;;  %7108 = vst [vmem:[%s10727_s25 + $0x20] sm:$0x1] %v6411_v38  ;;  %v7187_v58 = vpack.c.bf16 %v5783_v42, %v5783_v42  ;;  %v5781_v43 = vadd.f32 %v8136_v36, %v10788_v17  ;;  %v5880_v54 = vadd.f32 %v5879_v48, %v5849_v0  ;;  %v8109_v41 = vpop.f32.mrb[8].mxu0 }
 0x31b   : > { %v10842_v46 = vpop.f32.mrb[13].mxu1  ;;  %v6088_v50 = vsel %vm10816_vm14, %v6080_v6, %v6087_v7  ;;  %v6404_v51 = vsel %vm10822_vm15, %v6089_v15, %v7102_v55  ;;  %v8137_v11 = vadd.f32 %v8106_v56, %v10790_v32  ;;  %v8138_v9 = vadd.f32 %v5630_v34, %v10792_v63  ;;  %v5643_v31 = vpop.f32.mrb[9].mxu0  ;;  %v7117_v7 = vld [vmem:[%s10727_s25 + $0x38] sm:$0x1] }
 0x31c   : > { %v10847_v21 = vpop.f32.mrb[14].mxu1  ;;  %7101 = vst [vmem:[%s10727_s25 + $0x10] sm:$0xf] %v6088_v50  ;;  %7103 = vst [vmem:[%s10727_s25 + $0x14] sm:$0x1] %v6404_v51  ;;  %v6125_v0 = vshrl.u32 %v7187_v58, 16  ;;  %v5812_v60 = vadd.f32 %v5811_v16, %v5781_v43  ;;  %v5850_v37 = vmul.f32 %v5781_v43, %v5781_v43  ;;  %v7185_v12 = vpack.c.bf16 %v5781_v43, %v5781_v43 }
 0x31d   : > { %v10855_v61 = vpop.f32.mrb[15].mxu1  ;;  %v6128_v14 = vshll.u32 %v7187_v58, 16  ;;  %v8110_v20 = vpop.f32.mrb[10].mxu0  ;;  %v5784_v44 = vadd.f32 %v8137_v11, %v10788_v17  ;;  %v5782_v25 = vadd.f32 %v8138_v9, %v10788_v17  ;;  %v8139_v32 = vadd.f32 %v8109_v41, %v10798_v18  ;;  %v7112_v9 = vld [vmem:[%s10727_s25 + $0x2c] sm:$0x1] }
 0x31e   : > { %v10862_v24 = vpop.f32.mrb[11].mxu0  ;;  %v6127_v63 = vrot.slane %v6125_v0, 7  ;;  %v5881_v2 = vadd.f32 %v5880_v54, %v5850_v37  ;;  %v8140_v26 = vadd.f32 %v5643_v31, %v10800_v27  ;;  %v8141_v52 = vadd.f32 %v8110_v20, %v10802_v39 }
 0x31f   : > { %v5852_v33 = vmul.f32 %v5783_v42, %v5783_v42  ;;  %v6108_v40 = vshrl.u32 %v7185_v12, 16  ;;  %v6111_v13 = vshll.u32 %v7185_v12, 16  ;;  %v7188_v56 = vpack.c.bf16 %v5784_v44, %v5784_v44 }
 0x320   : > { %v6130_v5 = vor.u32 %v6128_v14, %v6127_v63  ;;  %v5853_v35 = vmul.f32 %v5784_v44, %v5784_v44  ;;  %v5813_v4 = vadd.f32 %v5812_v60, %v5782_v25  ;;  %v5851_v30 = vmul.f32 %v5782_v25, %v5782_v25 }
 0x321   : > { %v6131_v45 = vrot.slane %v6127_v63, 4  ;;  %v6110_v34 = vrot.slane %v6108_v40, 7  ;;  %v6133_v57 = vshrl.u32 %v7188_v56, 16  ;;  %v7186_v6 = vpack.c.bf16 %v5782_v25, %v5782_v25  ;;  %v7124_v40 = vld [vmem:[%s10727_s25 + $0x48] sm:$0xf] }
 0x322   : > { %v10867_v18 = vpop.f32.mrb[16].mxu1  ;;  %v6421_v39 = vsel %vm10808_vm13, %v6130_v5, %v7114_v53  ;;  %v5814_v48 = vadd.f32 %v5813_v4, %v5783_v42  ;;  %v5882_v28 = vadd.f32 %v5881_v2, %v5851_v30  ;;  %v10875_v3 = vadd.f32 %v8139_v32, %v10788_v17  ;;  %v8113_v23 = vpop.f32.mrb[12].mxu0 }
 0x323   : > { %v10869_v27 = vpop.f32.mrb[17].mxu1  ;;  %7115 = vst [vmem:[%s10727_s25 + $0x30] sm:$0xf] %v6421_v39  ;;  %v6113_v59 = vor.u32 %v6111_v13, %v6110_v34  ;;  %v6135_v8 = vrot.slane %v6133_v57, 7  ;;  %v6136_v55 = vshll.u32 %v7188_v56, 16  ;;  %v6116_v36 = vshrl.u32 %v7186_v6, 16 }
 0x324   : > { %v10877_v29 = vpop.f32.mrb[18].mxu1  ;;  %v5659_v16 = vpop.f32.mrb[13].mxu0  ;;  %v6114_v38 = vrot.slane %v6110_v34, 4  ;;  %v5883_v42 = vadd.f32 %v5882_v28, %v5852_v33  ;;  %v6119_v15 = vshll.u32 %v7186_v6, 16  ;;  %v7191_v58 = vpack.c.bf16 %v10875_v3, %v10875_v3 }
 0x325   : > { %v10880_v49 = vpop.f32.mrb[19].mxu1  ;;  %v8114_v43 = vpop.f32.mrb[14].mxu0  ;;  %v6414_v54 = vsel %vm10808_vm13, %v6113_v59, %v7109_v22  ;;  %v6138_v41 = vor.u32 %v6136_v55, %v6135_v8  ;;  %v6140_v50 = vrot.slane %v6135_v8, 4  ;;  %v6118_v51 = vrot.slane %v6116_v36, 7 }
 0x326   : > { %v10887_v11 = vpop.f32.mrb[15].mxu0  ;;  %7110 = vst [vmem:[%s10727_s25 + $0x24] sm:$0xf] %v6414_v54  ;;  %v6159_v31 = vshrl.u32 %v7191_v58, 16  ;;  %v6162_v0 = vshll.u32 %v7191_v58, 16  ;;  %v5785_v14 = vadd.f32 %v8140_v26, %v10788_v17  ;;  %v5815_v60 = vadd.f32 %v5814_v48, %v5784_v44 }
 0x327   : > { %v6139_v37 = vsel %vm10816_vm14, %v6131_v45, %v6138_v41  ;;  %v6425_v20 = vsel %vm10822_vm15, %v6140_v50, %v7117_v7  ;;  %v6121_v12 = vor.u32 %v6119_v15, %v6118_v51  ;;  %v6123_v25 = vrot.slane %v6118_v51, 4  ;;  %v7119_v58 = vld [vmem:[%s10727_s25 + $0x3c] sm:$0xf] }
 0x328   : > { %7116 = vst [vmem:[%s10727_s25 + $0x34] sm:$0xf] %v6139_v37  ;;  %7118 = vst [vmem:[%s10727_s25 + $0x38] sm:$0x1] %v6425_v20  ;;  %v10898_v32 = vrot.slane %v6159_v31, 7  ;;  %v5816_v63 = vadd.f32 %v5815_v60, %v5785_v14  ;;  %v5854_v2 = vmul.f32 %v5785_v14, %v5785_v14  ;;  %v5884_v33 = vadd.f32 %v5883_v42, %v5853_v35 }
 0x329   : > { %v6122_v44 = vsel %vm10816_vm14, %v6114_v38, %v6121_v12  ;;  %v6418_v26 = vsel %vm10822_vm15, %v6123_v25, %v7112_v9  ;;  %v7189_v13 = vpack.c.bf16 %v5785_v14, %v5785_v14  ;;  %v5788_v56 = vadd.f32 %v8141_v52, %v10788_v17  ;;  %v7127_v31 = vld [vmem:[%s10727_s25 + $0x50] sm:$0x1] }
 0x32a   : > { %v10900_v53 = vpop.f32.mrb[20].mxu1  ;;  %7111 = vst [vmem:[%s10727_s25 + $0x28] sm:$0xf] %v6122_v44  ;;  %7113 = vst [vmem:[%s10727_s25 + $0x2c] sm:$0x1] %v6418_v26  ;;  %v5856_v4 = vmul.f32 %v10875_v3, %v10875_v3  ;;  %v6164_v35 = vor.u32 %v6162_v0, %v10898_v32  ;;  %v5885_v30 = vadd.f32 %v5884_v33, %v5854_v2  ;;  %v10917_v34 = vpop.f32.mrb[16].mxu0 }
 0x32b   : > { %v10908_v5 = vpop.f32.mrb[21].mxu1  ;;  %v8142_v45 = vadd.f32 %v10862_v24, %v10804_v47  ;;  %v6165_v52 = vrot.slane %v10898_v32, 4  ;;  %v6142_v6 = vshrl.u32 %v7189_v13, 16  ;;  %v6145_v39 = vshll.u32 %v7189_v13, 16  ;;  %v10922_v48 = vpop.f32.mrb[17].mxu0 }
 0x32c   : > { %v10919_v57 = vpop.f32.mrb[22].mxu1  ;;  %v7192_v22 = vpack.c.bf16 %v5788_v56, %v5788_v56  ;;  %v6435_v59 = vsel %vm10808_vm13, %v6164_v35, %v7124_v40  ;;  %v8143_v47 = vadd.f32 %v8113_v23, %v10835_v10  ;;  %v8144_v24 = vadd.f32 %v5659_v16, %v10842_v46  ;;  %v10931_v55 = vpop.f32.mrb[18].mxu0  ;;  %v7122_v13 = vld [vmem:[%s10727_s25 + $0x44] sm:$0x1] }
 0x32d   : > { %v10924_v28 = vpop.f32.mrb[23].mxu1  ;;  %v5786_v8 = vadd.f32 %v8142_v45, %v10788_v17  ;;  %7125 = vst [vmem:[%s10727_s25 + $0x48] sm:$0xf] %v6435_v59  ;;  %v6144_v36 = vrot.slane %v6142_v6, 7  ;;  %v5857_v38 = vmul.f32 %v5788_v56, %v5788_v56  ;;  %v8145_v42 = vadd.f32 %v8114_v43, %v10847_v21  ;;  %v10935_v15 = vpop.f32.mrb[19].mxu0 }
 0x32e   : > { %v6167_v7 = vshrl.u32 %v7192_v22, 16  ;;  %v10939_v51 = vadd.f32 %v8143_v47, %v10788_v17  ;;  %v6170_v23 = vshll.u32 %v7192_v22, 16  ;;  %v5789_v16 = vadd.f32 %v8144_v24, %v10788_v17 }
 0x32f   : > { %v5817_v54 = vadd.f32 %v5816_v63, %v5786_v8  ;;  %v5855_v41 = vmul.f32 %v5786_v8, %v5786_v8  ;;  %v7190_v50 = vpack.c.bf16 %v5786_v8, %v5786_v8  ;;  %v6147_v10 = vor.u32 %v6145_v39, %v6144_v36 }
 0x330   : > { %v6169_v46 = vrot.slane %v6167_v7, 7  ;;  %v6148_v9 = vrot.slane %v6144_v36, 4  ;;  %v5858_v35 = vmul.f32 %v5789_v16, %v5789_v16 }
 0x331   : > { %v5818_v0 = vadd.f32 %v5817_v54, %v10875_v3  ;;  %v5886_v21 = vadd.f32 %v5885_v30, %v5855_v41  ;;  %v6150_v43 = vshrl.u32 %v7190_v50, 16  ;;  %v6428_v60 = vsel %vm10808_vm13, %v6147_v10, %v7119_v58 }
 0x332   : > { %v10944_v14 = vpop.f32.mrb[24].mxu1  ;;  %v6172_v37 = vor.u32 %v6170_v23, %v6169_v46  ;;  %v6174_v20 = vrot.slane %v6169_v46, 4  ;;  %v6153_v12 = vshll.u32 %v7190_v50, 16  ;;  %7120 = vst [vmem:[%s10727_s25 + $0x3c] sm:$0xf] %v6428_v60  ;;  %v7195_v3 = vpack.c.bf16 %v10939_v51, %v10939_v51  ;;  %v10953_v33 = vpop.f32.mrb[20].mxu0 }
 0x333   : > { %v10948_v25 = vpop.f32.mrb[25].mxu1  ;;  %v5887_v32 = vadd.f32 %v5886_v21, %v5856_v4  ;;  %v6152_v63 = vrot.slane %v6150_v43, 7  ;;  %v5819_v2 = vadd.f32 %v5818_v0, %v5788_v56  ;;  %v7193_v30 = vpack.c.bf16 %v5789_v16, %v5789_v16  ;;  %v10962_v45 = vpop.f32.mrb[21].mxu0  ;;  %v7134_v50 = vld [vmem:[%s10727_s25 + $0x60] sm:$0xf] }
 0x334   : > { %v10955_v44 = vpop.f32.mrb[26].mxu1  ;;  %v6173_v26 = vsel %vm10816_vm14, %v6165_v52, %v6172_v37  ;;  %v6439_v40 = vsel %vm10822_vm15, %v6174_v20, %v7127_v31  ;;  %v6193_v39 = vshrl.u32 %v7195_v3, 16  ;;  %v6196_v22 = vshll.u32 %v7195_v3, 16  ;;  %v10968_v52 = vpop.f32.mrb[22].mxu0  ;;  %v7129_v0 = vld [vmem:[%s10727_s25 + $0x54] sm:$0xf] }
 0x335   : > { %v10964_v4 = vpop.f32.mrb[27].mxu1  ;;  %7126 = vst [vmem:[%s10727_s25 + $0x4c] sm:$0xf] %v6173_v26  ;;  %7128 = vst [vmem:[%s10727_s25 + $0x50] sm:$0x1] %v6439_v40  ;;  %v6155_v56 = vor.u32 %v6153_v12, %v6152_v63  ;;  %v6157_v6 = vrot.slane %v6152_v63, 4  ;;  %v5820_v59 = vadd.f32 %v5819_v2, %v5789_v16  ;;  %v5888_v8 = vadd.f32 %v5887_v32, %v5857_v38 }
 0x336   : > { %v6176_v47 = vshrl.u32 %v7193_v30, 16  ;;  %v6179_v24 = vshll.u32 %v7193_v30, 16  ;;  %v10970_v36 = vpop.f32.mrb[23].mxu0  ;;  %v6195_v54 = vrot.slane %v6193_v39, 7  ;;  %v5792_v41 = vadd.f32 %v8145_v42, %v10788_v17  ;;  %v7137_v39 = vld [vmem:[%s10727_s25 + $0x68] sm:$0x1] }
 0x337   : > { %v6156_v7 = vsel %vm10816_vm14, %v6148_v9, %v6155_v56  ;;  %v6432_v58 = vsel %vm10822_vm15, %v6157_v6, %v7122_v13  ;;  %v5889_v10 = vadd.f32 %v5888_v8, %v5858_v35  ;;  %v8146_v38 = vadd.f32 %v10887_v11, %v10855_v61 }
 0x338   : > { %7121 = vst [vmem:[%s10727_s25 + $0x40] sm:$0xf] %v6156_v7  ;;  %7123 = vst [vmem:[%s10727_s25 + $0x44] sm:$0x1] %v6432_v58  ;;  %v10980_v46 = vrot.slane %v6176_v47, 7  ;;  %v8147_v23 = vadd.f32 %v10917_v34, %v10867_v18  ;;  %v5860_v16 = vmul.f32 %v10939_v51, %v10939_v51  ;;  %v6198_v9 = vor.u32 %v6196_v22, %v6195_v54 }
 0x339   : > { %v6199_v31 = vrot.slane %v6195_v54, 4  ;;  %v7196_v42 = vpack.c.bf16 %v5792_v41, %v5792_v41  ;;  %v5861_v60 = vmul.f32 %v5792_v41, %v5792_v41  ;;  %v5790_v37 = vadd.f32 %v8146_v38, %v10788_v17 }
 0x33a   : > { %v10989_v21 = vpop.f32.mrb[28].mxu1  ;;  %v6181_v43 = vor.u32 %v6179_v24, %v10980_v46  ;;  %v10994_v61 = vadd.f32 %v8147_v23, %v10788_v17  ;;  %v6449_v11 = vsel %vm10808_vm13, %v6198_v9, %v7134_v50  ;;  %v6182_v34 = vrot.slane %v10980_v46, 4  ;;  %v11003_v32 = vpop.f32.mrb[24].mxu0 }
 0x33b   : > { %v10996_v18 = vpop.f32.mrb[29].mxu1  ;;  %v6201_v20 = vshrl.u32 %v7196_v42, 16  ;;  %v8148_v12 = vadd.f32 %v10922_v48, %v10869_v27  ;;  %7135 = vst [vmem:[%s10727_s25 + $0x60] sm:$0xf] %v6449_v11  ;;  %v5821_v2 = vadd.f32 %v5820_v59, %v5790_v37  ;;  %v5859_v26 = vmul.f32 %v5790_v37, %v5790_v37  ;;  %v11010_v13 = vpop.f32.mrb[25].mxu0 }
 0x33c   : > { %v11005_v63 = vpop.f32.mrb[30].mxu1  ;;  %v6442_v3 = vsel %vm10808_vm13, %v6181_v43, %v7129_v0  ;;  %v7194_v40 = vpack.c.bf16 %v5790_v37, %v5790_v37  ;;  %v6204_v56 = vshll.u32 %v7196_v42, 16  ;;  %v7199_v27 = vpack.c.bf16 %v10994_v61, %v10994_v61  ;;  %v11018_v6 = vpop.f32.mrb[26].mxu0 }
 0x33d   : > { %v11012_v35 = vpop.f32.mrb[31].mxu1  ;;  %7130 = vst [vmem:[%s10727_s25 + $0x54] sm:$0xf] %v6442_v3  ;;  %v6203_v30 = vrot.slane %v6201_v20, 7  ;;  %v5793_v48 = vadd.f32 %v8148_v12, %v10788_v17  ;;  %v5822_v22 = vadd.f32 %v5821_v2, %v10939_v51  ;;  %v5890_v59 = vadd.f32 %v5889_v10, %v5859_v26  ;;  %v11022_v24 = vpop.f32.mrb[27].mxu0 }
 0x33e   : > { %v6184_v8 = vshrl.u32 %v7194_v40, 16  ;;  %v6187_v47 = vshll.u32 %v7194_v40, 16  ;;  %v6227_v54 = vshrl.u32 %v7199_v27, 16  ;;  %v6230_v50 = vshll.u32 %v7199_v27, 16  ;;  %v7132_v10 = vld [vmem:[%s10727_s25 + $0x5c] sm:$0x1] }
 0x33f   : > { %v6206_v7 = vor.u32 %v6204_v56, %v6203_v30  ;;  %v6208_v58 = vrot.slane %v6203_v30, 4  ;;  %v5891_v46 = vadd.f32 %v5890_v59, %v5860_v16  ;;  %v5823_v23 = vadd.f32 %v5822_v22, %v5792_v41  ;;  %v7144_v16 = vld [vmem:[%s10727_s25 + $0x78] sm:$0xf] }
 0x340   : > { %v6186_v38 = vrot.slane %v6184_v8, 7  ;;  %v5862_v9 = vmul.f32 %v5793_v48, %v5793_v48  ;;  %v11029_v42 = vrot.slane %v6227_v54, 7  ;;  %v7197_v43 = vpack.c.bf16 %v5793_v48, %v5793_v48  ;;  %v7139_v8 = vld [vmem:[%s10727_s25 + $0x6c] sm:$0xf] }
 0x341   : > { %v6207_v0 = vsel %vm10816_vm14, %v6199_v31, %v6206_v7  ;;  %v6453_v51 = vsel %vm10822_vm15, %v6208_v58, %v7137_v39  ;;  %v5824_v20 = vadd.f32 %v5823_v23, %v5793_v48  ;;  %v5892_v41 = vadd.f32 %v5891_v46, %v5861_v60 }
 0x342   : > { %7136 = vst [vmem:[%s10727_s25 + $0x64] sm:$0xf] %v6207_v0  ;;  %7138 = vst [vmem:[%s10727_s25 + $0x68] sm:$0x1] %v6453_v51  ;;  %v6189_v37 = vor.u32 %v6187_v47, %v6186_v38  ;;  %v6191_v11 = vrot.slane %v6186_v38, 4  ;;  %v5864_v12 = vmul.f32 %v10994_v61, %v10994_v61  ;;  %v6232_v31 = vor.u32 %v6230_v50, %v11029_v42  ;;  %v11037_v26 = vpop.f32.mrb[28].mxu0 }
 0x343   : > { %v6210_v3 = vshrl.u32 %v7197_v43, 16  ;;  %v6213_v2 = vshll.u32 %v7197_v43, 16  ;;  %v5893_v56 = vadd.f32 %v5892_v41, %v5862_v9  ;;  %v8149_v60 = vadd.f32 %v10931_v55, %v10877_v29  ;;  %v11045_v27 = vpop.f32.mrb[29].mxu0 }
 0x344   : > { %v6190_v40 = vsel %vm10816_vm14, %v6182_v34, %v6189_v37  ;;  %v6446_v30 = vsel %vm10822_vm15, %v6191_v11, %v7132_v10  ;;  %v6463_v48 = vsel %vm10808_vm13, %v6232_v31, %v7144_v16  ;;  %v8150_v22 = vadd.f32 %v10935_v15, %v10880_v49  ;;  %v11055_v59 = vpop.f32.mrb[30].mxu0 }
 0x345   : > { %7131 = vst [vmem:[%s10727_s25 + $0x58] sm:$0xf] %v6190_v40  ;;  %7133 = vst [vmem:[%s10727_s25 + $0x5c] sm:$0x1] %v6446_v30  ;;  %v6212_v39 = vrot.slane %v6210_v3, 7  ;;  %v8151_v34 = vadd.f32 %v10953_v33, %v10900_v53  ;;  %v5796_v29 = vadd.f32 %v8149_v60, %v10788_v17  ;;  %v8152_v55 = vadd.f32 %v10962_v45, %v10908_v5  ;;  %v11066_v49 = vpop.f32.mrb[31].mxu0 }
 0x346   : > { %7145 = vst [vmem:[%s10727_s25 + $0x78] sm:$0xf] %v6463_v48  ;;  %v8153_v47 = vadd.f32 %v10968_v52, %v10919_v57  ;;  %v8154_v7 = vadd.f32 %v10970_v36, %v10924_v28  ;;  %v6233_v53 = vrot.slane %v11029_v42, 4  ;;  %v5794_v33 = vadd.f32 %v8150_v22, %v10788_v17  ;;  %v7154_v22 = vld [vmem:[%s10727_s25 + $0x90] sm:$0xf] }
 0x347   : > { %v6215_v15 = vor.u32 %v6213_v2, %v6212_v39  ;;  %v11071_v58 = vadd.f32 %v8151_v34, %v10788_v17  ;;  %v6216_v54 = vrot.slane %v6212_v39, 4  ;;  %v5865_v50 = vmul.f32 %v5796_v29, %v5796_v29 }
 0x348   : > { %v7200_v5 = vpack.c.bf16 %v5796_v29, %v5796_v29  ;;  %v5797_v45 = vadd.f32 %v8152_v55, %v10788_v17  ;;  %v5825_v52 = vadd.f32 %v5824_v20, %v5794_v33  ;;  %v5863_v28 = vmul.f32 %v5794_v33, %v5794_v33  ;;  %v7147_v20 = vld [vmem:[%s10727_s25 + $0x80] sm:$0x1] }
 0x349   : > { %v6456_v57 = vsel %vm10808_vm13, %v6215_v15, %v7139_v8  ;;  %v7198_v36 = vpack.c.bf16 %v5794_v33, %v5794_v33  ;;  %v7203_v23 = vpack.c.bf16 %v11071_v58, %v11071_v58  ;;  %v11080_v9 = vadd.f32 %v8153_v47, %v10788_v17 }
 0x34a   : > { %7140 = vst [vmem:[%s10727_s25 + $0x6c] sm:$0xf] %v6456_v57  ;;  %v6235_v46 = vshrl.u32 %v7200_v5, 16  ;;  %v6238_v38 = vshll.u32 %v7200_v5, 16  ;;  %v5826_v0 = vadd.f32 %v5825_v52, %v10994_v61  ;;  %v5894_v51 = vadd.f32 %v5893_v56, %v5863_v28  ;;  %v7142_v61 = vld [vmem:[%s10727_s25 + $0x74] sm:$0x1] }
 0x34b   : > { %v6218_v10 = vshrl.u32 %v7198_v36, 16  ;;  %v5868_v42 = vmul.f32 %v11071_v58, %v11071_v58  ;;  %v6221_v37 = vshll.u32 %v7198_v36, 16  ;;  %v6261_v11 = vshrl.u32 %v7203_v23, 16 }
 0x34c   : > { %v6237_v43 = vrot.slane %v6235_v46, 7  ;;  %v5866_v16 = vmul.f32 %v5797_v45, %v5797_v45  ;;  %v5895_v41 = vadd.f32 %v5894_v51, %v5864_v12  ;;  %v5827_v3 = vadd.f32 %v5826_v0, %v5796_v29 }
 0x34d   : > { %v6220_v31 = vrot.slane %v6218_v10, 7  ;;  %v7201_v2 = vpack.c.bf16 %v5797_v45, %v5797_v45  ;;  %v6263_v56 = vrot.slane %v6261_v11, 7  ;;  %v6264_v60 = vshll.u32 %v7203_v23, 16  ;;  %v7149_v23 = vld [vmem:[%s10727_s25 + $0x84] sm:$0xf] }
 0x34e   : > { %v6240_v40 = vor.u32 %v6238_v38, %v6237_v43  ;;  %v6242_v30 = vrot.slane %v6237_v43, 4  ;;  %v5828_v34 = vadd.f32 %v5827_v3, %v5797_v45  ;;  %v5896_v8 = vadd.f32 %v5895_v41, %v5865_v50 }
 0x34f   : > { %v6223_v48 = vor.u32 %v6221_v37, %v6220_v31  ;;  %v6225_v39 = vrot.slane %v6220_v31, 4  ;;  %v6266_v55 = vor.u32 %v6264_v60, %v6263_v56  ;;  %v5869_v47 = vmul.f32 %v11080_v9, %v11080_v9 }
 0x350   : > { %v6241_v12 = vsel %vm10816_vm14, %v6233_v53, %v6240_v40  ;;  %v6467_v29 = vsel %vm10822_vm15, %v6242_v30, %v7147_v20  ;;  %v5897_v50 = vadd.f32 %v5896_v8, %v5866_v16  ;;  %v6244_v5 = vshrl.u32 %v7201_v2, 16  ;;  %v7157_v16 = vld [vmem:[%s10727_s25 + $0x98] sm:$0x1] }
 0x351   : > { %7146 = vst [vmem:[%s10727_s25 + $0x7c] sm:$0xf] %v6241_v12  ;;  %7148 = vst [vmem:[%s10727_s25 + $0x80] sm:$0x1] %v6467_v29  ;;  %v6224_v15 = vsel %vm10816_vm14, %v6216_v54, %v6223_v48  ;;  %v6460_v33 = vsel %vm10822_vm15, %v6225_v39, %v7142_v61  ;;  %v6477_v53 = vsel %vm10808_vm13, %v6266_v55, %v7154_v22  ;;  %v6247_v45 = vshll.u32 %v7201_v2, 16 }
 0x352   : > { %7141 = vst [vmem:[%s10727_s25 + $0x70] sm:$0xf] %v6224_v15  ;;  %7143 = vst [vmem:[%s10727_s25 + $0x74] sm:$0x1] %v6460_v33  ;;  %v7204_v57 = vpack.c.bf16 %v11080_v9, %v11080_v9  ;;  %v5798_v52 = vadd.f32 %v8154_v7, %v10788_v17  ;;  %v6246_v28 = vrot.slane %v6244_v5, 7  ;;  %v8155_v54 = vadd.f32 %v11003_v32, %v10944_v14 }
 0x353   : > { %7155 = vst [vmem:[%s10727_s25 + $0x90] sm:$0xf] %v6477_v53  ;;  %v8156_v36 = vadd.f32 %v11010_v13, %v10948_v25  ;;  %v8157_v46 = vadd.f32 %v11018_v6, %v10955_v44  ;;  %v6267_v38 = vrot.slane %v6263_v56, 4  ;;  %v7152_v39 = vld [vmem:[%s10727_s25 + $0x8c] sm:$0x1] }
 0x354   : > { %v6269_v0 = vshrl.u32 %v7204_v57, 16  ;;  %v5829_v51 = vadd.f32 %v5828_v34, %v5798_v52  ;;  %v5867_v10 = vmul.f32 %v5798_v52, %v5798_v52  ;;  %v6249_v43 = vor.u32 %v6247_v45, %v6246_v28  ;;  %v7164_v53 = vld [vmem:[%s10727_s25 + $0xa8] sm:$0xf] }
 0x355   : > { %v6272_v7 = vshll.u32 %v7204_v57, 16  ;;  %v7202_v37 = vpack.c.bf16 %v5798_v52, %v5798_v52  ;;  %v11116_v11 = vadd.f32 %v8155_v54, %v10788_v17  ;;  %v5801_v13 = vadd.f32 %v8156_v36, %v10788_v17  ;;  %v7159_v36 = vld [vmem:[%s10727_s25 + $0x9c] sm:$0xf] }
 0x356   : > { %v6271_v14 = vrot.slane %v6269_v0, 7  ;;  %v5830_v32 = vadd.f32 %v5829_v51, %v11071_v58  ;;  %v5898_v25 = vadd.f32 %v5897_v50, %v5867_v10  ;;  %v6250_v44 = vrot.slane %v6246_v28, 4 }
 0x357   : > { %v6470_v6 = vsel %vm10808_vm13, %v6249_v43, %v7149_v23  ;;  %v6252_v20 = vshrl.u32 %v7202_v37, 16  ;;  %v6255_v41 = vshll.u32 %v7202_v37, 16  ;;  %v7207_v58 = vpack.c.bf16 %v11116_v11, %v11116_v11 }
 0x358   : > { %7150 = vst [vmem:[%s10727_s25 + $0x84] sm:$0xf] %v6470_v6  ;;  %v6274_v31 = vor.u32 %v6272_v7, %v6271_v14  ;;  %v6276_v3 = vrot.slane %v6271_v14, 4  ;;  %v5899_v2 = vadd.f32 %v5898_v25, %v5868_v42  ;;  %v5831_v30 = vadd.f32 %v5830_v32, %v11080_v9 }
 0x359   : > { %v6254_v40 = vrot.slane %v6252_v20, 7  ;;  %v5870_v61 = vmul.f32 %v5801_v13, %v5801_v13  ;;  %v7205_v56 = vpack.c.bf16 %v5801_v13, %v5801_v13  ;;  %v5872_v22 = vmul.f32 %v11116_v11, %v11116_v11 }
 0x35a   : > { %v6275_v60 = vsel %vm10816_vm14, %v6267_v38, %v6274_v31  ;;  %v6481_v48 = vsel %vm10822_vm15, %v6276_v3, %v7157_v16  ;;  %v6295_v42 = vshrl.u32 %v7207_v58, 16  ;;  %v5832_v8 = vadd.f32 %v5831_v30, %v5801_v13 }
 0x35b   : > { %7156 = vst [vmem:[%s10727_s25 + $0x94] sm:$0xf] %v6275_v60  ;;  %7158 = vst [vmem:[%s10727_s25 + $0x98] sm:$0x1] %v6481_v48  ;;  %v6257_v34 = vor.u32 %v6255_v41, %v6254_v40  ;;  %v6259_v9 = vrot.slane %v6254_v40, 4  ;;  %v5900_v12 = vadd.f32 %v5899_v2, %v5869_v47  ;;  %v6298_v55 = vshll.u32 %v7207_v58, 16 }
 0x35c   : > { %v6297_v29 = vrot.slane %v6295_v42, 7  ;;  %v6278_v15 = vshrl.u32 %v7205_v56, 16  ;;  %v5804_v33 = vadd.f32 %v8157_v46, %v10788_v17  ;;  %v8158_v57 = vadd.f32 %v11022_v24, %v10964_v4  ;;  %v7162_v60 = vld [vmem:[%s10727_s25 + $0xa4] sm:$0x1] }
 0x35d   : > { %v6258_v50 = vsel %vm10816_vm14, %v6250_v44, %v6257_v34  ;;  %v6474_v5 = vsel %vm10822_vm15, %v6259_v9, %v7152_v39  ;;  %v5901_v45 = vadd.f32 %v5900_v12, %v5870_v61  ;;  %v6281_v54 = vshll.u32 %v7205_v56, 16 }
 0x35e   : > { %7151 = vst [vmem:[%s10727_s25 + $0x88] sm:$0xf] %v6258_v50  ;;  %7153 = vst [vmem:[%s10727_s25 + $0x8c] sm:$0x1] %v6474_v5  ;;  %v6300_v47 = vor.u32 %v6298_v55, %v6297_v29  ;;  %v6301_v52 = vrot.slane %v6297_v29, 4  ;;  %v6280_v28 = vrot.slane %v6278_v15, 7  ;;  %v7208_v46 = vpack.c.bf16 %v5804_v33, %v5804_v33 }
 0x35f   : > { %v5802_v38 = vadd.f32 %v8158_v57, %v10788_v17  ;;  %v8159_v23 = vadd.f32 %v11037_v26, %v10989_v21  ;;  %v8160_v0 = vadd.f32 %v11045_v27, %v10996_v18  ;;  %v5873_v51 = vmul.f32 %v5804_v33, %v5804_v33 }
 0x360   : > { %v6491_v4 = vsel %vm10808_vm13, %v6300_v47, %v7164_v53  ;;  %v6283_v24 = vor.u32 %v6281_v54, %v6280_v28  ;;  %v8161_v10 = vadd.f32 %v11055_v59, %v11005_v63  ;;  %v6284_v43 = vrot.slane %v6280_v28, 4  ;;  %v7167_v63 = vld [vmem:[%s10727_s25 + $0xb0] sm:$0x1]  ;;  %v7169_v28 = vld [vmem:[%s10727_s25 + $0xb4] sm:$0xf] }
 0x361   : > { %7165 = vst [vmem:[%s10727_s25 + $0xa8] sm:$0xf] %v6491_v4  ;;  %v6303_v7 = vshrl.u32 %v7208_v46, 16  ;;  %v5833_v37 = vadd.f32 %v5832_v8, %v5802_v38  ;;  %v5871_v14 = vmul.f32 %v5802_v38, %v5802_v38  ;;  %v7206_v26 = vpack.c.bf16 %v5802_v38, %v5802_v38  ;;  %v7174_v8 = vld [vmem:[%s10727_s25 + $0xc0] sm:$0xf] }
 0x362   : > { %v6484_v21 = vsel %vm10808_vm13, %v6283_v24, %v7159_v36  ;;  %v5807_v18 = vadd.f32 %v8159_v23, %v10788_v17  ;;  %v5805_v27 = vadd.f32 %v8160_v0, %v10788_v17  ;;  %v6306_v25 = vshll.u32 %v7208_v46, 16  ;;  %v7177_v54 = vld [vmem:[%s10727_s25 + $0xc8] sm:$0x1] }
 0x363   : > { %7160 = vst [vmem:[%s10727_s25 + $0x9c] sm:$0xf] %v6484_v21  ;;  %v6305_v32 = vrot.slane %v6303_v7, 7  ;;  %v5834_v13 = vadd.f32 %v5833_v37, %v11116_v11  ;;  %v5902_v44 = vadd.f32 %v5901_v45, %v5871_v14  ;;  %v6286_v59 = vshrl.u32 %v7206_v26, 16 }
 0x364   : > { %v6289_v6 = vshll.u32 %v7206_v26, 16  ;;  %v7211_v16 = vpack.c.bf16 %v5807_v18, %v5807_v18  ;;  %v5808_v20 = vadd.f32 %v8161_v10, %v10788_v17  ;;  %v5874_v61 = vmul.f32 %v5805_v27, %v5805_v27 }
 0x365   : > { %v6308_v41 = vor.u32 %v6306_v25, %v6305_v32  ;;  %v6310_v31 = vrot.slane %v6305_v32, 4  ;;  %v5903_v3 = vadd.f32 %v5902_v44, %v5872_v22  ;;  %v5835_v2 = vadd.f32 %v5834_v13, %v5804_v33  ;;  %v7172_v13 = vld [vmem:[%s10727_s25 + $0xbc] sm:$0x1] }
 0x366   : > { %v6288_v58 = vrot.slane %v6286_v59, 7  ;;  %v6329_v40 = vshrl.u32 %v7211_v16, 16  ;;  %v6332_v30 = vshll.u32 %v7211_v16, 16  ;;  %v7209_v9 = vpack.c.bf16 %v5805_v27, %v5805_v27 }
 0x367   : > { %v6309_v11 = vsel %vm10816_vm14, %v6301_v52, %v6308_v41  ;;  %v6495_v56 = vsel %vm10822_vm15, %v6310_v31, %v7167_v63  ;;  %v5836_v48 = vadd.f32 %v5835_v2, %v5805_v27  ;;  %v5904_v39 = vadd.f32 %v5903_v3, %v5873_v51 }
 0x368   : > { %7166 = vst [vmem:[%s10727_s25 + $0xac] sm:$0xf] %v6309_v11  ;;  %7168 = vst [vmem:[%s10727_s25 + $0xb0] sm:$0x1] %v6495_v56  ;;  %v6291_v22 = vor.u32 %v6289_v6, %v6288_v58  ;;  %v6293_v42 = vrot.slane %v6288_v58, 4  ;;  %v6331_v34 = vrot.slane %v6329_v40, 7  ;;  %v7212_v29 = vpack.c.bf16 %v5808_v20, %v5808_v20 }
 0x369   : > { %v5905_v12 = vadd.f32 %v5904_v39, %v5874_v61  ;;  %v8162_v55 = vadd.f32 %v11066_v49, %v11012_v35  ;;  %v6312_v5 = vshrl.u32 %v7209_v9, 16  ;;  %v6315_v35 = vshll.u32 %v7209_v9, 16 }
 0x36a   : > { %v6292_v15 = vsel %vm10816_vm14, %v6284_v43, %v6291_v22  ;;  %v6488_v33 = vsel %vm10822_vm15, %v6293_v42, %v7162_v60  ;;  %v6334_v50 = vor.u32 %v6332_v30, %v6331_v34  ;;  %v6337_v53 = vshrl.u32 %v7212_v29, 16 }
 0x36b   : > { %7161 = vst [vmem:[%s10727_s25 + $0xa0] sm:$0xf] %v6292_v15  ;;  %7163 = vst [vmem:[%s10727_s25 + $0xa4] sm:$0x1] %v6488_v33  ;;  %v5806_v57 = vadd.f32 %v8162_v55, %v10788_v17  ;;  %v6314_v47 = vrot.slane %v6312_v5, 7  ;;  %v6340_v52 = vshll.u32 %v7212_v29, 16  ;;  %v5876_v51 = vmul.f32 %v5807_v18, %v5807_v18 }
 0x36c   : > { %v6505_v45 = vsel %vm10808_vm13, %v6334_v50, %v7174_v8  ;;  %v6339_v49 = vrot.slane %v6337_v53, 7  ;;  %v6335_v23 = vrot.slane %v6331_v34, 4  ;;  %v5877_v37 = vmul.f32 %v5808_v20, %v5808_v20 }
 0x36d   : > { %7175 = vst [vmem:[%s10727_s25 + $0xc0] sm:$0xf] %v6505_v45  ;;  %v5837_v36 = vadd.f32 %v5836_v48, %v5806_v57  ;;  %v5875_v46 = vmul.f32 %v5806_v57, %v5806_v57  ;;  %v7210_v38 = vpack.c.bf16 %v5806_v57, %v5806_v57  ;;  %v6317_v0 = vor.u32 %v6315_v35, %v6314_v47 }
 0x36e   : > { %v6342_v4 = vor.u32 %v6340_v52, %v6339_v49  ;;  %v6344_v24 = vrot.slane %v6339_v49, 4  ;;  %v6318_v25 = vrot.slane %v6314_v47, 4 }
 0x36f   : > { %v5838_v17 = vadd.f32 %v5837_v36, %v5807_v18  ;;  %v5906_v10 = vadd.f32 %v5905_v12, %v5875_v46  ;;  %v6320_v43 = vshrl.u32 %v7210_v38, 16  ;;  %v6498_v7 = vsel %vm10808_vm13, %v6317_v0, %v7169_v28 }
 0x370   : > { %v6343_v14 = vsel %vm10816_vm14, %v6335_v23, %v6342_v4  ;;  %v6509_v21 = vsel %vm10822_vm15, %v6344_v24, %v7177_v54  ;;  %7170 = vst [vmem:[%s10727_s25 + $0xb4] sm:$0xf] %v6498_v7  ;;  %v6323_v32 = vshll.u32 %v7210_v38, 16 }
 0x371   : > { %7176 = vst [vmem:[%s10727_s25 + $0xc4] sm:$0xf] %v6343_v14  ;;  %7178 = vst [vmem:[%s10727_s25 + $0xc8] sm:$0x1] %v6509_v21  ;;  %v5839_v26 = vadd.f32 %v5838_v17, %v5808_v20  ;;  %v5907_v27 = vadd.f32 %v5906_v10, %v5876_v51  ;;  %v6322_v18 = vrot.slane %v6320_v43, 7  ;;  %v5915_v20 = vlaneseq }
 0x373   : > { %v5840_v62 = vrot.slane %v5839_v26, 4  ;;  %v5908_v44 = vadd.f32 %v5907_v27, %v5877_v37  ;;  %v6325_v63 = vor.u32 %v6323_v32, %v6322_v18  ;;  %v6327_v59 = vrot.slane %v6322_v18, 4 }
 0x374   : > { %v5916_v30 = vshrl.u32 %v5915_v20, 7 }
 0x375   : > { %v5841_v6 = vadd.f32 %v5840_v62, %v5839_v26  ;;  %v5909_v16 = vrot.slane %v5908_v44, 4  ;;  %v6326_v41 = vsel %vm10816_vm14, %v6318_v25, %v6325_v63  ;;  %v6502_v31 = vsel %vm10822_vm15, %v6327_v59, %v7172_v13 }
 0x376   : > { %7171 = vst [vmem:[%s10727_s25 + $0xb8] sm:$0xf] %v6326_v41  ;;  %7173 = vst [vmem:[%s10727_s25 + $0xbc] sm:$0x1] %v6502_v31  ;;  %vm5917_vm0 = vcmp.lt.s32.totalorder %v5916_v30, 4 }
 0x377   : > { %v5842_v3 = vrot.slane %v5841_v6, 2  ;;  %v5910_v2 = vadd.f32 %v5909_v16, %v5908_v44 }
 0x379   : > { %v5843_v58 = vadd.f32 %v5842_v3, %v5841_v6  ;;  %v5911_v40 = vrot.slane %v5910_v2, 2 }
 0x37b   : > { %v5844_v61 = vrot.slane %v5843_v58, 1  ;;  %v5912_v11 = vadd.f32 %v5911_v40, %v5910_v2 }
 0x37d   : > { %v5913_v56 = vrot.slane %v5912_v11, 1  ;;  %v5845_v1 = vadd.f32 %v5844_v61, %v5843_v58 }
 0x37f   : > { %v5914_v19 = vadd.f32 %v5913_v56, %v5912_v11 }
 0x381   : > { %v5918_v60 = vsel %vm5917_vm0, %v5845_v1, %v5914_v19 }
 0x382   : > { %5919 = vst [vmem:[%s282_s30] sm:$0xff] %v5918_v60 }
 0x383 PF: > { %s17_s21 = sadd.s32 1, %s8796_s21  }
 0x384   : > { %p14_p4 = scmp.ge.s32.totalorder %s17_s21, 4  }
 0x386   :  { %16 = sbr.rel (!%p14_p4) target bundleno = 1 (0x1), region = 102 }

</bundles_post_ra>
